<compile_context>
chip_gen: v5e
topology: v5e:2x2
jax: 0.10.0
libtpu: 0.0.40
codegen_flags: <defaults>
</compile_context>

<pallas_src>
import functools

import jax
import jax.numpy as jnp
from jax import lax
from jax.experimental import pallas as pl
from jax.experimental.pallas import tpu as pltpu

NOISE_DIM = 62
IMAGE_CHANNEL = 1
BN_EPS = 1e-5


# ---------------------------------------------------------------------------
# Pallas kernels
# ---------------------------------------------------------------------------
def _fused_linear_kernel(x_ref, w1_ref, g1_ref, b1_ref, w2_ref, g2_ref, b2_ref,
                         o_ref, h1_ref):
    # Linear-1 (+BN+ReLU) is tiny; compute it once into the persistent VMEM scratch.
    @pl.when(pl.program_id(0) == 0)
    def _():
        h = jnp.dot(x_ref[...], w1_ref[...], preferred_element_type=jnp.float32)
        mean = jnp.mean(h, axis=0, keepdims=True)
        var = jnp.mean((h - mean) ** 2, axis=0, keepdims=True)
        a = (h - mean) * lax.rsqrt(var + BN_EPS) * g1_ref[...] + b1_ref[...]
        h1_ref[...] = jnp.maximum(a, 0.0).astype(h1_ref.dtype)

    # Linear-2 N-tile: bf16 matmul with f32 MXU accumulation, BN over the batch axis
    # (exact: tiling is N-only), ReLU, store bf16.
    h2 = jnp.dot(h1_ref[...], w2_ref[...], preferred_element_type=jnp.float32)
    mean = jnp.mean(h2, axis=0, keepdims=True)
    var = jnp.mean((h2 - mean) ** 2, axis=0, keepdims=True)
    y = (h2 - mean) * lax.rsqrt(var + BN_EPS) * g2_ref[...] + b2_ref[...]
    o_ref[...] = jnp.maximum(y, 0.0).astype(o_ref.dtype)


def fused_linear_block(x, w1, g1, b1, w2, g2, b2, tile_n):
    """relu(BN(relu(BN(x @ w1)) @ w2)) with batch statistics; output bf16."""
    M, K1 = x.shape
    H1 = w1.shape[1]
    N = w2.shape[1]
    assert N % tile_n == 0
    return pl.pallas_call(
        _fused_linear_kernel,
        out_shape=jax.ShapeDtypeStruct((M, N), jnp.bfloat16),
        grid=(N // tile_n,),
        in_specs=[
            pl.BlockSpec((M, K1), lambda j: (0, 0)),
            pl.BlockSpec((K1, H1), lambda j: (0, 0)),
            pl.BlockSpec((1, H1), lambda j: (0, 0)),
            pl.BlockSpec((1, H1), lambda j: (0, 0)),
            pl.BlockSpec((H1, tile_n), lambda j: (0, j)),
            pl.BlockSpec((1, tile_n), lambda j: (0, j)),
            pl.BlockSpec((1, tile_n), lambda j: (0, j)),
        ],
        out_specs=pl.BlockSpec((M, tile_n), lambda j: (0, j)),
        scratch_shapes=[pltpu.VMEM((M, H1), jnp.bfloat16)],
        compiler_params=pltpu.CompilerParams(
            # Sequential: tile 0 materialises the Linear-1 activations in scratch;
            # the remaining tiles reuse them.
            dimension_semantics=("arbitrary",)),
    )(x, w1, g1.reshape(1, -1), b1.reshape(1, -1),
      w2, g2.reshape(1, -1), b2.reshape(1, -1))


def _matmul_kernel(x_ref, w_ref, o_ref):
    o_ref[...] = jnp.dot(x_ref[...], w_ref[...],
                         preferred_element_type=jnp.float32).astype(o_ref.dtype)


def matmul(x, w, out_dtype=jnp.bfloat16):
    """Plain bf16 matmul (the conv1 gemm); f32 MXU accumulation, bf16 store."""
    M, K = x.shape
    N = w.shape[1]
    return pl.pallas_call(
        _matmul_kernel,
        out_shape=jax.ShapeDtypeStruct((M, N), out_dtype),
        grid=(1,),
        in_specs=[pl.BlockSpec((M, K), lambda i: (0, 0)),
                  pl.BlockSpec((K, N), lambda i: (0, 0))],
        out_specs=pl.BlockSpec((M, N), lambda i: (0, 0)),
        compiler_params=pltpu.CompilerParams(
            dimension_semantics=("arbitrary",)),
    )(x, w)


def _bn_relu_matmul_kernel(y_ref, g_ref, b_ref, w_ref, o_ref):
    # Fused conv1 epilogue (BatchNorm2d over rows = B*H*W + ReLU) followed by the
    # conv2 gemm. No conv bias: it is cancelled by the batch-statistics BN.
    h = y_ref[...]
    mean = jnp.mean(h, axis=0, keepdims=True)
    var = jnp.mean((h - mean) ** 2, axis=0, keepdims=True)
    a = jnp.maximum(
        (h - mean) * lax.rsqrt(var + BN_EPS) * g_ref[...] + b_ref[...], 0.0)
    o_ref[...] = jnp.dot(a.astype(w_ref.dtype), w_ref[...],
                         preferred_element_type=jnp.float32).astype(o_ref.dtype)


def bn_relu_matmul(y, gamma, beta, w):
    M, C = y.shape
    N = w.shape[1]
    return pl.pallas_call(
        _bn_relu_matmul_kernel,
        out_shape=jax.ShapeDtypeStruct((M, N), jnp.bfloat16),
        grid=(1,),
        in_specs=[
            pl.BlockSpec((M, C), lambda i: (0, 0)),
            pl.BlockSpec((1, C), lambda i: (0, 0)),
            pl.BlockSpec((1, C), lambda i: (0, 0)),
            pl.BlockSpec((C, N), lambda i: (0, 0)),
        ],
        out_specs=pl.BlockSpec((M, N), lambda i: (0, 0)),
        compiler_params=pltpu.CompilerParams(
            dimension_semantics=("arbitrary",)),
    )(y, gamma.reshape(1, -1), beta.reshape(1, -1), w)


# ---------------------------------------------------------------------------
# Glue (plain JAX): weight reshaping and the 4-term col2im overlap-add. These are
# pure data movement / a few small adds; all hot FLOPs run in the kernels above.
# ---------------------------------------------------------------------------
def _convt_weight_to_gemm(w_t):
    """torch ConvTranspose2d weight (Cin, Cout, K, K) -> (Cin, K*K*Cout).

    Column ordering is (ky, kx, cout), matching the col2im reshape below.
    """
    Cin, Cout, K, _ = w_t.shape
    return jnp.transpose(w_t, (0, 2, 3, 1)).reshape(Cin, K * K * Cout)


# output-row parity -> ((input shift, kernel tap), ...) for k=4, s=2, p=1.
_PARITY_TERMS = {0: ((0, 1), (-1, 3)), 1: ((0, 2), (1, 0))}


def _col2im_k4s2p1(cols):
    """Transposed-conv (k=4, s=2, p=1) overlap-add via the 4-term parity form.

    cols: (B, H, W, 4, 4, C) per-pixel gemm outputs. Each output pixel receives
    exactly 4 contributions. Returns (B, 2H, 2W, C) float32.
    """
    B, H, W, _, _, C = cols.shape
    cols = cols.astype(jnp.float32)

    def shifted(ky, kx, dy, dx):
        a = cols[:, :, :, ky, kx, :]
        if dy:
            pad = ((0, 0), (1, 0), (0, 0), (0, 0)) if dy < 0 else ((0, 0), (0, 1), (0, 0), (0, 0))
            a = jnp.pad(a, pad)
            a = a[:, :H] if dy < 0 else a[:, 1:]
        if dx:
            pad = ((0, 0), (0, 0), (1, 0), (0, 0)) if dx < 0 else ((0, 0), (0, 0), (0, 1), (0, 0))
            a = jnp.pad(a, pad)
            a = a[:, :, :W] if dx < 0 else a[:, :, 1:]
        return a

    par = [[None, None], [None, None]]
    for p in (0, 1):
        for q in (0, 1):
            acc = None
            for dy, ky in _PARITY_TERMS[p]:
                for dx, kx in _PARITY_TERMS[q]:
                    t = shifted(ky, kx, dy, dx)
                    acc = t if acc is None else acc + t
            par[p][q] = acc                                    # (B, H, W, C)
    row0 = jnp.stack([par[0][0], par[0][1]], axis=3)           # [b, i, j, q, c]
    row1 = jnp.stack([par[1][0], par[1][1]], axis=3)
    out = jnp.stack([row0, row1], axis=2)                      # [b, i, p, j, q, c]
    return out.reshape(B, 2 * H, 2 * W, C)


def _permute_chw_to_hwc(v):
    return v.reshape(128, 7, 7).transpose(1, 2, 0).reshape(-1)


# ---------------------------------------------------------------------------
# Parameters (deterministic init mirroring initialize_weights: N(0, 0.02) weights,
# zero biases; BatchNorm gamma=1, beta=0). Matmul weights stored in bf16, padded /
# permuted at init so no runtime layout work is needed.
# ---------------------------------------------------------------------------
def init_generator_params(key):
    std = 0.02
    ks = jax.random.split(key, 4)
    bf16 = jnp.bfloat16
    p = {}
    # Linear-1: weight pre-padded along K (62 -> 128) so the MXU K pass is unmasked.
    w1 = std * jax.random.normal(ks[0], (NOISE_DIM, 1024), jnp.float32)
    p["w1"] = jnp.pad(w1, ((0, 128 - NOISE_DIM), (0, 0))).astype(bf16)
    p["bn1_g"] = jnp.ones((1024,), jnp.float32)
    p["bn1_b"] = jnp.zeros((1024,), jnp.float32)
    # Linear-2: columns pre-permuted from PyTorch's (c, h, w) to (h, w, c), so the
    # kernel output reshapes directly into NHWC conv-gemm rows (no activation transpose).
    w2 = std * jax.random.normal(ks[1], (1024, 128 * 7 * 7), jnp.float32)
    p["w2"] = w2.reshape(1024, 128, 7, 7).transpose(0, 2, 3, 1).reshape(1024, 6272).astype(bf16)
    p["bn2_g"] = _permute_chw_to_hwc(jnp.ones((6272,), jnp.float32))
    p["bn2_b"] = _permute_chw_to_hwc(jnp.zeros((6272,), jnp.float32))
    # ConvTranspose2d weights: torch layout kept for the reference; gemm form for kernels.
    ct1 = std * jax.random.normal(ks[2], (128, 64, 4, 4), jnp.float32)
    p["ct1_w"] = ct1.astype(bf16)
    p["ct1_wg"] = _convt_weight_to_gemm(ct1).astype(bf16)               # (128, 1024)
    p["bn3_g"] = jnp.ones((64,), jnp.float32)
    p["bn3_b"] = jnp.zeros((64,), jnp.float32)
    ct2 = std * jax.random.normal(ks[3], (64, IMAGE_CHANNEL, 4, 4), jnp.float32)
    p["ct2_w"] = ct2.astype(bf16)
    wg2 = _convt_weight_to_gemm(ct2)                                    # (64, 16)
    p["ct2_wg"] = jnp.pad(wg2, ((0, 0), (0, 128 - wg2.shape[1]))).astype(bf16)
    p["ct2_b"] = jnp.zeros((IMAGE_CHANNEL,), jnp.float32)
    # Biases b1, b2, ct1_b are omitted: a per-column constant is cancelled exactly by
    # the batch-statistics BatchNorm that follows (and they are zero-initialized anyway).
    return p


# ---------------------------------------------------------------------------
# Generator forward
# ---------------------------------------------------------------------------
def generator_forward(params, x):
    B = x.shape[0]
    # ---- model1: fused Linear-1 -> BN -> ReLU -> Linear-2 -> BN -> ReLU ----
    x_pad = jnp.pad(x.astype(jnp.bfloat16), ((0, 0), (0, 128 - NOISE_DIM)))
    h = fused_linear_block(x_pad, params["w1"], params["bn1_g"], params["bn1_b"],
                           params["w2"], params["bn2_g"], params["bn2_b"],
                           tile_n=896)                                  # (B, 6272) bf16, (h,w,c) cols
    feat = h.reshape(B * 49, 128)                                       # rows = (b, h, w), free reshape

    # ---- ConvTranspose2d(128->64, k4 s2 p1): gemm -> 4-term col2im ----
    cols1 = matmul(feat, params["ct1_wg"])                              # (B*49, 1024) bf16
    y1 = _col2im_k4s2p1(cols1.reshape(B, 7, 7, 4, 4, 64))               # (B, 14, 14, 64) f32

    # ---- BatchNorm2d + ReLU fused with the ConvTranspose2d(64->1) gemm ----
    cols2 = bn_relu_matmul(y1.reshape(B * 196, 64), params["bn3_g"],
                           params["bn3_b"], params["ct2_wg"])           # (B*196, 128) bf16
    cols2 = cols2[:, :16].reshape(B, 14, 14, 4, 4, IMAGE_CHANNEL)
    y2 = _col2im_k4s2p1(cols2)                                          # (B, 28, 28, 1) f32

    # ---- bias + exact sigmoid: plain XLA, fuses into the final overlap-add ----
    img = jax.nn.sigmoid(y2 + params["ct2_b"].reshape(1, 1, 1, -1))
    return img.transpose(0, 3, 1, 2)                                    # NCHW


# ---------------------------------------------------------------------------
# Pure-JAX reference (mirrors the bf16 casts of the kernel path but uses an
# independent conv formulation to validate the gemm + col2im math).
# ---------------------------------------------------------------------------
def reference_forward(params, x):
    f32 = jnp.float32

    def bn(h, g, b, axes):
        mean = jnp.mean(h, axis=axes, keepdims=True)
        var = jnp.mean((h - mean) ** 2, axis=axes, keepdims=True)
        return (h - mean) * lax.rsqrt(var + BN_EPS) * g + b

    xb = x.astype(jnp.bfloat16)
    h = jnp.dot(xb, params["w1"][:NOISE_DIM], preferred_element_type=f32)
    h = jnp.maximum(bn(h, params["bn1_g"], params["bn1_b"], (0,)), 0.0).astype(jnp.bfloat16)
    h = jnp.dot(h, params["w2"], preferred_element_type=f32)
    h = jnp.maximum(bn(h, params["bn2_g"], params["bn2_b"], (0,)), 0.0).astype(jnp.bfloat16)
    # w2 columns are (h, w, c)-ordered -> NHWC feature map -> NCHW for lax.conv.
    feat = h.reshape(-1, 7, 7, 128).transpose(0, 3, 1, 2)

    def convt(x_nchw, wt, b=None):
        K = wt.shape[2]
        w_oihw = jnp.transpose(wt[:, :, ::-1, ::-1], (1, 0, 2, 3))
        y = lax.conv_general_dilated(
            x_nchw, w_oihw, window_strides=(1, 1),
            padding=((K - 2, K - 2),) * 2, lhs_dilation=(2, 2),
            dimension_numbers=("NCHW", "OIHW", "NCHW"),
            preferred_element_type=f32)
        if b is not None:
            y = y + b.reshape(1, -1, 1, 1)
        return y

    y = convt(feat, params["ct1_w"])
    y = jnp.maximum(
        bn(y, params["bn3_g"].reshape(1, -1, 1, 1),
           params["bn3_b"].reshape(1, -1, 1, 1), (0, 2, 3)), 0.0).astype(jnp.bfloat16)
    y = convt(y, params["ct2_w"], params["ct2_b"])
    return jax.nn.sigmoid(y)


if __name__ == "__main__":
    key = jax.random.PRNGKey(0)
    pkey, xkey = jax.random.split(key)
    params = init_generator_params(pkey)

    B = 2  # BatchNorm in training mode (batch statistics) needs batch > 1
    x = jax.random.normal(xkey, (B, NOISE_DIM), jnp.float32)

    fwd = jax.jit(functools.partial(generator_forward, params))
    out = jax.block_until_ready(fwd(x))
    assert out.shape == (B, IMAGE_CHANNEL, 28, 28), out.shape

    ref = jax.block_until_ready(reference_forward(params, x))
    max_err = float(jnp.max(jnp.abs(out - ref)))
    assert max_err < 2e-2, f"mismatch vs reference: {max_err}"

    print("KERNEL_OK")
</pallas_src>

<mosaic_0001>
module attributes {stable_mosaic.version = 11 : i64} {
  func.func @_fused_linear_kernel(%arg0: i32, %arg1: memref<2x128xbf16, #tpu.memory_space<vmem>>, %arg2: memref<128x1024xbf16, #tpu.memory_space<vmem>>, %arg3: memref<1x1024xf32, #tpu.memory_space<vmem>>, %arg4: memref<1x1024xf32, #tpu.memory_space<vmem>>, %arg5: memref<1024x896xbf16, #tpu.memory_space<vmem>>, %arg6: memref<1x896xf32, #tpu.memory_space<vmem>>, %arg7: memref<1x896xf32, #tpu.memory_space<vmem>>, %arg8: memref<2x896xbf16, #tpu.memory_space<vmem>>, %arg9: memref<2x1024xbf16, #tpu.memory_space<vmem>>) attributes {dimension_semantics = [#tpu.dimension_semantics<arbitrary>], iteration_bounds = array<i64: 7>, scalar_prefetch = 0 : i64, scratch_operands = 1 : i64, tpu.core_type = #tpu.core_type<tc>, window_params = [{pipeline_mode = #tpu.pipeline_mode<synchronous>, transform_indices = @transform_0, window_bounds = array<i64: 2, 128>}, {pipeline_mode = #tpu.pipeline_mode<synchronous>, transform_indices = @transform_1, window_bounds = array<i64: 128, 1024>}, {pipeline_mode = #tpu.pipeline_mode<synchronous>, transform_indices = @transform_2, window_bounds = array<i64: 1, 1024>}, {pipeline_mode = #tpu.pipeline_mode<synchronous>, transform_indices = @transform_3, window_bounds = array<i64: 1, 1024>}, {transform_indices = @transform_4, window_bounds = array<i64: 1024, 896>}, {transform_indices = @transform_5, window_bounds = array<i64: 1, 896>}, {transform_indices = @transform_6, window_bounds = array<i64: 1, 896>}, {transform_indices = @transform_7, window_bounds = array<i64: 2, 896>}]} {
    %c0_i32 = arith.constant 0 : i32
    %0 = arith.cmpi eq, %arg0, %c0_i32 : i32
    %1 = arith.extui %0 : i1 to i32
    %c0_i32_0 = arith.constant 0 : i32
    %2 = arith.cmpi ne, %1, %c0_i32_0 : i32
    scf.if %2 {
      %c0_16 = arith.constant 0 : index
      %c0_17 = arith.constant 0 : index
      %34 = vector.load %arg1[%c0_16, %c0_17] : memref<2x128xbf16, #tpu.memory_space<vmem>>, vector<2x128xbf16>
      %c0_18 = arith.constant 0 : index
      %c0_19 = arith.constant 0 : index
      %35 = vector.load %arg2[%c0_18, %c0_19] : memref<128x1024xbf16, #tpu.memory_space<vmem>>, vector<128x1024xbf16>
      %cst_20 = arith.constant dense<0.000000e+00> : vector<2x1024xf32>
      %36 = tpu.matmul %34, %35, %cst_20 {dimension_numbers = #tpu.dot_dimension_numbers<[1], [0], [0], [1], [0, 0, 1, 1], [], []>} : vector<2x128xbf16>, vector<128x1024xbf16>, vector<2x1024xf32> -> vector<2x1024xf32>
      %cst_21 = arith.constant dense<0.000000e+00> : vector<1024xf32>
      %37 = vector.multi_reduction <add>, %36, %cst_21 [0] : vector<2x1024xf32> to vector<1024xf32>
      %38 = vector.shape_cast %37 : vector<1024xf32> to vector<1x1024xf32>
      %cst_22 = arith.constant 2.000000e+00 : f32
      %39 = vector.broadcast %cst_22 : f32 to vector<1x1024xf32>
      %40 = arith.divf %38, %39 : vector<1x1024xf32>
      %41 = vector.broadcast %40 : vector<1x1024xf32> to vector<2x1024xf32>
      %42 = arith.subf %36, %41 : vector<2x1024xf32>
      %43 = arith.mulf %42, %42 : vector<2x1024xf32>
      %cst_23 = arith.constant dense<0.000000e+00> : vector<1024xf32>
      %44 = vector.multi_reduction <add>, %43, %cst_23 [0] : vector<2x1024xf32> to vector<1024xf32>
      %45 = vector.shape_cast %44 : vector<1024xf32> to vector<1x1024xf32>
      %cst_24 = arith.constant 2.000000e+00 : f32
      %46 = vector.broadcast %cst_24 : f32 to vector<1x1024xf32>
      %47 = arith.divf %45, %46 : vector<1x1024xf32>
      %48 = vector.broadcast %40 : vector<1x1024xf32> to vector<2x1024xf32>
      %49 = arith.subf %36, %48 : vector<2x1024xf32>
      %cst_25 = arith.constant 9.99999974E-6 : f32
      %50 = vector.broadcast %cst_25 : f32 to vector<1x1024xf32>
      %51 = arith.addf %47, %50 : vector<1x1024xf32>
      %52 = math.rsqrt %51 : vector<1x1024xf32>
      %53 = vector.broadcast %52 : vector<1x1024xf32> to vector<2x1024xf32>
      %54 = arith.mulf %49, %53 : vector<2x1024xf32>
      %c0_26 = arith.constant 0 : index
      %c0_27 = arith.constant 0 : index
      %55 = vector.load %arg3[%c0_26, %c0_27] : memref<1x1024xf32, #tpu.memory_space<vmem>>, vector<1x1024xf32>
      %56 = vector.broadcast %55 : vector<1x1024xf32> to vector<2x1024xf32>
      %57 = arith.mulf %54, %56 : vector<2x1024xf32>
      %c0_28 = arith.constant 0 : index
      %c0_29 = arith.constant 0 : index
      %58 = vector.load %arg4[%c0_28, %c0_29] : memref<1x1024xf32, #tpu.memory_space<vmem>>, vector<1x1024xf32>
      %59 = vector.broadcast %58 : vector<1x1024xf32> to vector<2x1024xf32>
      %60 = arith.addf %57, %59 : vector<2x1024xf32>
      %cst_30 = arith.constant 0.000000e+00 : f32
      %61 = vector.broadcast %cst_30 : f32 to vector<2x1024xf32>
      %62 = arith.maximumf %60, %61 : vector<2x1024xf32>
      %63 = arith.truncf %62 : vector<2x1024xf32> to vector<2x1024xbf16>
      %c0_31 = arith.constant 0 : index
      %c0_32 = arith.constant 0 : index
      %64 = vector.load %arg9[%c0_31, %c0_32] : memref<2x1024xbf16, #tpu.memory_space<vmem>>, vector<2x1024xbf16>
      tpu.vector_store %arg9[%c0_31, %c0_32], %63 {strides = array<i32>} : memref<2x1024xbf16, #tpu.memory_space<vmem>>, vector<2x1024xbf16>,
    } else {
    }
    %c0 = arith.constant 0 : index
    %c0_1 = arith.constant 0 : index
    %3 = vector.load %arg9[%c0, %c0_1] : memref<2x1024xbf16, #tpu.memory_space<vmem>>, vector<2x1024xbf16>
    %c0_2 = arith.constant 0 : index
    %c0_3 = arith.constant 0 : index
    %4 = vector.load %arg5[%c0_2, %c0_3] : memref<1024x896xbf16, #tpu.memory_space<vmem>>, vector<1024x896xbf16>
    %cst = arith.constant dense<0.000000e+00> : vector<2x896xf32>
    %5 = tpu.matmul %3, %4, %cst {dimension_numbers = #tpu.dot_dimension_numbers<[1], [0], [0], [1], [0, 0, 1, 1], [], []>} : vector<2x1024xbf16>, vector<1024x896xbf16>, vector<2x896xf32> -> vector<2x896xf32>
    %cst_4 = arith.constant dense<0.000000e+00> : vector<896xf32>
    %6 = vector.multi_reduction <add>, %5, %cst_4 [0] : vector<2x896xf32> to vector<896xf32>
    %7 = vector.shape_cast %6 : vector<896xf32> to vector<1x896xf32>
    %cst_5 = arith.constant 2.000000e+00 : f32
    %8 = vector.broadcast %cst_5 : f32 to vector<1x896xf32>
    %9 = arith.divf %7, %8 : vector<1x896xf32>
    %10 = vector.broadcast %9 : vector<1x896xf32> to vector<2x896xf32>
    %11 = arith.subf %5, %10 : vector<2x896xf32>
    %12 = arith.mulf %11, %11 : vector<2x896xf32>
    %cst_6 = arith.constant dense<0.000000e+00> : vector<896xf32>
    %13 = vector.multi_reduction <add>, %12, %cst_6 [0] : vector<2x896xf32> to vector<896xf32>
    %14 = vector.shape_cast %13 : vector<896xf32> to vector<1x896xf32>
    %cst_7 = arith.constant 2.000000e+00 : f32
    %15 = vector.broadcast %cst_7 : f32 to vector<1x896xf32>
    %16 = arith.divf %14, %15 : vector<1x896xf32>
    %17 = vector.broadcast %9 : vector<1x896xf32> to vector<2x896xf32>
    %18 = arith.subf %5, %17 : vector<2x896xf32>
    %cst_8 = arith.constant 9.99999974E-6 : f32
    %19 = vector.broadcast %cst_8 : f32 to vector<1x896xf32>
    %20 = arith.addf %16, %19 : vector<1x896xf32>
    %21 = math.rsqrt %20 : vector<1x896xf32>
    %22 = vector.broadcast %21 : vector<1x896xf32> to vector<2x896xf32>
    %23 = arith.mulf %18, %22 : vector<2x896xf32>
    %c0_9 = arith.constant 0 : index
    %c0_10 = arith.constant 0 : index
    %24 = vector.load %arg6[%c0_9, %c0_10] : memref<1x896xf32, #tpu.memory_space<vmem>>, vector<1x896xf32>
    %25 = vector.broadcast %24 : vector<1x896xf32> to vector<2x896xf32>
    %26 = arith.mulf %23, %25 : vector<2x896xf32>
    %c0_11 = arith.constant 0 : index
    %c0_12 = arith.constant 0 : index
    %27 = vector.load %arg7[%c0_11, %c0_12] : memref<1x896xf32, #tpu.memory_space<vmem>>, vector<1x896xf32>
    %28 = vector.broadcast %27 : vector<1x896xf32> to vector<2x896xf32>
    %29 = arith.addf %26, %28 : vector<2x896xf32>
    %cst_13 = arith.constant 0.000000e+00 : f32
    %30 = vector.broadcast %cst_13 : f32 to vector<2x896xf32>
    %31 = arith.maximumf %29, %30 : vector<2x896xf32>
    %32 = arith.truncf %31 : vector<2x896xf32> to vector<2x896xbf16>
    %c0_14 = arith.constant 0 : index
    %c0_15 = arith.constant 0 : index
    %33 = vector.load %arg8[%c0_14, %c0_15] : memref<2x896xbf16, #tpu.memory_space<vmem>>, vector<2x896xbf16>
    tpu.vector_store %arg8[%c0_14, %c0_15], %32 {strides = array<i32>} : memref<2x896xbf16, #tpu.memory_space<vmem>>, vector<2x896xbf16>,
    return
  }
  func.func @transform_0(%arg0: i32) -> (i32, i32) {
    %c0_i32 = arith.constant 0 : i32
    %c0_i32_0 = arith.constant 0 : i32
    %c0_i32_1 = arith.constant 0 : i32
    return %c0_i32, %c0_i32_0 : i32, i32
  }
  func.func @transform_1(%arg0: i32) -> (i32, i32) {
    %c0_i32 = arith.constant 0 : i32
    %c0_i32_0 = arith.constant 0 : i32
    %c0_i32_1 = arith.constant 0 : i32
    return %c0_i32, %c0_i32_0 : i32, i32
  }
  func.func @transform_2(%arg0: i32) -> (i32, i32) {
    %c0_i32 = arith.constant 0 : i32
    %c0_i32_0 = arith.constant 0 : i32
    %c0_i32_1 = arith.constant 0 : i32
    return %c0_i32, %c0_i32_0 : i32, i32
  }
  func.func @transform_3(%arg0: i32) -> (i32, i32) {
    %c0_i32 = arith.constant 0 : i32
    %c0_i32_0 = arith.constant 0 : i32
    %c0_i32_1 = arith.constant 0 : i32
    return %c0_i32, %c0_i32_0 : i32, i32
  }
  func.func @transform_4(%arg0: i32) -> (i32, i32) {
    %c0_i32 = arith.constant 0 : i32
    %c0_i32_0 = arith.constant 0 : i32
    return %c0_i32, %arg0 : i32, i32
  }
  func.func @transform_5(%arg0: i32) -> (i32, i32) {
    %c0_i32 = arith.constant 0 : i32
    %c0_i32_0 = arith.constant 0 : i32
    return %c0_i32, %arg0 : i32, i32
  }
  func.func @transform_6(%arg0: i32) -> (i32, i32) {
    %c0_i32 = arith.constant 0 : i32
    %c0_i32_0 = arith.constant 0 : i32
    return %c0_i32, %arg0 : i32, i32
  }
  func.func @transform_7(%arg0: i32) -> (i32, i32) {
    %c0_i32 = arith.constant 0 : i32
    %c0_i32_0 = arith.constant 0 : i32
    return %c0_i32, %arg0 : i32, i32
  }
}

module attributes {stable_mosaic.version = 11 : i64} {
  func.func @_matmul_kernel(%arg0: i32, %arg1: memref<98x128xbf16, #tpu.memory_space<vmem>>, %arg2: memref<128x1024xbf16, #tpu.memory_space<vmem>>, %arg3: memref<98x1024xbf16, #tpu.memory_space<vmem>>) attributes {dimension_semantics = [#tpu.dimension_semantics<arbitrary>], iteration_bounds = array<i64: 1>, scalar_prefetch = 0 : i64, scratch_operands = 0 : i64, tpu.core_type = #tpu.core_type<tc>, window_params = [{pipeline_mode = #tpu.pipeline_mode<synchronous>, transform_indices = @transform_0, window_bounds = array<i64: 98, 128>}, {pipeline_mode = #tpu.pipeline_mode<synchronous>, transform_indices = @transform_1, window_bounds = array<i64: 128, 1024>}, {pipeline_mode = #tpu.pipeline_mode<synchronous>, transform_indices = @transform_2, window_bounds = array<i64: 98, 1024>}]} {
    %c0 = arith.constant 0 : index
    %c0_0 = arith.constant 0 : index
    %0 = vector.load %arg1[%c0, %c0_0] : memref<98x128xbf16, #tpu.memory_space<vmem>>, vector<98x128xbf16>
    %c0_1 = arith.constant 0 : index
    %c0_2 = arith.constant 0 : index
    %1 = vector.load %arg2[%c0_1, %c0_2] : memref<128x1024xbf16, #tpu.memory_space<vmem>>, vector<128x1024xbf16>
    %cst = arith.constant dense<0.000000e+00> : vector<98x1024xf32>
    %2 = tpu.matmul %0, %1, %cst {dimension_numbers = #tpu.dot_dimension_numbers<[1], [0], [0], [1], [0, 0, 1, 1], [], []>} : vector<98x128xbf16>, vector<128x1024xbf16>, vector<98x1024xf32> -> vector<98x1024xf32>
    %3 = arith.truncf %2 : vector<98x1024xf32> to vector<98x1024xbf16>
    %c0_3 = arith.constant 0 : index
    %c0_4 = arith.constant 0 : index
    %4 = vector.load %arg3[%c0_3, %c0_4] : memref<98x1024xbf16, #tpu.memory_space<vmem>>, vector<98x1024xbf16>
    tpu.vector_store %arg3[%c0_3, %c0_4], %3 {strides = array<i32>} : memref<98x1024xbf16, #tpu.memory_space<vmem>>, vector<98x1024xbf16>,
    return
  }
  func.func @transform_0(%arg0: i32) -> (i32, i32) {
    %c0_i32 = arith.constant 0 : i32
    %c0_i32_0 = arith.constant 0 : i32
    %c0_i32_1 = arith.constant 0 : i32
    return %c0_i32, %c0_i32_0 : i32, i32
  }
  func.func @transform_1(%arg0: i32) -> (i32, i32) {
    %c0_i32 = arith.constant 0 : i32
    %c0_i32_0 = arith.constant 0 : i32
    %c0_i32_1 = arith.constant 0 : i32
    return %c0_i32, %c0_i32_0 : i32, i32
  }
  func.func @transform_2(%arg0: i32) -> (i32, i32) {
    %c0_i32 = arith.constant 0 : i32
    %c0_i32_0 = arith.constant 0 : i32
    %c0_i32_1 = arith.constant 0 : i32
    return %c0_i32, %c0_i32_0 : i32, i32
  }
}

module attributes {stable_mosaic.version = 11 : i64} {
  func.func @_bn_relu_matmul_kernel(%arg0: i32, %arg1: memref<392x64xf32, #tpu.memory_space<vmem>>, %arg2: memref<1x64xf32, #tpu.memory_space<vmem>>, %arg3: memref<1x64xf32, #tpu.memory_space<vmem>>, %arg4: memref<64x128xbf16, #tpu.memory_space<vmem>>, %arg5: memref<392x128xbf16, #tpu.memory_space<vmem>>) attributes {dimension_semantics = [#tpu.dimension_semantics<arbitrary>], iteration_bounds = array<i64: 1>, scalar_prefetch = 0 : i64, scratch_operands = 0 : i64, tpu.core_type = #tpu.core_type<tc>, window_params = [{pipeline_mode = #tpu.pipeline_mode<synchronous>, transform_indices = @transform_0, window_bounds = array<i64: 392, 64>}, {pipeline_mode = #tpu.pipeline_mode<synchronous>, transform_indices = @transform_1, window_bounds = array<i64: 1, 64>}, {pipeline_mode = #tpu.pipeline_mode<synchronous>, transform_indices = @transform_2, window_bounds = array<i64: 1, 64>}, {pipeline_mode = #tpu.pipeline_mode<synchronous>, transform_indices = @transform_3, window_bounds = array<i64: 64, 128>}, {pipeline_mode = #tpu.pipeline_mode<synchronous>, transform_indices = @transform_4, window_bounds = array<i64: 392, 128>}]} {
    %c0 = arith.constant 0 : index
    %c0_0 = arith.constant 0 : index
    %0 = vector.load %arg1[%c0, %c0_0] : memref<392x64xf32, #tpu.memory_space<vmem>>, vector<392x64xf32>
    %cst = arith.constant dense<0.000000e+00> : vector<64xf32>
    %1 = vector.multi_reduction <add>, %0, %cst [0] : vector<392x64xf32> to vector<64xf32>
    %2 = vector.shape_cast %1 : vector<64xf32> to vector<1x64xf32>
    %cst_1 = arith.constant 3.920000e+02 : f32
    %3 = vector.broadcast %cst_1 : f32 to vector<1x64xf32>
    %4 = arith.divf %2, %3 : vector<1x64xf32>
    %5 = vector.broadcast %4 : vector<1x64xf32> to vector<392x64xf32>
    %6 = arith.subf %0, %5 : vector<392x64xf32>
    %7 = arith.mulf %6, %6 : vector<392x64xf32>
    %cst_2 = arith.constant dense<0.000000e+00> : vector<64xf32>
    %8 = vector.multi_reduction <add>, %7, %cst_2 [0] : vector<392x64xf32> to vector<64xf32>
    %9 = vector.shape_cast %8 : vector<64xf32> to vector<1x64xf32>
    %cst_3 = arith.constant 3.920000e+02 : f32
    %10 = vector.broadcast %cst_3 : f32 to vector<1x64xf32>
    %11 = arith.divf %9, %10 : vector<1x64xf32>
    %12 = vector.broadcast %4 : vector<1x64xf32> to vector<392x64xf32>
    %13 = arith.subf %0, %12 : vector<392x64xf32>
    %cst_4 = arith.constant 9.99999974E-6 : f32
    %14 = vector.broadcast %cst_4 : f32 to vector<1x64xf32>
    %15 = arith.addf %11, %14 : vector<1x64xf32>
    %16 = math.rsqrt %15 : vector<1x64xf32>
    %17 = vector.broadcast %16 : vector<1x64xf32> to vector<392x64xf32>
    %18 = arith.mulf %13, %17 : vector<392x64xf32>
    %c0_5 = arith.constant 0 : index
    %c0_6 = arith.constant 0 : index
    %19 = vector.load %arg2[%c0_5, %c0_6] : memref<1x64xf32, #tpu.memory_space<vmem>>, vector<1x64xf32>
    %20 = vector.broadcast %19 : vector<1x64xf32> to vector<392x64xf32>
    %21 = arith.mulf %18, %20 : vector<392x64xf32>
    %c0_7 = arith.constant 0 : index
    %c0_8 = arith.constant 0 : index
    %22 = vector.load %arg3[%c0_7, %c0_8] : memref<1x64xf32, #tpu.memory_space<vmem>>, vector<1x64xf32>
    %23 = vector.broadcast %22 : vector<1x64xf32> to vector<392x64xf32>
    %24 = arith.addf %21, %23 : vector<392x64xf32>
    %cst_9 = arith.constant 0.000000e+00 : f32
    %25 = vector.broadcast %cst_9 : f32 to vector<392x64xf32>
    %26 = arith.maximumf %24, %25 : vector<392x64xf32>
    %27 = arith.truncf %26 : vector<392x64xf32> to vector<392x64xbf16>
    %c0_10 = arith.constant 0 : index
    %c0_11 = arith.constant 0 : index
    %28 = vector.load %arg4[%c0_10, %c0_11] : memref<64x128xbf16, #tpu.memory_space<vmem>>, vector<64x128xbf16>
    %cst_12 = arith.constant dense<0.000000e+00> : vector<392x128xf32>
    %29 = tpu.matmul %27, %28, %cst_12 {dimension_numbers = #tpu.dot_dimension_numbers<[1], [0], [0], [1], [0, 0, 1, 1], [], []>} : vector<392x64xbf16>, vector<64x128xbf16>, vector<392x128xf32> -> vector<392x128xf32>
    %30 = arith.truncf %29 : vector<392x128xf32> to vector<392x128xbf16>
    %c0_13 = arith.constant 0 : index
    %c0_14 = arith.constant 0 : index
    %31 = vector.load %arg5[%c0_13, %c0_14] : memref<392x128xbf16, #tpu.memory_space<vmem>>, vector<392x128xbf16>
    tpu.vector_store %arg5[%c0_13, %c0_14], %30 {strides = array<i32>} : memref<392x128xbf16, #tpu.memory_space<vmem>>, vector<392x128xbf16>,
    return
  }
  func.func @transform_0(%arg0: i32) -> (i32, i32) {
    %c0_i32 = arith.constant 0 : i32
    %c0_i32_0 = arith.constant 0 : i32
    %c0_i32_1 = arith.constant 0 : i32
    return %c0_i32, %c0_i32_0 : i32, i32
  }
  func.func @transform_1(%arg0: i32) -> (i32, i32) {
    %c0_i32 = arith.constant 0 : i32
    %c0_i32_0 = arith.constant 0 : i32
    %c0_i32_1 = arith.constant 0 : i32
    return %c0_i32, %c0_i32_0 : i32, i32
  }
  func.func @transform_2(%arg0: i32) -> (i32, i32) {
    %c0_i32 = arith.constant 0 : i32
    %c0_i32_0 = arith.constant 0 : i32
    %c0_i32_1 = arith.constant 0 : i32
    return %c0_i32, %c0_i32_0 : i32, i32
  }
  func.func @transform_3(%arg0: i32) -> (i32, i32) {
    %c0_i32 = arith.constant 0 : i32
    %c0_i32_0 = arith.constant 0 : i32
    %c0_i32_1 = arith.constant 0 : i32
    return %c0_i32, %c0_i32_0 : i32, i32
  }
  func.func @transform_4(%arg0: i32) -> (i32, i32) {
    %c0_i32 = arith.constant 0 : i32
    %c0_i32_0 = arith.constant 0 : i32
    %c0_i32_1 = arith.constant 0 : i32
    return %c0_i32, %c0_i32_0 : i32, i32
  }
}

</mosaic_0001>

<bundles_post_ra>
// kernel: generator_forward.4
= control target key start
LH: loop header
LB: loop body
LE: loop exit
PB: predicated region body
PF: predicated region fallthrough
CT: control target
= control target key end

     0   :  { %7 = vsyncpa [#allocation3], 0  ;;  %s1296_s12 = smov [#allocation2]   ;;  %s1297_s14 = smov 512   ;;  %s1564_s0 = inlined_call_operand.vmem [shape: bf16[98,128], index: 0, kind: input, shape index: {}]   ;;  %s1565_s1 = inlined_call_operand.hbm [shape: bf16[128,1024], index: 1, kind: input, shape index: {}]   ;;  %s1566_s2 = inlined_call_operand.vmem [shape: bf16[98,1024], index: 2, kind: output, shape index: {}]  }
   0x1   :  { %s14_s11 = sshll.u32 %s1565_s1, 4  ;;  %s16_s13 = sshll.u32 %s1296_s12, 4  ;;  %s15_s11 = int_to_ptr.hbm [resolvable:$true] %s14_s11  ;;  %s17_s13 = int_to_ptr.vmem [resolvable:$true] %s16_s13 }
   0x2   :  { %s1298_s15 = smov 32  }
   0x3   :  { %22 = dma.hbm_to_vmem [thread:$0]  %s15_s11, 8192, %s17_s13, [#allocation3], %s1297_s14, %s1297_s14, %s1298_s15  }
   0x4   :  { %1294 = dma.done.wait [#allocation3], 8192  }
   0x5   :  { %1295 = vsyncadd [#allocation3], 4294959104  ;;  %v1167_v0 = vld [vmem:[#allocation2 + $0x1c0] sm:$0xf]  ;;  %v1259_v2 = vld [vmem:[#allocation2 + $0x1c4] sm:$0xf] }
   0x6   :  { %v1263_v1 = vld [vmem:[#allocation2 + $0x1dc] sm:$0xf0]  ;;  %v1169_v4 = vld [vmem:[#allocation2 + $0x1e0] sm:$0xf0]  ;;  %v1175_v5 = vld [vmem:[#allocation2 + $0x1c8] sm:$0xf] }
   0x7   :  { %v1168_v3 = vor.u32 %v1263_v1, %v1167_v0  ;;  %v1264_v6 = vld [vmem:[#allocation2 + $0x1e4] sm:$0xf0]  ;;  %v1172_v7 = vor.u32 %v1259_v2, %v1169_v4  ;;  %v1260_v9 = vld [vmem:[#allocation2 + $0x1cc] sm:$0xf]  ;;  %v1135_v11 = vld [vmem:[#allocation2 + $0x180] sm:$0xf] }
   0x8   :  { %v1176_v8 = vor.u32 %v1264_v6, %v1175_v5  ;;  %v1177_v10 = vld [vmem:[#allocation2 + $0x1e8] sm:$0xf0]  ;;  %v1255_v13 = vld [vmem:[#allocation2 + $0x19c] sm:$0xf0]  ;;  %v1251_v14 = vld [vmem:[#allocation2 + $0x184] sm:$0xf] }
   0x9   :  { %464 = vmatpush.bf16.msra.mxu0 %v1168_v3  ;;  %v1180_v12 = vor.u32 %v1260_v9, %v1177_v10  ;;  %v1137_v15 = vld [vmem:[#allocation2 + $0x1a0] sm:$0xf0]  ;;  %507 = vmatpush.bf16.msra.mxu1 %v1172_v7  ;;  %v1136_v16 = vor.u32 %v1255_v13, %v1135_v11  ;;  %v1143_v18 = vld [vmem:[#allocation2 + $0x188] sm:$0xf]  ;;  %v1252_v20 = vld [vmem:[#allocation2 + $0x18c] sm:$0xf] }
   0xa   :  { %550 = vmatpush.bf16.msra.mxu2 %v1176_v8  ;;  %v1140_v17 = vor.u32 %v1251_v14, %v1137_v15  ;;  %v1256_v19 = vld [vmem:[#allocation2 + $0x1a4] sm:$0xf0]  ;;  %v1145_v22 = vld [vmem:[#allocation2 + $0x1a8] sm:$0xf0]  ;;  %v1103_v23 = vld [vmem:[#allocation2 + $0x140] sm:$0xf] }
   0xb   :  { %593 = vmatpush.bf16.msra.mxu3 %v1180_v12  ;;  %v1144_v21 = vor.u32 %v1256_v19, %v1143_v18  ;;  %v1247_v24 = vld [vmem:[#allocation2 + $0x15c] sm:$0xf0]  ;;  %v1148_v25 = vor.u32 %v1252_v20, %v1145_v22  ;;  %v1243_v26 = vld [vmem:[#allocation2 + $0x144] sm:$0xf]  ;;  %v1111_v28 = vld [vmem:[#allocation2 + $0x148] sm:$0xf] }
   0xc   :  { %v1105_v27 = vld [vmem:[#allocation2 + $0x160] sm:$0xf0]  ;;  %v1104_v29 = vor.u32 %v1247_v24, %v1103_v23  ;;  %v1248_v30 = vld [vmem:[#allocation2 + $0x164] sm:$0xf0]  ;;  %v1244_v31 = vld [vmem:[#allocation2 + $0x14c] sm:$0xf] }
   0xd   :  { %465 = vmatpush.bf16.msra.mxu0 %v1136_v16  ;;  %v1113_v32 = vld [vmem:[#allocation2 + $0x168] sm:$0xf0]  ;;  %508 = vmatpush.bf16.msra.mxu1 %v1140_v17  ;;  %v1108_v33 = vor.u32 %v1243_v26, %v1105_v27  ;;  %v1112_v34 = vor.u32 %v1248_v30, %v1111_v28  ;;  %v1071_v35 = vld [vmem:[#allocation2 + $0x100] sm:$0xf]  ;;  %v1235_v37 = vld [vmem:[#allocation2 + $0x104] sm:$0xf] }
   0xe   :  { %551 = vmatpush.bf16.msra.mxu2 %v1144_v21  ;;  %v1239_v36 = vld [vmem:[#allocation2 + $0x11c] sm:$0xf0]  ;;  %v1116_v38 = vor.u32 %v1244_v31, %v1113_v32  ;;  %v1073_v39 = vld [vmem:[#allocation2 + $0x120] sm:$0xf0]  ;;  %v1079_v40 = vld [vmem:[#allocation2 + $0x108] sm:$0xf] }
   0xf   :  { %594 = vmatpush.bf16.msra.mxu3 %v1148_v25  ;;  %v1240_v41 = vld [vmem:[#allocation2 + $0x124] sm:$0xf0]  ;;  %v1236_v42 = vld [vmem:[#allocation2 + $0x10c] sm:$0xf]  ;;  %v1072_v44 = vor.u32 %v1239_v36, %v1071_v35  ;;  %v1076_v45 = vor.u32 %v1235_v37, %v1073_v39  ;;  %v1039_v47 = vld [vmem:[#allocation2 + $0xc0] sm:$0xf] }
  0x10   :  { %v1081_v43 = vld [vmem:[#allocation2 + $0x128] sm:$0xf0]  ;;  %v1080_v46 = vor.u32 %v1240_v41, %v1079_v40  ;;  %v1231_v48 = vld [vmem:[#allocation2 + $0xdc] sm:$0xf0]  ;;  %v1227_v49 = vld [vmem:[#allocation2 + $0xc4] sm:$0xf] }
  0x11   :  { %466 = vmatpush.bf16.msra.mxu0 %v1104_v29  ;;  %509 = vmatpush.bf16.msra.mxu1 %v1108_v33  ;;  %v1084_v50 = vor.u32 %v1236_v42, %v1081_v43  ;;  %v1041_v51 = vld [vmem:[#allocation2 + $0xe0] sm:$0xf0]  ;;  %v1047_v52 = vld [vmem:[#allocation2 + $0xc8] sm:$0xf]  ;;  %v1228_v54 = vld [vmem:[#allocation2 + $0xcc] sm:$0xf]  ;;  %v1040_v56 = vor.u32 %v1231_v48, %v1039_v47 }
  0x12   :  { %552 = vmatpush.bf16.msra.mxu2 %v1112_v34  ;;  %v1232_v53 = vld [vmem:[#allocation2 + $0xe4] sm:$0xf0]  ;;  %v1049_v55 = vld [vmem:[#allocation2 + $0xe8] sm:$0xf0]  ;;  %v1044_v57 = vor.u32 %v1227_v49, %v1041_v51  ;;  %v1007_v59 = vld [vmem:[#allocation2 + $0x80] sm:$0xf] }
  0x13   :  { %595 = vmatpush.bf16.msra.mxu3 %v1116_v38  ;;  %v1048_v58 = vor.u32 %v1232_v53, %v1047_v52  ;;  %v1223_v60 = vld [vmem:[#allocation2 + $0x9c] sm:$0xf0]  ;;  %v1219_v61 = vld [vmem:[#allocation2 + $0x84] sm:$0xf]  ;;  %v1052_v62 = vor.u32 %v1228_v54, %v1049_v55  ;;  %v1015_v0 = vld [vmem:[#allocation2 + $0x88] sm:$0xf] }
  0x14   :  { %v1009_v63 = vld [vmem:[#allocation2 + $0xa0] sm:$0xf0]  ;;  %v1224_v1 = vld [vmem:[#allocation2 + $0xa4] sm:$0xf0]  ;;  %v1220_v2 = vld [vmem:[#allocation2 + $0x8c] sm:$0xf]  ;;  %v1008_v4 = vor.u32 %v1223_v60, %v1007_v59 }
  0x15   :  { %467 = vmatpush.bf16.msra.mxu0 %v1072_v44  ;;  %510 = vmatpush.bf16.msra.mxu1 %v1076_v45  ;;  %v1017_v3 = vld [vmem:[#allocation2 + $0xa8] sm:$0xf0]  ;;  %v1012_v5 = vor.u32 %v1219_v61, %v1009_v63  ;;  %v1016_v6 = vor.u32 %v1224_v1, %v1015_v0  ;;  %v975_v7 = vld [vmem:[#allocation2 + $0x40] sm:$0xf]  ;;  %v1211_v9 = vld [vmem:[#allocation2 + $0x44] sm:$0xf] }
  0x16   :  { %553 = vmatpush.bf16.msra.mxu2 %v1080_v46  ;;  %v1215_v8 = vld [vmem:[#allocation2 + $0x5c] sm:$0xf0]  ;;  %v1020_v10 = vor.u32 %v1220_v2, %v1017_v3  ;;  %v977_v11 = vld [vmem:[#allocation2 + $0x60] sm:$0xf0]  ;;  %v983_v12 = vld [vmem:[#allocation2 + $0x48] sm:$0xf] }
  0x17   :  { %596 = vmatpush.bf16.msra.mxu3 %v1084_v50  ;;  %v1216_v13 = vld [vmem:[#allocation2 + $0x64] sm:$0xf0]  ;;  %v1212_v14 = vld [vmem:[#allocation2 + $0x4c] sm:$0xf]  ;;  %v976_v16 = vor.u32 %v1215_v8, %v975_v7  ;;  %v943_v17 = vld [vmem:[#allocation2] sm:$0xf]  ;;  %v980_v18 = vor.u32 %v1211_v9, %v977_v11 }
  0x18   :  { %v985_v15 = vld [vmem:[#allocation2 + $0x68] sm:$0xf0]  ;;  %v984_v19 = vor.u32 %v1216_v13, %v983_v12  ;;  %v1207_v20 = vld [vmem:[#allocation2 + $0x1c] sm:$0xf0]  ;;  %v1203_v21 = vld [vmem:[#allocation2 + $0x4] sm:$0xf] }
  0x19   :  { %468 = vmatpush.bf16.msra.mxu0 %v1040_v56  ;;  %511 = vmatpush.bf16.msra.mxu1 %v1044_v57  ;;  %v945_v22 = vld [vmem:[#allocation2 + $0x20] sm:$0xf0]  ;;  %v988_v23 = vor.u32 %v1212_v14, %v985_v15  ;;  %v951_v24 = vld [vmem:[#allocation2 + $0x8] sm:$0xf]  ;;  %v1204_v26 = vld [vmem:[#allocation2 + $0xc] sm:$0xf]  ;;  %v944_v30 = vor.u32 %v1207_v20, %v943_v17 }
  0x1a   :  { %554 = vmatpush.bf16.msra.mxu2 %v1048_v58  ;;  %v1208_v25 = vld [vmem:[#allocation2 + $0x24] sm:$0xf0]  ;;  %v953_v27 = vld [vmem:[#allocation2 + $0x28] sm:$0xf0]  ;;  %v1191_v28 = vld [vmem:[#allocation2 + $0x1d8] sm:$0xf]  ;;  %v948_v33 = vor.u32 %v1203_v21, %v945_v22 }
  0x1b   :  { %597 = vmatpush.bf16.msra.mxu3 %v1052_v62  ;;  %v1266_v29 = vld [vmem:[#allocation2 + $0x1f4] sm:$0xf0]  ;;  %v1262_v31 = vld [vmem:[#allocation2 + $0x1dc] sm:$0xf]  ;;  %v952_v34 = vor.u32 %v1208_v25, %v951_v24  ;;  %v1320_v35 = vld [vmem:[%s1564_s0] sm:$0xff]  ;;  %v956_v36 = vor.u32 %v1204_v26, %v953_v27 }
  0x1c   :  { %v1193_v32 = vld [vmem:[#allocation2 + $0x1f8] sm:$0xf0]  ;;  %v1192_v37 = vor.u32 %v1266_v29, %v1191_v28  ;;  %v1183_v38 = vld [vmem:[#allocation2 + $0x1d0] sm:$0xf]  ;;  %v1261_v40 = vld [vmem:[#allocation2 + $0x1d4] sm:$0xf] }
  0x1d   :  { %469 = vmatpush.bf16.msra.mxu0 %v1008_v4  ;;  %512 = vmatpush.bf16.msra.mxu1 %v1012_v5  ;;  %v1265_v39 = vld [vmem:[#allocation2 + $0x1ec] sm:$0xf0]  ;;  %v1196_v41 = vor.u32 %v1262_v31, %v1193_v32  ;;  %v1185_v42 = vld [vmem:[#allocation2 + $0x1f0] sm:$0xf0]  ;;  %v1159_v43 = vld [vmem:[#allocation2 + $0x198] sm:$0xf] }
  0x1e   :  { %555 = vmatpush.bf16.msra.mxu2 %v1016_v6  ;;  %v1258_v44 = vld [vmem:[#allocation2 + $0x1b4] sm:$0xf0]  ;;  %v1254_v45 = vld [vmem:[#allocation2 + $0x19c] sm:$0xf]  ;;  %v1184_v47 = vor.u32 %v1265_v39, %v1183_v38  ;;  %v1188_v48 = vor.u32 %v1261_v40, %v1185_v42  ;;  %v1151_v50 = vld [vmem:[#allocation2 + $0x190] sm:$0xf] }
  0x1f   :  { %598 = vmatpush.bf16.msra.mxu3 %v1020_v10  ;;  %v1161_v46 = vld [vmem:[#allocation2 + $0x1b8] sm:$0xf0]  ;;  %v1160_v49 = vor.u32 %v1258_v44, %v1159_v43  ;;  %v1257_v51 = vld [vmem:[#allocation2 + $0x1ac] sm:$0xf0]  ;;  %v1253_v52 = vld [vmem:[#allocation2 + $0x194] sm:$0xf] }
  0x20   :  { %v1164_v53 = vor.u32 %v1254_v45, %v1161_v46  ;;  %v1153_v54 = vld [vmem:[#allocation2 + $0x1b0] sm:$0xf0]  ;;  %v1127_v55 = vld [vmem:[#allocation2 + $0x158] sm:$0xf]  ;;  %v1246_v57 = vld [vmem:[#allocation2 + $0x15c] sm:$0xf]  ;;  %v1152_v59 = vor.u32 %v1257_v51, %v1151_v50 }
  0x21   :  { %470 = vmatpush.bf16.msra.mxu0 %v976_v16  ;;  %513 = vmatpush.bf16.msra.mxu1 %v980_v18  ;;  %v1250_v56 = vld [vmem:[#allocation2 + $0x174] sm:$0xf0]  ;;  %v1129_v58 = vld [vmem:[#allocation2 + $0x178] sm:$0xf0]  ;;  %v1156_v60 = vor.u32 %v1253_v52, %v1153_v54  ;;  %v1119_v62 = vld [vmem:[#allocation2 + $0x150] sm:$0xf] }
  0x22   :  { %556 = vmatpush.bf16.msra.mxu2 %v984_v19  ;;  %v1128_v61 = vor.u32 %v1250_v56, %v1127_v55  ;;  %v1249_v63 = vld [vmem:[#allocation2 + $0x16c] sm:$0xf0]  ;;  %v1245_v0 = vld [vmem:[#allocation2 + $0x154] sm:$0xf]  ;;  %v1132_v1 = vor.u32 %v1246_v57, %v1129_v58  ;;  %v1095_v3 = vld [vmem:[#allocation2 + $0x118] sm:$0xf] }
  0x23   :  { %599 = vmatpush.bf16.msra.mxu3 %v988_v23  ;;  %v1121_v2 = vld [vmem:[#allocation2 + $0x170] sm:$0xf0]  ;;  %v1242_v4 = vld [vmem:[#allocation2 + $0x134] sm:$0xf0]  ;;  %v1238_v5 = vld [vmem:[#allocation2 + $0x11c] sm:$0xf]  ;;  %v1120_v7 = vor.u32 %v1249_v63, %v1119_v62 }
  0x24   :  { %v1097_v6 = vld [vmem:[#allocation2 + $0x138] sm:$0xf0]  ;;  %v1124_v8 = vor.u32 %v1245_v0, %v1121_v2  ;;  %v1096_v9 = vor.u32 %v1242_v4, %v1095_v3  ;;  %v1329_v11 = vld [vmem:[%s1564_s0 + $0x8] sm:$0xff]  ;;  %v1087_v12 = vld [vmem:[#allocation2 + $0x110] sm:$0xf] }
  0x25   :  { %471 = vmatpush.bf16.msra.mxu0 %v944_v30  ;;  %514 = vmatpush.bf16.msra.mxu1 %v948_v33  ;;  %v1100_v10 = vor.u32 %v1238_v5, %v1097_v6  ;;  %v1241_v13 = vld [vmem:[#allocation2 + $0x12c] sm:$0xf0]  ;;  %v1237_v14 = vld [vmem:[#allocation2 + $0x114] sm:$0xf]  ;;  %v1063_v17 = vld [vmem:[#allocation2 + $0xd8] sm:$0xf] }
  0x26   :  { %557 = vmatpush.bf16.msra.mxu2 %v952_v34  ;;  %v1088_v15 = vor.u32 %v1241_v13, %v1087_v12  ;;  %v1089_v16 = vld [vmem:[#allocation2 + $0x130] sm:$0xf0]  ;;  %v1234_v18 = vld [vmem:[#allocation2 + $0xf4] sm:$0xf0]  ;;  %v1230_v21 = vld [vmem:[#allocation2 + $0xdc] sm:$0xf] }
  0x27   :  { %600 = vmatpush.bf16.msra.mxu3 %v956_v36  ;;  %v1092_v19 = vor.u32 %v1237_v14, %v1089_v16  ;;  %v1064_v20 = vor.u32 %v1234_v18, %v1063_v17  ;;  %v1065_v22 = vld [vmem:[#allocation2 + $0xf8] sm:$0xf0]  ;;  %v1055_v23 = vld [vmem:[#allocation2 + $0xd0] sm:$0xf]  ;;  %v1229_v26 = vld [vmem:[#allocation2 + $0xd4] sm:$0xf] }
  0x28   :  { %472 = vmatmul.bf16.vlgmr.msra.gmra.mxu0 %v1320_v35  ;;  %515 = vmatmul.bf16.vlgmr.msra.gmra.mxu1 %v1320_v35  ;;  %v1068_v24 = vor.u32 %v1230_v21, %v1065_v22  ;;  %v1233_v25 = vld [vmem:[#allocation2 + $0xec] sm:$0xf0]  ;;  %v1057_v27 = vld [vmem:[#allocation2 + $0xf0] sm:$0xf0]  ;;  %v1031_v31 = vld [vmem:[#allocation2 + $0x98] sm:$0xf] }
  0x29   :  { %558 = vmatmul.bf16.vlgmr.msra.gmra.mxu2 %v1320_v35  ;;  %636 = vmatpush.bf16.msrb.mxu0 %v1184_v47  ;;  %v1056_v28 = vor.u32 %v1233_v25, %v1055_v23  ;;  %v1060_v29 = vor.u32 %v1229_v26, %v1057_v27  ;;  %v1338_v30 = vld [vmem:[%s1564_s0 + $0x10] sm:$0xff]  ;;  %v1226_v32 = vld [vmem:[#allocation2 + $0xb4] sm:$0xf0]  ;;  %v1222_v33 = vld [vmem:[#allocation2 + $0x9c] sm:$0xf] }
  0x2a   :  { %722 = vmatpush.bf16.msrb.mxu2 %v1192_v37  ;;  %601 = vmatmul.bf16.vlgmr.msra.gmra.mxu3 %v1320_v35  ;;  %v1032_v34 = vor.u32 %v1226_v32, %v1031_v31  ;;  %v1033_v36 = vld [vmem:[#allocation2 + $0xb8] sm:$0xf0]  ;;  %v1023_v37 = vld [vmem:[#allocation2 + $0x90] sm:$0xf]  ;;  %v1025_v42 = vld [vmem:[#allocation2 + $0xb0] sm:$0xf0] }
  0x2b   :  { %765 = vmatpush.bf16.msrb.mxu3 %v1196_v41  ;;  %679 = vmatpush.bf16.msrb.mxu1 %v1188_v48  ;;  %v1225_v38 = vld [vmem:[#allocation2 + $0xac] sm:$0xf0]  ;;  %v1036_v39 = vor.u32 %v1222_v33, %v1033_v36  ;;  %v1221_v41 = vld [vmem:[#allocation2 + $0x94] sm:$0xf]  ;;  %v1347_v44 = vld [vmem:[%s1564_s0 + $0x18] sm:$0xff] }
  0x2c   :  { %v1024_v40 = vor.u32 %v1225_v38, %v1023_v37  ;;  %v1028_v43 = vor.u32 %v1221_v41, %v1025_v42  ;;  %v999_v45 = vld [vmem:[#allocation2 + $0x58] sm:$0xf]  ;;  %v1214_v47 = vld [vmem:[#allocation2 + $0x5c] sm:$0xf]  ;;  %v991_v50 = vld [vmem:[#allocation2 + $0x50] sm:$0xf] }
  0x2d   :  { %637 = vmatpush.bf16.msrb.mxu0 %v1152_v59  ;;  %v1218_v46 = vld [vmem:[#allocation2 + $0x74] sm:$0xf0]  ;;  %v1217_v51 = vld [vmem:[#allocation2 + $0x6c] sm:$0xf0]  ;;  %v1213_v54 = vld [vmem:[#allocation2 + $0x54] sm:$0xf] }
  0x2e   :  { %723 = vmatpush.bf16.msrb.mxu2 %v1160_v49  ;;  %v1000_v48 = vor.u32 %v1218_v46, %v999_v45  ;;  %v1001_v49 = vld [vmem:[#allocation2 + $0x78] sm:$0xf0]  ;;  %v993_v55 = vld [vmem:[#allocation2 + $0x70] sm:$0xf0]  ;;  %v1356_v57 = vld [vmem:[%s1564_s0 + $0x20] sm:$0xff] }
  0x2f   :  { %766 = vmatpush.bf16.msrb.mxu3 %v1164_v53  ;;  %680 = vmatpush.bf16.msrb.mxu1 %v1156_v60  ;;  %v1004_v52 = vor.u32 %v1214_v47, %v1001_v49  ;;  %v992_v53 = vor.u32 %v1217_v51, %v991_v50  ;;  %v996_v56 = vor.u32 %v1213_v54, %v993_v55  ;;  %v967_v58 = vld [vmem:[#allocation2 + $0x18] sm:$0xf]  ;;  %v1206_v60 = vld [vmem:[#allocation2 + $0x1c] sm:$0xf]  ;;  %v959_v63 = vld [vmem:[#allocation2 + $0x10] sm:$0xf] }
  0x30   :  { %v1210_v59 = vld [vmem:[#allocation2 + $0x34] sm:$0xf0]  ;;  %v969_v62 = vld [vmem:[#allocation2 + $0x38] sm:$0xf0]  ;;  %v1209_v0 = vld [vmem:[#allocation2 + $0x2c] sm:$0xf0] }
  0x31   :  { %638 = vmatpush.bf16.msrb.mxu0 %v1120_v7  ;;  %v960_v2 = vor.u32 %v1209_v0, %v959_v63  ;;  %v1205_v3 = vld [vmem:[#allocation2 + $0x14] sm:$0xf]  ;;  %v1365_v6 = vld [vmem:[%s1564_s0 + $0x28] sm:$0xff]  ;;  %v39_v7 = vld [vmem:[%s1564_s0 + $0x30] sm:$0x1] }
  0x32   :  { %724 = vmatpush.bf16.msrb.mxu2 %v1128_v61  ;;  %v968_v61 = vor.u32 %v1210_v59, %v967_v58  ;;  %v961_v4 = vld [vmem:[#allocation2 + $0x30] sm:$0xf0] }
  0x33   :  { %767 = vmatpush.bf16.msrb.mxu3 %v1132_v1  ;;  %681 = vmatpush.bf16.msrb.mxu1 %v1124_v8  ;;  %v972_v1 = vor.u32 %v1206_v60, %v969_v62  ;;  %v964_v5 = vor.u32 %v1205_v3, %v961_v4  ;;  %v129_v8 = vunpack.c.l.b16 %v39_v7 }
  0x35   :  { %639 = vmatpush.bf16.msrb.mxu0 %v1088_v15 }
  0x36   :  { %725 = vmatpush.bf16.msrb.mxu2 %v1096_v9  ;;  %v1374_v9 = vpack.c.b16 %v129_v8, %v129_v8 }
  0x37   :  { %768 = vmatpush.bf16.msrb.mxu3 %v1100_v10  ;;  %682 = vmatpush.bf16.msrb.mxu1 %v1092_v19 }
  0x38   :  { %477 = vmatmul.bf16.gmra.mxu0 %v1329_v11  ;;  %520 = vmatmul.bf16.gmra.mxu1 %v1329_v11 }
  0x39   :  { %563 = vmatmul.bf16.gmra.mxu2 %v1329_v11  ;;  %640 = vmatpush.bf16.msrb.mxu0 %v1056_v28 }
  0x3a   :  { %606 = vmatmul.bf16.gmra.mxu3 %v1329_v11  ;;  %726 = vmatpush.bf16.msrb.mxu2 %v1064_v20 }
  0x3b   :  { %769 = vmatpush.bf16.msrb.mxu3 %v1068_v24  ;;  %683 = vmatpush.bf16.msrb.mxu1 %v1060_v29 }
  0x3d   :  { %641 = vmatpush.bf16.msrb.mxu0 %v1024_v40 }
  0x3e   :  { %727 = vmatpush.bf16.msrb.mxu2 %v1032_v34 }
  0x3f   :  { %770 = vmatpush.bf16.msrb.mxu3 %v1036_v39  ;;  %684 = vmatpush.bf16.msrb.mxu1 %v1028_v43 }
  0x41   :  { %642 = vmatpush.bf16.msrb.mxu0 %v992_v53 }
  0x42   :  { %728 = vmatpush.bf16.msrb.mxu2 %v1000_v48 }
  0x43   :  { %771 = vmatpush.bf16.msrb.mxu3 %v1004_v52  ;;  %685 = vmatpush.bf16.msrb.mxu1 %v996_v56 }
  0x45   :  { %643 = vmatpush.bf16.msrb.mxu0 %v960_v2 }
  0x46   :  { %729 = vmatpush.bf16.msrb.mxu2 %v968_v61 }
  0x47   :  { %772 = vmatpush.bf16.msrb.mxu3 %v972_v1  ;;  %686 = vmatpush.bf16.msrb.mxu1 %v964_v5 }
  0x48   :  { %482 = vmatmul.bf16.gmra.mxu0 %v1338_v30  ;;  %525 = vmatmul.bf16.gmra.mxu1 %v1338_v30 }
  0x49   :  { %568 = vmatmul.bf16.gmra.mxu2 %v1338_v30 }
  0x4a   :  { %611 = vmatmul.bf16.gmra.mxu3 %v1338_v30 }
  0x58   :  { %487 = vmatmul.bf16.gmra.mxu0 %v1347_v44  ;;  %530 = vmatmul.bf16.gmra.mxu1 %v1347_v44 }
  0x59   :  { %573 = vmatmul.bf16.gmra.mxu2 %v1347_v44 }
  0x5a   :  { %616 = vmatmul.bf16.gmra.mxu3 %v1347_v44 }
  0x68   :  { %492 = vmatmul.bf16.gmra.mxu0 %v1356_v57  ;;  %535 = vmatmul.bf16.gmra.mxu1 %v1356_v57 }
  0x69   :  { %578 = vmatmul.bf16.gmra.mxu2 %v1356_v57 }
  0x6a   :  { %621 = vmatmul.bf16.gmra.mxu3 %v1356_v57 }
  0x78   :  { %497 = vmatmul.bf16.gmra.mxu0 %v1365_v6  ;;  %540 = vmatmul.bf16.gmra.mxu1 %v1365_v6 }
  0x79   :  { %583 = vmatmul.bf16.gmra.mxu2 %v1365_v6 }
  0x7a   :  { %626 = vmatmul.bf16.gmra.mxu3 %v1365_v6 }
  0x88   :  { %502 = vmatmul.bf16.gmra.mxu0 %v1374_v9  ;;  %545 = vmatmul.bf16.gmra.mxu1 %v1374_v9 }
  0x89   :  { %588 = vmatmul.bf16.gmra.mxu2 %v1374_v9 }
  0x8a   :  { %631 = vmatmul.bf16.gmra.mxu3 %v1374_v9 }
  0x98   :  { %644 = vmatmul.bf16.vlgmr.msrb.gmra.mxu0 %v1320_v35  ;;  %687 = vmatmul.bf16.vlgmr.msrb.gmra.mxu1 %v1320_v35 }
  0x99   :  { %730 = vmatmul.bf16.vlgmr.msrb.gmra.mxu2 %v1320_v35 }
  0x9a   :  { %773 = vmatmul.bf16.vlgmr.msrb.gmra.mxu3 %v1320_v35 }
  0xa5   :  { %v473_v10 = vpop.f32.mrf.mxu0  ;;  %v516_v12 = vpop.f32.mrf.mxu1 }
  0xa6   :  { %v808_v13 = vpack.c.bf16 %v516_v12, %v473_v10 }
  0xa8   :  { %649 = vmatmul.bf16.gmra.mxu0 %v1329_v11  ;;  %860 = vst [vmem:[%s1566_s2] sm:$0xff] %v808_v13  ;;  %692 = vmatmul.bf16.gmra.mxu1 %v1329_v11 }
  0xa9   :  { %735 = vmatmul.bf16.gmra.mxu2 %v1329_v11 }
  0xaa   :  { %778 = vmatmul.bf16.gmra.mxu3 %v1329_v11 }
  0xac   :  { %v559_v14 = vpop.f32.mrf.mxu2 }
  0xad   :  { %v602_v15 = vpop.f32.mrf.mxu3  ;;  %v475_v16 = vpop.f32.mrf.mxu0 }
  0xae   :  { %v809_v17 = vpack.c.bf16 %v602_v15, %v559_v14  ;;  %v518_v35 = vpop.f32.mrf.mxu1 }
  0xaf   :  { %v812_v18 = vpack.c.bf16 %v518_v35, %v475_v16 }
  0xb0   :  { %861 = vst [vmem:[%s1566_s2 + $0x8] sm:$0xff] %v809_v17 }
  0xb1   :  { %864 = vst [vmem:[%s1566_s2 + $0x20] sm:$0xff] %v812_v18 }
  0xb4   :  { %v561_v19 = vpop.f32.mrf.mxu2 }
  0xb5   :  { %v604_v20 = vpop.f32.mrf.mxu3  ;;  %v478_v21 = vpop.f32.mrf.mxu0 }
  0xb6   :  { %v813_v22 = vpack.c.bf16 %v604_v20, %v561_v19  ;;  %v521_v23 = vpop.f32.mrf.mxu1 }
  0xb7   :  { %v816_v11 = vpack.c.bf16 %v521_v23, %v478_v21 }
  0xb8   :  { %865 = vst [vmem:[%s1566_s2 + $0x28] sm:$0xff] %v813_v22  ;;  %654 = vmatmul.bf16.gmra.mxu0 %v1338_v30  ;;  %697 = vmatmul.bf16.gmra.mxu1 %v1338_v30 }
  0xb9   :  { %868 = vst [vmem:[%s1566_s2 + $0x40] sm:$0xff] %v816_v11  ;;  %740 = vmatmul.bf16.gmra.mxu2 %v1338_v30 }
  0xba   :  { %783 = vmatmul.bf16.gmra.mxu3 %v1338_v30 }
  0xbc   :  { %v564_v24 = vpop.f32.mrf.mxu2 }
  0xbd   :  { %v607_v25 = vpop.f32.mrf.mxu3  ;;  %v480_v26 = vpop.f32.mrf.mxu0 }
  0xbe   :  { %v817_v27 = vpack.c.bf16 %v607_v25, %v564_v24  ;;  %v523_v28 = vpop.f32.mrf.mxu1 }
  0xbf   :  { %v820_v29 = vpack.c.bf16 %v523_v28, %v480_v26 }
  0xc0   :  { %869 = vst [vmem:[%s1566_s2 + $0x48] sm:$0xff] %v817_v27 }
  0xc1   :  { %872 = vst [vmem:[%s1566_s2 + $0x60] sm:$0xff] %v820_v29 }
  0xc4   :  { %v566_v31 = vpop.f32.mrf.mxu2 }
  0xc5   :  { %v609_v32 = vpop.f32.mrf.mxu3  ;;  %v483_v33 = vpop.f32.mrf.mxu0 }
  0xc6   :  { %v821_v34 = vpack.c.bf16 %v609_v32, %v566_v31  ;;  %v526_v36 = vpop.f32.mrf.mxu1 }
  0xc7   :  { %v824_v30 = vpack.c.bf16 %v526_v36, %v483_v33 }
  0xc8   :  { %873 = vst [vmem:[%s1566_s2 + $0x68] sm:$0xff] %v821_v34  ;;  %659 = vmatmul.bf16.gmra.mxu0 %v1347_v44  ;;  %702 = vmatmul.bf16.gmra.mxu1 %v1347_v44 }
  0xc9   :  { %876 = vst [vmem:[%s1566_s2 + $0x80] sm:$0xff] %v824_v30  ;;  %745 = vmatmul.bf16.gmra.mxu2 %v1347_v44 }
  0xca   :  { %788 = vmatmul.bf16.gmra.mxu3 %v1347_v44 }
  0xcc   :  { %v569_v37 = vpop.f32.mrf.mxu2 }
  0xcd   :  { %v612_v38 = vpop.f32.mrf.mxu3  ;;  %v485_v39 = vpop.f32.mrf.mxu0 }
  0xce   :  { %v825_v40 = vpack.c.bf16 %v612_v38, %v569_v37  ;;  %v528_v41 = vpop.f32.mrf.mxu1 }
  0xcf   :  { %v828_v42 = vpack.c.bf16 %v528_v41, %v485_v39 }
  0xd0   :  { %877 = vst [vmem:[%s1566_s2 + $0x88] sm:$0xff] %v825_v40 }
  0xd1   :  { %880 = vst [vmem:[%s1566_s2 + $0xa0] sm:$0xff] %v828_v42 }
  0xd4   :  { %v571_v43 = vpop.f32.mrf.mxu2 }
  0xd5   :  { %v614_v45 = vpop.f32.mrf.mxu3  ;;  %v488_v46 = vpop.f32.mrf.mxu0 }
  0xd6   :  { %v829_v47 = vpack.c.bf16 %v614_v45, %v571_v43  ;;  %v531_v48 = vpop.f32.mrf.mxu1 }
  0xd7   :  { %v832_v44 = vpack.c.bf16 %v531_v48, %v488_v46 }
  0xd8   :  { %881 = vst [vmem:[%s1566_s2 + $0xa8] sm:$0xff] %v829_v47  ;;  %664 = vmatmul.bf16.gmra.mxu0 %v1356_v57  ;;  %707 = vmatmul.bf16.gmra.mxu1 %v1356_v57 }
  0xd9   :  { %884 = vst [vmem:[%s1566_s2 + $0xc0] sm:$0xff] %v832_v44  ;;  %750 = vmatmul.bf16.gmra.mxu2 %v1356_v57 }
  0xda   :  { %793 = vmatmul.bf16.gmra.mxu3 %v1356_v57 }
  0xdc   :  { %v574_v49 = vpop.f32.mrf.mxu2 }
  0xdd   :  { %v617_v50 = vpop.f32.mrf.mxu3  ;;  %v490_v51 = vpop.f32.mrf.mxu0 }
  0xde   :  { %v833_v52 = vpack.c.bf16 %v617_v50, %v574_v49  ;;  %v533_v53 = vpop.f32.mrf.mxu1 }
  0xdf   :  { %v836_v54 = vpack.c.bf16 %v533_v53, %v490_v51 }
  0xe0   :  { %885 = vst [vmem:[%s1566_s2 + $0xc8] sm:$0xff] %v833_v52 }
  0xe1   :  { %888 = vst [vmem:[%s1566_s2 + $0xe0] sm:$0xff] %v836_v54 }
  0xe4   :  { %v576_v55 = vpop.f32.mrf.mxu2 }
  0xe5   :  { %v619_v56 = vpop.f32.mrf.mxu3  ;;  %v493_v58 = vpop.f32.mrf.mxu0 }
  0xe6   :  { %v837_v59 = vpack.c.bf16 %v619_v56, %v576_v55  ;;  %v536_v60 = vpop.f32.mrf.mxu1 }
  0xe7   :  { %v840_v57 = vpack.c.bf16 %v536_v60, %v493_v58 }
  0xe8   :  { %889 = vst [vmem:[%s1566_s2 + $0xe8] sm:$0xff] %v837_v59  ;;  %669 = vmatmul.bf16.gmra.mxu0 %v1365_v6  ;;  %712 = vmatmul.bf16.gmra.mxu1 %v1365_v6 }
  0xe9   :  { %892 = vst [vmem:[%s1566_s2 + $0x100] sm:$0xff] %v840_v57  ;;  %755 = vmatmul.bf16.gmra.mxu2 %v1365_v6 }
  0xea   :  { %798 = vmatmul.bf16.gmra.mxu3 %v1365_v6 }
  0xec   :  { %v579_v61 = vpop.f32.mrf.mxu2 }
  0xed   :  { %v622_v62 = vpop.f32.mrf.mxu3  ;;  %v495_v63 = vpop.f32.mrf.mxu0 }
  0xee   :  { %v841_v0 = vpack.c.bf16 %v622_v62, %v579_v61  ;;  %v538_v1 = vpop.f32.mrf.mxu1 }
  0xef   :  { %v844_v2 = vpack.c.bf16 %v538_v1, %v495_v63 }
  0xf0   :  { %893 = vst [vmem:[%s1566_s2 + $0x108] sm:$0xff] %v841_v0 }
  0xf1   :  { %896 = vst [vmem:[%s1566_s2 + $0x120] sm:$0xff] %v844_v2 }
  0xf4   :  { %v581_v3 = vpop.f32.mrf.mxu2 }
  0xf5   :  { %v624_v4 = vpop.f32.mrf.mxu3  ;;  %v498_v5 = vpop.f32.mrf.mxu0 }
  0xf6   :  { %v845_v7 = vpack.c.bf16 %v624_v4, %v581_v3  ;;  %v541_v8 = vpop.f32.mrf.mxu1 }
  0xf7   :  { %v848_v6 = vpack.c.bf16 %v541_v8, %v498_v5 }
  0xf8   :  { %897 = vst [vmem:[%s1566_s2 + $0x128] sm:$0xff] %v845_v7  ;;  %674 = vmatmul.bf16.gmra.mxu0 %v1374_v9  ;;  %717 = vmatmul.bf16.gmra.mxu1 %v1374_v9 }
  0xf9   :  { %900 = vst [vmem:[%s1566_s2 + $0x140] sm:$0xff] %v848_v6  ;;  %760 = vmatmul.bf16.gmra.mxu2 %v1374_v9 }
  0xfa   :  { %803 = vmatmul.bf16.gmra.mxu3 %v1374_v9 }
  0xfc   :  { %v584_v10 = vpop.f32.mrf.mxu2 }
  0xfd   :  { %v627_v12 = vpop.f32.mrf.mxu3  ;;  %v500_v13 = vpop.f32.mrf.mxu0 }
  0xfe   :  { %v849_v14 = vpack.c.bf16 %v627_v12, %v584_v10  ;;  %v543_v15 = vpop.f32.mrf.mxu1 }
  0xff   :  { %v852_v16 = vpack.c.bf16 %v543_v15, %v500_v13 }
 0x100   :  { %901 = vst [vmem:[%s1566_s2 + $0x148] sm:$0xff] %v849_v14 }
 0x101   :  { %904 = vst [vmem:[%s1566_s2 + $0x160] sm:$0xff] %v852_v16 }
 0x104   :  { %v586_v17 = vpop.f32.mrf.mxu2 }
 0x105   :  { %v629_v35 = vpop.f32.mrf.mxu3  ;;  %v503_v18 = vpop.f32.mrf.mxu0 }
 0x106   :  { %v853_v19 = vpack.c.bf16 %v629_v35, %v586_v17  ;;  %v546_v20 = vpop.f32.mrf.mxu1 }
 0x107   :  { %v856_v9 = vpack.c.bf16 %v546_v20, %v503_v18 }
 0x108   :  { %905 = vst [vmem:[%s1566_s2 + $0x168] sm:$0xff] %v853_v19 }
 0x109   :  { %908 = vst [vmem:[%s1566_s2 + $0x180] sm:$0x11] %v856_v9 }
 0x10c   :  { %v589_v21 = vpop.f32.mrf.mxu2 }
 0x10d   :  { %v632_v22 = vpop.f32.mrf.mxu3  ;;  %v505_v23 = vpop.f32.mrf.mxu0 }
 0x10e   :  { %v857_v11 = vpack.c.bf16 %v632_v22, %v589_v21  ;;  %v548_v24 = vpop.f32.mrf.mxu1 }
 0x110   :  { %909 = vst [vmem:[%s1566_s2 + $0x188] sm:$0x11] %v857_v11 }
 0x114   :  { %v591_v25 = vpop.f32.mrf.mxu2 }
 0x115   :  { %v634_v26 = vpop.f32.mrf.mxu3  ;;  %v645_v27 = vpop.f32.mrf.mxu0 }
 0x116   :  { %v688_v28 = vpop.f32.mrf.mxu1 }
 0x117   :  { %v810_v29 = vpack.c.bf16 %v688_v28, %v645_v27 }
 0x119   :  { %862 = vst [vmem:[%s1566_s2 + $0x10] sm:$0xff] %v810_v29 }
 0x11c   :  { %v731_v31 = vpop.f32.mrf.mxu2 }
 0x11d   :  { %v774_v32 = vpop.f32.mrf.mxu3  ;;  %v647_v33 = vpop.f32.mrf.mxu0 }
 0x11e   :  { %v811_v34 = vpack.c.bf16 %v774_v32, %v731_v31  ;;  %v690_v36 = vpop.f32.mrf.mxu1 }
 0x11f   :  { %v814_v30 = vpack.c.bf16 %v690_v36, %v647_v33 }
 0x120   :  { %863 = vst [vmem:[%s1566_s2 + $0x18] sm:$0xff] %v811_v34 }
 0x121   :  { %866 = vst [vmem:[%s1566_s2 + $0x30] sm:$0xff] %v814_v30 }
 0x124   :  { %v733_v37 = vpop.f32.mrf.mxu2 }
 0x125   :  { %v776_v38 = vpop.f32.mrf.mxu3  ;;  %v650_v39 = vpop.f32.mrf.mxu0 }
 0x126   :  { %v815_v40 = vpack.c.bf16 %v776_v38, %v733_v37  ;;  %v693_v41 = vpop.f32.mrf.mxu1 }
 0x127   :  { %v818_v42 = vpack.c.bf16 %v693_v41, %v650_v39 }
 0x128   :  { %867 = vst [vmem:[%s1566_s2 + $0x38] sm:$0xff] %v815_v40 }
 0x129   :  { %870 = vst [vmem:[%s1566_s2 + $0x50] sm:$0xff] %v818_v42 }
 0x12c   :  { %v736_v43 = vpop.f32.mrf.mxu2 }
 0x12d   :  { %v779_v45 = vpop.f32.mrf.mxu3  ;;  %v652_v46 = vpop.f32.mrf.mxu0 }
 0x12e   :  { %v819_v47 = vpack.c.bf16 %v779_v45, %v736_v43  ;;  %v695_v48 = vpop.f32.mrf.mxu1 }
 0x12f   :  { %v822_v44 = vpack.c.bf16 %v695_v48, %v652_v46 }
 0x130   :  { %871 = vst [vmem:[%s1566_s2 + $0x58] sm:$0xff] %v819_v47 }
 0x131   :  { %874 = vst [vmem:[%s1566_s2 + $0x70] sm:$0xff] %v822_v44 }
 0x134   :  { %v738_v49 = vpop.f32.mrf.mxu2 }
 0x135   :  { %v781_v50 = vpop.f32.mrf.mxu3  ;;  %v655_v51 = vpop.f32.mrf.mxu0 }
 0x136   :  { %v823_v52 = vpack.c.bf16 %v781_v50, %v738_v49  ;;  %v698_v53 = vpop.f32.mrf.mxu1 }
 0x137   :  { %v826_v54 = vpack.c.bf16 %v698_v53, %v655_v51 }
 0x138   :  { %875 = vst [vmem:[%s1566_s2 + $0x78] sm:$0xff] %v823_v52 }
 0x139   :  { %878 = vst [vmem:[%s1566_s2 + $0x90] sm:$0xff] %v826_v54 }
 0x13c   :  { %v741_v55 = vpop.f32.mrf.mxu2 }
 0x13d   :  { %v784_v56 = vpop.f32.mrf.mxu3  ;;  %v657_v58 = vpop.f32.mrf.mxu0 }
 0x13e   :  { %v827_v59 = vpack.c.bf16 %v784_v56, %v741_v55  ;;  %v700_v60 = vpop.f32.mrf.mxu1 }
 0x13f   :  { %v830_v57 = vpack.c.bf16 %v700_v60, %v657_v58 }
 0x140   :  { %879 = vst [vmem:[%s1566_s2 + $0x98] sm:$0xff] %v827_v59 }
 0x141   :  { %882 = vst [vmem:[%s1566_s2 + $0xb0] sm:$0xff] %v830_v57 }
 0x144   :  { %v743_v61 = vpop.f32.mrf.mxu2 }
 0x145   :  { %v786_v62 = vpop.f32.mrf.mxu3  ;;  %v660_v63 = vpop.f32.mrf.mxu0 }
 0x146   :  { %v831_v0 = vpack.c.bf16 %v786_v62, %v743_v61  ;;  %v703_v1 = vpop.f32.mrf.mxu1 }
 0x147   :  { %v834_v2 = vpack.c.bf16 %v703_v1, %v660_v63 }
 0x148   :  { %883 = vst [vmem:[%s1566_s2 + $0xb8] sm:$0xff] %v831_v0 }
 0x149   :  { %886 = vst [vmem:[%s1566_s2 + $0xd0] sm:$0xff] %v834_v2 }
 0x14c   :  { %v746_v3 = vpop.f32.mrf.mxu2 }
 0x14d   :  { %v789_v4 = vpop.f32.mrf.mxu3  ;;  %v662_v5 = vpop.f32.mrf.mxu0 }
 0x14e   :  { %v835_v7 = vpack.c.bf16 %v789_v4, %v746_v3  ;;  %v705_v8 = vpop.f32.mrf.mxu1 }
 0x14f   :  { %v838_v6 = vpack.c.bf16 %v705_v8, %v662_v5 }
 0x150   :  { %887 = vst [vmem:[%s1566_s2 + $0xd8] sm:$0xff] %v835_v7 }
 0x151   :  { %890 = vst [vmem:[%s1566_s2 + $0xf0] sm:$0xff] %v838_v6 }
 0x154   :  { %v748_v10 = vpop.f32.mrf.mxu2 }
 0x155   :  { %v791_v12 = vpop.f32.mrf.mxu3  ;;  %v665_v13 = vpop.f32.mrf.mxu0 }
 0x156   :  { %v839_v14 = vpack.c.bf16 %v791_v12, %v748_v10  ;;  %v708_v15 = vpop.f32.mrf.mxu1 }
 0x157   :  { %v842_v16 = vpack.c.bf16 %v708_v15, %v665_v13 }
 0x158   :  { %891 = vst [vmem:[%s1566_s2 + $0xf8] sm:$0xff] %v839_v14 }
 0x159   :  { %894 = vst [vmem:[%s1566_s2 + $0x110] sm:$0xff] %v842_v16 }
 0x15c   :  { %v751_v17 = vpop.f32.mrf.mxu2 }
 0x15d   :  { %v794_v35 = vpop.f32.mrf.mxu3  ;;  %v667_v18 = vpop.f32.mrf.mxu0 }
 0x15e   :  { %v843_v19 = vpack.c.bf16 %v794_v35, %v751_v17  ;;  %v710_v20 = vpop.f32.mrf.mxu1 }
 0x15f   :  { %v846_v9 = vpack.c.bf16 %v710_v20, %v667_v18 }
 0x160   :  { %895 = vst [vmem:[%s1566_s2 + $0x118] sm:$0xff] %v843_v19 }
 0x161   :  { %898 = vst [vmem:[%s1566_s2 + $0x130] sm:$0xff] %v846_v9 }
 0x164   :  { %v753_v21 = vpop.f32.mrf.mxu2 }
 0x165   :  { %v796_v22 = vpop.f32.mrf.mxu3  ;;  %v670_v23 = vpop.f32.mrf.mxu0 }
 0x166   :  { %v847_v11 = vpack.c.bf16 %v796_v22, %v753_v21  ;;  %v713_v24 = vpop.f32.mrf.mxu1 }
 0x167   :  { %v850_v25 = vpack.c.bf16 %v713_v24, %v670_v23 }
 0x168   :  { %899 = vst [vmem:[%s1566_s2 + $0x138] sm:$0xff] %v847_v11 }
 0x169   :  { %902 = vst [vmem:[%s1566_s2 + $0x150] sm:$0xff] %v850_v25 }
 0x16c   :  { %v756_v26 = vpop.f32.mrf.mxu2 }
 0x16d   :  { %v799_v27 = vpop.f32.mrf.mxu3  ;;  %v672_v28 = vpop.f32.mrf.mxu0 }
 0x16e   :  { %v851_v29 = vpack.c.bf16 %v799_v27, %v756_v26  ;;  %v715_v31 = vpop.f32.mrf.mxu1 }
 0x16f   :  { %v854_v32 = vpack.c.bf16 %v715_v31, %v672_v28 }
 0x170   :  { %903 = vst [vmem:[%s1566_s2 + $0x158] sm:$0xff] %v851_v29 }
 0x171   :  { %906 = vst [vmem:[%s1566_s2 + $0x170] sm:$0xff] %v854_v32 }
 0x174   :  { %v758_v33 = vpop.f32.mrf.mxu2 }
 0x175   :  { %v801_v34 = vpop.f32.mrf.mxu3  ;;  %v675_v36 = vpop.f32.mrf.mxu0 }
 0x176   :  { %v855_v30 = vpack.c.bf16 %v801_v34, %v758_v33  ;;  %v718_v37 = vpop.f32.mrf.mxu1 }
 0x177   :  { %v858_v38 = vpack.c.bf16 %v718_v37, %v675_v36 }
 0x178   :  { %907 = vst [vmem:[%s1566_s2 + $0x178] sm:$0xff] %v855_v30 }
 0x179   :  { %910 = vst [vmem:[%s1566_s2 + $0x190] sm:$0x11] %v858_v38 }
 0x17c   :  { %v761_v39 = vpop.f32.mrf.mxu2 }
 0x17d   :  { %v804_v40 = vpop.f32.mrf.mxu3  ;;  %v677_v41 = vpop.f32.mrf.mxu0 }
 0x17e   :  { %v859_v42 = vpack.c.bf16 %v804_v40, %v761_v39  ;;  %v720_v43 = vpop.f32.mrf.mxu1 }
 0x180   :  { %911 = vst [vmem:[%s1566_s2 + $0x198] sm:$0x11] %v859_v42 }
 0x184   :  { %v763_v45 = vpop.f32.mrf.mxu2 }
 0x185   :  { %v806_v46 = vpop.f32.mrf.mxu3 }
 0x186   :  { %916 = vsyncpa [#allocation3], 1 }

// kernel: generator_forward.3
= control target key start
LH: loop header
LB: loop body
LE: loop exit
PB: predicated region body
PF: predicated region fallthrough
CT: control target
= control target key end

     0   :  { %12 = vsyncpa [#allocation4], 0  ;;  %s9460_s0 = inlined_call_operand.vmem [shape: bf16[2,128], index: 0, kind: input, shape index: {}]   ;;  %s9461_s1 = inlined_call_operand.hbm [shape: bf16[128,1024], index: 1, kind: input, shape index: {}]   ;;  %s9462_s2 = inlined_call_operand.vmem [shape: f32[1,1024], index: 2, kind: input, shape index: {}]   ;;  %s9463_s3 = inlined_call_operand.vmem [shape: f32[1,1024], index: 3, kind: input, shape index: {}]   ;;  %s9464_s4 = inlined_call_operand.hbm [shape: bf16[1024,6272], index: 4, kind: input, shape index: {}]   ;;  %s9465_s5 = inlined_call_operand.vmem [shape: f32[1,6272], index: 5, kind: input, shape index: {}]   ;;  %s9466_s6 = inlined_call_operand.vmem [shape: f32[1,6272], index: 6, kind: input, shape index: {}]   ;;  %s9467_s7 = inlined_call_operand.vmem [shape: bf16[2,6272], index: 7, kind: output, shape index: {}]  }
   0x1   :  { %13 = vsyncpa [#allocation6], 0 }
   0x2   :  { %15 = vsyncpa [#allocation6 + $0x1], 0  ;;  %s7997_s24 = smov 0   ;;  %s7999_s25 = smov 0  }
   0x3   :  { %s8001_s26 = smov 0   ;;  %s8003_s27 = smov 0  }
   0x4 LB: > { %s8016_s28 = sadd.s32 4294967295, %s7947_s27   ;;  %p125_p0 = scmp.ne.s32.totalorder %s7939_s25, %s7935_s24  ;;  %s7947_s27 = sphi %s8003_s27, %s9478_s27   ;;  %s7943_s26 = sphi %s8001_s26, %s9477_s26   ;;  %s7939_s25 = sphi %s7999_s25, %s9476_s25   ;;  %s7935_s24 = sphi %s7997_s24, %s9475_s24  }
   0x5   : > { %p126_p1 = scmp.eq.s32.totalorder %s8016_s28, 0  ;;  %p5160_p2 = scmp.ge.s32.totalorder %s7947_s27, 1 }
   0x6   : > { %p214_p3 = scmp.lt.s32.totalorder %s7947_s27, 8  ;;  %p5161_p4 = scmp.ne.s32.totalorder %s8016_s28, 0 }
   0x7   : > { %p8025_p5 = por %p126_p1, %p125_p0  ;;  %s228_s9 = sshll.u32 %s9461_s1, 4  ;;  %s229_s9 = int_to_ptr.hbm [resolvable:$true] %s228_s9 }
   0x8   : > { %p8032_p6 = pnand %p5160_p2, %p214_p3  ;;  %s7949_s11 = smov [#allocation3]  }
   0x9   : > { %s230_s12 = sshll.u32 %s7949_s11, 4  ;;  %s8041_s13 = sadd.s32 1, %s7947_s27   ;;  %s231_s12 = int_to_ptr.vmem [resolvable:$true] %s230_s12 }
   0xa   : > { %p7738_p7 = pneg %p8032_p6  ;;  %s7950_s14 = smov 512  }
   0xb   : > { %s7951_s15 = smov 32   ;;  %s109_s16 = ssub.s32 %s7947_s27, %s8041_s13 }
   0xc   : > { %p7739_p8 = pnand %p7738_p7, %p126_p1  ;;  %s112_s17 = sadd.s32 1, %s7943_s26 }
   0xd   : > { %p110_p9 = scmp.eq.s32.totalorder %s109_s16, 0  ;;  %p119_p10 = scmp.ne.s32.totalorder %s7943_s26, %s7939_s25 }
   0xe   : > { %7741 = dma.hbm_to_vmem [thread:$0]  (!%p7739_p8), %s229_s9, 8192, %s231_s12, [#allocation4], %s7950_s14, %s7950_s14, %s7951_s15  }
   0xf   : > { %p120_p11 = scmp.eq.s32.totalorder %s7947_s27, 0  ;;  %p7747_p12 = scmp.lt.s32.totalorder %s7947_s27, 7 }
  0x10   : > { %s8051_s18 = scalar_select %p110_p9, %s7943_s26, %s112_s17  }
  0x11   : > { %p121_p13 = por %p120_p11, %p119_p10  ;;  %s250_s19 = sand.u32 1, %s7943_s26  }
  0x12   : > { %s7730_s20 = smul.u32 3584, %s250_s19  ;;  %s251_s12 = scalar_lea.sflag [#allocation6], %s250_s19 }
  0x13   : > { %s7217_s21 = smul.u32 28, %s7947_s27  ;;  %p8055_p0 = pnand %p7747_p12, %p121_p13 }
  0x14   : > { %s254_s8 = scalar_lea.vmem [#allocation5], %s7730_s20  ;;  %s7886_s17 = scalar_lea.hbm %s9464_s4, 25088 }
  0x15   : > { %s259_s30 = scalar_lea.hbm %s9464_s4, %s7217_s21  ;;  %s262_s9 = sshll.u32 %s254_s8, 4  ;;  %s263_s9 = int_to_ptr.vmem [resolvable:$true] %s262_s9 }
  0x16   : > { %s260_s11 = sshll.u32 %s259_s30, 4  ;;  %p7883_p3 = pneg %p8055_p0  ;;  %s261_s11 = int_to_ptr.hbm [resolvable:$true] %s260_s11 }
  0x17   : > { %s7879_s14 = sshra.s32 %s261_s11, 4  ;;  %s7880_s14 = int_to_ptr.hbm [resolvable:$true] %s7879_s14 }
  0x18   : > { %s7881_s15 = scalar_lea.hbm %s7880_s14, 3584  ;;  %p7887_p9 = scmp.lt.s32.totalorder %s7880_s14, %s9464_s4 }
  0x19   : > { %p7882_p2 = scmp.ne.s32.totalorder %s7880_s14, %s7881_s15  ;;  %p7888_p10 = scmp.lt.s32.totalorder %s7886_s17, %s7881_s15 }
  0x1b   : > { %p7884_p7 = pnand %p7883_p3, %p7882_p2  ;;  %p7889_p11 = por %p7888_p10, %p7887_p9 }
  0x1d   : > { %p7885_p8 = pneg %p7884_p7 }
  0x1f   : > { %p7890_p12 = pnand %p7889_p11, %p7885_p8 }
  0x21   : > { %7893 = shalt.err (!%p7890_p12)
}
  0x22   : > { %s7952_s19 = smov 3136   ;;  %s7953_s20 = smov 448  }
  0x23   : > { %s7954_s24 = smov 28   ;;  %290 = sbr.rel (%p8032_p6) target bundleno = 984 (0x3d8), region = 48 }
  0x24   : > { %7745 = dma.hbm_to_vmem [thread:$0]  (!%p8055_p0), %s261_s11, 57344, %s263_s9, %s251_s12, %s7952_s19, %s7953_s20, %s7954_s24  }
  0x28   : > { %7926 = dma.done.wait (%p126_p1), [#allocation4], 8192  }
  0x29   : > { %7928 = vsyncadd (%p126_p1), [#allocation4], 4294959104  ;;  %s297_s30 = sand.u32 1, %s7939_s25  }
  0x2a   : > { %s7731_s8 = smul.u32 3584, %s297_s30  ;;  %s298_s14 = scalar_lea.sflag [#allocation6], %s297_s30 }
  0x2c   : > { %s8079_s15 = scalar_lea.vmem [#allocation5], %s7731_s8 }
  0x2d   : > { %7930 = dma.done.wait (%p8025_p5), %s298_s14, 57344  }
  0x2e   : > { %7932 = vsyncadd (%p8025_p5), %s298_s14, 4294909952  ;;  %s341_s10 = smul.u32 7, %s8016_s28 }
  0x30   : > { %p342_p6 = scmp.lt.s32.totalorder %s341_s10, 48  ;;  %359 = sbr.rel (%p5161_p4) target bundleno = 326 (0x146), region = 60 }
  0x32   : > { %s9480_s10 = smov (!%p342_p6, %s341_s10), 48 }
  0x33   : > { %s8092_s11 = scalar_lea.vmem %s9465_s5, %s9480_s10  ;;  %s8098_s16 = scalar_lea.vmem %s9466_s6, %s9480_s10 }
  0x34   : > { %s354_s23 = scalar_lea.vmem %s9467_s7, %s9480_s10 }
  0x35   : > { %v5393_v0 = vld [vmem:[#allocation3 + $0x1c0] sm:$0xf]  ;;  %v7274_v2 = vld [vmem:[#allocation3 + $0x1c4] sm:$0xf]  ;;  %v5401_v5 = vld [vmem:[#allocation3 + $0x1c8] sm:$0xf] }
  0x36   : > { %v7278_v1 = vld [vmem:[#allocation3 + $0x1dc] sm:$0xf0]  ;;  %v5395_v4 = vld [vmem:[#allocation3 + $0x1e0] sm:$0xf0]  ;;  %v7279_v6 = vld [vmem:[#allocation3 + $0x1e4] sm:$0xf0] }
  0x37   : > { %v5394_v3 = vor.u32 %v7278_v1, %v5393_v0  ;;  %v5398_v7 = vor.u32 %v7274_v2, %v5395_v4  ;;  %v5402_v8 = vor.u32 %v7279_v6, %v5401_v5  ;;  %v7275_v9 = vld [vmem:[#allocation3 + $0x1cc] sm:$0xf]  ;;  %v5361_v11 = vld [vmem:[#allocation3 + $0x180] sm:$0xf]  ;;  %v7266_v14 = vld [vmem:[#allocation3 + $0x184] sm:$0xf] }
  0x38   : > { %v5403_v10 = vld [vmem:[#allocation3 + $0x1e8] sm:$0xf0]  ;;  %v7270_v13 = vld [vmem:[#allocation3 + $0x19c] sm:$0xf0]  ;;  %v5363_v15 = vld [vmem:[#allocation3 + $0x1a0] sm:$0xf0] }
  0x39   : > { %745 = vmatpush.bf16.msra.mxu0 %v5394_v3  ;;  %v5406_v12 = vor.u32 %v7275_v9, %v5403_v10  ;;  %758 = vmatpush.bf16.msra.mxu1 %v5398_v7  ;;  %v5362_v16 = vor.u32 %v7270_v13, %v5361_v11  ;;  %v5366_v17 = vor.u32 %v7266_v14, %v5363_v15  ;;  %v5369_v18 = vld [vmem:[#allocation3 + $0x188] sm:$0xf]  ;;  %v7267_v20 = vld [vmem:[#allocation3 + $0x18c] sm:$0xf]  ;;  %v5329_v23 = vld [vmem:[#allocation3 + $0x140] sm:$0xf] }
  0x3a   : > { %771 = vmatpush.bf16.msra.mxu2 %v5402_v8  ;;  %v7271_v19 = vld [vmem:[#allocation3 + $0x1a4] sm:$0xf0]  ;;  %v5371_v22 = vld [vmem:[#allocation3 + $0x1a8] sm:$0xf0]  ;;  %v7262_v24 = vld [vmem:[#allocation3 + $0x15c] sm:$0xf0] }
  0x3b   : > { %784 = vmatpush.bf16.msra.mxu3 %v5406_v12  ;;  %v5370_v21 = vor.u32 %v7271_v19, %v5369_v18  ;;  %v5374_v25 = vor.u32 %v7267_v20, %v5371_v22  ;;  %v7258_v26 = vld [vmem:[#allocation3 + $0x144] sm:$0xf]  ;;  %v5337_v28 = vld [vmem:[#allocation3 + $0x148] sm:$0xf]  ;;  %v5330_v29 = vor.u32 %v7262_v24, %v5329_v23  ;;  %v7259_v31 = vld [vmem:[#allocation3 + $0x14c] sm:$0xf] }
  0x3c   : > { %v5331_v27 = vld [vmem:[#allocation3 + $0x160] sm:$0xf0]  ;;  %v7263_v30 = vld [vmem:[#allocation3 + $0x164] sm:$0xf0]  ;;  %v5339_v32 = vld [vmem:[#allocation3 + $0x168] sm:$0xf0] }
  0x3d   : > { %746 = vmatpush.bf16.msra.mxu0 %v5362_v16  ;;  %759 = vmatpush.bf16.msra.mxu1 %v5366_v17  ;;  %v5334_v33 = vor.u32 %v7258_v26, %v5331_v27  ;;  %v5338_v34 = vor.u32 %v7263_v30, %v5337_v28  ;;  %v5297_v35 = vld [vmem:[#allocation3 + $0x100] sm:$0xf]  ;;  %v7250_v37 = vld [vmem:[#allocation3 + $0x104] sm:$0xf]  ;;  %v5342_v38 = vor.u32 %v7259_v31, %v5339_v32  ;;  %v5305_v40 = vld [vmem:[#allocation3 + $0x108] sm:$0xf] }
  0x3e   : > { %772 = vmatpush.bf16.msra.mxu2 %v5370_v21  ;;  %v7254_v36 = vld [vmem:[#allocation3 + $0x11c] sm:$0xf0]  ;;  %v5299_v39 = vld [vmem:[#allocation3 + $0x120] sm:$0xf0]  ;;  %v7255_v41 = vld [vmem:[#allocation3 + $0x124] sm:$0xf0] }
  0x3f   : > { %785 = vmatpush.bf16.msra.mxu3 %v5374_v25  ;;  %v7251_v42 = vld [vmem:[#allocation3 + $0x10c] sm:$0xf]  ;;  %v5298_v44 = vor.u32 %v7254_v36, %v5297_v35  ;;  %v5302_v45 = vor.u32 %v7250_v37, %v5299_v39  ;;  %v5306_v46 = vor.u32 %v7255_v41, %v5305_v40  ;;  %v5265_v47 = vld [vmem:[#allocation3 + $0xc0] sm:$0xf]  ;;  %v7242_v49 = vld [vmem:[#allocation3 + $0xc4] sm:$0xf] }
  0x40   : > { %v5307_v43 = vld [vmem:[#allocation3 + $0x128] sm:$0xf0]  ;;  %v7246_v48 = vld [vmem:[#allocation3 + $0xdc] sm:$0xf0]  ;;  %v5267_v51 = vld [vmem:[#allocation3 + $0xe0] sm:$0xf0] }
  0x41   : > { %747 = vmatpush.bf16.msra.mxu0 %v5330_v29  ;;  %760 = vmatpush.bf16.msra.mxu1 %v5334_v33  ;;  %v5310_v50 = vor.u32 %v7251_v42, %v5307_v43  ;;  %v5273_v52 = vld [vmem:[#allocation3 + $0xc8] sm:$0xf]  ;;  %v7243_v54 = vld [vmem:[#allocation3 + $0xcc] sm:$0xf]  ;;  %v5266_v56 = vor.u32 %v7246_v48, %v5265_v47  ;;  %v5270_v57 = vor.u32 %v7242_v49, %v5267_v51  ;;  %v5233_v59 = vld [vmem:[#allocation3 + $0x80] sm:$0xf] }
  0x42   : > { %773 = vmatpush.bf16.msra.mxu2 %v5338_v34  ;;  %v7247_v53 = vld [vmem:[#allocation3 + $0xe4] sm:$0xf0]  ;;  %v5275_v55 = vld [vmem:[#allocation3 + $0xe8] sm:$0xf0]  ;;  %v7238_v60 = vld [vmem:[#allocation3 + $0x9c] sm:$0xf0] }
  0x43   : > { %786 = vmatpush.bf16.msra.mxu3 %v5342_v38  ;;  %v5274_v58 = vor.u32 %v7247_v53, %v5273_v52  ;;  %v7234_v61 = vld [vmem:[#allocation3 + $0x84] sm:$0xf]  ;;  %v5278_v62 = vor.u32 %v7243_v54, %v5275_v55  ;;  %v5241_v0 = vld [vmem:[#allocation3 + $0x88] sm:$0xf]  ;;  %v7235_v2 = vld [vmem:[#allocation3 + $0x8c] sm:$0xf]  ;;  %v5234_v4 = vor.u32 %v7238_v60, %v5233_v59 }
  0x44   : > { %v5235_v63 = vld [vmem:[#allocation3 + $0xa0] sm:$0xf0]  ;;  %v7239_v1 = vld [vmem:[#allocation3 + $0xa4] sm:$0xf0]  ;;  %v5243_v3 = vld [vmem:[#allocation3 + $0xa8] sm:$0xf0] }
  0x45   : > { %748 = vmatpush.bf16.msra.mxu0 %v5298_v44  ;;  %761 = vmatpush.bf16.msra.mxu1 %v5302_v45  ;;  %v5238_v5 = vor.u32 %v7234_v61, %v5235_v63  ;;  %v5242_v6 = vor.u32 %v7239_v1, %v5241_v0  ;;  %v5201_v7 = vld [vmem:[#allocation3 + $0x40] sm:$0xf]  ;;  %v7226_v9 = vld [vmem:[#allocation3 + $0x44] sm:$0xf]  ;;  %v5246_v10 = vor.u32 %v7235_v2, %v5243_v3  ;;  %v5209_v12 = vld [vmem:[#allocation3 + $0x48] sm:$0xf] }
  0x46   : > { %774 = vmatpush.bf16.msra.mxu2 %v5306_v46  ;;  %v7230_v8 = vld [vmem:[#allocation3 + $0x5c] sm:$0xf0]  ;;  %v5203_v11 = vld [vmem:[#allocation3 + $0x60] sm:$0xf0]  ;;  %v7231_v13 = vld [vmem:[#allocation3 + $0x64] sm:$0xf0] }
  0x47   : > { %787 = vmatpush.bf16.msra.mxu3 %v5310_v50  ;;  %v7227_v14 = vld [vmem:[#allocation3 + $0x4c] sm:$0xf]  ;;  %v5202_v16 = vor.u32 %v7230_v8, %v5201_v7  ;;  %v5169_v17 = vld [vmem:[#allocation3] sm:$0xf]  ;;  %v5206_v19 = vor.u32 %v7226_v9, %v5203_v11  ;;  %v5210_v20 = vor.u32 %v7231_v13, %v5209_v12  ;;  %v7218_v21 = vld [vmem:[#allocation3 + $0x4] sm:$0xf] }
  0x48   : > { %v5211_v15 = vld [vmem:[#allocation3 + $0x68] sm:$0xf0]  ;;  %v7222_v18 = vld [vmem:[#allocation3 + $0x1c] sm:$0xf0]  ;;  %v5171_v22 = vld [vmem:[#allocation3 + $0x20] sm:$0xf0] }
  0x49   : > { %749 = vmatpush.bf16.msra.mxu0 %v5266_v56  ;;  %762 = vmatpush.bf16.msra.mxu1 %v5270_v57  ;;  %v5177_v23 = vld [vmem:[#allocation3 + $0x8] sm:$0xf]  ;;  %v5214_v24 = vor.u32 %v7227_v14, %v5211_v15  ;;  %v7219_v26 = vld [vmem:[#allocation3 + $0xc] sm:$0xf]  ;;  %v5409_v28 = vld [vmem:[#allocation3 + $0x1d0] sm:$0xf]  ;;  %v5170_v31 = vor.u32 %v7222_v18, %v5169_v17  ;;  %v5174_v35 = vor.u32 %v7218_v21, %v5171_v22 }
  0x4a   : > { %775 = vmatpush.bf16.msra.mxu2 %v5274_v58  ;;  %v7223_v25 = vld [vmem:[#allocation3 + $0x24] sm:$0xf0]  ;;  %v5179_v27 = vld [vmem:[#allocation3 + $0x28] sm:$0xf0]  ;;  %v7280_v29 = vld [vmem:[#allocation3 + $0x1ec] sm:$0xf0] }
  0x4b   : > { %788 = vmatpush.bf16.msra.mxu3 %v5278_v62  ;;  %v7276_v30 = vld [vmem:[#allocation3 + $0x1d4] sm:$0xf]  ;;  %v5417_v33 = vld [vmem:[#allocation3 + $0x1d8] sm:$0xf]  ;;  %v5178_v36 = vor.u32 %v7223_v25, %v5177_v23  ;;  %v7277_v37 = vld [vmem:[#allocation3 + $0x1dc] sm:$0xf]  ;;  %v5182_v39 = vor.u32 %v7219_v26, %v5179_v27  ;;  %v5410_v40 = vor.u32 %v7280_v29, %v5409_v28 }
  0x4c   : > { %v5411_v32 = vld [vmem:[#allocation3 + $0x1f0] sm:$0xf0]  ;;  %v7281_v34 = vld [vmem:[#allocation3 + $0x1f4] sm:$0xf0]  ;;  %v5419_v38 = vld [vmem:[#allocation3 + $0x1f8] sm:$0xf0] }
  0x4d   : > { %750 = vmatpush.bf16.msra.mxu0 %v5234_v4  ;;  %763 = vmatpush.bf16.msra.mxu1 %v5238_v5  ;;  %v5414_v41 = vor.u32 %v7276_v30, %v5411_v32  ;;  %v5418_v42 = vor.u32 %v7281_v34, %v5417_v33  ;;  %v5377_v43 = vld [vmem:[#allocation3 + $0x190] sm:$0xf]  ;;  %v7268_v45 = vld [vmem:[#allocation3 + $0x194] sm:$0xf]  ;;  %v5422_v46 = vor.u32 %v7277_v37, %v5419_v38  ;;  %v5385_v48 = vld [vmem:[#allocation3 + $0x198] sm:$0xf] }
  0x4e   : > { %776 = vmatpush.bf16.msra.mxu2 %v5242_v6  ;;  %v7272_v44 = vld [vmem:[#allocation3 + $0x1ac] sm:$0xf0]  ;;  %v5379_v47 = vld [vmem:[#allocation3 + $0x1b0] sm:$0xf0]  ;;  %v7273_v49 = vld [vmem:[#allocation3 + $0x1b4] sm:$0xf0] }
  0x4f   : > { %789 = vmatpush.bf16.msra.mxu3 %v5246_v10  ;;  %v8109_v50 = vld [vmem:[%s9460_s0] sm:$0x1]  ;;  %v7269_v51 = vld [vmem:[#allocation3 + $0x19c] sm:$0xf]  ;;  %v5378_v53 = vor.u32 %v7272_v44, %v5377_v43  ;;  %v5382_v54 = vor.u32 %v7268_v45, %v5379_v47  ;;  %v5386_v55 = vor.u32 %v7273_v49, %v5385_v48  ;;  %v7260_v58 = vld [vmem:[#allocation3 + $0x154] sm:$0xf] }
  0x50   : > { %v5387_v52 = vld [vmem:[#allocation3 + $0x1b8] sm:$0xf0]  ;;  %v5345_v56 = vld [vmem:[#allocation3 + $0x150] sm:$0xf]  ;;  %v5347_v60 = vld [vmem:[#allocation3 + $0x170] sm:$0xf0] }
  0x51   : > { %751 = vmatpush.bf16.msra.mxu0 %v5202_v16  ;;  %764 = vmatpush.bf16.msra.mxu1 %v5206_v19  ;;  %v7264_v57 = vld [vmem:[#allocation3 + $0x16c] sm:$0xf0]  ;;  %v5390_v59 = vor.u32 %v7269_v51, %v5387_v52  ;;  %v5353_v61 = vld [vmem:[#allocation3 + $0x158] sm:$0xf]  ;;  %v7261_v63 = vld [vmem:[#allocation3 + $0x15c] sm:$0xf]  ;;  %v5350_v2 = vor.u32 %v7260_v58, %v5347_v60 }
  0x52   : > { %777 = vmatpush.bf16.msra.mxu2 %v5210_v20  ;;  %v7265_v62 = vld [vmem:[#allocation3 + $0x174] sm:$0xf0]  ;;  %v5355_v0 = vld [vmem:[#allocation3 + $0x178] sm:$0xf0]  ;;  %v5346_v1 = vor.u32 %v7264_v57, %v5345_v56  ;;  %v5313_v4 = vld [vmem:[#allocation3 + $0x110] sm:$0xf] }
  0x53   : > { %790 = vmatpush.bf16.msra.mxu3 %v5214_v24  ;;  %v5354_v3 = vor.u32 %v7265_v62, %v5353_v61  ;;  %v7256_v5 = vld [vmem:[#allocation3 + $0x12c] sm:$0xf0]  ;;  %v7252_v6 = vld [vmem:[#allocation3 + $0x114] sm:$0xf]  ;;  %v5358_v7 = vor.u32 %v7261_v63, %v5355_v0  ;;  %v5321_v9 = vld [vmem:[#allocation3 + $0x118] sm:$0xf] }
  0x54   : > { %v5315_v8 = vld [vmem:[#allocation3 + $0x130] sm:$0xf0]  ;;  %v7257_v10 = vld [vmem:[#allocation3 + $0x134] sm:$0xf0]  ;;  %v7253_v11 = vld [vmem:[#allocation3 + $0x11c] sm:$0xf]  ;;  %v5314_v13 = vor.u32 %v7256_v5, %v5313_v4 }
  0x55   : > { %752 = vmatpush.bf16.msra.mxu0 %v5170_v31  ;;  %765 = vmatpush.bf16.msra.mxu1 %v5174_v35  ;;  %v5323_v12 = vld [vmem:[#allocation3 + $0x138] sm:$0xf0]  ;;  %v5318_v14 = vor.u32 %v7252_v6, %v5315_v8  ;;  %v5322_v15 = vor.u32 %v7257_v10, %v5321_v9  ;;  %v5281_v16 = vld [vmem:[#allocation3 + $0xd0] sm:$0xf]  ;;  %v7244_v18 = vld [vmem:[#allocation3 + $0xd4] sm:$0xf] }
  0x56   : > { %778 = vmatpush.bf16.msra.mxu2 %v5178_v36  ;;  %v7248_v17 = vld [vmem:[#allocation3 + $0xec] sm:$0xf0]  ;;  %v5326_v19 = vor.u32 %v7253_v11, %v5323_v12  ;;  %v5283_v20 = vld [vmem:[#allocation3 + $0xf0] sm:$0xf0]  ;;  %v5289_v21 = vld [vmem:[#allocation3 + $0xd8] sm:$0xf] }
  0x57   : > { %791 = vmatpush.bf16.msra.mxu3 %v5182_v39  ;;  %v7249_v22 = vld [vmem:[#allocation3 + $0xf4] sm:$0xf0]  ;;  %v7245_v23 = vld [vmem:[#allocation3 + $0xdc] sm:$0xf]  ;;  %v5282_v25 = vor.u32 %v7248_v17, %v5281_v16  ;;  %v5286_v26 = vor.u32 %v7244_v18, %v5283_v20  ;;  %v5249_v28 = vld [vmem:[#allocation3 + $0x90] sm:$0xf] }
  0x58   : > { %753 = vmatmul.bf16.vlgmr.msra.gmra.mxu0 %v8109_v50  ;;  %766 = vmatmul.bf16.vlgmr.msra.gmra.mxu1 %v8109_v50  ;;  %v5291_v24 = vld [vmem:[#allocation3 + $0xf8] sm:$0xf0]  ;;  %v5290_v27 = vor.u32 %v7249_v22, %v5289_v21  ;;  %v7240_v29 = vld [vmem:[#allocation3 + $0xac] sm:$0xf0]  ;;  %v7236_v30 = vld [vmem:[#allocation3 + $0x94] sm:$0xf] }
  0x59   : > { %797 = vmatpush.bf16.msrb.mxu0 %v5410_v40  ;;  %810 = vmatpush.bf16.msrb.mxu1 %v5414_v41  ;;  %v5294_v31 = vor.u32 %v7245_v23, %v5291_v24  ;;  %v5251_v32 = vld [vmem:[#allocation3 + $0xb0] sm:$0xf0]  ;;  %v5257_v33 = vld [vmem:[#allocation3 + $0x98] sm:$0xf]  ;;  %v7237_v35 = vld [vmem:[#allocation3 + $0x9c] sm:$0xf]  ;;  %v5250_v37 = vor.u32 %v7240_v29, %v5249_v28 }
  0x5a   : > { %823 = vmatpush.bf16.msrb.mxu2 %v5418_v42  ;;  %792 = vmatmul.bf16.vlgmr.msra.gmra.mxu3 %v8109_v50  ;;  %v7241_v34 = vld [vmem:[#allocation3 + $0xb4] sm:$0xf0]  ;;  %v5259_v36 = vld [vmem:[#allocation3 + $0xb8] sm:$0xf0]  ;;  %v5254_v38 = vor.u32 %v7236_v30, %v5251_v32  ;;  %v5217_v40 = vld [vmem:[#allocation3 + $0x50] sm:$0xf] }
  0x5b   : > { %836 = vmatpush.bf16.msrb.mxu3 %v5422_v46  ;;  %779 = vmatmul.bf16.vlgmr.msra.gmra.mxu2 %v8109_v50  ;;  %v5258_v39 = vor.u32 %v7241_v34, %v5257_v33  ;;  %v7232_v41 = vld [vmem:[#allocation3 + $0x6c] sm:$0xf0]  ;;  %v7228_v42 = vld [vmem:[#allocation3 + $0x54] sm:$0xf]  ;;  %v5262_v43 = vor.u32 %v7237_v35, %v5259_v36  ;;  %v5225_v45 = vld [vmem:[#allocation3 + $0x58] sm:$0xf] }
  0x5c   : > { %v5219_v44 = vld [vmem:[#allocation3 + $0x70] sm:$0xf0]  ;;  %v7233_v46 = vld [vmem:[#allocation3 + $0x74] sm:$0xf0]  ;;  %v7229_v47 = vld [vmem:[#allocation3 + $0x5c] sm:$0xf]  ;;  %v5218_v49 = vor.u32 %v7232_v41, %v5217_v40 }
  0x5d   : > { %798 = vmatpush.bf16.msrb.mxu0 %v5378_v53  ;;  %811 = vmatpush.bf16.msrb.mxu1 %v5382_v54  ;;  %v5227_v48 = vld [vmem:[#allocation3 + $0x78] sm:$0xf0]  ;;  %v5222_v51 = vor.u32 %v7228_v42, %v5219_v44  ;;  %v5226_v52 = vor.u32 %v7233_v46, %v5225_v45  ;;  %v5185_v53 = vld [vmem:[#allocation3 + $0x10] sm:$0xf]  ;;  %v5187_v57 = vld [vmem:[#allocation3 + $0x30] sm:$0xf0] }
  0x5e   : > { %824 = vmatpush.bf16.msrb.mxu2 %v5386_v55  ;;  %v7224_v54 = vld [vmem:[#allocation3 + $0x2c] sm:$0xf0]  ;;  %v7220_v55 = vld [vmem:[#allocation3 + $0x14] sm:$0xf]  ;;  %v5230_v56 = vor.u32 %v7229_v47, %v5227_v48  ;;  %v5193_v58 = vld [vmem:[#allocation3 + $0x18] sm:$0xf] }
  0x5f   : > { %837 = vmatpush.bf16.msrb.mxu3 %v5390_v59  ;;  %v7225_v59 = vld [vmem:[#allocation3 + $0x34] sm:$0xf0]  ;;  %v7221_v60 = vld [vmem:[#allocation3 + $0x1c] sm:$0xf]  ;;  %v5186_v62 = vor.u32 %v7224_v54, %v5185_v53  ;;  %v5190_v63 = vor.u32 %v7220_v55, %v5187_v57  ;;  %vm849_vm0 = vcmask 1041408  }
  0x60   : > { %v5195_v61 = vld [vmem:[#allocation3 + $0x38] sm:$0xf0]  ;;  %v5194_v0 = vor.u32 %v7225_v59, %v5193_v58 }
  0x61   : > { %799 = vmatpush.bf16.msrb.mxu0 %v5346_v1  ;;  %812 = vmatpush.bf16.msrb.mxu1 %v5350_v2  ;;  %v5198_v1 = vor.u32 %v7221_v60, %v5195_v61  ;;  %v7955_v2 = vmov 2.0  }
  0x62   : > { %825 = vmatpush.bf16.msrb.mxu2 %v5354_v3  ;;  %7789 = vrcp.f32 %v7955_v2 }
  0x63   : > { %838 = vmatpush.bf16.msrb.mxu3 %v5358_v7 }
  0x65   : > { %800 = vmatpush.bf16.msrb.mxu0 %v5314_v13  ;;  %813 = vmatpush.bf16.msrb.mxu1 %v5318_v14 }
  0x66   : > { %826 = vmatpush.bf16.msrb.mxu2 %v5322_v15 }
  0x67   : > { %839 = vmatpush.bf16.msrb.mxu3 %v5326_v19 }
  0x68   : > { %v7790_v3 = vpop.eup %7789 }
  0x69   : > { %801 = vmatpush.bf16.msrb.mxu0 %v5282_v25  ;;  %814 = vmatpush.bf16.msrb.mxu1 %v5286_v26  ;;  %v907_v4 = vmul.f32 2.0, %v7790_v3  ;;  %vm911_vm1 = vweird.f32 %v7790_v3 }
  0x6a   : > { %827 = vmatpush.bf16.msrb.mxu2 %v5290_v27 }
  0x6b   : > { %840 = vmatpush.bf16.msrb.mxu3 %v5294_v31  ;;  %v908_v5 = vsub.f32 1.0, %v907_v4 }
  0x6d   : > { %802 = vmatpush.bf16.msrb.mxu0 %v5250_v37  ;;  %815 = vmatpush.bf16.msrb.mxu1 %v5254_v38  ;;  %v909_v11 = vmul.f32 %v7790_v3, %v908_v5 }
  0x6e   : > { %828 = vmatpush.bf16.msrb.mxu2 %v5258_v39 }
  0x6f   : > { %841 = vmatpush.bf16.msrb.mxu3 %v5262_v43  ;;  %v910_v16 = vadd.f32 %v7790_v3, %v909_v11 }
  0x71   : > { %803 = vmatpush.bf16.msrb.mxu0 %v5218_v49  ;;  %816 = vmatpush.bf16.msrb.mxu1 %v5222_v51  ;;  %v8123_v28 = vsel %vm911_vm1, %v7790_v3, %v910_v16 }
  0x72   : > { %829 = vmatpush.bf16.msrb.mxu2 %v5226_v52 }
  0x73   : > { %842 = vmatpush.bf16.msrb.mxu3 %v5230_v56 }
  0x75   : > { %804 = vmatpush.bf16.msrb.mxu0 %v5186_v62  ;;  %817 = vmatpush.bf16.msrb.mxu1 %v5190_v63 }
  0x76   : > { %830 = vmatpush.bf16.msrb.mxu2 %v5194_v0 }
  0x77   : > { %843 = vmatpush.bf16.msrb.mxu3 %v5198_v1 }
  0x78   : > { %805 = vmatmul.bf16.vlgmr.msrb.gmra.mxu0 %v8109_v50  ;;  %818 = vmatmul.bf16.vlgmr.msrb.gmra.mxu1 %v8109_v50 }
  0x79   : > { %831 = vmatmul.bf16.vlgmr.msrb.gmra.mxu2 %v8109_v50 }
  0x7a   : > { %844 = vmatmul.bf16.vlgmr.msrb.gmra.mxu3 %v8109_v50 }
  0xd5   : > { %v754_v6 = vpop.f32.mrf.mxu0  ;;  %v767_v8 = vpop.f32.mrf.mxu1 }
  0xd6   : > { %v850_v7 = vsel %vm849_vm0, %v754_v6, 0.0  ;;  %v857_v10 = vsel %vm849_vm0, %v767_v8, 0.0 }
  0xd7   : > { %v851_v9 = vrot.slane %v850_v7, 4  ;;  %v858_v12 = vrot.slane %v857_v10, 4 }
  0xd9   : > { %v852_v13 = vadd.f32 %v851_v9, %v850_v7  ;;  %v859_v14 = vadd.f32 %v858_v12, %v857_v10 }
  0xdb   : > { %v853_v15 = vrot.slane %v852_v13, 2  ;;  %v860_v50 = vrot.slane %v859_v14, 2 }
  0xdd   : > { %v854_v18 = vadd.f32 %v853_v15, %v852_v13  ;;  %v793_v20 = vpop.f32.mrf.mxu3  ;;  %v756_v21 = vpop.f32.mrf.mxu0  ;;  %v861_v22 = vadd.f32 %v860_v50, %v859_v14 }
  0xde   : > { %v780_v17 = vpop.f32.mrf.mxu2  ;;  %v871_v24 = vsel %vm849_vm0, %v793_v20, 0.0  ;;  %v769_v25 = vpop.f32.mrf.mxu1 }
  0xdf   : > { %v864_v19 = vsel %vm849_vm0, %v780_v17, 0.0  ;;  %v855_v26 = vrot.slane %v854_v18, 1  ;;  %v872_v27 = vrot.slane %v871_v24, 4  ;;  %v862_v29 = vrot.slane %v861_v22, 1 }
  0xe0   : > { %v865_v23 = vrot.slane %v864_v19, 4 }
  0xe1   : > { %v856_v31 = vadd.f32 %v855_v26, %v854_v18  ;;  %v873_v32 = vadd.f32 %v872_v27, %v871_v24  ;;  %v863_v33 = vadd.f32 %v862_v29, %v861_v22 }
  0xe2   : > { %v866_v30 = vadd.f32 %v865_v23, %v864_v19 }
  0xe3   : > { %v913_v35 = vmul.f32 %v8123_v28, %v856_v31  ;;  %v874_v36 = vrot.slane %v873_v32, 2  ;;  %v914_v37 = vmul.f32 %v8123_v28, %v863_v33 }
  0xe4   : > { %v867_v34 = vrot.slane %v866_v30, 2 }
  0xe5   : > { %v8127_v40 = vsub.f32 %v754_v6, %v913_v35  ;;  %v875_v41 = vadd.f32 %v874_v36, %v873_v32  ;;  %v795_v42 = vpop.f32.mrf.mxu3  ;;  %v8129_v43 = vsub.f32 %v767_v8, %v914_v37 }
  0xe6   : > { %v868_v38 = vadd.f32 %v867_v34, %v866_v30  ;;  %v782_v39 = vpop.f32.mrf.mxu2 }
  0xe7   : > { %v929_v45 = vmul.f32 %v8127_v40, %v8127_v40  ;;  %v876_v46 = vrot.slane %v875_v41, 1  ;;  %v930_v47 = vmul.f32 %v8129_v43, %v8129_v43 }
  0xe8   : > { %v869_v44 = vrot.slane %v868_v38, 1 }
  0xe9   : > { %v937_v49 = vsel %vm849_vm0, %v929_v45, 0.0  ;;  %v877_v51 = vadd.f32 %v876_v46, %v875_v41  ;;  %v944_v53 = vsel %vm849_vm0, %v930_v47, 0.0 }
  0xea   : > { %v870_v48 = vadd.f32 %v869_v44, %v868_v38  ;;  %v938_v52 = vrot.slane %v937_v49, 4  ;;  %v945_v55 = vrot.slane %v944_v53, 4 }
  0xeb   : > { %v916_v56 = vmul.f32 %v8123_v28, %v877_v51 }
  0xec   : > { %v915_v54 = vmul.f32 %v8123_v28, %v870_v48  ;;  %v939_v57 = vadd.f32 %v938_v52, %v937_v49  ;;  %v946_v59 = vadd.f32 %v945_v55, %v944_v53 }
  0xed   : > { %v8141_v60 = vsub.f32 %v793_v20, %v916_v56 }
  0xee   : > { %v8139_v58 = vsub.f32 %v780_v17, %v915_v54  ;;  %v940_v61 = vrot.slane %v939_v57, 2  ;;  %v947_v63 = vrot.slane %v946_v59, 2 }
  0xef   : > { %v932_v0 = vmul.f32 %v8141_v60, %v8141_v60 }
  0xf0   : > { %v931_v62 = vmul.f32 %v8139_v58, %v8139_v58  ;;  %v941_v1 = vadd.f32 %v940_v61, %v939_v57  ;;  %v948_v3 = vadd.f32 %v947_v63, %v946_v59 }
  0xf1   : > { %v958_v5 = vsel %vm849_vm0, %v932_v0, 0.0 }
  0xf2   : > { %v951_v2 = vsel %vm849_vm0, %v931_v62, 0.0  ;;  %v942_v6 = vrot.slane %v941_v1, 1  ;;  %v959_v7 = vrot.slane %v958_v5, 4  ;;  %v949_v9 = vrot.slane %v948_v3, 1 }
  0xf3   : > { %v952_v4 = vrot.slane %v951_v2, 4 }
  0xf4   : > { %v943_v12 = vadd.f32 %v942_v6, %v941_v1  ;;  %v950_v14 = vadd.f32 %v949_v9, %v948_v3  ;;  %v960_v17 = vadd.f32 %v959_v7, %v958_v5  ;;  %v8176_v3 = vld [vmem:[%s9462_s2] sm:$0xff] }
  0xf5   : > { %v806_v8 = vpop.f32.mrf.mxu0  ;;  %v8150_v11 = vpop.f32.mrf.mxu1  ;;  %v953_v13 = vadd.f32 %v952_v4, %v951_v2 }
  0xf6   : > { %v878_v10 = vsel %vm849_vm0, %v806_v8, 0.0  ;;  %v885_v16 = vsel %vm849_vm0, %v8150_v11, 0.0  ;;  %v993_v50 = vmul.f32 %v943_v12, %v8123_v28  ;;  %v994_v18 = vmul.f32 %v950_v14, %v8123_v28 }
  0xf7   : > { %v879_v15 = vrot.slane %v878_v10, 4  ;;  %v954_v21 = vrot.slane %v953_v13, 2  ;;  %v886_v22 = vrot.slane %v885_v16, 4  ;;  %v961_v26 = vrot.slane %v960_v17, 2 }
  0xf8   : > { %v8156_v20 = vadd.f32 1e-05, %v993_v50  ;;  %v8158_v23 = vadd.f32 1e-05, %v994_v18 }
  0xf9   : > { %v880_v19 = vadd.f32 %v879_v15, %v878_v10  ;;  %v887_v27 = vadd.f32 %v886_v22, %v885_v16  ;;  %v955_v33 = vadd.f32 %v954_v21, %v953_v13  ;;  %v962_v41 = vadd.f32 %v961_v26, %v960_v17  ;;  %v8191_v17 = vld [vmem:[%s9463_s3] sm:$0xff] }
  0xfa   : > { %7791 = vrsqrt.f32 %v8156_v20  ;;  %vm1015_vm3 = vweird.f32 %v8156_v20  ;;  %vm1025_vm5 = vweird.f32 %v8158_v23  ;;  %v1100_v26 = vperm.slane %v8176_v3, 1 }
  0xfb   : > { %v881_v24 = vrot.slane %v880_v19, 2  ;;  %7793 = vrsqrt.f32 %v8158_v23  ;;  %v888_v34 = vrot.slane %v887_v27, 2  ;;  %v956_v47 = vrot.slane %v955_v33, 1 }
  0xfc   : > { %v8160_v25 = vpop.f32.mrf.mxu2  ;;  %v963_v55 = vrot.slane %v962_v41, 1 }
  0xfd   : > { %v8163_v29 = vpop.f32.mrf.mxu3  ;;  %v808_v30 = vpop.f32.mrf.mxu0  ;;  %v882_v31 = vadd.f32 %v881_v24, %v880_v19  ;;  %v892_v35 = vsel %vm849_vm0, %v8160_v25, 0.0  ;;  %v889_v42 = vadd.f32 %v888_v34, %v887_v27  ;;  %v957_v0 = vadd.f32 %v956_v47, %v955_v33 }
  0xfe   : > { %v821_v32 = vpop.f32.mrf.mxu1  ;;  %v899_v36 = vsel %vm849_vm0, %v8163_v29, 0.0  ;;  %v893_v38 = vrot.slane %v892_v35, 4  ;;  %v964_v9 = vadd.f32 %v963_v55, %v962_v41 }
  0xff   : > { %v883_v37 = vrot.slane %v882_v31, 1  ;;  %v900_v39 = vrot.slane %v899_v36, 4  ;;  %v890_v48 = vrot.slane %v889_v42, 1 }
 0x100   : > { %v894_v45 = vadd.f32 %v893_v38, %v892_v35  ;;  %v7792_v46 = vpop.eup %7791  ;;  %v996_v27 = vmul.f32 %v964_v9, %v8123_v28  ;;  %v1126_v35 = vperm.slane %v8191_v17, 1 }
 0x101   : > { %v884_v44 = vadd.f32 %v883_v37, %v882_v31  ;;  %v901_v49 = vadd.f32 %v900_v39, %v899_v36  ;;  %v7794_v51 = vpop.eup %7793  ;;  %v1010_v52 = vmul.f32 %v7792_v46, %v8156_v20  ;;  %v891_v61 = vadd.f32 %v890_v48, %v889_v42 }
 0x102   : > { %v1020_v54 = vmul.f32 %v7794_v51, %v8158_v23  ;;  %v895_v62 = vrot.slane %v894_v45, 2  ;;  %vm1016_vm2 = vweird.f32 %v7792_v46  ;;  %vm1026_vm4 = vweird.f32 %v7794_v51 }
 0x103   : > { %v1011_v57 = vmul.f32 %v7792_v46, %v1010_v52  ;;  %v917_v59 = vmul.f32 %v8123_v28, %v884_v44  ;;  %v902_v1 = vrot.slane %v901_v49, 2  ;;  %v918_v5 = vmul.f32 %v8123_v28, %v891_v61  ;;  %vm1017_vm6 = vmor %vm1015_vm3, %vm1016_vm2 }
 0x104   : > { %v834_v53 = vpop.f32.mrf.mxu2  ;;  %v1021_v63 = vmul.f32 %v7794_v51, %v1020_v54  ;;  %v896_v6 = vadd.f32 %v895_v62, %v894_v45  ;;  %v995_v20 = vmul.f32 %v957_v0, %v8123_v28  ;;  %vm1027_vm7 = vmor %vm1025_vm5, %vm1026_vm4  ;;  %v1125_v31 = vperm.slane %v8191_v17, 0 }
 0x105   : > { %v847_v56 = vpop.f32.mrf.mxu3  ;;  %v1012_v2 = vmul.f32 0.5, %v1011_v57  ;;  %v8178_v4 = vsub.f32 %v806_v8, %v917_v59  ;;  %v903_v10 = vadd.f32 %v902_v1, %v901_v49  ;;  %v8184_v14 = vsub.f32 %v8150_v11, %v918_v5 }
 0x106   : > { %v1022_v7 = vmul.f32 0.5, %v1021_v63  ;;  %v897_v15 = vrot.slane %v896_v6, 1  ;;  %v1099_v8 = vperm.slane %v8176_v3, 0  ;;  %v8206_v39 = vadd.f32 1e-05, %v995_v20 }
 0x107   : > { %v1013_v12 = vsub.f32 1.5, %v1012_v2  ;;  %v933_v13 = vmul.f32 %v8178_v4, %v8178_v4  ;;  %v904_v19 = vrot.slane %v903_v10, 1  ;;  %v934_v22 = vmul.f32 %v8184_v14, %v8184_v14 }
 0x108   : > { %v1023_v16 = vsub.f32 1.5, %v1022_v7  ;;  %v898_v30 = vadd.f32 %v897_v15, %v896_v6  ;;  %v8208_v44 = vadd.f32 1e-05, %v996_v27  ;;  %7795 = vrsqrt.f32 %v8206_v39 }
 0x109   : > { %v1014_v50 = vmul.f32 %v7792_v46, %v1013_v12  ;;  %v965_v18 = vsel %vm849_vm0, %v933_v13, 0.0  ;;  %v972_v36 = vsel %vm849_vm0, %v934_v22, 0.0  ;;  %v905_v37 = vadd.f32 %v904_v19, %v903_v10 }
 0x10a   : > { %v1024_v11 = vmul.f32 %v7794_v51, %v1023_v16  ;;  %v966_v21 = vrot.slane %v965_v18, 4  ;;  %v973_v45 = vrot.slane %v972_v36, 4  ;;  %7797 = vrsqrt.f32 %v8208_v44 }
 0x10b   : > { %v1018_v24 = vsel %vm1017_vm6, %v7792_v46, %v1014_v50  ;;  %vm1035_vm10 = vweird.f32 %v8206_v39  ;;  %vm1045_vm11 = vweird.f32 %v8208_v44 }
 0x10c   : > { %v1089_v23 = vmul.f32 %v1018_v24, %v8127_v40  ;;  %v1028_v32 = vsel %vm1027_vm7, %v7794_v51, %v1024_v11  ;;  %v967_v33 = vadd.f32 %v966_v21, %v965_v18  ;;  %v919_v40 = vmul.f32 %v8123_v28, %v898_v30 }
 0x10d   : > { %v1090_v34 = vmul.f32 %v1028_v32, %v8129_v43  ;;  %v974_v49 = vadd.f32 %v973_v45, %v972_v36  ;;  %v920_v43 = vmul.f32 %v8123_v28, %v905_v37 }
 0x10e   : > { %v1115_v38 = vmul.f32 %v1099_v8, %v1089_v23  ;;  %v968_v41 = vrot.slane %v967_v33, 2  ;;  %v8214_v53 = vsub.f32 %v8160_v25, %v919_v40  ;;  %v8226_v2 = vpop.eup %7795 }
 0x10f   : > { %v1116_v42 = vmul.f32 %v1100_v26, %v1090_v34  ;;  %v975_v55 = vrot.slane %v974_v49, 2  ;;  %v8222_v62 = vsub.f32 %v8163_v29, %v920_v43  ;;  %v1030_v13 = vmul.f32 %v8226_v2, %v8206_v39 }
 0x110   : > { %v1141_v46 = vadd.f32 %v1125_v31, %v1115_v38  ;;  %v969_v47 = vadd.f32 %v968_v41, %v967_v33  ;;  %v935_v57 = vmul.f32 %v8214_v53, %v8214_v53  ;;  %v8230_v7 = vpop.eup %7797  ;;  %vm1036_vm8 = vweird.f32 %v8226_v2 }
 0x111   : > { %v1142_v48 = vadd.f32 %v1126_v35, %v1116_v42  ;;  %v976_v61 = vadd.f32 %v975_v55, %v974_v49  ;;  %v936_v6 = vmul.f32 %v8222_v62, %v8222_v62  ;;  %v1040_v15 = vmul.f32 %v8230_v7, %v8208_v44  ;;  %vm8248_vm13 = vmor %vm1035_vm10, %vm1036_vm8 }
 0x112   : > { %v1149_v51 = vmax.f32 %v1141_v46, 0.0  ;;  %v970_v52 = vrot.slane %v969_v47, 1  ;;  %v979_v0 = vsel %vm849_vm0, %v935_v57, 0.0  ;;  %v1031_v21 = vmul.f32 %v8226_v2, %v1030_v13 }
 0x113   : > { %v1150_v54 = vmax.f32 %v1142_v48, 0.0  ;;  %v977_v25 = vrot.slane %v976_v61, 1  ;;  %v980_v1 = vrot.slane %v979_v0, 4  ;;  %v986_v8 = vsel %vm849_vm0, %v936_v6, 0.0 }
 0x114   : > { %v971_v56 = vadd.f32 %v970_v52, %v969_v47  ;;  %v987_v18 = vrot.slane %v986_v8, 4  ;;  %v1041_v22 = vmul.f32 %v8230_v7, %v1040_v15  ;;  %v1032_v31 = vmul.f32 0.5, %v1031_v21 }
 0x115   : > { %v8219_v59 = vpack.c.bf16 %v1150_v54, %v1149_v51  ;;  %v978_v9 = vadd.f32 %v977_v25, %v976_v61  ;;  %v981_v10 = vadd.f32 %v980_v1, %v979_v0  ;;  %vm1046_vm9 = vweird.f32 %v8230_v7 }
 0x116   : > { %v997_v63 = vmul.f32 %v971_v56, %v8123_v28  ;;  %v988_v11 = vadd.f32 %v987_v18, %v986_v8  ;;  %v1042_v32 = vmul.f32 0.5, %v1041_v22  ;;  %v1033_v41 = vsub.f32 1.5, %v1032_v31  ;;  %vm1047_vm15 = vmor %vm1045_vm11, %vm1046_vm9 }
 0x117   : > { %v998_v29 = vmul.f32 %v978_v9, %v8123_v28  ;;  %v982_v12 = vrot.slane %v981_v10, 2  ;;  %v1101_v6 = vperm.slane %v8176_v3, 2  ;;  %v1102_v9 = vperm.slane %v8176_v3, 3 }
 0x118   : > { %v1005_v5 = vadd.f32 1e-05, %v997_v63  ;;  %v989_v27 = vrot.slane %v988_v11, 2  ;;  %v1043_v42 = vsub.f32 1.5, %v1042_v32  ;;  %v1034_v49 = vmul.f32 %v8226_v2, %v1033_v41 }
 0x119   : > { %v1006_v16 = vadd.f32 1e-05, %v998_v29  ;;  %v983_v50 = vadd.f32 %v982_v12, %v981_v10  ;;  %v1103_v29 = vperm.slane %v8176_v3, 4  ;;  %v1104_v13 = vperm.slane %v8176_v3, 5 }
 0x11a   : > { %7799 = vrsqrt.f32 %v1005_v5  ;;  %v990_v33 = vadd.f32 %v989_v27, %v988_v11  ;;  %v1044_v43 = vmul.f32 %v8230_v7, %v1043_v42  ;;  %vm1055_vm1 = vweird.f32 %v1005_v5 }
 0x11b   : > { %7801 = vrsqrt.f32 %v1006_v16  ;;  %v984_v19 = vrot.slane %v983_v50, 1  ;;  %v1038_v61 = vsel %vm8248_vm13, %v8226_v2, %v1034_v49  ;;  %vm1065_vm3 = vweird.f32 %v1006_v16 }
 0x11c   : > { %v991_v38 = vrot.slane %v990_v33, 1  ;;  %v1048_v39 = vsel %vm1047_vm15, %v8230_v7, %v1044_v43  ;;  %v1091_v1 = vmul.f32 %v1038_v61, %v8139_v58  ;;  %v1129_v18 = vperm.slane %v8191_v17, 4 }
 0x11d   : > { %v985_v26 = vadd.f32 %v984_v19, %v983_v50  ;;  %v1128_v50 = vperm.slane %v8191_v17, 3  ;;  %v1105_v22 = vperm.slane %v8176_v3, 6  ;;  %vm1176_vm11 = vcmask 1042434  }
 0x11e   : > { %v992_v40 = vadd.f32 %v991_v38, %v990_v33  ;;  %v1117_v8 = vmul.f32 %v1101_v6, %v1091_v1  ;;  %v1131_v33 = vperm.slane %v8191_v17, 6  ;;  %v1132_v38 = vperm.slane %v8191_v17, 7 }
 0x11f   : > { %v999_v23 = vmul.f32 %v985_v26, %v8123_v28  ;;  %v1165_v55 = vrot.slane %v8219_v59, 3  ;;  %vm1181_vm13 = vcmask 1044484   ;;  %vm1189_vm15 = vcmask 1045508  }
 0x120   : > { %v7800_v20 = vpop.eup %7799  ;;  %v1000_v48 = vmul.f32 %v992_v40, %v8123_v28 }
 0x121   : > { %v1050_v24 = vmul.f32 %v7800_v20, %v1005_v5  ;;  %v7802_v34 = vpop.eup %7801  ;;  %v1007_v35 = vadd.f32 1e-05, %v999_v23  ;;  %vm1056_vm12 = vweird.f32 %v7800_v20  ;;  %v1092_v5 = vmul.f32 %v1048_v39, %v8141_v60 }
 0x122   : > { %v1060_v37 = vmul.f32 %v7802_v34, %v1006_v16  ;;  %v1008_v52 = vadd.f32 1e-05, %v1000_v48  ;;  %vm1066_vm14 = vweird.f32 %v7802_v34  ;;  %vm1057_vm2 = vmor %vm1055_vm1, %vm1056_vm12  ;;  %v1127_v16 = vperm.slane %v8191_v17, 2 }
 0x123   : > { %v1051_v30 = vmul.f32 %v7800_v20, %v1050_v24  ;;  %7803 = vrsqrt.f32 %v1007_v35  ;;  %vm1067_vm4 = vmor %vm1065_vm3, %vm1066_vm14  ;;  %vm1075_vm6 = vweird.f32 %v1007_v35  ;;  %v1118_v60 = vmul.f32 %v1102_v9, %v1092_v5 }
 0x124   : > { %v1061_v45 = vmul.f32 %v7802_v34, %v1060_v37  ;;  %7805 = vrsqrt.f32 %v1008_v52  ;;  %v1143_v26 = vadd.f32 %v1127_v16, %v1117_v8  ;;  %vm1085_vm9 = vweird.f32 %v1008_v52 }
 0x125   : > { %v1052_v36 = vmul.f32 0.5, %v1051_v30  ;;  %v1144_v27 = vadd.f32 %v1128_v50, %v1118_v60  ;;  %v1106_v37 = vperm.slane %v8176_v3, 7  ;;  %vm1172_vm12 = vcmask 1040384  }
 0x126   : > { %v1062_v47 = vmul.f32 0.5, %v1061_v45  ;;  %vm1185_vm14 = vcmask 1046534   ;;  %vm1191_vm1 = vcmask 1043456   ;;  %v1175_v61 = vsel %vm1172_vm12, %v8219_v59, %v1165_v55 }
 0x127   : > { %v1053_v46 = vsub.f32 1.5, %v1052_v36  ;;  %v1152_v36 = vmax.f32 %v1144_v27, 0.0 }
 0x128   : > { %v1063_v51 = vsub.f32 1.5, %v1062_v47 }
 0x129   : > { %v7804_v54 = vpop.eup %7803  ;;  %v1054_v28 = vmul.f32 %v7800_v20, %v1053_v46 }
 0x12a   : > { %v1064_v56 = vmul.f32 %v7802_v34, %v1063_v51  ;;  %v1070_v57 = vmul.f32 %v7804_v54, %v1007_v35  ;;  %vm1076_vm5 = vweird.f32 %v7804_v54  ;;  %v7806_v2 = vpop.eup %7805  ;;  %v1151_v35 = vmax.f32 %v1143_v26, 0.0 }
 0x12b   : > { %v1058_v63 = vsel %vm1057_vm2, %v7800_v20, %v1054_v28  ;;  %v1080_v58 = vmul.f32 %v7806_v2, %v1008_v52  ;;  %vm1077_vm7 = vmor %vm1075_vm6, %vm1076_vm5  ;;  %vm1086_vm8 = vweird.f32 %v7806_v2 }
 0x12c   : > { %v1071_v44 = vmul.f32 %v7804_v54, %v1070_v57  ;;  %v1068_v0 = vsel %vm1067_vm4, %v7802_v34, %v1064_v56  ;;  %v1093_v7 = vmul.f32 %v1058_v63, %v8178_v4  ;;  %v1130_v4 = vperm.slane %v8191_v17, 5  ;;  %vm1087_vm10 = vmor %vm1085_vm9, %vm1086_vm8 }
 0x12d   : > { %v1094_v12 = vmul.f32 %v1068_v0, %v8184_v14  ;;  %v1081_v11 = vmul.f32 %v7806_v2, %v1080_v58  ;;  %v1158_v46 = vpack.c.bf16 %v1152_v36, %v1151_v35 }
 0x12e   : > { %v1072_v25 = vmul.f32 0.5, %v1071_v44  ;;  %v1119_v20 = vmul.f32 %v1103_v29, %v1093_v7 }
 0x12f   : > { %v1120_v14 = vmul.f32 %v1104_v13, %v1094_v12  ;;  %v1082_v24 = vmul.f32 0.5, %v1081_v11  ;;  %v1166_v51 = vrot.slane %v1158_v46, 6  ;;  %v1167_v52 = vrot.slane %v1158_v46, 1 }
 0x130   : > { %v1073_v10 = vsub.f32 1.5, %v1072_v25  ;;  %v1145_v23 = vadd.f32 %v1129_v18, %v1119_v20 }
 0x131   : > { %v1083_v30 = vsub.f32 1.5, %v1082_v24  ;;  %v1146_v31 = vadd.f32 %v1130_v4, %v1120_v14  ;;  %v1179_v17 = vsel %vm1176_vm11, %v1166_v51, %v1167_v52 }
 0x132   : > { %v1074_v15 = vmul.f32 %v7804_v54, %v1073_v10  ;;  %v1153_v41 = vmax.f32 %v1145_v23, 0.0  ;;  %v1180_v63 = vsel %vm849_vm0, %v1175_v61, %v1179_v17 }
 0x133   : > { %v1084_v34 = vmul.f32 %v7806_v2, %v1083_v30  ;;  %v1154_v42 = vmax.f32 %v1146_v31, 0.0 }
 0x134   : > { %v1078_v19 = vsel %vm1077_vm7, %v7804_v54, %v1074_v15 }
 0x135   : > { %v1095_v21 = vmul.f32 %v1078_v19, %v8214_v53  ;;  %v1088_v53 = vsel %vm1087_vm10, %v7806_v2, %v1084_v34  ;;  %v1159_v48 = vpack.c.bf16 %v1154_v42, %v1153_v41 }
 0x136   : > { %v1096_v40 = vmul.f32 %v1088_v53, %v8222_v62 }
 0x137   : > { %v1121_v32 = vmul.f32 %v1105_v22, %v1095_v21  ;;  %v1168_v3 = vrot.slane %v1159_v48, 4  ;;  %v1169_v28 = vrot.slane %v1159_v48, 7 }
 0x138   : > { %v1122_v47 = vmul.f32 %v1106_v37, %v1096_v40 }
 0x139   : > { %v1147_v45 = vadd.f32 %v1131_v33, %v1121_v32  ;;  %v1184_v39 = vsel %vm1181_vm13, %v1168_v3, %v1169_v28 }
 0x13a   : > { %v1148_v43 = vadd.f32 %v1132_v38, %v1122_v47 }
 0x13b   : > { %v1155_v49 = vmax.f32 %v1147_v45, 0.0 }
 0x13c   : > { %v1156_v54 = vmax.f32 %v1148_v43, 0.0 }
 0x13e   : > { %v1160_v56 = vpack.c.bf16 %v1156_v54, %v1155_v49 }
 0x140   : > { %v1170_v57 = vrot.slane %v1160_v56, 2  ;;  %v1171_v62 = vrot.slane %v1160_v56, 5 }
 0x142   : > { %v1188_v44 = vsel %vm1185_vm14, %v1170_v57, %v1171_v62 }
 0x143   : > { %v1190_v0 = vsel %vm1189_vm15, %v1184_v39, %v1188_v44 }
 0x144   : > { %v1192_v25 = vsel %vm1191_vm1, %v1180_v63, %v1190_v0 }
 0x145   : > { %1194 = vst [vmem:[#allocation2] sm:$0xff] %v1192_v25 }
 0x146 PF: > { %v5621_v59 = vld [vmem:[%s8079_s15 + $0x188] sm:$0xf]  ;;  %v7334_v1 = vld [vmem:[%s8079_s15 + $0x1a0] sm:$0xf0]  ;;  %v5593_v15 = vld [vmem:[%s8079_s15 + $0x150] sm:$0xf] }
 0x147   : > { %v5845_v6 = vld [vmem:[%s8079_s15 + $0x348] sm:$0xf]  ;;  %v5622_v5 = vor.u32 %v7334_v1, %v5621_v59  ;;  %v7390_v9 = vld [vmem:[%s8079_s15 + $0x360] sm:$0xf0]  ;;  %v7327_v8 = vld [vmem:[%s8079_s15 + $0x168] sm:$0xf0] }
 0x148   : > { %v6069_v10 = vld [vmem:[%s8079_s15 + $0x508] sm:$0xf]  ;;  %v7446_v2 = vld [vmem:[%s8079_s15 + $0x520] sm:$0xf0]  ;;  %v5846_v7 = vor.u32 %v7390_v9, %v5845_v6  ;;  %v5817_v16 = vld [vmem:[%s8079_s15 + $0x310] sm:$0xf]  ;;  %v5594_v50 = vor.u32 %v7327_v8, %v5593_v15 }
 0x149   : > { %v6070_v29 = vor.u32 %v7446_v2, %v6069_v10  ;;  %v6293_v12 = vld [vmem:[%s8079_s15 + $0x6c8] sm:$0xf]  ;;  %v7502_v13 = vld [vmem:[%s8079_s15 + $0x6e0] sm:$0xf0]  ;;  %4030 = vmatpush.bf16.msra.mxu0 %v5622_v5  ;;  %v7383_v60 = vld [vmem:[%s8079_s15 + $0x328] sm:$0xf0] }
 0x14a   : > { %v6294_v58 = vor.u32 %v7502_v13, %v6293_v12  ;;  %4043 = vmatpush.bf16.msra.mxu1 %v5846_v7  ;;  %v5818_v18 = vor.u32 %v7383_v60, %v5817_v16  ;;  %v6041_v4 = vld [vmem:[%s8079_s15 + $0x4d0] sm:$0xf]  ;;  %v7439_v19 = vld [vmem:[%s8079_s15 + $0x4e8] sm:$0xf0]  ;;  %v5565_v21 = vld [vmem:[%s8079_s15 + $0x118] sm:$0xf] }
 0x14b   : > { %4056 = vmatpush.bf16.msra.mxu2 %v6070_v29  ;;  %v6265_v11 = vld [vmem:[%s8079_s15 + $0x690] sm:$0xf]  ;;  %v6042_v20 = vor.u32 %v7439_v19, %v6041_v4  ;;  %v7495_v14 = vld [vmem:[%s8079_s15 + $0x6a8] sm:$0xf0]  ;;  %v7320_v22 = vld [vmem:[%s8079_s15 + $0x130] sm:$0xf0] }
 0x14c   : > { %4069 = vmatpush.bf16.msra.mxu3 %v6294_v58  ;;  %v6266_v24 = vor.u32 %v7495_v14, %v6265_v11  ;;  %v5789_v26 = vld [vmem:[%s8079_s15 + $0x2d8] sm:$0xf]  ;;  %v7376_v27 = vld [vmem:[%s8079_s15 + $0x2f0] sm:$0xf0]  ;;  %v5566_v23 = vor.u32 %v7320_v22, %v5565_v21  ;;  %v5537_v36 = vld [vmem:[%s8079_s15 + $0xe0] sm:$0xf] }
 0x14d   : > { %v6013_v30 = vld [vmem:[%s8079_s15 + $0x498] sm:$0xf]  ;;  %4031 = vmatpush.bf16.msra.mxu0 %v5594_v50  ;;  %v7432_v31 = vld [vmem:[%s8079_s15 + $0x4b0] sm:$0xf0]  ;;  %v5790_v34 = vor.u32 %v7376_v27, %v5789_v26  ;;  %v7313_v37 = vld [vmem:[%s8079_s15 + $0xf8] sm:$0xf0] }
 0x14e   : > { %v6237_v32 = vld [vmem:[%s8079_s15 + $0x658] sm:$0xf]  ;;  %v7488_v33 = vld [vmem:[%s8079_s15 + $0x670] sm:$0xf0]  ;;  %4044 = vmatpush.bf16.msra.mxu1 %v5818_v18  ;;  %v6014_v35 = vor.u32 %v7432_v31, %v6013_v30  ;;  %v5761_v53 = vld [vmem:[%s8079_s15 + $0x2a0] sm:$0xf]  ;;  %v5538_v47 = vor.u32 %v7313_v37, %v5537_v36 }
 0x14f   : > { %4057 = vmatpush.bf16.msra.mxu2 %v6042_v20  ;;  %v6238_v38 = vor.u32 %v7488_v33, %v6237_v32  ;;  %v7369_v41 = vld [vmem:[%s8079_s15 + $0x2b8] sm:$0xf0]  ;;  %v5985_v42 = vld [vmem:[%s8079_s15 + $0x460] sm:$0xf]  ;;  %v5509_v43 = vld [vmem:[%s8079_s15 + $0xa8] sm:$0xf] }
 0x150   : > { %4070 = vmatpush.bf16.msra.mxu3 %v6266_v24  ;;  %v7425_v45 = vld [vmem:[%s8079_s15 + $0x478] sm:$0xf0]  ;;  %v6209_v40 = vld [vmem:[%s8079_s15 + $0x620] sm:$0xf]  ;;  %v5762_v48 = vor.u32 %v7369_v41, %v5761_v53  ;;  %v7306_v51 = vld [vmem:[%s8079_s15 + $0xc0] sm:$0xf0] }
 0x151   : > { %v7481_v46 = vld [vmem:[%s8079_s15 + $0x638] sm:$0xf0]  ;;  %4032 = vmatpush.bf16.msra.mxu0 %v5566_v23  ;;  %v5986_v49 = vor.u32 %v7425_v45, %v5985_v42  ;;  %v5733_v52 = vld [vmem:[%s8079_s15 + $0x268] sm:$0xf]  ;;  %v7362_v55 = vld [vmem:[%s8079_s15 + $0x280] sm:$0xf0]  ;;  %v5510_v57 = vor.u32 %v7306_v51, %v5509_v43 }
 0x152   : > { %4045 = vmatpush.bf16.msra.mxu1 %v5790_v34  ;;  %v6210_v54 = vor.u32 %v7481_v46, %v6209_v40  ;;  %v5957_v3 = vld [vmem:[%s8079_s15 + $0x428] sm:$0xf]  ;;  %v7418_v28 = vld [vmem:[%s8079_s15 + $0x440] sm:$0xf0]  ;;  %v5734_v62 = vor.u32 %v7362_v55, %v5733_v52  ;;  %v5481_v39 = vld [vmem:[%s8079_s15 + $0x70] sm:$0xf] }
 0x153   : > { %4058 = vmatpush.bf16.msra.mxu2 %v6014_v35  ;;  %v6181_v56 = vld [vmem:[%s8079_s15 + $0x5e8] sm:$0xf]  ;;  %v7474_v17 = vld [vmem:[%s8079_s15 + $0x600] sm:$0xf0]  ;;  %v5958_v61 = vor.u32 %v7418_v28, %v5957_v3  ;;  %v7299_v44 = vld [vmem:[%s8079_s15 + $0x88] sm:$0xf0] }
 0x154   : > { %4071 = vmatpush.bf16.msra.mxu3 %v6238_v38  ;;  %v5705_v63 = vld [vmem:[%s8079_s15 + $0x230] sm:$0xf]  ;;  %v6182_v0 = vor.u32 %v7474_v17, %v6181_v56  ;;  %v7355_v25 = vld [vmem:[%s8079_s15 + $0x248] sm:$0xf0]  ;;  %v5482_v9 = vor.u32 %v7299_v44, %v5481_v39  ;;  %v5453_v7 = vld [vmem:[%s8079_s15 + $0x38] sm:$0xf] }
 0x155   : > { %4033 = vmatpush.bf16.msra.mxu0 %v5538_v47  ;;  %v5929_v59 = vld [vmem:[%s8079_s15 + $0x3f0] sm:$0xf]  ;;  %v7411_v1 = vld [vmem:[%s8079_s15 + $0x408] sm:$0xf0]  ;;  %v5706_v10 = vor.u32 %v7355_v25, %v5705_v63  ;;  %v7292_v29 = vld [vmem:[%s8079_s15 + $0x50] sm:$0xf0] }
 0x156   : > { %4046 = vmatpush.bf16.msra.mxu1 %v5762_v48  ;;  %v6153_v6 = vld [vmem:[%s8079_s15 + $0x5b0] sm:$0xf]  ;;  %v7467_v5 = vld [vmem:[%s8079_s15 + $0x5c8] sm:$0xf0]  ;;  %v5930_v2 = vor.u32 %v7411_v1, %v5929_v59  ;;  %v5677_v12 = vld [vmem:[%s8079_s15 + $0x1f8] sm:$0xf]  ;;  %v5454_v50 = vor.u32 %v7292_v29, %v5453_v7 }
 0x157   : > { %4059 = vmatpush.bf16.msra.mxu2 %v5986_v49  ;;  %v6154_v13 = vor.u32 %v7467_v5, %v6153_v6  ;;  %v7348_v15 = vld [vmem:[%s8079_s15 + $0x210] sm:$0xf0]  ;;  %v5901_v58 = vld [vmem:[%s8079_s15 + $0x3b8] sm:$0xf]  ;;  %v5425_v18 = vld [vmem:[%s8079_s15] sm:$0xf] }
 0x158   : > { %4072 = vmatpush.bf16.msra.mxu3 %v6210_v54  ;;  %v7404_v8 = vld [vmem:[%s8079_s15 + $0x3d0] sm:$0xf0]  ;;  %v6125_v16 = vld [vmem:[%s8079_s15 + $0x578] sm:$0xf]  ;;  %v7285_v4 = vld [vmem:[%s8079_s15 + $0x18] sm:$0xf0]  ;;  %v5678_v19 = vor.u32 %v7348_v15, %v5677_v12 }
 0x159   : > { %4034 = vmatpush.bf16.msra.mxu0 %v5510_v57  ;;  %v7460_v60 = vld [vmem:[%s8079_s15 + $0x590] sm:$0xf0]  ;;  %v5902_v11 = vor.u32 %v7404_v8, %v5901_v58  ;;  %v5649_v20 = vld [vmem:[%s8079_s15 + $0x1c0] sm:$0xf]  ;;  %v7341_v14 = vld [vmem:[%s8079_s15 + $0x1d8] sm:$0xf0]  ;;  %v5426_v32 = vor.u32 %v7285_v4, %v5425_v18 }
 0x15a   : > { %4047 = vmatpush.bf16.msra.mxu1 %v5734_v62  ;;  %v5873_v21 = vld [vmem:[%s8079_s15 + $0x380] sm:$0xf]  ;;  %v6126_v22 = vor.u32 %v7460_v60, %v6125_v16  ;;  %v7397_v24 = vld [vmem:[%s8079_s15 + $0x398] sm:$0xf0]  ;;  %v6517_v30 = vld [vmem:[%s8079_s15 + $0x888] sm:$0xf]  ;;  %v5650_v36 = vor.u32 %v7341_v14, %v5649_v20 }
 0x15b   : > { %4060 = vmatpush.bf16.msra.mxu2 %v5958_v61  ;;  %v6097_v26 = vld [vmem:[%s8079_s15 + $0x540] sm:$0xf]  ;;  %v7453_v27 = vld [vmem:[%s8079_s15 + $0x558] sm:$0xf0]  ;;  %v7558_v23 = vld [vmem:[%s8079_s15 + $0x8a0] sm:$0xf0]  ;;  %v5874_v37 = vor.u32 %v7397_v24, %v5873_v21 }
 0x15c   : > { %4073 = vmatpush.bf16.msra.mxu3 %v6182_v0  ;;  %v6741_v31 = vld [vmem:[%s8079_s15 + $0xa48] sm:$0xf]  ;;  %v7614_v33 = vld [vmem:[%s8079_s15 + $0xa60] sm:$0xf0]  ;;  %v6098_v41 = vor.u32 %v7453_v27, %v6097_v26  ;;  %v6518_v42 = vor.u32 %v7558_v23, %v6517_v30  ;;  %v6489_v46 = vld [vmem:[%s8079_s15 + $0x850] sm:$0xf] }
 0x15d   : > { %4035 = vmatpush.bf16.msra.mxu0 %v5482_v9  ;;  %v6965_v34 = vld [vmem:[%s8079_s15 + $0xc08] sm:$0xf]  ;;  %v7670_v35 = vld [vmem:[%s8079_s15 + $0xc20] sm:$0xf0]  ;;  %v6742_v45 = vor.u32 %v7614_v33, %v6741_v31  ;;  %v7551_v47 = vld [vmem:[%s8079_s15 + $0x868] sm:$0xf0] }
 0x15e   : > { %4048 = vmatpush.bf16.msra.mxu1 %v5706_v10  ;;  %v7189_v53 = vld [vmem:[%s8079_s15 + $0xdc8] sm:$0xf]  ;;  %v7726_v38 = vld [vmem:[%s8079_s15 + $0xde0] sm:$0xf0]  ;;  %v6966_v40 = vor.u32 %v7670_v35, %v6965_v34  ;;  %v6713_v48 = vld [vmem:[%s8079_s15 + $0xa10] sm:$0xf]  ;;  %v6490_v28 = vor.u32 %v7551_v47, %v6489_v46 }
 0x15f   : > { %4061 = vmatpush.bf16.msra.mxu2 %v5930_v2  ;;  %v7190_v49 = vor.u32 %v7726_v38, %v7189_v53  ;;  %v7607_v43 = vld [vmem:[%s8079_s15 + $0xa28] sm:$0xf0]  ;;  %v6937_v51 = vld [vmem:[%s8079_s15 + $0xbd0] sm:$0xf]  ;;  %v1195_v3 = vld [vmem:[#allocation2] sm:$0xff]  ;;  %vm4758_vm0 = vcmask 1041408  }
 0x160   : > { %4074 = vmatpush.bf16.msra.mxu3 %v6154_v13  ;;  %v7663_v52 = vld [vmem:[%s8079_s15 + $0xbe8] sm:$0xf0]  ;;  %v7161_v54 = vld [vmem:[%s8079_s15 + $0xd90] sm:$0xf]  ;;  %1709 = vst [vmem:[#allocation1] ss:$9 sm:$0xff] %v1195_v3  ;;  %v6714_v56 = vor.u32 %v7607_v43, %v6713_v48 }
 0x161   : > { %4036 = vmatpush.bf16.msra.mxu0 %v5454_v50  ;;  %v7719_v55 = vld [vmem:[%s8079_s15 + $0xda8] sm:$0xf0]  ;;  %v6938_v17 = vor.u32 %v7663_v52, %v6937_v51  ;;  %v6461_v57 = vld [vmem:[%s8079_s15 + $0x818] sm:$0xf]  ;;  %v7544_v62 = vld [vmem:[%s8079_s15 + $0x830] sm:$0xf0] }
 0x162   : > { %4049 = vmatpush.bf16.msra.mxu1 %v5678_v19  ;;  %v6685_v61 = vld [vmem:[%s8079_s15 + $0x9d8] sm:$0xf]  ;;  %v7162_v39 = vor.u32 %v7719_v55, %v7161_v54  ;;  %v7600_v44 = vld [vmem:[%s8079_s15 + $0x9f0] sm:$0xf0]  ;;  %v6462_v1 = vor.u32 %v7544_v62, %v6461_v57  ;;  %v6433_v6 = vld [vmem:[%s8079_s15 + $0x7e0] sm:$0xf] }
 0x163   : > { %4062 = vmatpush.bf16.msra.mxu2 %v5902_v11  ;;  %v6909_v63 = vld [vmem:[%s8079_s15 + $0xb98] sm:$0xf]  ;;  %v7656_v0 = vld [vmem:[%s8079_s15 + $0xbb0] sm:$0xf0]  ;;  %v6686_v5 = vor.u32 %v7600_v44, %v6685_v61  ;;  %v7537_v10 = vld [vmem:[%s8079_s15 + $0x7f8] sm:$0xf0] }
 0x164   : > { %4075 = vmatpush.bf16.msra.mxu3 %v6126_v22  ;;  %v7133_v25 = vld [vmem:[%s8079_s15 + $0xd58] sm:$0xf]  ;;  %v7712_v59 = vld [vmem:[%s8079_s15 + $0xd70] sm:$0xf0]  ;;  %v6910_v9 = vor.u32 %v7656_v0, %v6909_v63  ;;  %v6657_v2 = vld [vmem:[%s8079_s15 + $0x9a0] sm:$0xf]  ;;  %v6434_v60 = vor.u32 %v7537_v10, %v6433_v6 }
 0x165   : > { %4037 = vmatpush.bf16.msra.mxu0 %v5426_v32  ;;  %v7593_v7 = vld [vmem:[%s8079_s15 + $0x9b8] sm:$0xf0]  ;;  %v7134_v29 = vor.u32 %v7712_v59, %v7133_v25  ;;  %v6881_v12 = vld [vmem:[%s8079_s15 + $0xb60] sm:$0xf]  ;;  %v6405_v11 = vld [vmem:[%s8079_s15 + $0x7a8] sm:$0xf] }
 0x166   : > { %4050 = vmatpush.bf16.msra.mxu1 %v5650_v36  ;;  %v7649_v13 = vld [vmem:[%s8079_s15 + $0xb78] sm:$0xf0]  ;;  %v7105_v15 = vld [vmem:[%s8079_s15 + $0xd20] sm:$0xf]  ;;  %v6658_v4 = vor.u32 %v7593_v7, %v6657_v2  ;;  %v7530_v20 = vld [vmem:[%s8079_s15 + $0x7c0] sm:$0xf0] }
 0x167   : > { %4063 = vmatpush.bf16.msra.mxu2 %v5874_v37  ;;  %v7705_v58 = vld [vmem:[%s8079_s15 + $0xd38] sm:$0xf0]  ;;  %v8373_v8 = vld [vmem:[#allocation1 + $0x12] sm:$0xff]  ;;  %v8375_v16 = vld [vmem:[#allocation1] sm:$0xff]  ;;  %v6882_v19 = vor.u32 %v7649_v13, %v6881_v12  ;;  %v6406_v23 = vor.u32 %v7530_v20, %v6405_v11  ;;  %vm5044_vm15 = vcmask 1040384   ;;  %vm5048_vm1 = vcmask 1042434  }
 0x168   : > { %4076 = vmatpush.bf16.msra.mxu3 %v6098_v41  ;;  %v8378_v50 = vld [vmem:[#allocation1 + $0x1b] sm:$0xff]  ;;  %v8380_v18 = vld [vmem:[#allocation1 + $0x9] sm:$0xff]  ;;  %v7106_v21 = vor.u32 %v7705_v58, %v7105_v15  ;;  %v7586_v22 = vld [vmem:[%s8079_s15 + $0x980] sm:$0xf0]  ;;  %4038 = vmatmul.bf16.vlgmr.msra.gmra.mxu0 %v8375_v16 }
 0x169   : > { %4082 = vmatpush.bf16.msrb.mxu0 %v6518_v42  ;;  %v6629_v14 = vld [vmem:[%s8079_s15 + $0x968] sm:$0xf]  ;;  %v7642_v26 = vld [vmem:[%s8079_s15 + $0xb40] sm:$0xf0]  ;;  %4051 = vmatmul.bf16.vlgmr.msra.gmra.mxu1 %v8380_v18  ;;  %v6377_v33 = vld [vmem:[%s8079_s15 + $0x770] sm:$0xf] }
 0x16a   : > { %4095 = vmatpush.bf16.msrb.mxu1 %v6742_v45  ;;  %4064 = vmatmul.bf16.vlgmr.msra.gmra.mxu2 %v8373_v8  ;;  %v6853_v24 = vld [vmem:[%s8079_s15 + $0xb28] sm:$0xf]  ;;  %v7698_v30 = vld [vmem:[%s8079_s15 + $0xd00] sm:$0xf0]  ;;  %v6630_v31 = vor.u32 %v7586_v22, %v6629_v14  ;;  %v7523_v34 = vld [vmem:[%s8079_s15 + $0x788] sm:$0xf0] }
 0x16b   : > { %4108 = vmatpush.bf16.msrb.mxu2 %v6966_v40  ;;  %v7077_v27 = vld [vmem:[%s8079_s15 + $0xce8] sm:$0xf]  ;;  %4077 = vmatmul.bf16.vlgmr.msra.gmra.mxu3 %v8378_v50  ;;  %v6854_v32 = vor.u32 %v7642_v26, %v6853_v24  ;;  %v6601_v35 = vld [vmem:[%s8079_s15 + $0x930] sm:$0xf]  ;;  %v7579_v37 = vld [vmem:[%s8079_s15 + $0x948] sm:$0xf0]  ;;  %v6378_v45 = vor.u32 %v7523_v34, %v6377_v33 }
 0x16c   : > { %4121 = vmatpush.bf16.msrb.mxu3 %v7190_v49  ;;  %v7078_v36 = vor.u32 %v7698_v30, %v7077_v27  ;;  %v6825_v53 = vld [vmem:[%s8079_s15 + $0xaf0] sm:$0xf]  ;;  %v7635_v38 = vld [vmem:[%s8079_s15 + $0xb08] sm:$0xf0]  ;;  %v6602_v40 = vor.u32 %v7579_v37, %v6601_v35  ;;  %v6349_v47 = vld [vmem:[%s8079_s15 + $0x738] sm:$0xf] }
 0x16d   : > { %4083 = vmatpush.bf16.msrb.mxu0 %v6490_v28  ;;  %v7049_v41 = vld [vmem:[%s8079_s15 + $0xcb0] sm:$0xf]  ;;  %v7691_v42 = vld [vmem:[%s8079_s15 + $0xcc8] sm:$0xf0]  ;;  %v6826_v46 = vor.u32 %v7635_v38, %v6825_v53  ;;  %v7516_v48 = vld [vmem:[%s8079_s15 + $0x750] sm:$0xf0] }
 0x16e   : > { %4096 = vmatpush.bf16.msrb.mxu1 %v6714_v56  ;;  %v6573_v49 = vld [vmem:[%s8079_s15 + $0x8f8] sm:$0xf]  ;;  %v7050_v43 = vor.u32 %v7691_v42, %v7049_v41  ;;  %v7572_v51 = vld [vmem:[%s8079_s15 + $0x910] sm:$0xf0]  ;;  %v6350_v28 = vor.u32 %v7516_v48, %v6349_v47  ;;  %v6321_v56 = vld [vmem:[%s8079_s15 + $0x700] sm:$0xf] }
 0x16f   : > { %4109 = vmatpush.bf16.msrb.mxu2 %v6938_v17  ;;  %v6797_v52 = vld [vmem:[%s8079_s15 + $0xab8] sm:$0xf]  ;;  %v7628_v54 = vld [vmem:[%s8079_s15 + $0xad0] sm:$0xf0]  ;;  %v7509_v17 = vld [vmem:[%s8079_s15 + $0x718] sm:$0xf0]  ;;  %v6574_v57 = vor.u32 %v7572_v51, %v6573_v49 }
 0x170   : > { %4122 = vmatpush.bf16.msrb.mxu3 %v7162_v39  ;;  %v7021_v55 = vld [vmem:[%s8079_s15 + $0xc78] sm:$0xf]  ;;  %v7684_v3 = vld [vmem:[%s8079_s15 + $0xc90] sm:$0xf0]  ;;  %v6798_v62 = vor.u32 %v7628_v54, %v6797_v52  ;;  %v6545_v61 = vld [vmem:[%s8079_s15 + $0x8c0] sm:$0xf] }
 0x171   : > { %4084 = vmatpush.bf16.msrb.mxu0 %v6462_v1  ;;  %v7565_v39 = vld [vmem:[%s8079_s15 + $0x8d8] sm:$0xf0]  ;;  %v6769_v44 = vld [vmem:[%s8079_s15 + $0xa80] sm:$0xf]  ;;  %v7022_v63 = vor.u32 %v7684_v3, %v7021_v55  ;;  %v7331_v1 = vld [vmem:[%s8079_s15 + $0x18c] sm:$0xf] }
 0x172   : > { %4097 = vmatpush.bf16.msrb.mxu1 %v6686_v5  ;;  %v7621_v0 = vld [vmem:[%s8079_s15 + $0xa98] sm:$0xf0]  ;;  %v6993_v25 = vld [vmem:[%s8079_s15 + $0xc40] sm:$0xf]  ;;  %v5623_v6 = vld [vmem:[%s8079_s15 + $0x1a4] sm:$0xf0] }
 0x173   : > { %4110 = vmatpush.bf16.msrb.mxu2 %v6910_v9  ;;  %v7677_v59 = vld [vmem:[%s8079_s15 + $0xc58] sm:$0xf0]  ;;  %v7387_v5 = vld [vmem:[%s8079_s15 + $0x34c] sm:$0xf]  ;;  %v6322_v9 = vor.u32 %v7509_v17, %v6321_v56  ;;  %v5847_v10 = vld [vmem:[%s8079_s15 + $0x364] sm:$0xf0]  ;;  %v6770_v12 = vor.u32 %v7621_v0, %v6769_v44 }
 0x174   : > { %4123 = vmatpush.bf16.msrb.mxu3 %v7134_v29  ;;  %v7443_v2 = vld [vmem:[%s8079_s15 + $0x50c] sm:$0xf]  ;;  %v6071_v7 = vld [vmem:[%s8079_s15 + $0x524] sm:$0xf0]  ;;  %v6546_v29 = vor.u32 %v7565_v39, %v6545_v61  ;;  %v6994_v58 = vor.u32 %v7677_v59, %v6993_v25  ;;  %v7324_v11 = vld [vmem:[%s8079_s15 + $0x154] sm:$0xf] }
 0x175   : > { %4085 = vmatpush.bf16.msrb.mxu0 %v6434_v60  ;;  %v7499_v13 = vld [vmem:[%s8079_s15 + $0x6cc] sm:$0xf]  ;;  %v6295_v15 = vld [vmem:[%s8079_s15 + $0x6e4] sm:$0xf0]  ;;  %v5626_v60 = vor.u32 %v7331_v1, %v5623_v6  ;;  %v5595_v20 = vld [vmem:[%s8079_s15 + $0x16c] sm:$0xf0] }
 0x176   : > { %4098 = vmatpush.bf16.msrb.mxu1 %v6658_v4  ;;  %v5850_v4 = vor.u32 %v7387_v5, %v5847_v10  ;;  %v7380_v14 = vld [vmem:[%s8079_s15 + $0x314] sm:$0xf]  ;;  %v5819_v22 = vld [vmem:[%s8079_s15 + $0x32c] sm:$0xf0]  ;;  %v8431_v27 = vld [vmem:[#allocation1 + $0x36] sm:$0xff]  ;;  %v5598_v33 = vor.u32 %v7324_v11, %v5595_v20 }
 0x177   : > { %4111 = vmatpush.bf16.msrb.mxu2 %v6882_v19  ;;  %v6074_v19 = vor.u32 %v7443_v2, %v6071_v7  ;;  %v7436_v24 = vld [vmem:[%s8079_s15 + $0x4d4] sm:$0xf]  ;;  %v6043_v26 = vld [vmem:[%s8079_s15 + $0x4ec] sm:$0xf0]  ;;  %v8439_v34 = vld [vmem:[#allocation1 + $0x2d] sm:$0xff]  ;;  %v5822_v35 = vor.u32 %v7380_v14, %v5819_v22 }
 0x178   : > { %4124 = vmatpush.bf16.msrb.mxu3 %v7106_v21  ;;  %v6298_v21 = vor.u32 %v7499_v13, %v6295_v15  ;;  %v7492_v30 = vld [vmem:[%s8079_s15 + $0x694] sm:$0xf]  ;;  %v7317_v37 = vld [vmem:[%s8079_s15 + $0x11c] sm:$0xf]  ;;  %v5567_v53 = vld [vmem:[%s8079_s15 + $0x134] sm:$0xf0] }
 0x179   : > { %4086 = vmatpush.bf16.msrb.mxu0 %v6406_v23  ;;  %v6267_v23 = vld [vmem:[%s8079_s15 + $0x6ac] sm:$0xf0]  ;;  %v7373_v38 = vld [vmem:[%s8079_s15 + $0x2dc] sm:$0xf]  ;;  %v5791_v42 = vld [vmem:[%s8079_s15 + $0x2f4] sm:$0xf0]  ;;  %v5570_v48 = vor.u32 %v7317_v37, %v5567_v53 }
 0x17a   : > { %4099 = vmatpush.bf16.msrb.mxu1 %v6630_v31  ;;  %v8435_v31 = vld [vmem:[#allocation1 + $0x24] sm:$0xff]  ;;  %v6270_v41 = vor.u32 %v7492_v30, %v6267_v23  ;;  %v5794_v49 = vor.u32 %v7373_v38, %v5791_v42  ;;  %v7310_v51 = vld [vmem:[%s8079_s15 + $0xe4] sm:$0xf]  ;;  %v5539_v52 = vld [vmem:[%s8079_s15 + $0xfc] sm:$0xf0] }
 0x17b   : > { %4112 = vmatpush.bf16.msrb.mxu2 %v6854_v32  ;;  %v8437_v32 = vld [vmem:[#allocation1 + $0x3f] sm:$0xff]  ;;  %v6239_v47 = vld [vmem:[%s8079_s15 + $0x674] sm:$0xf0]  ;;  %v7366_v54 = vld [vmem:[%s8079_s15 + $0x2a4] sm:$0xf] }
 0x17c   : > { %4125 = vmatpush.bf16.msrb.mxu3 %v7078_v36  ;;  %v6046_v36 = vor.u32 %v7436_v24, %v6043_v26  ;;  %v5763_v3 = vld [vmem:[%s8079_s15 + $0x2bc] sm:$0xf0]  ;;  %v7478_v17 = vld [vmem:[%s8079_s15 + $0x624] sm:$0xf]  ;;  %v7303_v44 = vld [vmem:[%s8079_s15 + $0xac] sm:$0xf] }
 0x17d   : > { %4087 = vmatpush.bf16.msrb.mxu0 %v6378_v45  ;;  %v7429_v45 = vld [vmem:[%s8079_s15 + $0x49c] sm:$0xf]  ;;  %v5987_v56 = vld [vmem:[%s8079_s15 + $0x47c] sm:$0xf0]  ;;  %v5766_v61 = vor.u32 %v7366_v54, %v5763_v3  ;;  %v7359_v0 = vld [vmem:[%s8079_s15 + $0x26c] sm:$0xf] }
 0x17e   : > { %4100 = vmatpush.bf16.msrb.mxu1 %v6602_v40  ;;  %v6015_v40 = vld [vmem:[%s8079_s15 + $0x4b4] sm:$0xf0]  ;;  %v5735_v59 = vld [vmem:[%s8079_s15 + $0x284] sm:$0xf0]  ;;  %v7415_v1 = vld [vmem:[%s8079_s15 + $0x42c] sm:$0xf] }
 0x17f   : > { %4113 = vmatpush.bf16.msrb.mxu2 %v6826_v46  ;;  %v7485_v46 = vld [vmem:[%s8079_s15 + $0x65c] sm:$0xf]  ;;  %v5959_v6 = vld [vmem:[%s8079_s15 + $0x444] sm:$0xf0]  ;;  %v7471_v5 = vld [vmem:[%s8079_s15 + $0x5ec] sm:$0xf]  ;;  %v5738_v2 = vor.u32 %v7359_v0, %v5735_v59 }
 0x180   : > { %4126 = vmatpush.bf16.msrb.mxu3 %v7050_v43  ;;  %v6018_v43 = vor.u32 %v7429_v45, %v6015_v40  ;;  %v6242_v55 = vor.u32 %v7485_v46, %v6239_v47  ;;  %v5962_v7 = vor.u32 %v7415_v1, %v5959_v6  ;;  %v7352_v13 = vld [vmem:[%s8079_s15 + $0x234] sm:$0xf]  ;;  %v6155_v11 = vld [vmem:[%s8079_s15 + $0x5cc] sm:$0xf0]  ;;  %v7289_v22 = vld [vmem:[%s8079_s15 + $0x3c] sm:$0xf] }
 0x181   : > { %4088 = vmatpush.bf16.msrb.mxu0 %v6350_v28  ;;  %v7422_v28 = vld [vmem:[%s8079_s15 + $0x464] sm:$0xf]  ;;  %v5455_v24 = vld [vmem:[%s8079_s15 + $0x54] sm:$0xf0]  ;;  %v7345_v26 = vld [vmem:[%s8079_s15 + $0x1fc] sm:$0xf] }
 0x182   : > { %4101 = vmatpush.bf16.msrb.mxu1 %v6574_v57  ;;  %v6211_v57 = vld [vmem:[%s8079_s15 + $0x63c] sm:$0xf0]  ;;  %v5990_v39 = vor.u32 %v7422_v28, %v5987_v56  ;;  %v5679_v23 = vld [vmem:[%s8079_s15 + $0x214] sm:$0xf0]  ;;  %v5458_v53 = vor.u32 %v7289_v22, %v5455_v24  ;;  %v7282_v38 = vld [vmem:[%s8079_s15 + $0x4] sm:$0xf] }
 0x183   : > { %4114 = vmatpush.bf16.msrb.mxu2 %v6798_v62  ;;  %v5542_v62 = vor.u32 %v7310_v51, %v5539_v52  ;;  %v6214_v25 = vor.u32 %v7478_v17, %v6211_v57  ;;  %v6127_v37 = vld [vmem:[%s8079_s15 + $0x594] sm:$0xf0]  ;;  %v5682_v42 = vor.u32 %v7345_v26, %v5679_v23  ;;  %v7338_v40 = vld [vmem:[%s8079_s15 + $0x1c4] sm:$0xf]  ;;  %v5651_v46 = vld [vmem:[%s8079_s15 + $0x1dc] sm:$0xf0] }
 0x184   : > { %4127 = vmatpush.bf16.msrb.mxu3 %v7022_v63  ;;  %v5511_v63 = vld [vmem:[%s8079_s15 + $0xc4] sm:$0xf0]  ;;  %v7394_v47 = vld [vmem:[%s8079_s15 + $0x384] sm:$0xf]  ;;  %v6099_v51 = vld [vmem:[%s8079_s15 + $0x55c] sm:$0xf0]  ;;  %v5654_v57 = vor.u32 %v7338_v40, %v5651_v46 }
 0x185   : > { %4089 = vmatpush.bf16.msrb.mxu0 %v6322_v9  ;;  %v6183_v9 = vld [vmem:[%s8079_s15 + $0x604] sm:$0xf0]  ;;  %v5514_v10 = vor.u32 %v7303_v44, %v5511_v63  ;;  %v7555_v52 = vld [vmem:[%s8079_s15 + $0x88c] sm:$0xf]  ;;  %v7548_v59 = vld [vmem:[%s8079_s15 + $0x854] sm:$0xf] }
 0x186   : > { %4102 = vmatpush.bf16.msrb.mxu1 %v6546_v29  ;;  %v7296_v29 = vld [vmem:[%s8079_s15 + $0x74] sm:$0xf]  ;;  %v6186_v15 = vor.u32 %v7471_v5, %v6183_v9  ;;  %v6519_v54 = vld [vmem:[%s8079_s15 + $0x8a4] sm:$0xf0]  ;;  %v7667_v56 = vld [vmem:[%s8079_s15 + $0xc0c] sm:$0xf] }
 0x187   : > { %4115 = vmatpush.bf16.msrb.mxu2 %v6770_v12  ;;  %v5483_v12 = vld [vmem:[%s8079_s15 + $0x8c] sm:$0xf0]  ;;  %v6743_v28 = vld [vmem:[%s8079_s15 + $0xa64] sm:$0xf0]  ;;  %v6522_v63 = vor.u32 %v7555_v52, %v6519_v54  ;;  %v7604_v6 = vld [vmem:[%s8079_s15 + $0xa14] sm:$0xf] }
 0x188   : > { %4128 = vmatpush.bf16.msrb.mxu3 %v6994_v58  ;;  %4090 = vmatmul.bf16.vlgmr.msrb.gmra.mxu0 %v8435_v31  ;;  %v5707_v58 = vld [vmem:[%s8079_s15 + $0x24c] sm:$0xf0]  ;;  %v5486_v20 = vor.u32 %v7296_v29, %v5483_v12  ;;  %v6967_v17 = vld [vmem:[%s8079_s15 + $0xc24] sm:$0xf0]  ;;  %v7135_v22 = vld [vmem:[%s8079_s15 + $0xd74] sm:$0xf0] }
 0x189   : > { %4134 = vmatpush.bf16.msra.mxu0 %v5626_v60  ;;  %4103 = vmatmul.bf16.vlgmr.msrb.gmra.mxu1 %v8439_v34  ;;  %v7408_v60 = vld [vmem:[%s8079_s15 + $0x3f4] sm:$0xf]  ;;  %v5710_v14 = vor.u32 %v7352_v13, %v5707_v58  ;;  %v6491_v1 = vld [vmem:[%s8079_s15 + $0x86c] sm:$0xf0]  ;;  %v7541_v58 = vld [vmem:[%s8079_s15 + $0x81c] sm:$0xf] }
 0x18a   : > { %4147 = vmatpush.bf16.msra.mxu1 %v5850_v4  ;;  %4116 = vmatmul.bf16.vlgmr.msrb.gmra.mxu2 %v8431_v27  ;;  %v5931_v4 = vld [vmem:[%s8079_s15 + $0x40c] sm:$0xf0]  ;;  %v6494_v12 = vor.u32 %v7548_v59, %v6491_v1  ;;  %v6435_v23 = vld [vmem:[%s8079_s15 + $0x7fc] sm:$0xf0]  ;;  %v7583_v40 = vld [vmem:[%s8079_s15 + $0x96c] sm:$0xf] }
 0x18b   : > { %4160 = vmatpush.bf16.msra.mxu2 %v6074_v19  ;;  %4129 = vmatmul.bf16.vlgmr.msrb.gmra.mxu3 %v8437_v32  ;;  %v7464_v19 = vld [vmem:[%s8079_s15 + $0x5b4] sm:$0xf]  ;;  %v6715_v9 = vld [vmem:[%s8079_s15 + $0xa2c] sm:$0xf0]  ;;  %v7513_v59 = vld [vmem:[%s8079_s15 + $0x73c] sm:$0xf] }
 0x18c   : > { %4173 = vmatpush.bf16.msra.mxu3 %v6298_v21  ;;  %v5934_v21 = vor.u32 %v7408_v60, %v5931_v4  ;;  %v6158_v30 = vor.u32 %v7464_v19, %v6155_v11  ;;  %v7163_v29 = vld [vmem:[%s8079_s15 + $0xdac] sm:$0xf0]  ;;  %v6718_v13 = vor.u32 %v7604_v6, %v6715_v9  ;;  %v6463_v60 = vld [vmem:[%s8079_s15 + $0x834] sm:$0xf0]  ;;  %v7597_v4 = vld [vmem:[%s8079_s15 + $0x9dc] sm:$0xf] }
 0x18d   : > { %4135 = vmatpush.bf16.msra.mxu0 %v5598_v33  ;;  %v7401_v33 = vld [vmem:[%s8079_s15 + $0x3bc] sm:$0xf]  ;;  %v6687_v11 = vld [vmem:[%s8079_s15 + $0x9f4] sm:$0xf0]  ;;  %v6466_v24 = vor.u32 %v7541_v58, %v6463_v60 }
 0x18e   : > { %4148 = vmatpush.bf16.msra.mxu1 %v5822_v35  ;;  %v5903_v35 = vld [vmem:[%s8079_s15 + $0x3d4] sm:$0xf0]  ;;  %v6690_v26 = vor.u32 %v7597_v4, %v6687_v11  ;;  %v7569_v6 = vld [vmem:[%s8079_s15 + $0x8fc] sm:$0xf]  ;;  %v7562_v4 = vld [vmem:[%s8079_s15 + $0x8c4] sm:$0xf] }
 0x18f   : > { %4161 = vmatpush.bf16.msra.mxu2 %v6046_v36  ;;  %v7457_v36 = vld [vmem:[%s8079_s15 + $0x57c] sm:$0xf]  ;;  %v5906_v45 = vor.u32 %v7401_v33, %v5903_v35  ;;  %v7590_v33 = vld [vmem:[%s8079_s15 + $0x9a4] sm:$0xf]  ;;  %v6659_v35 = vld [vmem:[%s8079_s15 + $0x9bc] sm:$0xf0] }
 0x190   : > { %4174 = vmatpush.bf16.msra.mxu3 %v6270_v41  ;;  %v5427_v41 = vld [vmem:[%s8079_s15 + $0x1c] sm:$0xf0]  ;;  %v6351_v1 = vld [vmem:[%s8079_s15 + $0x754] sm:$0xf0]  ;;  %v7618_v11 = vld [vmem:[%s8079_s15 + $0xa84] sm:$0xf] }
 0x191   : > { %4136 = vmatpush.bf16.msra.mxu0 %v5570_v48  ;;  %v6130_v48 = vor.u32 %v7457_v36, %v6127_v37  ;;  %v5430_v3 = vor.u32 %v7282_v38, %v5427_v41  ;;  %v6883_v36 = vld [vmem:[%s8079_s15 + $0xb7c] sm:$0xf0]  ;;  %v7702_v37 = vld [vmem:[%s8079_s15 + $0xd24] sm:$0xf]  ;;  %v6662_v38 = vor.u32 %v7590_v33, %v6659_v35  ;;  %v6575_v9 = vld [vmem:[%s8079_s15 + $0x914] sm:$0xf0] }
 0x192   : > { %4149 = vmatpush.bf16.msra.mxu1 %v5794_v49  ;;  %v5875_v49 = vld [vmem:[%s8079_s15 + $0x39c] sm:$0xf0]  ;;  %v6578_v58 = vor.u32 %v7569_v6, %v6575_v9  ;;  %v6077_v33 = vld [vmem:[%s8079_s15 + $0x510] sm:$0xf]  ;;  %v5993_v6 = vld [vmem:[%s8079_s15 + $0x468] sm:$0xf] }
 0x193   : > { %4162 = vmatpush.bf16.msra.mxu2 %v6018_v43  ;;  %v7450_v43 = vld [vmem:[%s8079_s15 + $0x544] sm:$0xf] }
 0x194   : > { %4175 = vmatpush.bf16.msra.mxu3 %v6242_v55  ;;  %v7611_v55 = vld [vmem:[%s8079_s15 + $0xa4c] sm:$0xf]  ;;  %v6102_v44 = vor.u32 %v7450_v43, %v6099_v51  ;;  %v7079_v51 = vld [vmem:[%s8079_s15 + $0xd04] sm:$0xf0]  ;;  %v7482_v9 = vld [vmem:[%s8079_s15 + $0x640] sm:$0xf0] }
 0x195   : > { %4137 = vmatpush.bf16.msra.mxu0 %v5542_v62  ;;  %v5878_v62 = vor.u32 %v7394_v47, %v5875_v49  ;;  %v6746_v0 = vor.u32 %v7611_v55, %v6743_v28  ;;  %v6631_v47 = vld [vmem:[%s8079_s15 + $0x984] sm:$0xf0]  ;;  %v7695_v43 = vld [vmem:[%s8079_s15 + $0xcec] sm:$0xf]  ;;  %v6379_v28 = vld [vmem:[%s8079_s15 + $0x78c] sm:$0xf0] }
 0x196   : > { %4150 = vmatpush.bf16.msra.mxu1 %v5766_v61  ;;  %v7723_v61 = vld [vmem:[%s8079_s15 + $0xdcc] sm:$0xf]  ;;  %v6855_v49 = vld [vmem:[%s8079_s15 + $0xb44] sm:$0xf0]  ;;  %v6634_v54 = vor.u32 %v7583_v40, %v6631_v47  ;;  %v5825_v40 = vld [vmem:[%s8079_s15 + $0x318] sm:$0xf] }
 0x197   : > { %4163 = vmatpush.bf16.msra.mxu2 %v5990_v39  ;;  %v7191_v39 = vld [vmem:[%s8079_s15 + $0xde4] sm:$0xf0]  ;;  %v7384_v47 = vld [vmem:[%s8079_s15 + $0x330] sm:$0xf0] }
 0x198   : > { %4176 = vmatpush.bf16.msra.mxu3 %v6214_v25  ;;  %v6970_v25 = vor.u32 %v7667_v56, %v6967_v17  ;;  %v7194_v5 = vor.u32 %v7723_v61, %v7191_v39  ;;  %v7576_v56 = vld [vmem:[%s8079_s15 + $0x934] sm:$0xf]  ;;  %v7082_v17 = vor.u32 %v7695_v43, %v7079_v51  ;;  %v6827_v61 = vld [vmem:[%s8079_s15 + $0xb0c] sm:$0xf0]  ;;  %v6273_v43 = vld [vmem:[%s8079_s15 + $0x698] sm:$0xf] }
 0x199   : > { %4138 = vmatpush.bf16.msra.mxu0 %v5514_v10  ;;  %v7660_v10 = vld [vmem:[%s8079_s15 + $0xbd4] sm:$0xf] }
 0x19a   : > { %4151 = vmatpush.bf16.msra.mxu1 %v5738_v2  ;;  %v6939_v2 = vld [vmem:[%s8079_s15 + $0xbec] sm:$0xf0]  ;;  %v7688_v39 = vld [vmem:[%s8079_s15 + $0xcb4] sm:$0xf] }
 0x19b   : > { %4164 = vmatpush.bf16.msra.mxu2 %v5962_v7  ;;  %v7716_v7 = vld [vmem:[%s8079_s15 + $0xd94] sm:$0xf] }
 0x19c   : > { %4177 = vmatpush.bf16.msra.mxu3 %v6186_v15  ;;  %v6942_v15 = vor.u32 %v7660_v10, %v6939_v2  ;;  %v7166_v19 = vor.u32 %v7716_v7, %v7163_v29  ;;  %v7625_v10 = vld [vmem:[%s8079_s15 + $0xabc] sm:$0xf]  ;;  %v6799_v2 = vld [vmem:[%s8079_s15 + $0xad4] sm:$0xf0]  ;;  %v7496_v51 = vld [vmem:[%s8079_s15 + $0x6b0] sm:$0xf0] }
 0x19d   : > { %4139 = vmatpush.bf16.msra.mxu0 %v5486_v20  ;;  %v7653_v20 = vld [vmem:[%s8079_s15 + $0xb9c] sm:$0xf]  ;;  %v7023_v29 = vld [vmem:[%s8079_s15 + $0xc94] sm:$0xf0]  ;;  %v6802_v60 = vor.u32 %v7625_v10, %v6799_v2 }
 0x19e   : > { %4152 = vmatpush.bf16.msra.mxu1 %v5710_v14  ;;  %v6911_v14 = vld [vmem:[%s8079_s15 + $0xbb4] sm:$0xf0]  ;;  %v7681_v7 = vld [vmem:[%s8079_s15 + $0xc7c] sm:$0xf] }
 0x19f   : > { %4165 = vmatpush.bf16.msra.mxu2 %v5934_v21  ;;  %v7709_v21 = vld [vmem:[%s8079_s15 + $0xd5c] sm:$0xf] }
 0x1a0   : > { %4178 = vmatpush.bf16.msra.mxu3 %v6158_v30  ;;  %v6914_v30 = vor.u32 %v7653_v20, %v6911_v14  ;;  %v7026_v20 = vor.u32 %v7681_v7, %v7023_v29  ;;  %v6771_v14 = vld [vmem:[%s8079_s15 + $0xa9c] sm:$0xf0]  ;;  %v5517_v29 = vld [vmem:[%s8079_s15 + $0xb0] sm:$0xf] }
 0x1a1   : > { %4140 = vmatpush.bf16.msra.mxu0 %v5458_v53 }
 0x1a2   : > { %4153 = vmatpush.bf16.msra.mxu1 %v5682_v42  ;;  %v7527_v42 = vld [vmem:[%s8079_s15 + $0x7ac] sm:$0xf] }
 0x1a3   : > { %4166 = vmatpush.bf16.msra.mxu2 %v5906_v45  ;;  %v6407_v45 = vld [vmem:[%s8079_s15 + $0x7c4] sm:$0xf0] }
 0x1a4   : > { %4179 = vmatpush.bf16.msra.mxu3 %v6130_v48  ;;  %v7639_v48 = vld [vmem:[%s8079_s15 + $0xb2c] sm:$0xf]  ;;  %v6410_v52 = vor.u32 %v7527_v42, %v6407_v45  ;;  %v5601_v42 = vld [vmem:[%s8079_s15 + $0x158] sm:$0xf]  ;;  %v7328_v45 = vld [vmem:[%s8079_s15 + $0x170] sm:$0xf0] }
 0x1a5   : > { %4141 = vmatpush.bf16.msra.mxu0 %v5430_v3  ;;  %v6858_v55 = vor.u32 %v7639_v48, %v6855_v49  ;;  %v7520_v3 = vld [vmem:[%s8079_s15 + $0x774] sm:$0xf]  ;;  %v6049_v48 = vld [vmem:[%s8079_s15 + $0x4d8] sm:$0xf] }
 0x1a6   : > { %4154 = vmatpush.bf16.msra.mxu1 %v5654_v57  ;;  %v6603_v57 = vld [vmem:[%s8079_s15 + $0x94c] sm:$0xf0]  ;;  %v7440_v49 = vld [vmem:[%s8079_s15 + $0x4f0] sm:$0xf0] }
 0x1a7   : > { %4167 = vmatpush.bf16.msra.mxu2 %v5878_v62  ;;  %v7632_v62 = vld [vmem:[%s8079_s15 + $0xaf4] sm:$0xf] }
 0x1a8   : > { %4180 = vmatpush.bf16.msra.mxu3 %v6102_v44  ;;  %4142 = vmatmul.bf16.vlgmr.msra.gmra.mxu0 %v8375_v16  ;;  %v7138_v16 = vor.u32 %v7709_v21, %v7135_v22  ;;  %v7051_v44 = vld [vmem:[%s8079_s15 + $0xccc] sm:$0xf0]  ;;  %v7674_v21 = vld [vmem:[%s8079_s15 + $0xc44] sm:$0xf]  ;;  %v6995_v22 = vld [vmem:[%s8079_s15 + $0xc5c] sm:$0xf0] }
 0x1a9   : > { %4186 = vmatpush.bf16.msrb.mxu0 %v6522_v63  ;;  %4155 = vmatmul.bf16.vlgmr.msra.gmra.mxu1 %v8380_v18  ;;  %v7107_v18 = vld [vmem:[%s8079_s15 + $0xd3c] sm:$0xf0]  ;;  %v6382_v63 = vor.u32 %v7520_v3, %v6379_v28  ;;  %v7321_v28 = vld [vmem:[%s8079_s15 + $0x138] sm:$0xf0] }
 0x1aa   : > { %4199 = vmatpush.bf16.msrb.mxu1 %v6746_v0  ;;  %4168 = vmatmul.bf16.vlgmr.msra.gmra.mxu2 %v8373_v8  ;;  %v7534_v8 = vld [vmem:[%s8079_s15 + $0x7e4] sm:$0xf]  ;;  %v7110_v46 = vor.u32 %v7702_v37, %v7107_v18  ;;  %v6606_v0 = vor.u32 %v7576_v56, %v6603_v57  ;;  %v7503_v37 = vld [vmem:[%s8079_s15 + $0x6e8] sm:$0xf0]  ;;  %v6998_v18 = vor.u32 %v7674_v21, %v6995_v22  ;;  %v5573_v3 = vld [vmem:[%s8079_s15 + $0x120] sm:$0xf] }
 0x1ab   : > { %4212 = vmatpush.bf16.msrb.mxu2 %v6970_v25  ;;  %4181 = vmatmul.bf16.vlgmr.msra.gmra.mxu3 %v8378_v50  ;;  %v7646_v50 = vld [vmem:[%s8079_s15 + $0xb64] sm:$0xf]  ;;  %v6438_v53 = vor.u32 %v7534_v8, %v6435_v23  ;;  %v6830_v25 = vor.u32 %v7632_v62, %v6827_v61  ;;  %v7391_v23 = vld [vmem:[%s8079_s15 + $0x368] sm:$0xf0]  ;;  %v5797_v56 = vld [vmem:[%s8079_s15 + $0x2e0] sm:$0xf] }
 0x1ac   : > { %4225 = vmatpush.bf16.msrb.mxu3 %v7194_v5  ;;  %v6886_v41 = vor.u32 %v7646_v50, %v6883_v36  ;;  %v7054_v5 = vor.u32 %v7688_v39, %v7051_v44  ;;  %v6774_v50 = vor.u32 %v7618_v11, %v6771_v14  ;;  %v6301_v36 = vld [vmem:[%s8079_s15 + $0x6d0] sm:$0xf]  ;;  %v7377_v57 = vld [vmem:[%s8079_s15 + $0x2f8] sm:$0xf0]  ;;  %v6021_v62 = vld [vmem:[%s8079_s15 + $0x4a0] sm:$0xf] }
 0x1ad   : > { %4187 = vmatpush.bf16.msrb.mxu0 %v6494_v12  ;;  %v6354_v12 = vor.u32 %v7513_v59, %v6351_v1  ;;  %v7433_v61 = vld [vmem:[%s8079_s15 + $0x4b8] sm:$0xf0]  ;;  %v6245_v39 = vld [vmem:[%s8079_s15 + $0x660] sm:$0xf]  ;;  %v5769_v59 = vld [vmem:[%s8079_s15 + $0x2a8] sm:$0xf] }
 0x1ae   : > { %4200 = vmatpush.bf16.msrb.mxu1 %v6718_v13  ;;  %v7506_v13 = vld [vmem:[%s8079_s15 + $0x704] sm:$0xf]  ;;  %v7489_v44 = vld [vmem:[%s8079_s15 + $0x678] sm:$0xf0]  ;;  %v7475_v11 = vld [vmem:[%s8079_s15 + $0x608] sm:$0xf0] }
 0x1af   : > { %4213 = vmatpush.bf16.msrb.mxu2 %v6942_v15  ;;  %v6323_v15 = vld [vmem:[%s8079_s15 + $0x71c] sm:$0xf0]  ;;  %v7370_v1 = vld [vmem:[%s8079_s15 + $0x2c0] sm:$0xf0]  ;;  %v5489_v22 = vld [vmem:[%s8079_s15 + $0x78] sm:$0xf] }
 0x1b0   : > { %4226 = vmatpush.bf16.msrb.mxu3 %v7166_v19  ;;  %v6547_v19 = vld [vmem:[%s8079_s15 + $0x8dc] sm:$0xf0]  ;;  %v6326_v8 = vor.u32 %v7506_v13, %v6323_v15  ;;  %v5770_v2 = vor.u32 %v7370_v1, %v5769_v59  ;;  %v5741_v13 = vld [vmem:[%s8079_s15 + $0x270] sm:$0xf] }
 0x1b1   : > { %4188 = vmatpush.bf16.msrb.mxu0 %v6466_v24  ;;  %v5629_v24 = vld [vmem:[%s8079_s15 + $0x190] sm:$0xf]  ;;  %v6550_v35 = vor.u32 %v7562_v4, %v6547_v19  ;;  %v7419_v4 = vld [vmem:[%s8079_s15 + $0x448] sm:$0xf0] }
 0x1b2   : > { %4201 = vmatpush.bf16.msrb.mxu1 %v6690_v26  ;;  %v7335_v26 = vld [vmem:[%s8079_s15 + $0x1a8] sm:$0xf0]  ;;  %v6189_v19 = vld [vmem:[%s8079_s15 + $0x5f0] sm:$0xf] }
 0x1b3   : > { %4214 = vmatpush.bf16.msrb.mxu2 %v6914_v30  ;;  %v5853_v30 = vld [vmem:[%s8079_s15 + $0x350] sm:$0xf] }
 0x1b4   : > { %4227 = vmatpush.bf16.msrb.mxu3 %v7138_v16  ;;  %v7447_v16 = vld [vmem:[%s8079_s15 + $0x528] sm:$0xf0]  ;;  %v7197_v59 = vld [vmem:[%s8079_s15 + $0xdd0] sm:$0xf] }
 0x1b5   : > { %4189 = vmatpush.bf16.msrb.mxu0 %v6438_v53  ;;  %v5630_v53 = vor.u32 %v7335_v26, %v5629_v24  ;;  %v7300_v24 = vld [vmem:[%s8079_s15 + $0x90] sm:$0xf0]  ;;  %v5713_v26 = vld [vmem:[%s8079_s15 + $0x238] sm:$0xf] }
 0x1b6   : > { %4202 = vmatpush.bf16.msrb.mxu1 %v6662_v38  ;;  %v5854_v38 = vor.u32 %v7391_v23, %v5853_v30  ;;  %v6190_v30 = vor.u32 %v7475_v11, %v6189_v19  ;;  %v5937_v23 = vld [vmem:[%s8079_s15 + $0x3f8] sm:$0xf]  ;;  %v6469_v11 = vld [vmem:[%s8079_s15 + $0x820] sm:$0xf] }
 0x1b7   : > { %4215 = vmatpush.bf16.msrb.mxu2 %v6886_v41  ;;  %v6078_v41 = vor.u32 %v7447_v16, %v6077_v33  ;;  %v7412_v33 = vld [vmem:[%s8079_s15 + $0x410] sm:$0xf0]  ;;  %v6161_v16 = vld [vmem:[%s8079_s15 + $0x5b8] sm:$0xf] }
 0x1b8   : > { %4228 = vmatpush.bf16.msrb.mxu3 %v7110_v46  ;;  %v6302_v46 = vor.u32 %v7503_v37, %v6301_v36  ;;  %v5938_v37 = vor.u32 %v7412_v33, %v5937_v23  ;;  %v7713_v23 = vld [vmem:[%s8079_s15 + $0xd78] sm:$0xf0]  ;;  %v8656_v33 = vld [vmem:[#allocation1] sm:$0xff] }
 0x1b9   : > { %4190 = vmatpush.bf16.msrb.mxu0 %v6410_v52  ;;  %v5602_v52 = vor.u32 %v7328_v45, %v5601_v42  ;;  %v7349_v42 = vld [vmem:[%s8079_s15 + $0x218] sm:$0xf0]  ;;  %v5909_v45 = vld [vmem:[%s8079_s15 + $0x3c0] sm:$0xf] }
 0x1ba   : > { %4203 = vmatpush.bf16.msrb.mxu1 %v6634_v54  ;;  %v5826_v54 = vor.u32 %v7384_v47, %v5825_v40  ;;  %v7405_v40 = vld [vmem:[%s8079_s15 + $0x3d8] sm:$0xf0] }
 0x1bb   : > { %4216 = vmatpush.bf16.msrb.mxu2 %v6858_v55  ;;  %v6050_v55 = vor.u32 %v7440_v49, %v6049_v48  ;;  %v7461_v47 = vld [vmem:[%s8079_s15 + $0x598] sm:$0xf0]  ;;  %v5433_v49 = vld [vmem:[%s8079_s15 + $0x8] sm:$0xf] }
 0x1bc   : > { %4229 = vmatpush.bf16.msrb.mxu3 %v7082_v17  ;;  %v6274_v17 = vor.u32 %v7496_v51, %v6273_v43  ;;  %v7286_v43 = vld [vmem:[%s8079_s15 + $0x20] sm:$0xf0] }
 0x1bd   : > { %4191 = vmatpush.bf16.msrb.mxu0 %v6382_v63  ;;  %v5798_v63 = vor.u32 %v7377_v57, %v5797_v56  ;;  %v7398_v56 = vld [vmem:[%s8079_s15 + $0x3a0] sm:$0xf0] }
 0x1be   : > { %4204 = vmatpush.bf16.msrb.mxu1 %v6606_v0  ;;  %v6022_v0 = vor.u32 %v7433_v61, %v6021_v62  ;;  %v7454_v57 = vld [vmem:[%s8079_s15 + $0x560] sm:$0xf0]  ;;  %v6525_v62 = vld [vmem:[%s8079_s15 + $0x890] sm:$0xf]  ;;  %v7559_v61 = vld [vmem:[%s8079_s15 + $0x8a8] sm:$0xf0] }
 0x1bf   : > { %4217 = vmatpush.bf16.msrb.mxu2 %v6830_v25  ;;  %v5545_v25 = vld [vmem:[%s8079_s15 + $0xe8] sm:$0xf] }
 0x1c0   : > { %4230 = vmatpush.bf16.msrb.mxu3 %v7054_v5  ;;  %v7426_v5 = vld [vmem:[%s8079_s15 + $0x480] sm:$0xf0] }
 0x1c1   : > { %4192 = vmatpush.bf16.msrb.mxu0 %v6354_v12  ;;  %v5994_v7 = vor.u32 %v7426_v5, %v5993_v6  ;;  %v7307_v12 = vld [vmem:[%s8079_s15 + $0xc8] sm:$0xf0]  ;;  %v6526_v6 = vor.u32 %v7559_v61, %v6525_v62 }
 0x1c2   : > { %4205 = vmatpush.bf16.msrb.mxu1 %v6578_v58  ;;  %v7363_v58 = vld [vmem:[%s8079_s15 + $0x288] sm:$0xf0] }
 0x1c3   : > { %4218 = vmatpush.bf16.msrb.mxu2 %v6802_v60  ;;  %v5965_v60 = vld [vmem:[%s8079_s15 + $0x430] sm:$0xf]  ;;  %v5742_v14 = vor.u32 %v7363_v58, %v5741_v13  ;;  %v7664_v13 = vld [vmem:[%s8079_s15 + $0xbf0] sm:$0xf0] }
 0x1c4   : > { %4231 = vmatpush.bf16.msrb.mxu3 %v7026_v20  ;;  %v5518_v20 = vor.u32 %v7307_v12, %v5517_v29  ;;  %v5966_v21 = vor.u32 %v7419_v4, %v5965_v60  ;;  %v7608_v29 = vld [vmem:[%s8079_s15 + $0xa30] sm:$0xf0]  ;;  %v6945_v12 = vld [vmem:[%s8079_s15 + $0xbd8] sm:$0xf] }
 0x1c5   : > { %4193 = vmatpush.bf16.msrb.mxu0 %v6326_v8  ;;  %v7356_v8 = vld [vmem:[%s8079_s15 + $0x250] sm:$0xf0]  ;;  %v6946_v19 = vor.u32 %v7664_v13, %v6945_v12 }
 0x1c6   : > { %4206 = vmatpush.bf16.msrb.mxu1 %v6550_v35  ;;  %v7468_v35 = vld [vmem:[%s8079_s15 + $0x5d0] sm:$0xf0]  ;;  %v5714_v36 = vor.u32 %v7356_v8, %v5713_v26  ;;  %v7657_v26 = vld [vmem:[%s8079_s15 + $0xbb8] sm:$0xf0]  ;;  %v7141_v8 = vld [vmem:[%s8079_s15 + $0xd60] sm:$0xf] }
 0x1c7   : > { %4219 = vmatpush.bf16.msrb.mxu2 %v6774_v50  ;;  %v5490_v50 = vor.u32 %v7300_v24, %v5489_v22  ;;  %v7720_v58 = vld [vmem:[%s8079_s15 + $0xdb0] sm:$0xf0]  ;;  %v7601_v22 = vld [vmem:[%s8079_s15 + $0x9f8] sm:$0xf0]  ;;  %v6917_v24 = vld [vmem:[%s8079_s15 + $0xba0] sm:$0xf] }
 0x1c8   : > { %4232 = vmatpush.bf16.msrb.mxu3 %v6998_v18  ;;  %4194 = vmatmul.bf16.vlgmr.msrb.gmra.mxu0 %v8435_v31  ;;  %v7314_v31 = vld [vmem:[%s8079_s15 + $0x100] sm:$0xf0]  ;;  %v5461_v18 = vld [vmem:[%s8079_s15 + $0x40] sm:$0xf] }
 0x1c9   : > { %4238 = vmatpush.bf16.msra.mxu0 %v5630_v53  ;;  %4207 = vmatmul.bf16.vlgmr.msrb.gmra.mxu1 %v8439_v34  ;;  %v6217_v34 = vld [vmem:[%s8079_s15 + $0x628] sm:$0xf]  ;;  %v5546_v10 = vor.u32 %v7314_v31, %v5545_v25  ;;  %v7293_v53 = vld [vmem:[%s8079_s15 + $0x58] sm:$0xf0] }
 0x1ca   : > { %4251 = vmatpush.bf16.msra.mxu1 %v5854_v38  ;;  %4220 = vmatmul.bf16.vlgmr.msrb.gmra.mxu2 %v8431_v27  ;;  %v5574_v27 = vor.u32 %v7321_v28, %v5573_v3  ;;  %v6218_v15 = vor.u32 %v7482_v9, %v6217_v34  ;;  %v5685_v38 = vld [vmem:[%s8079_s15 + $0x200] sm:$0xf]  ;;  %v5462_v48 = vor.u32 %v7293_v53, %v5461_v18  ;;  %v5881_v3 = vld [vmem:[%s8079_s15 + $0x388] sm:$0xf]  ;;  %v6497_v9 = vld [vmem:[%s8079_s15 + $0x858] sm:$0xf] }
 0x1cb   : > { %4264 = vmatpush.bf16.msra.mxu2 %v6078_v41  ;;  %4233 = vmatmul.bf16.vlgmr.msrb.gmra.mxu3 %v8437_v32  ;;  %v6246_v32 = vor.u32 %v7489_v44, %v6245_v39  ;;  %v6162_v41 = vor.u32 %v7468_v35, %v6161_v16  ;;  %v5686_v51 = vor.u32 %v7349_v42, %v5685_v38  ;;  %v6749_v39 = vld [vmem:[%s8079_s15 + $0xa50] sm:$0xf]  ;;  %v6441_v18 = vld [vmem:[%s8079_s15 + $0x7e8] sm:$0xf]  ;;  %v7538_v53 = vld [vmem:[%s8079_s15 + $0x800] sm:$0xf0] }
 0x1cc   : > { %4277 = vmatpush.bf16.msra.mxu3 %v6302_v46  ;;  %v6133_v46 = vld [vmem:[%s8079_s15 + $0x580] sm:$0xf]  ;;  %v5434_v44 = vor.u32 %v7286_v43, %v5433_v49  ;;  %v5882_v31 = vor.u32 %v7398_v56, %v5881_v3  ;;  %v8659_v16 = vld [vmem:[#allocation1 + $0x1b] sm:$0xff]  ;;  %v7594_v42 = vld [vmem:[%s8079_s15 + $0x9c0] sm:$0xf0] }
 0x1cd   : > { %4239 = vmatpush.bf16.msra.mxu0 %v5602_v52  ;;  %v5910_v52 = vor.u32 %v7405_v40, %v5909_v45  ;;  %v6134_v28 = vor.u32 %v7461_v47, %v6133_v46  ;;  %v6665_v38 = vld [vmem:[%s8079_s15 + $0x9a8] sm:$0xf]  ;;  %v7650_v40 = vld [vmem:[%s8079_s15 + $0xb80] sm:$0xf0]  ;;  %v7587_v3 = vld [vmem:[%s8079_s15 + $0x988] sm:$0xf0] }
 0x1ce   : > { %4252 = vmatpush.bf16.msra.mxu1 %v5826_v54  ;;  %v5657_v54 = vld [vmem:[%s8079_s15 + $0x1c8] sm:$0xf]  ;;  %v7706_v47 = vld [vmem:[%s8079_s15 + $0xd40] sm:$0xf0]  ;;  %v6666_v49 = vor.u32 %v7594_v42, %v6665_v38  ;;  %v7643_v56 = vld [vmem:[%s8079_s15 + $0xb48] sm:$0xf0] }
 0x1cf   : > { %4265 = vmatpush.bf16.msra.mxu2 %v6050_v55  ;;  %v7342_v55 = vld [vmem:[%s8079_s15 + $0x1e0] sm:$0xf0]  ;;  %v6889_v45 = vld [vmem:[%s8079_s15 + $0xb68] sm:$0xf]  ;;  %v5631_v42 = vld [vmem:[%s8079_s15 + $0x1ac] sm:$0xf0] }
 0x1d0   : > { %4278 = vmatpush.bf16.msra.mxu3 %v6274_v17  ;;  %v6105_v17 = vld [vmem:[%s8079_s15 + $0x548] sm:$0xf]  ;;  %v5658_v25 = vor.u32 %v7342_v55, %v5657_v54  ;;  %v6890_v43 = vor.u32 %v7650_v40, %v6889_v45  ;;  %v6637_v54 = vld [vmem:[%s8079_s15 + $0x970] sm:$0xf]  ;;  %v7388_v45 = vld [vmem:[%s8079_s15 + $0x354] sm:$0xf] }
 0x1d1   : > { %4240 = vmatpush.bf16.msra.mxu0 %v5574_v27  ;;  %v7615_v27 = vld [vmem:[%s8079_s15 + $0xa68] sm:$0xf0]  ;;  %v6106_v1 = vor.u32 %v7454_v57, %v6105_v17  ;;  %v7113_v46 = vld [vmem:[%s8079_s15 + $0xd28] sm:$0xf]  ;;  %v7085_v17 = vld [vmem:[%s8079_s15 + $0xcf0] sm:$0xf]  ;;  %v6638_v61 = vor.u32 %v7587_v3, %v6637_v54 }
 0x1d2   : > { %4253 = vmatpush.bf16.msra.mxu1 %v5798_v63  ;;  %v6973_v63 = vld [vmem:[%s8079_s15 + $0xc10] sm:$0xf]  ;;  %v6750_v5 = vor.u32 %v7615_v27, %v6749_v39  ;;  %v7114_v55 = vor.u32 %v7706_v47, %v7113_v46  ;;  %v7699_v57 = vld [vmem:[%s8079_s15 + $0xd08] sm:$0xf0]  ;;  %v7524_v27 = vld [vmem:[%s8079_s15 + $0x790] sm:$0xf0] }
 0x1d3   : > { %4266 = vmatpush.bf16.msra.mxu2 %v6022_v0  ;;  %v7671_v0 = vld [vmem:[%s8079_s15 + $0xc28] sm:$0xf0]  ;;  %v6303_v3 = vld [vmem:[%s8079_s15 + $0x6ec] sm:$0xf0] }
 0x1d4   : > { %4279 = vmatpush.bf16.msra.mxu3 %v6246_v32  ;;  %v7727_v32 = vld [vmem:[%s8079_s15 + $0xde8] sm:$0xf0]  ;;  %v6974_v34 = vor.u32 %v7671_v0, %v6973_v63  ;;  %v6609_v63 = vld [vmem:[%s8079_s15 + $0x938] sm:$0xf]  ;;  %v7086_v0 = vor.u32 %v7699_v57, %v7085_v17 }
 0x1d5   : > { %4241 = vmatpush.bf16.msra.mxu0 %v5546_v10  ;;  %v7552_v10 = vld [vmem:[%s8079_s15 + $0x870] sm:$0xf0] }
 0x1d6   : > { %4254 = vmatpush.bf16.msra.mxu1 %v5770_v2  ;;  %v6721_v2 = vld [vmem:[%s8079_s15 + $0xa18] sm:$0xf]  ;;  %v6498_v60 = vor.u32 %v7552_v10, %v6497_v9 }
 0x1d7   : > { %4267 = vmatpush.bf16.msra.mxu2 %v5994_v7  ;;  %v7198_v7 = vor.u32 %v7727_v32, %v7197_v59  ;;  %v6722_v4 = vor.u32 %v7608_v29, %v6721_v2  ;;  %v7636_v59 = vld [vmem:[%s8079_s15 + $0xb10] sm:$0xf0]  ;;  %v7057_v32 = vld [vmem:[%s8079_s15 + $0xcb8] sm:$0xf]  ;;  %v6357_v2 = vld [vmem:[%s8079_s15 + $0x740] sm:$0xf] }
 0x1d8   : > { %4280 = vmatpush.bf16.msra.mxu3 %v6218_v15  ;;  %v7169_v15 = vld [vmem:[%s8079_s15 + $0xd98] sm:$0xf]  ;;  %v6581_v29 = vld [vmem:[%s8079_s15 + $0x900] sm:$0xf] }
 0x1d9   : > { %4242 = vmatpush.bf16.msra.mxu0 %v5518_v20  ;;  %v7545_v20 = vld [vmem:[%s8079_s15 + $0x838] sm:$0xf0] }
 0x1da   : > { %4255 = vmatpush.bf16.msra.mxu1 %v5742_v14  ;;  %v6693_v14 = vld [vmem:[%s8079_s15 + $0x9e0] sm:$0xf]  ;;  %v6470_v35 = vor.u32 %v7545_v20, %v6469_v11 }
 0x1db   : > { %4268 = vmatpush.bf16.msra.mxu2 %v5966_v21  ;;  %v7170_v21 = vor.u32 %v7720_v58, %v7169_v15  ;;  %v7573_v15 = vld [vmem:[%s8079_s15 + $0x918] sm:$0xf0]  ;;  %v6805_v58 = vld [vmem:[%s8079_s15 + $0xac0] sm:$0xf] }
 0x1dc   : > { %4281 = vmatpush.bf16.msra.mxu3 %v6190_v30  ;;  %v8651_v30 = vld [vmem:[#allocation1 + $0x12] sm:$0xff] }
 0x1dd   : > { %4243 = vmatpush.bf16.msra.mxu0 %v5490_v50  ;;  %v8662_v50 = vld [vmem:[#allocation1 + $0x9] sm:$0xff] }
 0x1de   : > { %4256 = vmatpush.bf16.msra.mxu1 %v5714_v36  ;;  %v6694_v36 = vor.u32 %v7601_v22, %v6693_v14  ;;  %v6329_v14 = vld [vmem:[%s8079_s15 + $0x708] sm:$0xf] }
 0x1df   : > { %4269 = vmatpush.bf16.msra.mxu2 %v5938_v37  ;;  %v6918_v37 = vor.u32 %v7657_v26, %v6917_v24  ;;  %v6582_v24 = vor.u32 %v7573_v15, %v6581_v29  ;;  %v5799_v29 = vld [vmem:[%s8079_s15 + $0x2fc] sm:$0xf0]  ;;  %v8732_v15 = vld [vmem:[#allocation1 + $0x24] sm:$0xff] }
 0x1e0   : > { %4282 = vmatpush.bf16.msra.mxu3 %v6162_v41  ;;  %v7142_v41 = vor.u32 %v7713_v23, %v7141_v8  ;;  %v6553_v8 = vld [vmem:[%s8079_s15 + $0x8c8] sm:$0xf]  ;;  %v7566_v23 = vld [vmem:[%s8079_s15 + $0x8e0] sm:$0xf0] }
 0x1e1   : > { %4244 = vmatpush.bf16.msra.mxu0 %v5462_v48  ;;  %v6442_v48 = vor.u32 %v7538_v53, %v6441_v18  ;;  %v7001_v18 = vld [vmem:[%s8079_s15 + $0xc48] sm:$0xf]  ;;  %v7678_v53 = vld [vmem:[%s8079_s15 + $0xc60] sm:$0xf0] }
 0x1e2   : > { %4257 = vmatpush.bf16.msra.mxu1 %v5686_v51  ;;  %v6413_v51 = vld [vmem:[%s8079_s15 + $0x7b0] sm:$0xf] }
 0x1e3   : > { %4270 = vmatpush.bf16.msra.mxu2 %v5910_v52  ;;  %v7531_v52 = vld [vmem:[%s8079_s15 + $0x7c8] sm:$0xf0] }
 0x1e4   : > { %4283 = vmatpush.bf16.msra.mxu3 %v6134_v28  ;;  %v6861_v28 = vld [vmem:[%s8079_s15 + $0xb30] sm:$0xf]  ;;  %v6414_v62 = vor.u32 %v7531_v52, %v6413_v51  ;;  %v6554_v52 = vor.u32 %v7566_v23, %v6553_v8  ;;  %v5771_v8 = vld [vmem:[%s8079_s15 + $0x2c4] sm:$0xf0]  ;;  %v7423_v23 = vld [vmem:[%s8079_s15 + $0x46c] sm:$0xf] }
 0x1e5   : > { %4245 = vmatpush.bf16.msra.mxu0 %v5434_v44  ;;  %v6862_v39 = vor.u32 %v7643_v56, %v6861_v28  ;;  %v6385_v44 = vld [vmem:[%s8079_s15 + $0x778] sm:$0xf]  ;;  %v7002_v28 = vor.u32 %v7678_v53, %v7001_v18  ;;  %v6219_v18 = vld [vmem:[%s8079_s15 + $0x644] sm:$0xf0] }
 0x1e6   : > { %4258 = vmatpush.bf16.msra.mxu1 %v5658_v25  ;;  %v7580_v25 = vld [vmem:[%s8079_s15 + $0x950] sm:$0xf0] }
 0x1e7   : > { %4271 = vmatpush.bf16.msra.mxu2 %v5882_v31  ;;  %v6833_v31 = vld [vmem:[%s8079_s15 + $0xaf8] sm:$0xf]  ;;  %v6610_v9 = vor.u32 %v7580_v25, %v6609_v63 }
 0x1e8   : > { %4284 = vmatpush.bf16.msra.mxu3 %v6106_v1  ;;  %4246 = vmatmul.bf16.vlgmr.msra.gmra.mxu0 %v8656_v33  ;;  %v7692_v1 = vld [vmem:[%s8079_s15 + $0xcd0] sm:$0xf0]  ;;  %v6834_v10 = vor.u32 %v7636_v59, %v6833_v31  ;;  %v5827_v63 = vld [vmem:[%s8079_s15 + $0x334] sm:$0xf0]  ;;  %v7493_v31 = vld [vmem:[%s8079_s15 + $0x69c] sm:$0xf] }
 0x1e9   : > { %4290 = vmatpush.bf16.msrb.mxu0 %v6526_v6  ;;  %4259 = vmatmul.bf16.vlgmr.msra.gmra.mxu1 %v8662_v50  ;;  %v4039_v6 = vpop.f32.mrf.mxu0  ;;  %v7058_v13 = vor.u32 %v7692_v1, %v7057_v32  ;;  %v6051_v25 = vld [vmem:[%s8079_s15 + $0x4f4] sm:$0xf0] }
 0x1ea   : > { %4303 = vmatpush.bf16.msrb.mxu1 %v6750_v5  ;;  %4272 = vmatmul.bf16.vlgmr.msra.gmra.mxu2 %v8651_v30  ;;  %v6386_v5 = vor.u32 %v7524_v27, %v6385_v44  ;;  %v6275_v59 = vld [vmem:[%s8079_s15 + $0x6b4] sm:$0xf0] }
 0x1eb   : > { %4316 = vmatpush.bf16.msrb.mxu2 %v6974_v34  ;;  %4285 = vmatmul.bf16.vlgmr.msra.gmra.mxu3 %v8659_v16  ;;  %v4052_v34 = vpop.f32.mrf.mxu1 }
 0x1ec   : > { %4329 = vmatpush.bf16.msrb.mxu3 %v7198_v7  ;;  %v7517_v7 = vld [vmem:[%s8079_s15 + $0x758] sm:$0xf0]  ;;  %v4053_v12 = vadd.f32 %v4052_v34, %v4039_v6  ;;  %v7318_v34 = vld [vmem:[%s8079_s15 + $0x124] sm:$0xf] }
 0x1ed   : > { %4291 = vmatpush.bf16.msrb.mxu0 %v6498_v60  ;;  %v7629_v60 = vld [vmem:[%s8079_s15 + $0xad8] sm:$0xf0]  ;;  %v4065_v11 = vpop.f32.mrf.mxu2  ;;  %v6358_v20 = vor.u32 %v7517_v7, %v6357_v2  ;;  %v8726_v2 = vld [vmem:[#allocation1 + $0x36] sm:$0xff]  ;;  %v6278_v7 = vor.u32 %v7493_v31, %v6275_v59  ;;  %v5939_v59 = vld [vmem:[%s8079_s15 + $0x414] sm:$0xf0] }
 0x1ee   : > { %4304 = vmatpush.bf16.msrb.mxu1 %v6722_v4  ;;  %v7029_v4 = vld [vmem:[%s8079_s15 + $0xc80] sm:$0xf]  ;;  %v4066_v22 = vadd.f32 %v4065_v11, %v4053_v12  ;;  %v6806_v26 = vor.u32 %v7629_v60, %v6805_v58  ;;  %v4078_v38 = vpop.f32.mrf.mxu3  ;;  %v7430_v12 = vld [vmem:[%s8079_s15 + $0x4a4] sm:$0xf]  ;;  %v8735_v58 = vld [vmem:[#allocation1 + $0x3f] sm:$0xff] }
 0x1ef   : > { %4317 = vmatpush.bf16.msrb.mxu2 %v6946_v19  ;;  %v7685_v19 = vld [vmem:[%s8079_s15 + $0xc98] sm:$0xf0]  ;;  %v7486_v60 = vld [vmem:[%s8079_s15 + $0x664] sm:$0xf] }
 0x1f0   : > { %4330 = vmatpush.bf16.msrb.mxu3 %v7170_v21  ;;  %v7510_v21 = vld [vmem:[%s8079_s15 + $0x720] sm:$0xf0]  ;;  %v8708_v40 = vadd.f32 %v4078_v38, %v4066_v22  ;;  %v5547_v22 = vld [vmem:[%s8079_s15 + $0x104] sm:$0xf0]  ;;  %v7409_v31 = vld [vmem:[%s8079_s15 + $0x3fc] sm:$0xf] }
 0x1f1   : > { %4292 = vmatpush.bf16.msrb.mxu0 %v6470_v35  ;;  %v6777_v35 = vld [vmem:[%s8079_s15 + $0xa88] sm:$0xf]  ;;  %v4041_v46 = vpop.f32.mrf.mxu0  ;;  %v6330_v47 = vor.u32 %v7510_v21, %v6329_v14  ;;  %v7311_v21 = vld [vmem:[%s8079_s15 + $0xec] sm:$0xf] }
 0x1f2   : > { %4305 = vmatpush.bf16.msrb.mxu1 %v6694_v36  ;;  %v7030_v36 = vor.u32 %v7685_v19, %v7029_v4  ;;  %v6247_v4 = vld [vmem:[%s8079_s15 + $0x67c] sm:$0xf0]  ;;  %v5550_v53 = vor.u32 %v7311_v21, %v5547_v22 }
 0x1f3   : > { %4318 = vmatpush.bf16.msrb.mxu2 %v6918_v37  ;;  %v7622_v37 = vld [vmem:[%s8079_s15 + $0xaa0] sm:$0xf0]  ;;  %v4054_v51 = vpop.f32.mrf.mxu1  ;;  %v5911_v21 = vld [vmem:[%s8079_s15 + $0x3dc] sm:$0xf0] }
 0x1f4   : > { %4331 = vmatpush.bf16.msrb.mxu3 %v7142_v41  ;;  %v7332_v41 = vld [vmem:[%s8079_s15 + $0x194] sm:$0xf]  ;;  %v6778_v54 = vor.u32 %v7622_v37, %v6777_v35  ;;  %v8740_v19 = vld [vmem:[#allocation1 + $0x2d] sm:$0xff]  ;;  %v5995_v35 = vld [vmem:[%s8079_s15 + $0x484] sm:$0xf0] }
 0x1f5   : > { %4293 = vmatpush.bf16.msrb.mxu0 %v6442_v48  ;;  %v5855_v48 = vld [vmem:[%s8079_s15 + $0x36c] sm:$0xf0]  ;;  %v5634_v56 = vor.u32 %v7332_v41, %v5631_v42  ;;  %v4067_v44 = vpop.f32.mrf.mxu2  ;;  %v7479_v37 = vld [vmem:[%s8079_s15 + $0x62c] sm:$0xf]  ;;  %v5998_v42 = vor.u32 %v7423_v23, %v5995_v35 }
 0x1f6   : > { %4306 = vmatpush.bf16.msrb.mxu1 %v6666_v49  ;;  %v7444_v49 = vld [vmem:[%s8079_s15 + $0x514] sm:$0xf]  ;;  %v5858_v17 = vor.u32 %v7388_v45, %v5855_v48  ;;  %v4080_v1 = vpop.f32.mrf.mxu3  ;;  %v5519_v48 = vld [vmem:[%s8079_s15 + $0xcc] sm:$0xf0]  ;;  %v7353_v44 = vld [vmem:[%s8079_s15 + $0x23c] sm:$0xf] }
 0x1f7   : > { %4319 = vmatpush.bf16.msrb.mxu2 %v6890_v43  ;;  %v6079_v43 = vld [vmem:[%s8079_s15 + $0x52c] sm:$0xf0]  ;;  %v7465_v1 = vld [vmem:[%s8079_s15 + $0x5bc] sm:$0xf]  ;;  %v7283_v35 = vld [vmem:[%s8079_s15 + $0xc] sm:$0xf] }
 0x1f8   : > { %4332 = vmatpush.bf16.msrb.mxu3 %v7114_v55  ;;  %v7500_v55 = vld [vmem:[%s8079_s15 + $0x6d4] sm:$0xf]  ;;  %v6082_v57 = vor.u32 %v7444_v49, %v6079_v43  ;;  %v6222_v43 = vor.u32 %v7479_v37, %v6219_v18  ;;  %v5743_v51 = vld [vmem:[%s8079_s15 + $0x28c] sm:$0xf0]  ;;  %v7339_v37 = vld [vmem:[%s8079_s15 + $0x1cc] sm:$0xf] }
 0x1f9   : > { %4294 = vmatpush.bf16.msrb.mxu0 %v6414_v62  ;;  %v7325_v62 = vld [vmem:[%s8079_s15 + $0x15c] sm:$0xf]  ;;  %v6306_v27 = vor.u32 %v7500_v55, %v6303_v3  ;;  %v7360_v49 = vld [vmem:[%s8079_s15 + $0x274] sm:$0xf] }
 0x1fa   : > { %4307 = vmatpush.bf16.msrb.mxu1 %v6638_v61  ;;  %v5603_v61 = vld [vmem:[%s8079_s15 + $0x174] sm:$0xf0]  ;;  %v7472_v3 = vld [vmem:[%s8079_s15 + $0x5f4] sm:$0xf] }
 0x1fb   : > { %4320 = vmatpush.bf16.msrb.mxu2 %v6862_v39  ;;  %v7381_v39 = vld [vmem:[%s8079_s15 + $0x31c] sm:$0xf]  ;;  %v5606_v32 = vor.u32 %v7325_v62, %v5603_v61 }
 0x1fc   : > { %4333 = vmatpush.bf16.msrb.mxu3 %v7086_v0  ;;  %v7437_v0 = vld [vmem:[%s8079_s15 + $0x4dc] sm:$0xf]  ;;  %v5830_v6 = vor.u32 %v7381_v39, %v5827_v63  ;;  %v5491_v39 = vld [vmem:[%s8079_s15 + $0x94] sm:$0xf0] }
 0x1fd   : > { %4295 = vmatpush.bf16.msrb.mxu0 %v6386_v5  ;;  %v6054_v5 = vor.u32 %v7437_v0, %v6051_v25  ;;  %v7297_v61 = vld [vmem:[%s8079_s15 + $0x7c] sm:$0xf]  ;;  %v5715_v25 = vld [vmem:[%s8079_s15 + $0x254] sm:$0xf0] }
 0x1fe   : > { %4308 = vmatpush.bf16.msrb.mxu1 %v6610_v9  ;;  %v5575_v9 = vld [vmem:[%s8079_s15 + $0x13c] sm:$0xf0] }
 0x1ff   : > { %4321 = vmatpush.bf16.msrb.mxu2 %v6834_v10  ;;  %v7374_v10 = vld [vmem:[%s8079_s15 + $0x2e4] sm:$0xf]  ;;  %v5578_v11 = vor.u32 %v7318_v34, %v5575_v9  ;;  %v5494_v34 = vor.u32 %v7297_v61, %v5491_v39 }
 0x200   : > { %4334 = vmatpush.bf16.msrb.mxu3 %v7058_v13  ;;  %v6023_v13 = vld [vmem:[%s8079_s15 + $0x4bc] sm:$0xf0]  ;;  %v7290_v9 = vld [vmem:[%s8079_s15 + $0x44] sm:$0xf] }
 0x201   : > { %4296 = vmatpush.bf16.msrb.mxu0 %v6358_v20  ;;  %v5802_v20 = vor.u32 %v7374_v10, %v5799_v29  ;;  %v6026_v14 = vor.u32 %v7430_v12, %v6023_v13  ;;  %v5942_v29 = vor.u32 %v7409_v31, %v5939_v59  ;;  %v5463_v12 = vld [vmem:[%s8079_s15 + $0x5c] sm:$0xf0]  ;;  %v7346_v13 = vld [vmem:[%s8079_s15 + $0x204] sm:$0xf] }
 0x202   : > { %4309 = vmatpush.bf16.msrb.mxu1 %v6582_v24  ;;  %v7367_v24 = vld [vmem:[%s8079_s15 + $0x2ac] sm:$0xf]  ;;  %v5466_v23 = vor.u32 %v7290_v9, %v5463_v12  ;;  %v7717_v12 = vld [vmem:[%s8079_s15 + $0xd9c] sm:$0xf] }
 0x203   : > { %4322 = vmatpush.bf16.msrb.mxu2 %v6806_v26  ;;  %v6250_v26 = vor.u32 %v7486_v60, %v6247_v4  ;;  %v5774_v41 = vor.u32 %v7367_v24, %v5771_v8  ;;  %v5687_v60 = vld [vmem:[%s8079_s15 + $0x21c] sm:$0xf0] }
 0x204   : > { %4335 = vmatpush.bf16.msrb.mxu3 %v7030_v36  ;;  %v7956_v36 = vmov 2.0   ;;  %v6135_v8 = vld [vmem:[%s8079_s15 + $0x59c] sm:$0xf0] }
 0x205   : > { %4297 = vmatpush.bf16.msrb.mxu0 %v6330_v47  ;;  %7807 = vrcp.f32 %v7956_v36  ;;  %v4091_v38 = vpop.f32.mrf.mxu0  ;;  %v7304_v47 = vld [vmem:[%s8079_s15 + $0xb4] sm:$0xf]  ;;  %v5435_v36 = vld [vmem:[%s8079_s15 + $0x24] sm:$0xf0] }
 0x206   : > { %4310 = vmatpush.bf16.msrb.mxu1 %v6554_v52  ;;  %v4092_v45 = vadd.f32 %v4091_v38, %v8708_v40  ;;  %v4104_v46 = vpop.f32.mrf.mxu1  ;;  %v7416_v52 = vld [vmem:[%s8079_s15 + $0x434] sm:$0xf]  ;;  %v5522_v40 = vor.u32 %v7304_v47, %v5519_v48  ;;  %v7451_v48 = vld [vmem:[%s8079_s15 + $0x54c] sm:$0xf] }
 0x207   : > { %4323 = vmatpush.bf16.msrb.mxu2 %v6778_v54  ;;  %v5967_v54 = vld [vmem:[%s8079_s15 + $0x44c] sm:$0xf0] }
 0x208   : > { %4336 = vmatpush.bf16.msrb.mxu3 %v7002_v28  ;;  %4298 = vmatmul.bf16.vlgmr.msrb.gmra.mxu0 %v8732_v15  ;;  %v4105_v55 = vadd.f32 %v4104_v46, %v4092_v45  ;;  %v6191_v28 = vld [vmem:[%s8079_s15 + $0x60c] sm:$0xf0]  ;;  %v5883_v45 = vld [vmem:[%s8079_s15 + $0x3a4] sm:$0xf0] }
 0x209   : > { %4342 = vmatpush.bf16.msra.mxu0 %v5634_v56  ;;  %4311 = vmatmul.bf16.vlgmr.msrb.gmra.mxu1 %v8740_v19 }
 0x20a   : > { %4355 = vmatpush.bf16.msra.mxu1 %v5858_v17  ;;  %4324 = vmatmul.bf16.vlgmr.msrb.gmra.mxu2 %v8726_v2  ;;  %v5746_v17 = vor.u32 %v7360_v49, %v5743_v51  ;;  %v6107_v49 = vld [vmem:[%s8079_s15 + $0x564] sm:$0xf0] }
 0x20b   : > { %4368 = vmatpush.bf16.msra.mxu2 %v6082_v57  ;;  %4337 = vmatmul.bf16.vlgmr.msrb.gmra.mxu3 %v8735_v58  ;;  %v8760_v56 = vpop.eup %7807  ;;  %v5970_v57 = vor.u32 %v7416_v52, %v5967_v54 }
 0x20c   : > { %4381 = vmatpush.bf16.msra.mxu3 %v6306_v27  ;;  %v6194_v27 = vor.u32 %v7472_v3, %v6191_v28  ;;  %v7612_v3 = vld [vmem:[%s8079_s15 + $0xa54] sm:$0xf]  ;;  %v5438_v28 = vor.u32 %v7283_v35, %v5435_v36  ;;  %vm4813_vm2 = vweird.f32 %v8760_v56  ;;  %v6919_v35 = vld [vmem:[%s8079_s15 + $0xbbc] sm:$0xf0]  ;;  %v7710_v36 = vld [vmem:[%s8079_s15 + $0xd64] sm:$0xf] }
 0x20d   : > { %4343 = vmatpush.bf16.msra.mxu0 %v5606_v32  ;;  %v4117_v62 = vpop.f32.mrf.mxu2  ;;  %v4809_v32 = vmul.f32 2.0, %v8760_v56  ;;  %v4093_v10 = vpop.f32.mrf.mxu0 }
 0x20e   : > { %4356 = vmatpush.bf16.msra.mxu1 %v5830_v6  ;;  %v4118_v63 = vadd.f32 %v4117_v62, %v4105_v55  ;;  %v4130_v0 = vpop.f32.mrf.mxu3  ;;  %v6163_v6 = vld [vmem:[%s8079_s15 + $0x5d4] sm:$0xf0]  ;;  %v4106_v4 = vpop.f32.mrf.mxu1  ;;  %v6527_v55 = vld [vmem:[%s8079_s15 + $0x8ac] sm:$0xf0] }
 0x20f   : > { %4369 = vmatpush.bf16.msra.mxu2 %v6054_v5  ;;  %v4810_v24 = vsub.f32 1.0, %v4809_v32  ;;  %v6723_v10 = vld [vmem:[%s8079_s15 + $0xa34] sm:$0xf0] }
 0x210   : > { %4382 = vmatpush.bf16.msra.mxu3 %v6278_v7  ;;  %v8771_v5 = vadd.f32 %v4130_v0, %v4118_v63  ;;  %v5718_v7 = vor.u32 %v7353_v44, %v5715_v25  ;;  %v7724_v44 = vld [vmem:[%s8079_s15 + $0xdd4] sm:$0xf]  ;;  %v6110_v63 = vor.u32 %v7451_v48, %v6107_v49  ;;  %v7549_v25 = vld [vmem:[%s8079_s15 + $0x85c] sm:$0xf]  ;;  %v7115_v48 = vld [vmem:[%s8079_s15 + $0xd44] sm:$0xf0] }
 0x211   : > { %4344 = vmatpush.bf16.msra.mxu0 %v5578_v11  ;;  %v4811_v54 = vmul.f32 %v8760_v56, %v4810_v24  ;;  %v7598_v24 = vld [vmem:[%s8079_s15 + $0x9e4] sm:$0xf] }
 0x212   : > { %4357 = vmatpush.bf16.msra.mxu1 %v5802_v20  ;;  %v4759_v11 = vsel %vm4758_vm0, %v8771_v5, 0.0  ;;  %v6166_v20 = vor.u32 %v7465_v1, %v6163_v6  ;;  %v6499_v6 = vld [vmem:[%s8079_s15 + $0x874] sm:$0xf0] }
 0x213   : > { %4370 = vmatpush.bf16.msra.mxu2 %v6026_v14  ;;  %v7402_v14 = vld [vmem:[%s8079_s15 + $0x3c4] sm:$0xf]  ;;  %v4760_v22 = vrot.slane %v4759_v11, 4  ;;  %v4812_v59 = vadd.f32 %v8760_v56, %v4811_v54  ;;  %v6502_v4 = vor.u32 %v7549_v25, %v6499_v6  ;;  %v7528_v54 = vld [vmem:[%s8079_s15 + $0x7b4] sm:$0xf] }
 0x214   : > { %4383 = vmatpush.bf16.msra.mxu3 %v6250_v26  ;;  %v7458_v26 = vld [vmem:[%s8079_s15 + $0x584] sm:$0xf]  ;;  %v5914_v38 = vor.u32 %v7402_v14, %v5911_v21  ;;  %v7521_v25 = vld [vmem:[%s8079_s15 + $0x77c] sm:$0xf]  ;;  %v6611_v6 = vld [vmem:[%s8079_s15 + $0x954] sm:$0xf0] }
 0x215   : > { %4345 = vmatpush.bf16.msra.mxu0 %v5550_v53  ;;  %v4761_v18 = vadd.f32 %v4760_v22, %v4759_v11  ;;  %v5690_v53 = vor.u32 %v7346_v13, %v5687_v60  ;;  %v4119_v46 = vpop.f32.mrf.mxu2  ;;  %v6138_v47 = vor.u32 %v7458_v26, %v6135_v8  ;;  %v7171_v13 = vld [vmem:[%s8079_s15 + $0xdb4] sm:$0xf0]  ;;  %v8811_v11 = vsel %vm4813_vm2, %v8760_v56, %v4812_v59  ;;  %v7542_v21 = vld [vmem:[%s8079_s15 + $0x824] sm:$0xf]  ;;  %v6471_v22 = vld [vmem:[%s8079_s15 + $0x83c] sm:$0xf0] }
 0x216   : > { %4358 = vmatpush.bf16.msra.mxu1 %v5774_v41  ;;  %v5659_v41 = vld [vmem:[%s8079_s15 + $0x1e4] sm:$0xf0]  ;;  %v4132_v51 = vpop.f32.mrf.mxu3  ;;  %v7174_v26 = vor.u32 %v7717_v12, %v7171_v13  ;;  %v6695_v8 = vld [vmem:[%s8079_s15 + $0x9fc] sm:$0xf0]  ;;  %v7577_v59 = vld [vmem:[%s8079_s15 + $0x93c] sm:$0xf] }
 0x217   : > { %4371 = vmatpush.bf16.msra.mxu2 %v5998_v42  ;;  %v7395_v42 = vld [vmem:[%s8079_s15 + $0x38c] sm:$0xf]  ;;  %v4762_v52 = vrot.slane %v4761_v18, 2  ;;  %v5662_v61 = vor.u32 %v7339_v37, %v5659_v41  ;;  %v7143_v56 = vld [vmem:[%s8079_s15 + $0xd7c] sm:$0xf0] }
 0x218   : > { %4384 = vmatpush.bf16.msra.mxu3 %v6222_v43  ;;  %v7556_v43 = vld [vmem:[%s8079_s15 + $0x894] sm:$0xf]  ;;  %v5886_v39 = vor.u32 %v7395_v42, %v5883_v45  ;;  %v6443_v41 = vld [vmem:[%s8079_s15 + $0x804] sm:$0xf0]  ;;  %v7591_v42 = vld [vmem:[%s8079_s15 + $0x9ac] sm:$0xf] }
 0x219   : > { %4346 = vmatpush.bf16.msra.mxu0 %v5522_v40  ;;  %v6751_v40 = vld [vmem:[%s8079_s15 + $0xa6c] sm:$0xf0]  ;;  %v4763_v62 = vadd.f32 %v4762_v52, %v4761_v18  ;;  %v6530_v0 = vor.u32 %v7556_v43, %v6527_v55  ;;  %v6474_v18 = vor.u32 %v7542_v21, %v6471_v22  ;;  %v7647_v45 = vld [vmem:[%s8079_s15 + $0xb6c] sm:$0xf]  ;;  %v6891_v46 = vld [vmem:[%s8079_s15 + $0xb84] sm:$0xf0] }
 0x21a   : > { %4359 = vmatpush.bf16.msra.mxu1 %v5746_v17  ;;  %v7668_v17 = vld [vmem:[%s8079_s15 + $0xc14] sm:$0xf]  ;;  %v6754_v32 = vor.u32 %v7612_v3, %v6751_v40  ;;  %v6894_v52 = vor.u32 %v7647_v45, %v6891_v46  ;;  %v6415_v55 = vld [vmem:[%s8079_s15 + $0x7cc] sm:$0xf0]  ;;  %v7059_v12 = vld [vmem:[%s8079_s15 + $0xcd4] sm:$0xf0] }
 0x21b   : > { %4372 = vmatpush.bf16.msra.mxu2 %v5970_v57  ;;  %v6975_v57 = vld [vmem:[%s8079_s15 + $0xc2c] sm:$0xf0]  ;;  %v4764_v31 = vrot.slane %v4763_v62, 1  ;;  %v7584_v3 = vld [vmem:[%s8079_s15 + $0x974] sm:$0xf] }
 0x21c   : > { %4385 = vmatpush.bf16.msra.mxu3 %v6194_v27  ;;  %v7199_v27 = vld [vmem:[%s8079_s15 + $0xdec] sm:$0xf0]  ;;  %v6978_v1 = vor.u32 %v7668_v17, %v6975_v57  ;;  %v7640_v17 = vld [vmem:[%s8079_s15 + $0xb34] sm:$0xf]  ;;  %v7514_v22 = vld [vmem:[%s8079_s15 + $0x744] sm:$0xf] }
 0x21d   : > { %4347 = vmatpush.bf16.msra.mxu0 %v5494_v34  ;;  %v7605_v34 = vld [vmem:[%s8079_s15 + $0xa1c] sm:$0xf]  ;;  %v7202_v9 = vor.u32 %v7724_v44, %v7199_v27  ;;  %v4765_v60 = vadd.f32 %v4764_v31, %v4763_v62  ;;  %v6863_v57 = vld [vmem:[%s8079_s15 + $0xb4c] sm:$0xf0]  ;;  %v6418_v27 = vor.u32 %v7528_v54, %v6415_v55  ;;  %v6387_v31 = vld [vmem:[%s8079_s15 + $0x794] sm:$0xf0] }
 0x21e   : > { %4360 = vmatpush.bf16.msra.mxu1 %v5718_v7  ;;  %v7661_v7 = vld [vmem:[%s8079_s15 + $0xbdc] sm:$0xf]  ;;  %v6555_v45 = vld [vmem:[%s8079_s15 + $0x8e4] sm:$0xf0]  ;;  %v7619_v46 = vld [vmem:[%s8079_s15 + $0xa8c] sm:$0xf] }
 0x21f   : > { %4373 = vmatpush.bf16.msra.mxu2 %v5942_v29  ;;  %v6947_v29 = vld [vmem:[%s8079_s15 + $0xbf4] sm:$0xf0]  ;;  %v4815_v37 = vmul.f32 %v8811_v11, %v4765_v60  ;;  %v6390_v60 = vor.u32 %v7521_v25, %v6387_v31 }
 0x220   : > { %4386 = vmatpush.bf16.msra.mxu3 %v6166_v20  ;;  %v6726_v20 = vor.u32 %v7605_v34, %v6723_v10  ;;  %v6950_v14 = vor.u32 %v7661_v7, %v6947_v29  ;;  %v7633_v34 = vld [vmem:[%s8079_s15 + $0xafc] sm:$0xf]  ;;  %v5637_v55 = vld [vmem:[%s8079_s15 + $0x198] sm:$0xf] }
 0x221   : > { %4348 = vmatpush.bf16.msra.mxu0 %v5466_v23  ;;  %v7654_v23 = vld [vmem:[%s8079_s15 + $0xba4] sm:$0xf]  ;;  %v7689_v29 = vld [vmem:[%s8079_s15 + $0xcbc] sm:$0xf] }
 0x222   : > { %4361 = vmatpush.bf16.msra.mxu1 %v5690_v53  ;;  %v6922_v53 = vor.u32 %v7654_v23, %v6919_v35  ;;  %v7062_v23 = vor.u32 %v7689_v29, %v7059_v12  ;;  %v6583_v35 = vld [vmem:[%s8079_s15 + $0x91c] sm:$0xf0]  ;;  %v7497_v29 = vld [vmem:[%s8079_s15 + $0x6b8] sm:$0xf0] }
 0x223   : > { %4374 = vmatpush.bf16.msra.mxu2 %v5914_v38  ;;  %v7535_v38 = vld [vmem:[%s8079_s15 + $0x7ec] sm:$0xf] }
 0x224   : > { %4387 = vmatpush.bf16.msra.mxu3 %v6138_v47  ;;  %v7703_v47 = vld [vmem:[%s8079_s15 + $0xd2c] sm:$0xf]  ;;  %v6446_v49 = vor.u32 %v7535_v38, %v6443_v41  ;;  %v6331_v41 = vld [vmem:[%s8079_s15 + $0x724] sm:$0xf0] }
 0x225   : > { %4349 = vmatpush.bf16.msra.mxu0 %v5438_v28  ;;  %v4143_v43 = vpop.f32.mrf.mxu0  ;;  %v7118_v40 = vor.u32 %v7703_v47, %v7115_v48  ;;  %v7507_v38 = vld [vmem:[%s8079_s15 + $0x70c] sm:$0xf] }
 0x226   : > { %4362 = vmatpush.bf16.msra.mxu1 %v5662_v61  ;;  %v4156_v28 = vpop.f32.mrf.mxu1  ;;  %v7696_v61 = vld [vmem:[%s8079_s15 + $0xcf4] sm:$0xf] }
 0x227   : > { %4375 = vmatpush.bf16.msra.mxu2 %v5886_v39  ;;  %v4157_v62 = vadd.f32 %v4156_v28, %v4143_v43  ;;  %v7087_v39 = vld [vmem:[%s8079_s15 + $0xd0c] sm:$0xf0]  ;;  %v7675_v43 = vld [vmem:[%s8079_s15 + $0xc4c] sm:$0xf]  ;;  %v5861_v28 = vld [vmem:[%s8079_s15 + $0x358] sm:$0xf] }
 0x228   : > { %4388 = vmatpush.bf16.msra.mxu3 %v6110_v63  ;;  %4350 = vmatmul.bf16.vlgmr.msra.gmra.mxu0 %v8656_v33  ;;  %v7146_v33 = vor.u32 %v7710_v36, %v7143_v56  ;;  %v7626_v36 = vld [vmem:[%s8079_s15 + $0xac4] sm:$0xf]  ;;  %v6807_v56 = vld [vmem:[%s8079_s15 + $0xadc] sm:$0xf0] }
 0x229   : > { %4394 = vmatpush.bf16.msrb.mxu0 %v6530_v0  ;;  %4363 = vmatmul.bf16.vlgmr.msra.gmra.mxu1 %v8662_v50  ;;  %v8835_v50 = vsub.f32 %v8771_v5, %v4815_v37  ;;  %v6639_v5 = vld [vmem:[%s8079_s15 + $0x98c] sm:$0xf0]  ;;  %v6866_v0 = vor.u32 %v7640_v17, %v6863_v57  ;;  %v6085_v17 = vld [vmem:[%s8079_s15 + $0x518] sm:$0xf]  ;;  %v7448_v57 = vld [vmem:[%s8079_s15 + $0x530] sm:$0xf0] }
 0x22a   : > { %4407 = vmatpush.bf16.msrb.mxu1 %v6754_v32  ;;  %4376 = vmatmul.bf16.vlgmr.msra.gmra.mxu2 %v8651_v30  ;;  %v6698_v30 = vor.u32 %v7598_v24, %v6695_v8  ;;  %v6642_v63 = vor.u32 %v7584_v3, %v6639_v5  ;;  %v6359_v24 = vld [vmem:[%s8079_s15 + $0x75c] sm:$0xf0]  ;;  %v7336_v3 = vld [vmem:[%s8079_s15 + $0x1b0] sm:$0xf0] }
 0x22b   : > { %4420 = vmatpush.bf16.msrb.mxu2 %v6978_v1  ;;  %4389 = vmatmul.bf16.vlgmr.msra.gmra.mxu3 %v8659_v16  ;;  %v6667_v16 = vld [vmem:[%s8079_s15 + $0x9c4] sm:$0xf0]  ;;  %v4829_v44 = vmul.f32 %v8835_v50, %v8835_v50  ;;  %v7090_v1 = vor.u32 %v7696_v61, %v7087_v39  ;;  %v7392_v5 = vld [vmem:[%s8079_s15 + $0x370] sm:$0xf0]  ;;  %v6309_v39 = vld [vmem:[%s8079_s15 + $0x6d8] sm:$0xf] }
 0x22c   : > { %4433 = vmatpush.bf16.msrb.mxu3 %v7202_v9  ;;  %v6670_v51 = vor.u32 %v7591_v42, %v6667_v16  ;;  %v6835_v9 = vld [vmem:[%s8079_s15 + $0xb14] sm:$0xf0]  ;;  %v7563_v16 = vld [vmem:[%s8079_s15 + $0x8cc] sm:$0xf]  ;;  %v5862_v31 = vor.u32 %v7392_v5, %v5861_v28 }
 0x22d   : > { %4395 = vmatpush.bf16.msrb.mxu0 %v6502_v4  ;;  %v4169_v32 = vpop.f32.mrf.mxu2  ;;  %v4836_v13 = vsel %vm4758_vm0, %v4829_v44, 0.0  ;;  %v6838_v21 = vor.u32 %v7633_v34, %v6835_v9  ;;  %v7504_v44 = vld [vmem:[%s8079_s15 + $0x6f0] sm:$0xf0]  ;;  %v7385_v34 = vld [vmem:[%s8079_s15 + $0x338] sm:$0xf0] }
 0x22e   : > { %4408 = vmatpush.bf16.msrb.mxu1 %v6726_v20  ;;  %v4170_v10 = vadd.f32 %v4169_v32, %v4157_v62  ;;  %v4182_v7 = vpop.f32.mrf.mxu3  ;;  %v4145_v20 = vpop.f32.mrf.mxu0  ;;  %v4837_v37 = vrot.slane %v4836_v13, 4  ;;  %v6558_v62 = vor.u32 %v7563_v16, %v6555_v45  ;;  %v7329_v32 = vld [vmem:[%s8079_s15 + $0x178] sm:$0xf0]  ;;  %v6057_v9 = vld [vmem:[%s8079_s15 + $0x4e0] sm:$0xf] }
 0x22f   : > { %4421 = vmatpush.bf16.msrb.mxu2 %v6950_v14  ;;  %v6614_v14 = vor.u32 %v7577_v59, %v6611_v6  ;;  %v4158_v8 = vpop.f32.mrf.mxu1  ;;  %v6086_v59 = vor.u32 %v7448_v57, %v6085_v17  ;;  %v6310_v6 = vor.u32 %v7504_v44, %v6309_v39  ;;  %v5973_v28 = vld [vmem:[%s8079_s15 + $0x438] sm:$0xf]  ;;  %v7476_v57 = vld [vmem:[%s8079_s15 + $0x610] sm:$0xf0] }
 0x230   : > { %4434 = vmatpush.bf16.msrb.mxu3 %v7174_v26  ;;  %v8856_v4 = vadd.f32 %v4182_v7, %v4170_v10  ;;  %v7570_v26 = vld [vmem:[%s8079_s15 + $0x904] sm:$0xf]  ;;  %v4838_v54 = vadd.f32 %v4837_v37, %v4836_v13  ;;  %v7441_v10 = vld [vmem:[%s8079_s15 + $0x4f8] sm:$0xf0]  ;;  %v6281_v7 = vld [vmem:[%s8079_s15 + $0x6a0] sm:$0xf] }
 0x231   : > { %4396 = vmatpush.bf16.msrb.mxu0 %v6474_v18  ;;  %v7682_v18 = vld [vmem:[%s8079_s15 + $0xc84] sm:$0xf]  ;;  %v6586_v42 = vor.u32 %v7570_v26, %v6583_v35  ;;  %v6058_v20 = vor.u32 %v7441_v10, %v6057_v9  ;;  %v6029_v8 = vld [vmem:[%s8079_s15 + $0x4a8] sm:$0xf]  ;;  %v7315_v37 = vld [vmem:[%s8079_s15 + $0x108] sm:$0xf0] }
 0x232   : > { %4409 = vmatpush.bf16.msrb.mxu1 %v6698_v30  ;;  %v7031_v30 = vld [vmem:[%s8079_s15 + $0xc9c] sm:$0xf0]  ;;  %v4839_v25 = vrot.slane %v4838_v54, 2  ;;  %v7378_v26 = vld [vmem:[%s8079_s15 + $0x300] sm:$0xf0] }
 0x233   : > { %4422 = vmatpush.bf16.msrb.mxu2 %v6922_v53  ;;  %v6362_v53 = vor.u32 %v7514_v22, %v6359_v24  ;;  %v7034_v48 = vor.u32 %v7682_v18, %v7031_v30  ;;  %v5805_v22 = vld [vmem:[%s8079_s15 + $0x2e8] sm:$0xf]  ;;  %v6282_v24 = vor.u32 %v7497_v29, %v6281_v7  ;;  %v6197_v17 = vld [vmem:[%s8079_s15 + $0x5f8] sm:$0xf]  ;;  %v7469_v9 = vld [vmem:[%s8079_s15 + $0x5d8] sm:$0xf0] }
 0x234   : > { %4435 = vmatpush.bf16.msrb.mxu3 %v7146_v33  ;;  %v6810_v33 = vor.u32 %v7626_v36, %v6807_v56  ;;  %v4840_v13 = vadd.f32 %v4839_v25, %v4838_v54  ;;  %v6253_v35 = vld [vmem:[%s8079_s15 + $0x668] sm:$0xf]  ;;  %v7490_v36 = vld [vmem:[%s8079_s15 + $0x680] sm:$0xf0]  ;;  %v5553_v56 = vld [vmem:[%s8079_s15 + $0xf0] sm:$0xf]  ;;  %v5806_v30 = vor.u32 %v7378_v26, %v5805_v22  ;;  %v6198_v25 = vor.u32 %v7476_v57, %v6197_v17 }
 0x235   : > { %4397 = vmatpush.bf16.msrb.mxu0 %v6446_v49  ;;  %v4171_v47 = vpop.f32.mrf.mxu2  ;;  %v6779_v49 = vld [vmem:[%s8079_s15 + $0xaa4] sm:$0xf0]  ;;  %v5554_v16 = vor.u32 %v7315_v37, %v5553_v56  ;;  %v5749_v54 = vld [vmem:[%s8079_s15 + $0x278] sm:$0xf]  ;;  %v7350_v22 = vld [vmem:[%s8079_s15 + $0x220] sm:$0xf0] }
 0x236   : > { %4410 = vmatpush.bf16.msrb.mxu1 %v6670_v51  ;;  %v7003_v51 = vld [vmem:[%s8079_s15 + $0xc64] sm:$0xf0]  ;;  %v6782_v61 = vor.u32 %v7619_v46, %v6779_v49  ;;  %v4841_v18 = vrot.slane %v4840_v13, 1  ;;  %v7462_v56 = vld [vmem:[%s8079_s15 + $0x5a0] sm:$0xf0] }
 0x237   : > { %4423 = vmatpush.bf16.msrb.mxu2 %v6894_v52  ;;  %v4184_v52 = vpop.f32.mrf.mxu3  ;;  %v5469_v29 = vld [vmem:[%s8079_s15 + $0x48] sm:$0xf]  ;;  %v7205_v17 = vld [vmem:[%s8079_s15 + $0xdd8] sm:$0xf]  ;;  %v7728_v57 = vld [vmem:[%s8079_s15 + $0xdf0] sm:$0xf0] }
 0x238   : > { %4436 = vmatpush.bf16.msrb.mxu3 %v7118_v40  ;;  %v6334_v40 = vor.u32 %v7507_v38, %v6331_v41  ;;  %v7371_v38 = vld [vmem:[%s8079_s15 + $0x2c8] sm:$0xf0]  ;;  %v6001_v41 = vld [vmem:[%s8079_s15 + $0x470] sm:$0xf]  ;;  %v4842_v47 = vadd.f32 %v4841_v18, %v4840_v13  ;;  %v7308_v52 = vld [vmem:[%s8079_s15 + $0xd0] sm:$0xf0] }
 0x239   : > { %4398 = vmatpush.bf16.msrb.mxu0 %v6418_v27  ;;  %v7006_v27 = vor.u32 %v7675_v43, %v7003_v51  ;;  %v5525_v51 = vld [vmem:[%s8079_s15 + $0xb8] sm:$0xf]  ;;  %v5441_v18 = vld [vmem:[%s8079_s15 + $0x10] sm:$0xf] }
 0x23a   : > { %4411 = vmatpush.bf16.msrb.mxu1 %v6642_v63  ;;  %v5638_v63 = vor.u32 %v7336_v3, %v5637_v55  ;;  %v7364_v3 = vld [vmem:[%s8079_s15 + $0x290] sm:$0xf0] }
 0x23b   : > { %4424 = vmatpush.bf16.msrb.mxu2 %v6866_v0  ;;  %v5609_v0 = vld [vmem:[%s8079_s15 + $0x160] sm:$0xf] }
 0x23c   : > { %4437 = vmatpush.bf16.msrb.mxu3 %v7090_v1  ;;  %v5833_v1 = vld [vmem:[%s8079_s15 + $0x320] sm:$0xf]  ;;  %v5610_v12 = vor.u32 %v7329_v32, %v5609_v0  ;;  %v7357_v32 = vld [vmem:[%s8079_s15 + $0x258] sm:$0xf0] }
 0x23d   : > { %4399 = vmatpush.bf16.msrb.mxu0 %v6390_v60  ;;  %v5834_v60 = vor.u32 %v7385_v34, %v5833_v1  ;;  %v5721_v0 = vld [vmem:[%s8079_s15 + $0x240] sm:$0xf] }
 0x23e   : > { %4412 = vmatpush.bf16.msrb.mxu1 %v6614_v14  ;;  %v5581_v14 = vld [vmem:[%s8079_s15 + $0x128] sm:$0xf]  ;;  %v5945_v1 = vld [vmem:[%s8079_s15 + $0x400] sm:$0xf] }
 0x23f   : > { %4425 = vmatpush.bf16.msrb.mxu2 %v6838_v21  ;;  %v7322_v21 = vld [vmem:[%s8079_s15 + $0x140] sm:$0xf0]  ;;  %v6169_v34 = vld [vmem:[%s8079_s15 + $0x5c0] sm:$0xf] }
 0x240   : > { %4438 = vmatpush.bf16.msrb.mxu3 %v7062_v23  ;;  %v7434_v23 = vld [vmem:[%s8079_s15 + $0x4c0] sm:$0xf0] }
 0x241   : > { %4400 = vmatpush.bf16.msrb.mxu0 %v6362_v53  ;;  %v6030_v53 = vor.u32 %v7434_v23, %v6029_v8  ;;  %v6170_v8 = vor.u32 %v7469_v9, %v6169_v34  ;;  %v5917_v23 = vld [vmem:[%s8079_s15 + $0x3c8] sm:$0xf]  ;;  %v7721_v34 = vld [vmem:[%s8079_s15 + $0xdb8] sm:$0xf0] }
 0x242   : > { %4413 = vmatpush.bf16.msrb.mxu1 %v6586_v42  ;;  %v7427_v42 = vld [vmem:[%s8079_s15 + $0x488] sm:$0xf0] }
 0x243   : > { %4426 = vmatpush.bf16.msrb.mxu2 %v6810_v33  ;;  %v6225_v33 = vld [vmem:[%s8079_s15 + $0x630] sm:$0xf] }
 0x244   : > { %4439 = vmatpush.bf16.msrb.mxu3 %v7034_v48  ;;  %v6002_v48 = vor.u32 %v7427_v42, %v6001_v41  ;;  %v7343_v41 = vld [vmem:[%s8079_s15 + $0x1e8] sm:$0xf0]  ;;  %v5889_v42 = vld [vmem:[%s8079_s15 + $0x390] sm:$0xf] }
 0x245   : > { %4401 = vmatpush.bf16.msrb.mxu0 %v6334_v40  ;;  %v4195_v46 = vpop.f32.mrf.mxu0  ;;  %v7420_v40 = vld [vmem:[%s8079_s15 + $0x450] sm:$0xf0] }
 0x246   : > { %4414 = vmatpush.bf16.msrb.mxu1 %v6558_v62  ;;  %v4196_v49 = vadd.f32 %v4195_v46, %v8856_v4  ;;  %v4208_v43 = vpop.f32.mrf.mxu1  ;;  %v5526_v62 = vor.u32 %v7308_v52, %v5525_v51  ;;  %v4885_v4 = vmul.f32 %v4842_v47, %v8811_v11  ;;  %v5974_v39 = vor.u32 %v7420_v40, %v5973_v28  ;;  %v7455_v46 = vld [vmem:[%s8079_s15 + $0x568] sm:$0xf0]  ;;  %v6533_v47 = vld [vmem:[%s8079_s15 + $0x898] sm:$0xf] }
 0x247   : > { %4427 = vmatpush.bf16.msrb.mxu2 %v6782_v61  ;;  %v5750_v61 = vor.u32 %v7364_v3, %v5749_v54  ;;  %v6757_v51 = vld [vmem:[%s8079_s15 + $0xa58] sm:$0xf]  ;;  %v7616_v54 = vld [vmem:[%s8079_s15 + $0xa70] sm:$0xf0] }
 0x248   : > { %4440 = vmatpush.bf16.msrb.mxu3 %v7006_v27  ;;  %4402 = vmatmul.bf16.vlgmr.msrb.gmra.mxu0 %v8732_v15  ;;  %v5777_v15 = vld [vmem:[%s8079_s15 + $0x2b0] sm:$0xf]  ;;  %v4209_v5 = vadd.f32 %v4208_v43, %v4196_v49  ;;  %v5497_v27 = vld [vmem:[%s8079_s15 + $0x80] sm:$0xf]  ;;  %v7560_v43 = vld [vmem:[%s8079_s15 + $0x8b0] sm:$0xf0] }
 0x249   : > { %4446 = vmatpush.bf16.msra.mxu0 %v5638_v63  ;;  %4415 = vmatmul.bf16.vlgmr.msrb.gmra.mxu1 %v8740_v19  ;;  %v7483_v19 = vld [vmem:[%s8079_s15 + $0x648] sm:$0xf0]  ;;  %v5778_v45 = vor.u32 %v7371_v38, %v5777_v15  ;;  %v7301_v63 = vld [vmem:[%s8079_s15 + $0x98] sm:$0xf0]  ;;  %v7672_v3 = vld [vmem:[%s8079_s15 + $0xc30] sm:$0xf0] }
 0x24a   : > { %4459 = vmatpush.bf16.msra.mxu1 %v5862_v31  ;;  %4428 = vmatmul.bf16.vlgmr.msrb.gmra.mxu2 %v8726_v2  ;;  %v5582_v2 = vor.u32 %v7322_v21, %v5581_v14  ;;  %v6226_v55 = vor.u32 %v7483_v19, %v6225_v33  ;;  %v5498_v7 = vor.u32 %v7301_v63, %v5497_v27  ;;  %v5693_v21 = vld [vmem:[%s8079_s15 + $0x208] sm:$0xf]  ;;  %v7399_v33 = vld [vmem:[%s8079_s15 + $0x3a8] sm:$0xf0]  ;;  %v7553_v63 = vld [vmem:[%s8079_s15 + $0x878] sm:$0xf0] }
 0x24b   : > { %4472 = vmatpush.bf16.msra.mxu2 %v6086_v59  ;;  %4441 = vmatmul.bf16.vlgmr.msrb.gmra.mxu3 %v8735_v58  ;;  %v6254_v58 = vor.u32 %v7490_v36, %v6253_v35  ;;  %v7406_v35 = vld [vmem:[%s8079_s15 + $0x3e0] sm:$0xf0]  ;;  %v5694_v38 = vor.u32 %v7350_v22, %v5693_v21 }
 0x24c   : > { %4485 = vmatpush.bf16.msra.mxu3 %v6310_v6  ;;  %v7413_v6 = vld [vmem:[%s8079_s15 + $0x418] sm:$0xf0]  ;;  %v7602_v22 = vld [vmem:[%s8079_s15 + $0xa00] sm:$0xf0] }
 0x24d   : > { %4447 = vmatpush.bf16.msra.mxu0 %v5610_v12  ;;  %v4221_v44 = vpop.f32.mrf.mxu2  ;;  %v7294_v12 = vld [vmem:[%s8079_s15 + $0x60] sm:$0xf0]  ;;  %v4197_v13 = vpop.f32.mrf.mxu0  ;;  %v5946_v14 = vor.u32 %v7413_v6, %v5945_v1  ;;  %v7177_v6 = vld [vmem:[%s8079_s15 + $0xda0] sm:$0xf] }
 0x24e   : > { %4460 = vmatpush.bf16.msra.mxu1 %v5834_v60  ;;  %v4222_v31 = vadd.f32 %v4221_v44, %v4209_v5  ;;  %v4234_v59 = vpop.f32.mrf.mxu3  ;;  %v8932_v60 = vadd.f32 1e-05, %v4885_v4  ;;  %v5470_v37 = vor.u32 %v7294_v12, %v5469_v29  ;;  %v5890_v5 = vor.u32 %v7399_v33, %v5889_v42  ;;  %v6477_v13 = vld [vmem:[%s8079_s15 + $0x828] sm:$0xf]  ;;  %v7595_v33 = vld [vmem:[%s8079_s15 + $0x9c8] sm:$0xf0] }
 0x24f   : > { %4473 = vmatpush.bf16.msra.mxu2 %v6058_v20  ;;  %v5722_v20 = vor.u32 %v7357_v32, %v5721_v0  ;;  %v6534_v4 = vor.u32 %v7560_v43, %v6533_v47  ;;  %v6758_v44 = vor.u32 %v7616_v54, %v6757_v51  ;;  %v6729_v0 = vld [vmem:[%s8079_s15 + $0xa20] sm:$0xf]  ;;  %v7665_v32 = vld [vmem:[%s8079_s15 + $0xbf8] sm:$0xf0]  ;;  %v7178_v21 = vor.u32 %v7721_v34, %v7177_v6  ;;  %v7121_v47 = vld [vmem:[%s8079_s15 + $0xd30] sm:$0xf] }
 0x250   : > { %4486 = vmatpush.bf16.msra.mxu3 %v6282_v24  ;;  %v8928_v10 = vadd.f32 %v4234_v59, %v4222_v31  ;;  %v4210_v24 = vpop.f32.mrf.mxu1  ;;  %7809 = vrsqrt.f32 %v8932_v60  ;;  %v7609_v31 = vld [vmem:[%s8079_s15 + $0xa38] sm:$0xf0]  ;;  %v6953_v59 = vld [vmem:[%s8079_s15 + $0xbe0] sm:$0xf]  ;;  %vm4905_vm4 = vweird.f32 %v8932_v60 }
 0x251   : > { %4448 = vmatpush.bf16.msra.mxu0 %v5582_v2  ;;  %v6141_v2 = vld [vmem:[%s8079_s15 + $0x588] sm:$0xf]  ;;  %v6730_v29 = vor.u32 %v7609_v31, %v6729_v0  ;;  %v6954_v12 = vor.u32 %v7665_v32, %v6953_v59  ;;  %v6393_v59 = vld [vmem:[%s8079_s15 + $0x780] sm:$0xf]  ;;  %v7525_v32 = vld [vmem:[%s8079_s15 + $0x798] sm:$0xf0] }
 0x252   : > { %4461 = vmatpush.bf16.msra.mxu1 %v5806_v30  ;;  %v4766_v26 = vsel %vm4758_vm0, %v8928_v10, 0.0  ;;  %v7287_v30 = vld [vmem:[%s8079_s15 + $0x28] sm:$0xf0]  ;;  %v6925_v24 = vld [vmem:[%s8079_s15 + $0xba8] sm:$0xf] }
 0x253   : > { %4474 = vmatpush.bf16.msra.mxu2 %v6030_v53  ;;  %v4767_v36 = vrot.slane %v4766_v26, 4  ;;  %v5665_v53 = vld [vmem:[%s8079_s15 + $0x1d0] sm:$0xf]  ;;  %v5442_v52 = vor.u32 %v7287_v30, %v5441_v18  ;;  %v8990_v18 = vld [vmem:[#allocation1 + $0x9] sm:$0xff] }
 0x254   : > { %4487 = vmatpush.bf16.msra.mxu3 %v6254_v58  ;;  %v5918_v58 = vor.u32 %v7406_v35, %v5917_v23  ;;  %v5666_v40 = vor.u32 %v7343_v41, %v5665_v53  ;;  %v7149_v35 = vld [vmem:[%s8079_s15 + $0xd68] sm:$0xf]  ;;  %v6673_v41 = vld [vmem:[%s8079_s15 + $0x9b0] sm:$0xf] }
 0x255   : > { %4449 = vmatpush.bf16.msra.mxu0 %v5554_v16  ;;  %v4768_v15 = vadd.f32 %v4767_v36, %v4766_v26  ;;  %v4223_v19 = vpop.f32.mrf.mxu2  ;;  %v6142_v16 = vor.u32 %v7462_v56, %v6141_v2  ;;  %v7658_v26 = vld [vmem:[%s8079_s15 + $0xbc0] sm:$0xf0]  ;;  %v8982_v2 = vld [vmem:[#allocation1] sm:$0xff] }
 0x256   : > { %4462 = vmatpush.bf16.msra.mxu1 %v5778_v45  ;;  %v6113_v45 = vld [vmem:[%s8079_s15 + $0x550] sm:$0xf]  ;;  %v7714_v36 = vld [vmem:[%s8079_s15 + $0xd80] sm:$0xf0] }
 0x257   : > { %4475 = vmatpush.bf16.msra.mxu2 %v6002_v48  ;;  %v4236_v48 = vpop.f32.mrf.mxu3  ;;  %v4769_v49 = vrot.slane %v4768_v15, 2  ;;  %v8985_v56 = vld [vmem:[#allocation1 + $0x1b] sm:$0xff]  ;;  %v7150_v42 = vor.u32 %v7714_v36, %v7149_v35 }
 0x258   : > { %4488 = vmatpush.bf16.msra.mxu3 %v6226_v55  ;;  %v6981_v55 = vld [vmem:[%s8079_s15 + $0xc18] sm:$0xf]  ;;  %v6897_v19 = vld [vmem:[%s8079_s15 + $0xb70] sm:$0xf]  ;;  %v7707_v48 = vld [vmem:[%s8079_s15 + $0xd48] sm:$0xf0] }
 0x259   : > { %4450 = vmatpush.bf16.msra.mxu0 %v5526_v62  ;;  %v4770_v28 = vadd.f32 %v4769_v49, %v4768_v15  ;;  %v6114_v62 = vor.u32 %v7455_v46, %v6113_v45  ;;  %v6982_v27 = vor.u32 %v7672_v3, %v6981_v55  ;;  %v6926_v15 = vor.u32 %v7658_v26, %v6925_v24  ;;  %v6421_v55 = vld [vmem:[%s8079_s15 + $0x7b8] sm:$0xf]  ;;  %v7532_v3 = vld [vmem:[%s8079_s15 + $0x7d0] sm:$0xf0] }
 0x25a   : > { %4463 = vmatpush.bf16.msra.mxu1 %v5750_v61  ;;  %v6505_v61 = vld [vmem:[%s8079_s15 + $0x860] sm:$0xf]  ;;  %v6422_v0 = vor.u32 %v7532_v3, %v6421_v55  ;;  %v6394_v26 = vor.u32 %v7525_v32, %v6393_v59  ;;  %v7567_v3 = vld [vmem:[%s8079_s15 + $0x8e8] sm:$0xf0] }
 0x25b   : > { %4476 = vmatpush.bf16.msra.mxu2 %v5974_v39  ;;  %v4771_v39 = vrot.slane %v4770_v28, 1  ;;  %v6506_v9 = vor.u32 %v7553_v63, %v6505_v61 }
 0x25c   : > { %4489 = vmatpush.bf16.msra.mxu3 %v6198_v25  ;;  %v7206_v25 = vor.u32 %v7728_v57, %v7205_v17  ;;  %v7122_v17 = vor.u32 %v7707_v48, %v7121_v47  ;;  %v7588_v57 = vld [vmem:[%s8079_s15 + $0x990] sm:$0xf0]  ;;  %v7686_v47 = vld [vmem:[%s8079_s15 + $0xca0] sm:$0xf0] }
 0x25d   : > { %4451 = vmatpush.bf16.msra.mxu0 %v5498_v7  ;;  %v4772_v1 = vadd.f32 %v4771_v39, %v4770_v28  ;;  %v6645_v28 = vld [vmem:[%s8079_s15 + $0x978] sm:$0xf] }
 0x25e   : > { %4464 = vmatpush.bf16.msra.mxu1 %v5722_v20  ;;  %v7546_v20 = vld [vmem:[%s8079_s15 + $0x840] sm:$0xf0] }
 0x25f   : > { %4477 = vmatpush.bf16.msra.mxu2 %v5946_v14  ;;  %v4816_v7 = vmul.f32 %v8811_v11, %v4772_v1  ;;  %v6701_v14 = vld [vmem:[%s8079_s15 + $0x9e8] sm:$0xf]  ;;  %v6617_v1 = vld [vmem:[%s8079_s15 + $0x940] sm:$0xf] }
 0x260   : > { %4490 = vmatpush.bf16.msra.mxu3 %v6170_v8  ;;  %v8974_v8 = vld [vmem:[#allocation1 + $0x12] sm:$0xff]  ;;  %v6702_v53 = vor.u32 %v7602_v22, %v6701_v14  ;;  %v7693_v22 = vld [vmem:[%s8079_s15 + $0xcd8] sm:$0xf0] }
 0x261   : > { %4452 = vmatpush.bf16.msra.mxu0 %v5470_v37  ;;  %v8978_v23 = vsub.f32 %v8928_v10, %v4816_v7  ;;  %v8988_v37 = vpop.eup %7809  ;;  %v6478_v10 = vor.u32 %v7546_v20, %v6477_v13  ;;  %v7581_v7 = vld [vmem:[%s8079_s15 + $0x958] sm:$0xf0] }
 0x262   : > { %4465 = vmatpush.bf16.msra.mxu1 %v5694_v38  ;;  %v6449_v38 = vld [vmem:[%s8079_s15 + $0x7f0] sm:$0xf]  ;;  %v4900_v45 = vmul.f32 %v8988_v37, %v8932_v60  ;;  %vm4906_vm3 = vweird.f32 %v8988_v37 }
 0x263   : > { %4478 = vmatpush.bf16.msra.mxu2 %v5918_v58  ;;  %v4830_v30 = vmul.f32 %v8978_v23, %v8978_v23  ;;  %v7539_v58 = vld [vmem:[%s8079_s15 + $0x808] sm:$0xf0]  ;;  %vm9064_vm5 = vmor %vm4905_vm4, %vm4906_vm3 }
 0x264   : > { %4491 = vmatpush.bf16.msra.mxu3 %v6142_v16  ;;  %v7651_v16 = vld [vmem:[%s8079_s15 + $0xb88] sm:$0xf0]  ;;  %v6450_v43 = vor.u32 %v7539_v58, %v6449_v38  ;;  %v4901_v39 = vmul.f32 %v8988_v37, %v4900_v45  ;;  %v6589_v38 = vld [vmem:[%s8079_s15 + $0x908] sm:$0xf] }
 0x265   : > { %4453 = vmatpush.bf16.msra.mxu0 %v5442_v52  ;;  %v4843_v46 = vsel %vm4758_vm0, %v4830_v30, 0.0  ;;  %v4247_v51 = vpop.f32.mrf.mxu0  ;;  %v6674_v52 = vor.u32 %v7595_v33, %v6673_v41  ;;  %v6898_v54 = vor.u32 %v7651_v16, %v6897_v19  ;;  %v7574_v33 = vld [vmem:[%s8079_s15 + $0x920] sm:$0xf0]  ;;  %v6813_v19 = vld [vmem:[%s8079_s15 + $0xac8] sm:$0xf] }
 0x266   : > { %4466 = vmatpush.bf16.msra.mxu1 %v5666_v40  ;;  %v4844_v49 = vrot.slane %v4843_v46, 4  ;;  %v4260_v40 = vpop.f32.mrf.mxu1  ;;  %v4902_v14 = vmul.f32 0.5, %v4901_v39  ;;  %v7630_v16 = vld [vmem:[%s8079_s15 + $0xae0] sm:$0xf0]  ;;  %v7333_v39 = vld [vmem:[%s8079_s15 + $0x19c] sm:$0xf] }
 0x267   : > { %4479 = vmatpush.bf16.msra.mxu2 %v5890_v5  ;;  %v4261_v61 = vadd.f32 %v4260_v40, %v4247_v51  ;;  %v7511_v51 = vld [vmem:[%s8079_s15 + $0x728] sm:$0xf0]  ;;  %v6814_v55 = vor.u32 %v7630_v16, %v6813_v19  ;;  %v5583_v19 = vld [vmem:[%s8079_s15 + $0x144] sm:$0xf0] }
 0x268   : > { %4492 = vmatpush.bf16.msra.mxu3 %v6114_v62  ;;  %4454 = vmatmul.bf16.vlgmr.msra.gmra.mxu0 %v8982_v2  ;;  %v4845_v5 = vadd.f32 %v4844_v49, %v4843_v46  ;;  %v6869_v62 = vld [vmem:[%s8079_s15 + $0xb38] sm:$0xf]  ;;  %v4903_v45 = vsub.f32 1.5, %v4902_v14  ;;  %v7037_v46 = vld [vmem:[%s8079_s15 + $0xc88] sm:$0xf] }
 0x269   : > { %4498 = vmatpush.bf16.msrb.mxu0 %v6534_v4  ;;  %4467 = vmatmul.bf16.vlgmr.msra.gmra.mxu1 %v8990_v18  ;;  %v7644_v4 = vld [vmem:[%s8079_s15 + $0xb50] sm:$0xf0]  ;;  %v7623_v40 = vld [vmem:[%s8079_s15 + $0xaa8] sm:$0xf0]  ;;  %v7382_v14 = vld [vmem:[%s8079_s15 + $0x324] sm:$0xf] }
 0x26a   : > { %4511 = vmatpush.bf16.msrb.mxu1 %v6758_v44  ;;  %4480 = vmatmul.bf16.vlgmr.msra.gmra.mxu2 %v8974_v8  ;;  %v7093_v44 = vld [vmem:[%s8079_s15 + $0xcf8] sm:$0xf]  ;;  %v4846_v63 = vrot.slane %v4845_v5, 2  ;;  %v6870_v31 = vor.u32 %v7644_v4, %v6869_v62  ;;  %v7009_v62 = vld [vmem:[%s8079_s15 + $0xc50] sm:$0xf]  ;;  %v9083_v16 = vld [vmem:[#allocation1 + $0x36] sm:$0xff] }
 0x26b   : > { %4524 = vmatpush.bf16.msrb.mxu2 %v6982_v27  ;;  %4493 = vmatmul.bf16.vlgmr.msra.gmra.mxu3 %v8985_v56  ;;  %v7700_v27 = vld [vmem:[%s8079_s15 + $0xd10] sm:$0xf0]  ;;  %v7679_v4 = vld [vmem:[%s8079_s15 + $0xc68] sm:$0xf0] }
 0x26c   : > { %4537 = vmatpush.bf16.msrb.mxu3 %v7206_v25  ;;  %v6646_v25 = vor.u32 %v7588_v57, %v6645_v28  ;;  %v4847_v34 = vadd.f32 %v4846_v63, %v4845_v5  ;;  %v6785_v28 = vld [vmem:[%s8079_s15 + $0xa90] sm:$0xf]  ;;  %v7038_v57 = vor.u32 %v7686_v47, %v7037_v46  ;;  %v5807_v46 = vld [vmem:[%s8079_s15 + $0x304] sm:$0xf0]  ;;  %v7431_v47 = vld [vmem:[%s8079_s15 + $0x4ac] sm:$0xf] }
 0x26d   : > { %4499 = vmatpush.bf16.msrb.mxu0 %v6506_v9  ;;  %v4273_v6 = vpop.f32.mrf.mxu2  ;;  %v7094_v9 = vor.u32 %v7700_v27, %v7093_v44  ;;  %v4249_v36 = vpop.f32.mrf.mxu0  ;;  %v5639_v44 = vld [vmem:[%s8079_s15 + $0x1b4] sm:$0xf0]  ;;  %v7389_v27 = vld [vmem:[%s8079_s15 + $0x35c] sm:$0xf]  ;;  %v6786_v32 = vor.u32 %v7623_v40, %v6785_v28 }
 0x26e   : > { %4512 = vmatpush.bf16.msrb.mxu1 %v6730_v29  ;;  %v6841_v29 = vld [vmem:[%s8079_s15 + $0xb00] sm:$0xf]  ;;  %v4274_v13 = vadd.f32 %v4273_v6, %v4261_v61  ;;  %v4286_v20 = vpop.f32.mrf.mxu3  ;;  %v4848_v24 = vrot.slane %v4847_v34, 1  ;;  %v4262_v58 = vpop.f32.mrf.mxu1  ;;  %v6311_v6 = vld [vmem:[%s8079_s15 + $0x6f4] sm:$0xf0] }
 0x26f   : > { %4525 = vmatpush.bf16.msrb.mxu2 %v6954_v12  ;;  %v7637_v12 = vld [vmem:[%s8079_s15 + $0xb18] sm:$0xf0] }
 0x270   : > { %4538 = vmatpush.bf16.msrb.mxu3 %v7178_v21  ;;  %v7065_v21 = vld [vmem:[%s8079_s15 + $0xcc0] sm:$0xf]  ;;  %v9023_v35 = vadd.f32 %v4286_v20, %v4274_v13  ;;  %v6842_v30 = vor.u32 %v7637_v12, %v6841_v29  ;;  %v4849_v41 = vadd.f32 %v4848_v24, %v4847_v34  ;;  %v4904_v34 = vmul.f32 %v8988_v37, %v4903_v45  ;;  %v7326_v13 = vld [vmem:[%s8079_s15 + $0x164] sm:$0xf]  ;;  %v7417_v36 = vld [vmem:[%s8079_s15 + $0x43c] sm:$0xf] }
 0x271   : > { %4500 = vmatpush.bf16.msrb.mxu0 %v6478_v10  ;;  %v6618_v10 = vor.u32 %v7581_v7, %v6617_v1  ;;  %v7501_v1 = vld [vmem:[%s8079_s15 + $0x6dc] sm:$0xf]  ;;  %v5642_v7 = vor.u32 %v7333_v39, %v5639_v44  ;;  %v5611_v20 = vld [vmem:[%s8079_s15 + $0x17c] sm:$0xf0]  ;;  %v7438_v24 = vld [vmem:[%s8079_s15 + $0x4e4] sm:$0xf] }
 0x272   : > { %4513 = vmatpush.bf16.msrb.mxu1 %v6702_v53  ;;  %v6365_v53 = vld [vmem:[%s8079_s15 + $0x748] sm:$0xf]  ;;  %v4886_v48 = vmul.f32 %v4849_v41, %v8811_v11  ;;  %v4908_v60 = vsel %vm9064_vm5, %v8988_v37, %v4904_v34  ;;  %v7375_v37 = vld [vmem:[%s8079_s15 + $0x2ec] sm:$0xf]  ;;  %v9100_v28 = vld [vmem:[#allocation1 + $0x2d] sm:$0xff] }
 0x273   : > { %4526 = vmatpush.bf16.msrb.mxu2 %v6926_v15  ;;  %v7518_v15 = vld [vmem:[%s8079_s15 + $0x760] sm:$0xf0]  ;;  %v7368_v39 = vld [vmem:[%s8079_s15 + $0x2b4] sm:$0xf]  ;;  %v5779_v44 = vld [vmem:[%s8079_s15 + $0x2cc] sm:$0xf0] }
 0x274   : > { %4539 = vmatpush.bf16.msrb.mxu3 %v7150_v42  ;;  %v7066_v42 = vor.u32 %v7693_v22, %v7065_v21  ;;  %v6366_v49 = vor.u32 %v7518_v15, %v6365_v53  ;;  %v6314_v21 = vor.u32 %v7501_v1, %v6311_v6  ;;  %v5835_v22 = vld [vmem:[%s8079_s15 + $0x33c] sm:$0xf0]  ;;  %v9076_v15 = vld [vmem:[%s8092_s11] sm:$0xff]  ;;  %v5782_v34 = vor.u32 %v7368_v39, %v5779_v44  ;;  %v5471_v44 = vld [vmem:[%s8079_s15 + $0x64] sm:$0xf0] }
 0x275   : > { %4501 = vmatpush.bf16.msrb.mxu0 %v6450_v43  ;;  %v6337_v43 = vld [vmem:[%s8079_s15 + $0x710] sm:$0xf]  ;;  %v4275_v5 = vpop.f32.mrf.mxu2  ;;  %v5838_v41 = vor.u32 %v7382_v14, %v5835_v22  ;;  %v5527_v14 = vld [vmem:[%s8079_s15 + $0xd4] sm:$0xf0] }
 0x276   : > { %4514 = vmatpush.bf16.msrb.mxu1 %v6674_v52  ;;  %v6561_v52 = vld [vmem:[%s8079_s15 + $0x8d0] sm:$0xf]  ;;  %v4288_v61 = vpop.f32.mrf.mxu3  ;;  %v6338_v63 = vor.u32 %v7511_v51, %v6337_v43  ;;  %v9090_v43 = vld [vmem:[#allocation1 + $0x24] sm:$0xff] }
 0x277   : > { %4527 = vmatpush.bf16.msrb.mxu2 %v6898_v54  ;;  %v6590_v54 = vor.u32 %v7574_v33, %v6589_v38  ;;  %v6562_v59 = vor.u32 %v7567_v3, %v6561_v52  ;;  %v5614_v38 = vor.u32 %v7326_v13, %v5611_v20  ;;  %v7319_v33 = vld [vmem:[%s8079_s15 + $0x12c] sm:$0xf]  ;;  %v4978_v3 = vperm.slane %v9076_v15, 0  ;;  %v7312_v5 = vld [vmem:[%s8079_s15 + $0xf4] sm:$0xf] }
 0x278   : > { %4540 = vmatpush.bf16.msrb.mxu3 %v7122_v17  ;;  %v9040_v17 = vadd.f32 1e-05, %v4886_v48  ;;  %v6031_v48 = vld [vmem:[%s8079_s15 + $0x4c4] sm:$0xf0]  ;;  %v9093_v51 = vld [vmem:[#allocation1 + $0x3f] sm:$0xff]  ;;  %v5586_v40 = vor.u32 %v7319_v33, %v5583_v19 }
 0x279   : > { %4502 = vmatpush.bf16.msrb.mxu0 %v6422_v0  ;;  %v5863_v0 = vld [vmem:[%s8079_s15 + $0x374] sm:$0xf0]  ;;  %v7487_v52 = vld [vmem:[%s8079_s15 + $0x66c] sm:$0xf]  ;;  %v6034_v61 = vor.u32 %v7431_v47, %v6031_v48  ;;  %v7298_v19 = vld [vmem:[%s8079_s15 + $0x84] sm:$0xf] }
 0x27a   : > { %4515 = vmatpush.bf16.msrb.mxu1 %v6646_v25  ;;  %7811 = vrsqrt.f32 %v9040_v17  ;;  %v7445_v25 = vld [vmem:[%s8079_s15 + $0x51c] sm:$0xf]  ;;  %v5866_v29 = vor.u32 %v7389_v27, %v5863_v0  ;;  %v6003_v0 = vld [vmem:[%s8079_s15 + $0x48c] sm:$0xf0]  ;;  %vm4915_vm7 = vweird.f32 %v9040_v17  ;;  %v5751_v22 = vld [vmem:[%s8079_s15 + $0x294] sm:$0xf0] }
 0x27b   : > { %4528 = vmatpush.bf16.msrb.mxu2 %v6870_v31  ;;  %v6087_v31 = vld [vmem:[%s8079_s15 + $0x534] sm:$0xf0] }
 0x27c   : > { %4541 = vmatpush.bf16.msrb.mxu3 %v7094_v9  ;;  %v7010_v9 = vor.u32 %v7679_v4, %v7009_v62  ;;  %v6090_v12 = vor.u32 %v7445_v25, %v6087_v31  ;;  %v9106_v62 = vld [vmem:[%s8098_s16] sm:$0xff] }
 0x27d   : > { %4503 = vmatpush.bf16.msrb.mxu0 %v6394_v26  ;;  %v6059_v26 = vld [vmem:[%s8079_s15 + $0x4fc] sm:$0xf0]  ;;  %v7480_v31 = vld [vmem:[%s8079_s15 + $0x634] sm:$0xf]  ;;  %v5001_v1 = vperm.slane %v9106_v62, 0 }
 0x27e   : > { %4516 = vmatpush.bf16.msrb.mxu1 %v6618_v10  ;;  %v7494_v10 = vld [vmem:[%s8079_s15 + $0x6a4] sm:$0xf] }
 0x27f   : > { %4529 = vmatpush.bf16.msrb.mxu2 %v6842_v30  ;;  %v6283_v30 = vld [vmem:[%s8079_s15 + $0x6bc] sm:$0xf0] }
 0x280   : > { %4542 = vmatpush.bf16.msrb.mxu3 %v7066_v42  ;;  %v9070_v53 = vpop.eup %7811  ;;  %v6062_v42 = vor.u32 %v7438_v24, %v6059_v26  ;;  %v6286_v45 = vor.u32 %v7494_v10, %v6283_v30  ;;  %v4979_v24 = vperm.slane %v9076_v15, 1 }
 0x281   : > { %4504 = vmatpush.bf16.msrb.mxu0 %v6366_v49  ;;  %v4910_v58 = vmul.f32 %v9070_v53, %v9040_v17  ;;  %vm4916_vm6 = vweird.f32 %v9070_v53  ;;  %v5975_v17 = vld [vmem:[%s8079_s15 + $0x454] sm:$0xf0] }
 0x282   : > { %4517 = vmatpush.bf16.msrb.mxu1 %v6590_v54  ;;  %v6255_v54 = vld [vmem:[%s8079_s15 + $0x684] sm:$0xf0]  ;;  %vm4917_vm8 = vmor %vm4915_vm7, %vm4916_vm6 }
 0x283   : > { %4530 = vmatpush.bf16.msrb.mxu2 %v6814_v55  ;;  %v4911_v49 = vmul.f32 %v9070_v53, %v4910_v58  ;;  %v4969_v55 = vmul.f32 %v4908_v60, %v8835_v50  ;;  %v5810_v50 = vor.u32 %v7375_v37, %v5807_v46  ;;  %v6258_v27 = vor.u32 %v7487_v52, %v6255_v54  ;;  %v6199_v60 = vld [vmem:[%s8079_s15 + $0x614] sm:$0xf0]  ;;  %v5499_v37 = vld [vmem:[%s8079_s15 + $0x9c] sm:$0xf0]  ;;  %v7410_v52 = vld [vmem:[%s8079_s15 + $0x404] sm:$0xf] }
 0x284   : > { %4543 = vmatpush.bf16.msrb.mxu3 %v7038_v57  ;;  %v5555_v57 = vld [vmem:[%s8079_s15 + $0x10c] sm:$0xf0]  ;;  %v5947_v54 = vld [vmem:[%s8079_s15 + $0x41c] sm:$0xf0] }
 0x285   : > { %4505 = vmatpush.bf16.msrb.mxu0 %v6338_v63  ;;  %v4912_v4 = vmul.f32 0.5, %v4911_v49  ;;  %v7424_v63 = vld [vmem:[%s8079_s15 + $0x474] sm:$0xf]  ;;  %v5558_v6 = vor.u32 %v7312_v5, %v5555_v57  ;;  %v5723_v49 = vld [vmem:[%s8079_s15 + $0x25c] sm:$0xf0]  ;;  %v5950_v39 = vor.u32 %v7410_v52, %v5947_v54 }
 0x286   : > { %4518 = vmatpush.bf16.msrb.mxu1 %v6562_v59  ;;  %v6227_v59 = vld [vmem:[%s8079_s15 + $0x64c] sm:$0xf0]  ;;  %v4312_v20 = vpop.f32.mrf.mxu1  ;;  %v7550_v52 = vld [vmem:[%s8079_s15 + $0x864] sm:$0xf]  ;;  %v6507_v54 = vld [vmem:[%s8079_s15 + $0x87c] sm:$0xf0] }
 0x287   : > { %4531 = vmatpush.bf16.msrb.mxu2 %v6786_v32  ;;  %v4913_v25 = vsub.f32 1.5, %v4912_v4  ;;  %v4992_v32 = vmul.f32 %v4978_v3, %v4969_v55  ;;  %v6230_v26 = vor.u32 %v7480_v31, %v6227_v59  ;;  %v7466_v55 = vld [vmem:[%s8079_s15 + $0x5c4] sm:$0xf]  ;;  %v6171_v3 = vld [vmem:[%s8079_s15 + $0x5dc] sm:$0xf0] }
 0x288   : > { %4544 = vmatpush.bf16.msrb.mxu3 %v7010_v9  ;;  %4506 = vmatmul.bf16.vlgmr.msrb.gmra.mxu0 %v9090_v43  ;;  %v4299_v9 = vpop.f32.mrf.mxu0  ;;  %v7291_v4 = vld [vmem:[%s8079_s15 + $0x4c] sm:$0xf]  ;;  %v6174_v59 = vor.u32 %v7466_v55, %v6171_v3  ;;  %v7606_v55 = vld [vmem:[%s8079_s15 + $0xa24] sm:$0xf] }
 0x289   : > { %4550 = vmatpush.bf16.msra.mxu0 %v5642_v7  ;;  %4519 = vmatmul.bf16.vlgmr.msrb.gmra.mxu1 %v9100_v28  ;;  %v7305_v7 = vld [vmem:[%s8079_s15 + $0xbc] sm:$0xf]  ;;  %v4300_v13 = vadd.f32 %v4299_v9, %v9023_v35 }
 0x28a   : > { %4563 = vmatpush.bf16.msra.mxu1 %v5866_v29  ;;  %4532 = vmatmul.bf16.vlgmr.msrb.gmra.mxu2 %v9083_v16  ;;  %v4914_v29 = vmul.f32 %v9070_v53, %v4913_v25  ;;  %v7473_v35 = vld [vmem:[%s8079_s15 + $0x5fc] sm:$0xf]  ;;  %v5530_v15 = vor.u32 %v7305_v7, %v5527_v14  ;;  %v5474_v7 = vor.u32 %v7291_v4, %v5471_v44 }
 0x28b   : > { %4576 = vmatpush.bf16.msra.mxu2 %v6090_v12  ;;  %4545 = vmatmul.bf16.vlgmr.msrb.gmra.mxu3 %v9093_v51  ;;  %v6006_v12 = vor.u32 %v7424_v63, %v6003_v0  ;;  %v4313_v30 = vadd.f32 %v4312_v20, %v4300_v13  ;;  %v5695_v63 = vld [vmem:[%s8079_s15 + $0x224] sm:$0xf0]  ;;  %v7340_v13 = vld [vmem:[%s8079_s15 + $0x1d4] sm:$0xf] }
 0x28c   : > { %4589 = vmatpush.bf16.msra.mxu3 %v6314_v21  ;;  %v7361_v21 = vld [vmem:[%s8079_s15 + $0x27c] sm:$0xf]  ;;  %v4918_v10 = vsel %vm4917_vm8, %v9070_v53, %v4914_v29  ;;  %v5978_v53 = vor.u32 %v7417_v36, %v5975_v17  ;;  %v7284_v29 = vld [vmem:[%s8079_s15 + $0x14] sm:$0xf]  ;;  %v5891_v17 = vld [vmem:[%s8079_s15 + $0x3ac] sm:$0xf0] }
 0x28d   : > { %4551 = vmatpush.bf16.msra.mxu0 %v5614_v38  ;;  %v5015_v38 = vadd.f32 %v5001_v1, %v4992_v32  ;;  %v4970_v58 = vmul.f32 %v4918_v10, %v8978_v23  ;;  %v4325_v33 = vpop.f32.mrf.mxu2  ;;  %v6202_v23 = vor.u32 %v7473_v35, %v6199_v60  ;;  %v7403_v32 = vld [vmem:[%s8079_s15 + $0x3cc] sm:$0xf]  ;;  %v5919_v1 = vld [vmem:[%s8079_s15 + $0x3e4] sm:$0xf0]  ;;  %v7452_v10 = vld [vmem:[%s8079_s15 + $0x554] sm:$0xf] }
 0x28e   : > { %4564 = vmatpush.bf16.msra.mxu1 %v5838_v41  ;;  %v5002_v41 = vperm.slane %v9106_v62, 1  ;;  %v4326_v47 = vadd.f32 %v4325_v33, %v4313_v30  ;;  %v4338_v48 = vpop.f32.mrf.mxu3  ;;  %v5502_v62 = vor.u32 %v7298_v19, %v5499_v37  ;;  %v4314_v0 = vpop.f32.mrf.mxu1  ;;  %v6115_v30 = vld [vmem:[%s8079_s15 + $0x56c] sm:$0xf0]  ;;  %v7557_v60 = vld [vmem:[%s8079_s15 + $0x89c] sm:$0xf] }
 0x28f   : > { %4577 = vmatpush.bf16.msra.mxu2 %v6062_v42  ;;  %v5754_v42 = vor.u32 %v7361_v21, %v5751_v22  ;;  %v4993_v46 = vmul.f32 %v4979_v24, %v4970_v58  ;;  %v5922_v21 = vor.u32 %v7403_v32, %v5919_v1  ;;  %v5667_v22 = vld [vmem:[%s8079_s15 + $0x1ec] sm:$0xf0]  ;;  %v7396_v24 = vld [vmem:[%s8079_s15 + $0x394] sm:$0xf]  ;;  %v7613_v58 = vld [vmem:[%s8079_s15 + $0xa5c] sm:$0xf] }
 0x290   : > { %4590 = vmatpush.bf16.msra.mxu3 %v6286_v45  ;;  %v7354_v45 = vld [vmem:[%s8079_s15 + $0x244] sm:$0xf]  ;;  %v9141_v57 = vadd.f32 %v4338_v48, %v4326_v47  ;;  %v5670_v19 = vor.u32 %v7340_v13, %v5667_v22  ;;  %v5894_v37 = vor.u32 %v7396_v24, %v5891_v17  ;;  %v6479_v0 = vld [vmem:[%s8079_s15 + $0x844] sm:$0xf0]  ;;  %v7655_v32 = vld [vmem:[%s8079_s15 + $0xbac] sm:$0xf] }
 0x291   : > { %4552 = vmatpush.bf16.msra.mxu0 %v5586_v40  ;;  %v5022_v40 = vmax.f32 %v5015_v38, 0.0  ;;  %v5016_v5 = vadd.f32 %v5002_v41, %v4993_v46  ;;  %v6535_v38 = vld [vmem:[%s8079_s15 + $0x8b4] sm:$0xf0]  ;;  %v6927_v1 = vld [vmem:[%s8079_s15 + $0xbc4] sm:$0xf0] }
 0x292   : > { %4565 = vmatpush.bf16.msra.mxu1 %v5810_v50  ;;  %v4301_v50 = vpop.f32.mrf.mxu0  ;;  %v4773_v31 = vsel %vm4758_vm0, %v9141_v57, 0.0  ;;  %v7207_v46 = vld [vmem:[%s8079_s15 + $0xdf4] sm:$0xf0]  ;;  %v6538_v47 = vor.u32 %v7557_v60, %v6535_v38  ;;  %v7536_v13 = vld [vmem:[%s8079_s15 + $0x7f4] sm:$0xf] }
 0x293   : > { %4578 = vmatpush.bf16.msra.mxu2 %v6034_v61  ;;  %v5726_v61 = vor.u32 %v7354_v45, %v5723_v49  ;;  %v5023_v25 = vmax.f32 %v5016_v5, 0.0  ;;  %v4774_v20 = vrot.slane %v4773_v31, 4  ;;  %v7725_v45 = vld [vmem:[%s8079_s15 + $0xddc] sm:$0xf]  ;;  %v7662_v5 = vld [vmem:[%s8079_s15 + $0xbe4] sm:$0xf] }
 0x294   : > { %4591 = vmatpush.bf16.msra.mxu3 %v6258_v27  ;;  %v7347_v27 = vld [vmem:[%s8079_s15 + $0x20c] sm:$0xf]  ;;  %v7210_v3 = vor.u32 %v7725_v45, %v7207_v46  ;;  %v7718_v50 = vld [vmem:[%s8079_s15 + $0xda4] sm:$0xf]  ;;  %v6899_v22 = vld [vmem:[%s8079_s15 + $0xb8c] sm:$0xf0] }
 0x295   : > { %4553 = vmatpush.bf16.msra.mxu0 %v5558_v6  ;;  %v7459_v6 = vld [vmem:[%s8079_s15 + $0x58c] sm:$0xf]  ;;  %v9153_v9 = vpack.c.bf16 %v5023_v25, %v5022_v40  ;;  %v5698_v14 = vor.u32 %v7347_v27, %v5695_v63  ;;  %v4775_v33 = vadd.f32 %v4774_v20, %v4773_v31  ;;  %v6731_v40 = vld [vmem:[%s8079_s15 + $0xa3c] sm:$0xf0]  ;;  %v6451_v20 = vld [vmem:[%s8079_s15 + $0x80c] sm:$0xf0] }
 0x296   : > { %4566 = vmatpush.bf16.msra.mxu1 %v5782_v34  ;;  %v6143_v34 = vld [vmem:[%s8079_s15 + $0x5a4] sm:$0xf0]  ;;  %v4340_v35 = vpop.f32.mrf.mxu3  ;;  %v6734_v44 = vor.u32 %v7606_v55, %v6731_v40  ;;  %v7543_v63 = vld [vmem:[%s8079_s15 + $0x82c] sm:$0xf]  ;;  %v6423_v60 = vld [vmem:[%s8079_s15 + $0x7d4] sm:$0xf0] }
 0x297   : > { %4579 = vmatpush.bf16.msra.mxu2 %v6006_v12  ;;  %v5443_v12 = vld [vmem:[%s8079_s15 + $0x2c] sm:$0xf0]  ;;  %v6146_v36 = vor.u32 %v7459_v6, %v6143_v34  ;;  %v4776_v4 = vrot.slane %v4775_v33, 2  ;;  %v7599_v25 = vld [vmem:[%s8079_s15 + $0x9ec] sm:$0xf] }
 0x298   : > { %4592 = vmatpush.bf16.msra.mxu3 %v6230_v26  ;;  %v4327_v26 = vpop.f32.mrf.mxu2  ;;  %v5446_v41 = vor.u32 %v7284_v29, %v5443_v12  ;;  %v7711_v34 = vld [vmem:[%s8079_s15 + $0xd6c] sm:$0xf]  ;;  %v6482_v29 = vor.u32 %v7543_v63, %v6479_v0  ;;  %v7529_v35 = vld [vmem:[%s8079_s15 + $0x7bc] sm:$0xf]  ;;  %v7095_v45 = vld [vmem:[%s8079_s15 + $0xd14] sm:$0xf0] }
 0x299   : > { %4554 = vmatpush.bf16.msra.mxu0 %v5530_v15  ;;  %v6759_v15 = vld [vmem:[%s8079_s15 + $0xa74] sm:$0xf0]  ;;  %v4777_v6 = vadd.f32 %v4776_v4, %v4775_v33  ;;  %v7704_v26 = vld [vmem:[%s8079_s15 + $0xd34] sm:$0xf]  ;;  %v7585_v38 = vld [vmem:[%s8079_s15 + $0x97c] sm:$0xf]  ;;  %v6426_v46 = vor.u32 %v7529_v35, %v6423_v60 }
 0x29a   : > { %4567 = vmatpush.bf16.msra.mxu1 %v5754_v42  ;;  %v7669_v42 = vld [vmem:[%s8079_s15 + $0xc1c] sm:$0xf]  ;;  %v6762_v48 = vor.u32 %v7613_v58, %v6759_v15  ;;  %v6647_v15 = vld [vmem:[%s8079_s15 + $0x994] sm:$0xf0]  ;;  %v7634_v40 = vld [vmem:[%s8079_s15 + $0xb04] sm:$0xf] }
 0x29b   : > { %4580 = vmatpush.bf16.msra.mxu2 %v5978_v53  ;;  %v6983_v53 = vld [vmem:[%s8079_s15 + $0xc34] sm:$0xf0]  ;;  %v4778_v24 = vrot.slane %v4777_v6, 1  ;;  %v5645_v60 = vld [vmem:[%s8079_s15 + $0x1a0] sm:$0xf] }
 0x29c   : > { %4593 = vmatpush.bf16.msra.mxu3 %v6202_v23  ;;  %v6118_v23 = vor.u32 %v7452_v10, %v6115_v30  ;;  %v6986_v49 = vor.u32 %v7669_v42, %v6983_v53  ;;  %v7641_v42 = vld [vmem:[%s8079_s15 + $0xb3c] sm:$0xf]  ;;  %v6871_v53 = vld [vmem:[%s8079_s15 + $0xb54] sm:$0xf0] }
 0x29d   : > { %4555 = vmatpush.bf16.msra.mxu0 %v5502_v62  ;;  %v6955_v62 = vld [vmem:[%s8079_s15 + $0xbfc] sm:$0xf0] }
 0x29e   : > { %4568 = vmatpush.bf16.msra.mxu1 %v5726_v61  ;;  %v7179_v61 = vld [vmem:[%s8079_s15 + $0xdbc] sm:$0xf0]  ;;  %v6958_v27 = vor.u32 %v7662_v5, %v6955_v62 }
 0x29f   : > { %4581 = vmatpush.bf16.msra.mxu2 %v5950_v39  ;;  %v6510_v39 = vor.u32 %v7550_v52, %v6507_v54  ;;  %v7182_v31 = vor.u32 %v7718_v50, %v7179_v61  ;;  %v7578_v52 = vld [vmem:[%s8079_s15 + $0x944] sm:$0xf]  ;;  %v6843_v5 = vld [vmem:[%s8079_s15 + $0xb1c] sm:$0xf0] }
 0x2a0   : > { %4594 = vmatpush.bf16.msra.mxu3 %v6174_v59  ;;  %v6703_v59 = vld [vmem:[%s8079_s15 + $0xa04] sm:$0xf0]  ;;  %v7690_v61 = vld [vmem:[%s8079_s15 + $0xcc4] sm:$0xf] }
 0x2a1   : > { %4556 = vmatpush.bf16.msra.mxu0 %v5474_v7  ;;  %v7151_v7 = vld [vmem:[%s8079_s15 + $0xd84] sm:$0xf0]  ;;  %v6706_v12 = vor.u32 %v7599_v25, %v6703_v59  ;;  %v6846_v25 = vor.u32 %v7634_v40, %v6843_v5  ;;  %v7386_v40 = vld [vmem:[%s8079_s15 + $0x340] sm:$0xf0] }
 0x2a2   : > { %4569 = vmatpush.bf16.msra.mxu1 %v5698_v14  ;;  %v7592_v14 = vld [vmem:[%s8079_s15 + $0x9b4] sm:$0xf]  ;;  %v6367_v59 = vld [vmem:[%s8079_s15 + $0x764] sm:$0xf0] }
 0x2a3   : > { %4582 = vmatpush.bf16.msra.mxu2 %v5922_v21  ;;  %v6675_v21 = vld [vmem:[%s8079_s15 + $0x9cc] sm:$0xf0]  ;;  %v6065_v5 = vld [vmem:[%s8079_s15 + $0x4e8] sm:$0xf] }
 0x2a4   : > { %4595 = vmatpush.bf16.msra.mxu3 %v6146_v36  ;;  %v6454_v36 = vor.u32 %v7536_v13, %v6451_v20  ;;  %v6678_v10 = vor.u32 %v7592_v14, %v6675_v21  ;;  %v7039_v13 = vld [vmem:[%s8079_s15 + $0xca4] sm:$0xf0]  ;;  %v7508_v14 = vld [vmem:[%s8079_s15 + $0x714] sm:$0xf] }
 0x2a5   : > { %4557 = vmatpush.bf16.msra.mxu0 %v5446_v41  ;;  %v4351_v17 = vpop.f32.mrf.mxu0 }
 0x2a6   : > { %4570 = vmatpush.bf16.msra.mxu1 %v5670_v19  ;;  %v4364_v58 = vpop.f32.mrf.mxu1  ;;  %v4779_v19 = vadd.f32 %v4778_v24, %v4777_v6  ;;  %v7620_v24 = vld [vmem:[%s8079_s15 + $0xa94] sm:$0xf] }
 0x2a7   : > { %4583 = vmatpush.bf16.msra.mxu2 %v5894_v37  ;;  %v4365_v33 = vadd.f32 %v4364_v58, %v4351_v17  ;;  %v7697_v37 = vld [vmem:[%s8079_s15 + $0xcfc] sm:$0xf]  ;;  %v7676_v17 = vld [vmem:[%s8079_s15 + $0xc54] sm:$0xf]  ;;  %v5869_v58 = vld [vmem:[%s8079_s15 + $0x360] sm:$0xf] }
 0x2a8   : > { %4596 = vmatpush.bf16.msra.mxu3 %v6118_v23  ;;  %4558 = vmatmul.bf16.vlgmr.msra.gmra.mxu0 %v8982_v2  ;;  %v7154_v2 = vor.u32 %v7711_v34, %v7151_v7  ;;  %v6650_v23 = vor.u32 %v7585_v38, %v6647_v15  ;;  %v7098_v55 = vor.u32 %v7697_v37, %v7095_v45  ;;  %v6591_v34 = vld [vmem:[%s8079_s15 + $0x924] sm:$0xf0]  ;;  %v7627_v7 = vld [vmem:[%s8079_s15 + $0xacc] sm:$0xf]  ;;  %v7337_v38 = vld [vmem:[%s8079_s15 + $0x1b8] sm:$0xf0] }
 0x2a9   : > { %4602 = vmatpush.bf16.msrb.mxu0 %v6538_v47  ;;  %4571 = vmatmul.bf16.vlgmr.msra.gmra.mxu1 %v8990_v18  ;;  %v7123_v18 = vld [vmem:[%s8079_s15 + $0xd4c] sm:$0xf0]  ;;  %v6874_v47 = vor.u32 %v7641_v42, %v6871_v53  ;;  %v4817_v50 = vmul.f32 %v8811_v11, %v4779_v19  ;;  %v7393_v15 = vld [vmem:[%s8079_s15 + $0x378] sm:$0xf0]  ;;  %v6093_v42 = vld [vmem:[%s8079_s15 + $0x520] sm:$0xf] }
 0x2aa   : > { %4615 = vmatpush.bf16.msrb.mxu1 %v6762_v48  ;;  %4584 = vmatmul.bf16.vlgmr.msra.gmra.mxu2 %v8974_v8  ;;  %v6930_v8 = vor.u32 %v7655_v32, %v6927_v1  ;;  %v7126_v41 = vor.u32 %v7704_v26, %v7123_v18  ;;  %v7522_v48 = vld [vmem:[%s8079_s15 + $0x784] sm:$0xf]  ;;  %v7571_v32 = vld [vmem:[%s8079_s15 + $0x90c] sm:$0xf]  ;;  %v7449_v53 = vld [vmem:[%s8079_s15 + $0x538] sm:$0xf0] }
 0x2ab   : > { %4628 = vmatpush.bf16.msrb.mxu2 %v6986_v49  ;;  %4597 = vmatmul.bf16.vlgmr.msra.gmra.mxu3 %v8985_v56  ;;  %v7648_v56 = vld [vmem:[%s8079_s15 + $0xb74] sm:$0xf]  ;;  %v6395_v49 = vld [vmem:[%s8079_s15 + $0x79c] sm:$0xf0]  ;;  %v6594_v21 = vor.u32 %v7571_v32, %v6591_v34  ;;  %v7505_v45 = vld [vmem:[%s8079_s15 + $0x6f8] sm:$0xf0] }
 0x2ac   : > { %4641 = vmatpush.bf16.msrb.mxu3 %v7210_v3  ;;  %v6902_v30 = vor.u32 %v7648_v56, %v6899_v22  ;;  %v6619_v3 = vld [vmem:[%s8079_s15 + $0x95c] sm:$0xf0]  ;;  %v7564_v22 = vld [vmem:[%s8079_s15 + $0x8d4] sm:$0xf]  ;;  %v7379_v32 = vld [vmem:[%s8079_s15 + $0x308] sm:$0xf0] }
 0x2ad   : > { %4603 = vmatpush.bf16.msrb.mxu0 %v6510_v39  ;;  %v4377_v54 = vpop.f32.mrf.mxu2  ;;  %v7067_v39 = vld [vmem:[%s8079_s15 + $0xcdc] sm:$0xf0]  ;;  %v4353_v63 = vpop.f32.mrf.mxu0  ;;  %v6622_v0 = vor.u32 %v7578_v52, %v6619_v3  ;;  %v6094_v52 = vor.u32 %v7449_v53, %v6093_v42  ;;  %v6261_v34 = vld [vmem:[%s8079_s15 + $0x670] sm:$0xf] }
 0x2ae   : > { %4616 = vmatpush.bf16.msrb.mxu1 %v6734_v44  ;;  %v4378_v62 = vadd.f32 %v4377_v54, %v4365_v33  ;;  %v4390_v4 = vpop.f32.mrf.mxu3  ;;  %v6398_v44 = vor.u32 %v7522_v48, %v6395_v49  ;;  %v4366_v1 = vpop.f32.mrf.mxu1  ;;  %v7070_v6 = vor.u32 %v7690_v61, %v7067_v39  ;;  %v6317_v37 = vld [vmem:[%s8079_s15 + $0x6e0] sm:$0xf]  ;;  %v5870_v49 = vor.u32 %v7393_v15, %v5869_v58  ;;  %v7330_v54 = vld [vmem:[%s8079_s15 + $0x180] sm:$0xf0]  ;;  %v7365_v58 = vld [vmem:[%s8079_s15 + $0x298] sm:$0xf0] }
 0x2af   : > { %4629 = vmatpush.bf16.msrb.mxu2 %v6958_v27  ;;  %v6318_v3 = vor.u32 %v7505_v45, %v6317_v37  ;;  %v6037_v1 = vld [vmem:[%s8079_s15 + $0x4b0] sm:$0xf]  ;;  %v7421_v15 = vld [vmem:[%s8079_s15 + $0x458] sm:$0xf0]  ;;  %v6205_v53 = vld [vmem:[%s8079_s15 + $0x600] sm:$0xf] }
 0x2b0   : > { %4642 = vmatpush.bf16.msrb.mxu3 %v7182_v31  ;;  %v9216_v27 = vadd.f32 %v4390_v4, %v4378_v62  ;;  %v7515_v31 = vld [vmem:[%s8079_s15 + $0x74c] sm:$0xf]  ;;  %v7442_v62 = vld [vmem:[%s8079_s15 + $0x500] sm:$0xf0]  ;;  %v6289_v4 = vld [vmem:[%s8079_s15 + $0x6a8] sm:$0xf] }
 0x2b1   : > { %4604 = vmatpush.bf16.msrb.mxu0 %v6482_v29  ;;  %v6815_v29 = vld [vmem:[%s8079_s15 + $0xae4] sm:$0xf0]  ;;  %v6370_v20 = vor.u32 %v7515_v31, %v6367_v59  ;;  %v6066_v63 = vor.u32 %v7442_v62, %v6065_v5  ;;  %v5813_v31 = vld [vmem:[%s8079_s15 + $0x2f0] sm:$0xf]  ;;  %v7470_v62 = vld [vmem:[%s8079_s15 + $0x5e0] sm:$0xf0] }
 0x2b2   : > { %4617 = vmatpush.bf16.msrb.mxu1 %v6706_v12  ;;  %v9225_v12 = vsub.f32 %v9141_v57, %v4817_v50  ;;  %v6818_v56 = vor.u32 %v7627_v7, %v6815_v29  ;;  %v6563_v57 = vld [vmem:[%s8079_s15 + $0x8ec] sm:$0xf0]  ;;  %v7498_v50 = vld [vmem:[%s8079_s15 + $0x6c0] sm:$0xf0]  ;;  %v7491_v7 = vld [vmem:[%s8079_s15 + $0x688] sm:$0xf0] }
 0x2b3   : > { %4630 = vmatpush.bf16.msrb.mxu2 %v6930_v8  ;;  %v7683_v8 = vld [vmem:[%s8079_s15 + $0xc8c] sm:$0xf]  ;;  %v6566_v33 = vor.u32 %v7564_v22, %v6563_v57  ;;  %v6290_v59 = vor.u32 %v7498_v50, %v6289_v4  ;;  %v6233_v22 = vld [vmem:[%s8079_s15 + $0x638] sm:$0xf]  ;;  %v7484_v57 = vld [vmem:[%s8079_s15 + $0x650] sm:$0xf0] }
 0x2b4   : > { %4643 = vmatpush.bf16.msrb.mxu3 %v7154_v2  ;;  %v6339_v2 = vld [vmem:[%s8079_s15 + $0x72c] sm:$0xf0]  ;;  %v7042_v18 = vor.u32 %v7683_v8, %v7039_v13  ;;  %v4831_v35 = vmul.f32 %v9225_v12, %v9225_v12  ;;  %v5814_v8 = vor.u32 %v7379_v32, %v5813_v31  ;;  %v6177_v5 = vld [vmem:[%s8079_s15 + $0x5c8] sm:$0xf] }
 0x2b5   : > { %4605 = vmatpush.bf16.msrb.mxu0 %v6454_v36  ;;  %v4379_v26 = vpop.f32.mrf.mxu2  ;;  %v6787_v36 = vld [vmem:[%s8079_s15 + $0xaac] sm:$0xf0] }
 0x2b6   : > { %4618 = vmatpush.bf16.msrb.mxu1 %v6678_v10  ;;  %v7011_v10 = vld [vmem:[%s8079_s15 + $0xc6c] sm:$0xf0]  ;;  %v6790_v19 = vor.u32 %v7620_v24, %v6787_v36  ;;  %v4850_v48 = vsel %vm4758_vm0, %v4831_v35, 0.0  ;;  %v7309_v35 = vld [vmem:[%s8079_s15 + $0xd8] sm:$0xf0] }
 0x2b7   : > { %4631 = vmatpush.bf16.msrb.mxu2 %v6902_v30  ;;  %v4392_v30 = vpop.f32.mrf.mxu3  ;;  %v4851_v61 = vrot.slane %v4850_v48, 4  ;;  %v5701_v31 = vld [vmem:[%s8079_s15 + $0x210] sm:$0xf] }
 0x2b8   : > { %4644 = vmatpush.bf16.msrb.mxu3 %v7126_v41  ;;  %v6342_v41 = vor.u32 %v7508_v14, %v6339_v2  ;;  %v5785_v14 = vld [vmem:[%s8079_s15 + $0x2b8] sm:$0xf]  ;;  %v7372_v2 = vld [vmem:[%s8079_s15 + $0x2d0] sm:$0xf0]  ;;  %v5533_v30 = vld [vmem:[%s8079_s15 + $0xc0] sm:$0xf] }
 0x2b9   : > { %4606 = vmatpush.bf16.msrb.mxu0 %v6426_v46  ;;  %v7014_v46 = vor.u32 %v7676_v17, %v7011_v10  ;;  %v4852_v29 = vadd.f32 %v4851_v61, %v4850_v48  ;;  %v5729_v48 = vld [vmem:[%s8079_s15 + $0x248] sm:$0xf] }
 0x2ba   : > { %4619 = vmatpush.bf16.msrb.mxu1 %v6650_v23  ;;  %v5646_v23 = vor.u32 %v7337_v38, %v5645_v60  ;;  %v5757_v60 = vld [vmem:[%s8079_s15 + $0x280] sm:$0xf]  ;;  %v6234_v38 = vor.u32 %v7484_v57, %v6233_v22  ;;  %v7344_v22 = vld [vmem:[%s8079_s15 + $0x1f0] sm:$0xf0]  ;;  %v5897_v57 = vld [vmem:[%s8079_s15 + $0x398] sm:$0xf] }
 0x2bb   : > { %4632 = vmatpush.bf16.msrb.mxu2 %v6874_v47  ;;  %v5617_v47 = vld [vmem:[%s8079_s15 + $0x168] sm:$0xf]  ;;  %v5758_v37 = vor.u32 %v7365_v58, %v5757_v60  ;;  %v6765_v60 = vld [vmem:[%s8079_s15 + $0xa60] sm:$0xf] }
 0x2bc   : > { %4645 = vmatpush.bf16.msrb.mxu3 %v7098_v55  ;;  %v5841_v55 = vld [vmem:[%s8079_s15 + $0x328] sm:$0xf]  ;;  %v5618_v39 = vor.u32 %v7330_v54, %v5617_v47  ;;  %v7302_v47 = vld [vmem:[%s8079_s15 + $0xa0] sm:$0xf0] }
 0x2bd   : > { %4607 = vmatpush.bf16.msrb.mxu0 %v6398_v44  ;;  %v5842_v44 = vor.u32 %v7386_v40, %v5841_v55  ;;  %v7358_v55 = vld [vmem:[%s8079_s15 + $0x260] sm:$0xf0] }
 0x2be   : > { %4620 = vmatpush.bf16.msrb.mxu1 %v6622_v0  ;;  %v5589_v0 = vld [vmem:[%s8079_s15 + $0x130] sm:$0xf]  ;;  %v7414_v40 = vld [vmem:[%s8079_s15 + $0x420] sm:$0xf0] }
 0x2bf   : > { %4633 = vmatpush.bf16.msrb.mxu2 %v6846_v25  ;;  %v7323_v25 = vld [vmem:[%s8079_s15 + $0x148] sm:$0xf0] }
 0x2c0   : > { %4646 = vmatpush.bf16.msrb.mxu3 %v7070_v6  ;;  %v7435_v6 = vld [vmem:[%s8079_s15 + $0x4c8] sm:$0xf0] }
 0x2c1   : > { %4608 = vmatpush.bf16.msrb.mxu0 %v6370_v20  ;;  %v6038_v13 = vor.u32 %v7435_v6, %v6037_v1  ;;  %v5561_v20 = vld [vmem:[%s8079_s15 + $0xf8] sm:$0xf]  ;;  %v6178_v6 = vor.u32 %v7470_v62, %v6177_v5  ;;  %v7666_v5 = vld [vmem:[%s8079_s15 + $0xc00] sm:$0xf0] }
 0x2c2   : > { %4621 = vmatpush.bf16.msrb.mxu1 %v6594_v21  ;;  %v6009_v21 = vld [vmem:[%s8079_s15 + $0x478] sm:$0xf] }
 0x2c3   : > { %4634 = vmatpush.bf16.msrb.mxu2 %v6818_v56  ;;  %v7428_v56 = vld [vmem:[%s8079_s15 + $0x490] sm:$0xf0] }
 0x2c4   : > { %4647 = vmatpush.bf16.msrb.mxu3 %v7042_v18  ;;  %v5786_v18 = vor.u32 %v7372_v2, %v5785_v14  ;;  %v6010_v36 = vor.u32 %v7428_v56, %v6009_v21  ;;  %v7288_v14 = vld [vmem:[%s8079_s15 + $0x30] sm:$0xf0] }
 0x2c5   : > { %4609 = vmatpush.bf16.msrb.mxu0 %v6342_v41  ;;  %v4403_v26 = vpop.f32.mrf.mxu0  ;;  %v5981_v41 = vld [vmem:[%s8079_s15 + $0x440] sm:$0xf] }
 0x2c6   : > { %4622 = vmatpush.bf16.msrb.mxu1 %v6566_v33  ;;  %v4404_v17 = vadd.f32 %v4403_v26, %v9216_v27  ;;  %v4416_v10 = vpop.f32.mrf.mxu1  ;;  %v7477_v33 = vld [vmem:[%s8079_s15 + $0x618] sm:$0xf0]  ;;  %v5534_v27 = vor.u32 %v7309_v35, %v5533_v30  ;;  %v5982_v45 = vor.u32 %v7421_v15, %v5981_v41  ;;  %v6989_v15 = vld [vmem:[%s8079_s15 + $0xc20] sm:$0xf] }
 0x2c7   : > { %4635 = vmatpush.bf16.msrb.mxu2 %v6790_v19  ;;  %v7561_v35 = vld [vmem:[%s8079_s15 + $0x8b8] sm:$0xf0] }
 0x2c8   : > { %4648 = vmatpush.bf16.msrb.mxu3 %v7014_v46  ;;  %4610 = vmatmul.bf16.vlgmr.msrb.gmra.mxu0 %v9090_v43  ;;  %v7316_v43 = vld [vmem:[%s8079_s15 + $0x110] sm:$0xf0]  ;;  %v4417_v42 = vadd.f32 %v4416_v10, %v4404_v17  ;;  %v6541_v17 = vld [vmem:[%s8079_s15 + $0x8a0] sm:$0xf]  ;;  %v7617_v41 = vld [vmem:[%s8079_s15 + $0xa78] sm:$0xf0] }
 0x2c9   : > { %4654 = vmatpush.bf16.msra.mxu0 %v5646_v23  ;;  %4623 = vmatmul.bf16.vlgmr.msrb.gmra.mxu1 %v9100_v28  ;;  %v4853_v28 = vrot.slane %v4852_v29, 2  ;;  %v5562_v24 = vor.u32 %v7316_v43, %v5561_v20  ;;  %v5505_v23 = vld [vmem:[%s8079_s15 + $0x88] sm:$0xf]  ;;  %v5449_v43 = vld [vmem:[%s8079_s15 + $0x18] sm:$0xf] }
 0x2ca   : > { %4667 = vmatpush.bf16.msra.mxu1 %v5870_v49  ;;  %4636 = vmatmul.bf16.vlgmr.msrb.gmra.mxu2 %v9083_v16  ;;  %v5590_v16 = vor.u32 %v7323_v25, %v5589_v0  ;;  %v6206_v49 = vor.u32 %v7477_v33, %v6205_v53  ;;  %v5506_v61 = vor.u32 %v7302_v47, %v5505_v23  ;;  %v7295_v25 = vld [vmem:[%s8079_s15 + $0x68] sm:$0xf0]  ;;  %v6513_v23 = vld [vmem:[%s8079_s15 + $0x868] sm:$0xf] }
 0x2cb   : > { %4680 = vmatpush.bf16.msra.mxu2 %v6094_v52  ;;  %4649 = vmatmul.bf16.vlgmr.msrb.gmra.mxu3 %v9093_v51  ;;  %v6262_v51 = vor.u32 %v7491_v7, %v6261_v34  ;;  %v4854_v19 = vadd.f32 %v4853_v28, %v4852_v29  ;;  %v5925_v34 = vld [vmem:[%s8079_s15 + $0x3d0] sm:$0xf]  ;;  %v7407_v7 = vld [vmem:[%s8079_s15 + $0x3e8] sm:$0xf0]  ;;  %v7400_v28 = vld [vmem:[%s8079_s15 + $0x3b0] sm:$0xf0]  ;;  %v5450_v58 = vor.u32 %v7288_v14, %v5449_v43 }
 0x2cc   : > { %4693 = vmatpush.bf16.msra.mxu3 %v6318_v3  ;;  %v5953_v3 = vld [vmem:[%s8079_s15 + $0x408] sm:$0xf]  ;;  %v5926_v56 = vor.u32 %v7407_v7, %v5925_v34  ;;  %v7603_v34 = vld [vmem:[%s8079_s15 + $0xa08] sm:$0xf0]  ;;  %v6933_v7 = vld [vmem:[%s8079_s15 + $0xbb0] sm:$0xf] }
 0x2cd   : > { %4655 = vmatpush.bf16.msra.mxu0 %v5618_v39  ;;  %v4429_v46 = vpop.f32.mrf.mxu2  ;;  %v4855_v4 = vrot.slane %v4854_v19, 1  ;;  %v5477_v39 = vld [vmem:[%s8079_s15 + $0x50] sm:$0xf]  ;;  %v5954_v0 = vor.u32 %v7414_v40, %v5953_v3  ;;  %v7610_v3 = vld [vmem:[%s8079_s15 + $0xa40] sm:$0xf0] }
 0x2ce   : > { %4668 = vmatpush.bf16.msra.mxu1 %v5842_v44  ;;  %v4430_v52 = vadd.f32 %v4429_v46, %v4417_v42  ;;  %v4442_v54 = vpop.f32.mrf.mxu3  ;;  %v4405_v44 = vpop.f32.mrf.mxu0  ;;  %v5478_v20 = vor.u32 %v7295_v25, %v5477_v39  ;;  %v7673_v42 = vld [vmem:[%s8079_s15 + $0xc38] sm:$0xf0]  ;;  %v6542_v46 = vor.u32 %v7561_v35, %v6541_v17  ;;  %v6961_v40 = vld [vmem:[%s8079_s15 + $0xbe8] sm:$0xf]  ;;  %v7722_v39 = vld [vmem:[%s8079_s15 + $0xdc0] sm:$0xf0] }
 0x2cf   : > { %4681 = vmatpush.bf16.msra.mxu2 %v6066_v63  ;;  %v5730_v63 = vor.u32 %v7358_v55, %v5729_v48  ;;  %v4418_v32 = vpop.f32.mrf.mxu1  ;;  %v6766_v48 = vor.u32 %v7617_v41, %v6765_v60  ;;  %v6962_v25 = vor.u32 %v7666_v5, %v6961_v40  ;;  %v7841_v43 = vld [vmem:[#allocation1 + $0x1b] sm:$0xff]  ;;  %v7129_v17 = vld [vmem:[%s8079_s15 + $0xd38] sm:$0xf]  ;;  %v7526_v5 = vld [vmem:[%s8079_s15 + $0x7a0] sm:$0xf0] }
 0x2d0   : > { %4694 = vmatpush.bf16.msra.mxu3 %v6290_v59  ;;  %v9293_v50 = vadd.f32 %v4442_v54, %v4430_v52  ;;  %v7351_v59 = vld [vmem:[%s8079_s15 + $0x228] sm:$0xf0]  ;;  %v7554_v52 = vld [vmem:[%s8079_s15 + $0x880] sm:$0xf0]  ;;  %v6737_v54 = vld [vmem:[%s8079_s15 + $0xa28] sm:$0xf] }
 0x2d1   : > { %4656 = vmatpush.bf16.msra.mxu0 %v5590_v16  ;;  %v6149_v16 = vld [vmem:[%s8079_s15 + $0x590] sm:$0xf]  ;;  %v5702_v21 = vor.u32 %v7351_v59, %v5701_v31  ;;  %v6514_v44 = vor.u32 %v7554_v52, %v6513_v23  ;;  %v7547_v59 = vld [vmem:[%s8079_s15 + $0x848] sm:$0xf0]  ;;  %v6401_v40 = vld [vmem:[%s8079_s15 + $0x788] sm:$0xf] }
 0x2d2   : > { %4669 = vmatpush.bf16.msra.mxu1 %v5814_v8  ;;  %v4780_v1 = vsel %vm4758_vm0, %v9293_v50, 0.0  ;;  %v7463_v8 = vld [vmem:[%s8079_s15 + $0x5a8] sm:$0xf0]  ;;  %v6485_v31 = vld [vmem:[%s8079_s15 + $0x830] sm:$0xf] }
 0x2d3   : > { %4682 = vmatpush.bf16.msra.mxu2 %v6038_v13  ;;  %v4781_v29 = vrot.slane %v4780_v1, 4  ;;  %v4856_v13 = vadd.f32 %v4855_v4, %v4854_v19  ;;  %v6150_v26 = vor.u32 %v7463_v8, %v6149_v16  ;;  %v5898_v19 = vor.u32 %v7400_v28, %v5897_v57  ;;  %v6709_v32 = vld [vmem:[%s8079_s15 + $0x9f0] sm:$0xf]  ;;  %v6681_v57 = vld [vmem:[%s8079_s15 + $0x9b8] sm:$0xf] }
 0x2d4   : > { %4695 = vmatpush.bf16.msra.mxu3 %v6262_v51  ;;  %v5673_v51 = vld [vmem:[%s8079_s15 + $0x1d8] sm:$0xf]  ;;  %v7157_v8 = vld [vmem:[%s8079_s15 + $0xd70] sm:$0xf]  ;;  %v6486_v14 = vor.u32 %v7547_v59, %v6485_v31 }
 0x2d5   : > { %4657 = vmatpush.bf16.msra.mxu0 %v5562_v24  ;;  %v4782_v2 = vadd.f32 %v4781_v29, %v4780_v1  ;;  %v4431_v24 = vpop.f32.mrf.mxu2  ;;  %v5674_v33 = vor.u32 %v7344_v22, %v5673_v51  ;;  %v7659_v29 = vld [vmem:[%s8079_s15 + $0xbc8] sm:$0xf0]  ;;  %v7842_v51 = vld [vmem:[#allocation1 + $0x9] sm:$0xff]  ;;  %v7540_v22 = vld [vmem:[%s8079_s15 + $0x810] sm:$0xf0] }
 0x2d6   : > { %4670 = vmatpush.bf16.msra.mxu1 %v5786_v18  ;;  %v6121_v18 = vld [vmem:[%s8079_s15 + $0x558] sm:$0xf]  ;;  %v4444_v10 = vpop.f32.mrf.mxu3  ;;  %v7596_v24 = vld [vmem:[%s8079_s15 + $0x9d0] sm:$0xf0] }
 0x2d7   : > { %4683 = vmatpush.bf16.msra.mxu2 %v6010_v36  ;;  %v7456_v36 = vld [vmem:[%s8079_s15 + $0x570] sm:$0xf0]  ;;  %v4783_v30 = vrot.slane %v4782_v2, 2 }
 0x2d8   : > { %4696 = vmatpush.bf16.msra.mxu3 %v6234_v38  ;;  %v4887_v38 = vmul.f32 %v4856_v13, %v8811_v11  ;;  %v7715_v13 = vld [vmem:[%s8079_s15 + $0xd88] sm:$0xf0]  ;;  %v7708_v10 = vld [vmem:[%s8079_s15 + $0xd50] sm:$0xf0] }
 0x2d9   : > { %4658 = vmatpush.bf16.msra.mxu0 %v5534_v27  ;;  %v4784_v53 = vadd.f32 %v4783_v30, %v4782_v2  ;;  %v7213_v27 = vld [vmem:[%s8079_s15 + $0xde0] sm:$0xf]  ;;  %v6710_v2 = vor.u32 %v7603_v34, %v6709_v32  ;;  %v7158_v28 = vor.u32 %v7715_v13, %v7157_v8  ;;  %v7073_v32 = vld [vmem:[%s8079_s15 + $0xcc8] sm:$0xf] }
 0x2da   : > { %4671 = vmatpush.bf16.msra.mxu1 %v5758_v37  ;;  %v7729_v37 = vld [vmem:[%s8079_s15 + $0xdf8] sm:$0xf0]  ;;  %v9328_v62 = vadd.f32 1e-05, %v4887_v38 }
 0x2db   : > { %4684 = vmatpush.bf16.msra.mxu2 %v5982_v45  ;;  %v6122_v45 = vor.u32 %v7456_v36, %v6121_v18  ;;  %v4785_v47 = vrot.slane %v4784_v53, 1  ;;  %v7214_v55 = vor.u32 %v7729_v37, %v7213_v27  ;;  %v7652_v18 = vld [vmem:[%s8079_s15 + $0xb90] sm:$0xf0]  ;;  %v7130_v27 = vor.u32 %v7708_v10, %v7129_v17  ;;  %v7589_v37 = vld [vmem:[%s8079_s15 + $0x998] sm:$0xf0] }
 0x2dc   : > { %4697 = vmatpush.bf16.msra.mxu3 %v6206_v49  ;;  %v6990_v49 = vor.u32 %v7673_v42, %v6989_v15  ;;  %7813 = vrsqrt.f32 %v9328_v62  ;;  %v6429_v15 = vld [vmem:[%s8079_s15 + $0x7c0] sm:$0xf]  ;;  %v7533_v42 = vld [vmem:[%s8079_s15 + $0x7d8] sm:$0xf0]  ;;  %v6345_v17 = vld [vmem:[%s8079_s15 + $0x718] sm:$0xf]  ;;  %vm4925_vm10 = vweird.f32 %v9328_v62 }
 0x2dd   : > { %4659 = vmatpush.bf16.msra.mxu0 %v5506_v61  ;;  %v4786_v4 = vadd.f32 %v4785_v47, %v4784_v53  ;;  %v7185_v61 = vld [vmem:[%s8079_s15 + $0xda8] sm:$0xf]  ;;  %v6653_v53 = vld [vmem:[%s8079_s15 + $0x980] sm:$0xf] }
 0x2de   : > { %4672 = vmatpush.bf16.msra.mxu1 %v5730_v63  ;;  %v7186_v1 = vor.u32 %v7722_v39, %v7185_v61  ;;  %v7101_v47 = vld [vmem:[%s8079_s15 + $0xd00] sm:$0xf] }
 0x2df   : > { %4685 = vmatpush.bf16.msra.mxu2 %v5954_v0  ;;  %v4818_v63 = vmul.f32 %v8811_v11, %v4786_v4  ;;  %v6738_v0 = vor.u32 %v7610_v3, %v6737_v54  ;;  %v6430_v54 = vor.u32 %v7533_v42, %v6429_v15  ;;  %v6625_v4 = vld [vmem:[%s8079_s15 + $0x948] sm:$0xf] }
 0x2e0   : > { %4698 = vmatpush.bf16.msra.mxu3 %v6178_v6  ;;  %v7839_v6 = vld [vmem:[#allocation1 + $0x12] sm:$0xff] }
 0x2e1   : > { %4660 = vmatpush.bf16.msra.mxu0 %v5478_v20  ;;  %v9341_v16 = vsub.f32 %v9293_v50, %v4818_v63  ;;  %v7840_v20 = vld [vmem:[#allocation1] sm:$0xff]  ;;  %v7582_v63 = vld [vmem:[%s8079_s15 + $0x960] sm:$0xf0] }
 0x2e2   : > { %4673 = vmatpush.bf16.msra.mxu1 %v5702_v21  ;;  %v6934_v21 = vor.u32 %v7659_v29, %v6933_v7  ;;  %v9356_v38 = vpop.eup %7813  ;;  %v6402_v7 = vor.u32 %v7526_v5, %v6401_v40  ;;  %v6626_v13 = vor.u32 %v7582_v63, %v6625_v4  ;;  %v7845_v40 = vld [vmem:[#allocation1 + $0x36] sm:$0xff]  ;;  %v9402_v63 = vld [vmem:[%s8092_s11] sm:$0xff] }
 0x2e3   : > { %4686 = vmatpush.bf16.msra.mxu2 %v5926_v56  ;;  %v4832_v50 = vmul.f32 %v9341_v16, %v9341_v16  ;;  %v6457_v56 = vld [vmem:[%s8079_s15 + $0x7f8] sm:$0xf]  ;;  %vm4926_vm9 = vweird.f32 %v9356_v38 }
 0x2e4   : > { %4699 = vmatpush.bf16.msra.mxu3 %v6150_v26  ;;  %v6905_v26 = vld [vmem:[%s8079_s15 + $0xb78] sm:$0xf]  ;;  %v6458_v35 = vor.u32 %v7540_v22, %v6457_v56  ;;  %v7575_v56 = vld [vmem:[%s8079_s15 + $0x928] sm:$0xf0]  ;;  %v6821_v22 = vld [vmem:[%s8079_s15 + $0xad0] sm:$0xf] }
 0x2e5   : > { %4661 = vmatpush.bf16.msra.mxu0 %v5450_v58  ;;  %v4857_v36 = vsel %vm4758_vm0, %v4832_v50, 0.0  ;;  %v4455_v60 = vpop.f32.mrf.mxu0  ;;  %v6682_v58 = vor.u32 %v7596_v24, %v6681_v57  ;;  %v6906_v41 = vor.u32 %v7652_v18, %v6905_v26  ;;  %v7631_v57 = vld [vmem:[%s8079_s15 + $0xae8] sm:$0xf0]  ;;  %vm4927_vm11 = vmor %vm4925_vm10, %vm4926_vm9 }
 0x2e6   : > { %4674 = vmatpush.bf16.msra.mxu1 %v5674_v33  ;;  %v4858_v30 = vrot.slane %v4857_v36, 4  ;;  %v4468_v33 = vpop.f32.mrf.mxu1  ;;  %v7687_v24 = vld [vmem:[%s8079_s15 + $0xca8] sm:$0xf0] }
 0x2e7   : > { %4687 = vmatpush.bf16.msra.mxu2 %v5898_v19  ;;  %v4469_v23 = vadd.f32 %v4468_v33, %v4455_v60  ;;  %v6569_v60 = vld [vmem:[%s8079_s15 + $0x8d8] sm:$0xf]  ;;  %v7624_v33 = vld [vmem:[%s8079_s15 + $0xab0] sm:$0xf0] }
 0x2e8   : > { %4700 = vmatpush.bf16.msra.mxu3 %v6122_v45  ;;  %4662 = vmatmul.bf16.vlgmr.msra.gmra.mxu0 %v7840_v20  ;;  %v4859_v19 = vadd.f32 %v4858_v30, %v4857_v36  ;;  %v6877_v45 = vld [vmem:[%s8079_s15 + $0xb40] sm:$0xf]  ;;  %v6822_v30 = vor.u32 %v7631_v57, %v6821_v22 }
 0x2e9   : > { %4706 = vmatpush.bf16.msrb.mxu0 %v6542_v46  ;;  %4675 = vmatmul.bf16.vlgmr.msra.gmra.mxu1 %v7842_v51  ;;  %v7645_v46 = vld [vmem:[%s8079_s15 + $0xb58] sm:$0xf0]  ;;  %v6597_v51 = vld [vmem:[%s8079_s15 + $0x910] sm:$0xf] }
 0x2ea   : > { %4719 = vmatpush.bf16.msrb.mxu1 %v6766_v48  ;;  %4688 = vmatmul.bf16.vlgmr.msra.gmra.mxu2 %v7839_v6  ;;  %v7701_v48 = vld [vmem:[%s8079_s15 + $0xd18] sm:$0xf0]  ;;  %v4860_v52 = vrot.slane %v4859_v19, 2  ;;  %v6878_v3 = vor.u32 %v7645_v46, %v6877_v45  ;;  %v6598_v10 = vor.u32 %v7575_v56, %v6597_v51 }
 0x2eb   : > { %4732 = vmatpush.bf16.msrb.mxu2 %v6990_v49  ;;  %4701 = vmatmul.bf16.vlgmr.msra.gmra.mxu3 %v7841_v43  ;;  %v4920_v49 = vmul.f32 %v9356_v38, %v9328_v62  ;;  %v6373_v43 = vld [vmem:[%s8079_s15 + $0x750] sm:$0xf]  ;;  %v4980_v62 = vperm.slane %v9402_v63, 2 }
 0x2ec   : > { %4745 = vmatpush.bf16.msrb.mxu3 %v7214_v55  ;;  %v6654_v55 = vor.u32 %v7589_v37, %v6653_v53  ;;  %v4861_v39 = vadd.f32 %v4860_v52, %v4859_v19  ;;  %v6793_v53 = vld [vmem:[%s8079_s15 + $0xa98] sm:$0xf]  ;;  %v7680_v37 = vld [vmem:[%s8079_s15 + $0xc70] sm:$0xf0] }
 0x2ed   : > { %4707 = vmatpush.bf16.msrb.mxu0 %v6514_v44  ;;  %v4481_v61 = vpop.f32.mrf.mxu2  ;;  %v7102_v44 = vor.u32 %v7701_v48, %v7101_v47  ;;  %v4921_v6 = vmul.f32 %v9356_v38, %v4920_v49  ;;  %v4457_v8 = vpop.f32.mrf.mxu0  ;;  %v6794_v47 = vor.u32 %v7624_v33, %v6793_v53 }
 0x2ee   : > { %4720 = vmatpush.bf16.msrb.mxu1 %v6738_v0  ;;  %v6849_v0 = vld [vmem:[%s8079_s15 + $0xb08] sm:$0xf]  ;;  %v4482_v31 = vadd.f32 %v4481_v61, %v4469_v23  ;;  %v4494_v59 = vpop.f32.mrf.mxu3  ;;  %v4862_v34 = vrot.slane %v4861_v39, 1  ;;  %v4470_v50 = vpop.f32.mrf.mxu1  ;;  %v7846_v61 = vld [vmem:[#allocation1 + $0x3f] sm:$0xff] }
 0x2ef   : > { %4733 = vmatpush.bf16.msrb.mxu2 %v6962_v25  ;;  %v7638_v25 = vld [vmem:[%s8079_s15 + $0xb20] sm:$0xf0]  ;;  %v4922_v26 = vmul.f32 0.5, %v4921_v6 }
 0x2f0   : > { %4746 = vmatpush.bf16.msrb.mxu3 %v7186_v1  ;;  %v7694_v1 = vld [vmem:[%s8079_s15 + $0xce0] sm:$0xf0]  ;;  %v9377_v29 = vadd.f32 %v4494_v59, %v4482_v31  ;;  %v6850_v20 = vor.u32 %v7638_v25, %v6849_v0 }
 0x2f1   : > { %4708 = vmatpush.bf16.msrb.mxu0 %v6486_v14  ;;  %v7519_v14 = vld [vmem:[%s8079_s15 + $0x768] sm:$0xf0]  ;;  %v4923_v46 = vsub.f32 1.5, %v4922_v26 }
 0x2f2   : > { %4721 = vmatpush.bf16.msrb.mxu1 %v6710_v2  ;;  %v4863_v2 = vadd.f32 %v4862_v34, %v4861_v39  ;;  %v6374_v36 = vor.u32 %v7519_v14, %v6373_v43 }
 0x2f3   : > { %4734 = vmatpush.bf16.msrb.mxu2 %v6934_v21  ;;  %v7074_v21 = vor.u32 %v7694_v1, %v7073_v32  ;;  %v4924_v49 = vmul.f32 %v9356_v38, %v4923_v46  ;;  %v9407_v1 = vld [vmem:[%s8098_s16] sm:$0xff] }
 0x2f4   : > { %4747 = vmatpush.bf16.msrb.mxu3 %v7158_v28  ;;  %v7045_v28 = vld [vmem:[%s8079_s15 + $0xc90] sm:$0xf]  ;;  %v4888_v18 = vmul.f32 %v4863_v2, %v8811_v11  ;;  %v5003_v6 = vperm.slane %v9407_v1, 2 }
 0x2f5   : > { %4709 = vmatpush.bf16.msrb.mxu0 %v6458_v35  ;;  %v7512_v35 = vld [vmem:[%s8079_s15 + $0x730] sm:$0xf0]  ;;  %v7046_v42 = vor.u32 %v7687_v24, %v7045_v28  ;;  %v4928_v5 = vsel %vm4927_vm11, %v9356_v38, %v4924_v49  ;;  %v5037_v28 = vrot.slane %v9153_v9, 3  ;;  %vm5057_vm11 = vcmask 1046534  }
 0x2f6   : > { %4722 = vmatpush.bf16.msrb.mxu1 %v6682_v58  ;;  %v7568_v58 = vld [vmem:[%s8079_s15 + $0x8f0] sm:$0xf0]  ;;  %v4895_v15 = vadd.f32 1e-05, %v4888_v18  ;;  %v4496_v19 = vpop.f32.mrf.mxu3  ;;  %v6346_v45 = vor.u32 %v7512_v35, %v6345_v17 }
 0x2f7   : > { %4735 = vmatpush.bf16.msrb.mxu2 %v6906_v41  ;;  %v4483_v41 = vpop.f32.mrf.mxu2  ;;  %v6570_v23 = vor.u32 %v7568_v58, %v6569_v60 }
 0x2f8   : > { %4748 = vmatpush.bf16.msrb.mxu3 %v7130_v27  ;;  %v7017_v27 = vld [vmem:[%s8079_s15 + $0xc58] sm:$0xf]  ;;  %7815 = vrsqrt.f32 %v4895_v15  ;;  %vm4935_vm13 = vweird.f32 %v4895_v15 }
 0x2f9   : > { %4710 = vmatpush.bf16.msrb.mxu0 %v6430_v54  ;;  %v7018_v48 = vor.u32 %v7680_v37, %v7017_v27 }
 0x2fa   : > { %4723 = vmatpush.bf16.msrb.mxu1 %v6654_v55  ;;  %v7843_v55 = vld [vmem:[#allocation1 + $0x24] sm:$0xff] }
 0x2fb   : > { %4736 = vmatpush.bf16.msrb.mxu2 %v6878_v3  ;;  %v7844_v3 = vld [vmem:[#allocation1 + $0x2d] sm:$0xff] }
 0x2fc   : > { %4749 = vmatpush.bf16.msrb.mxu3 %v7102_v44  ;;  %v4971_v44 = vmul.f32 %v4928_v5, %v9225_v12  ;;  %v4981_v12 = vperm.slane %v9402_v63, 3 }
 0x2fd   : > { %4711 = vmatpush.bf16.msrb.mxu0 %v6402_v7 }
 0x2fe   : > { %4724 = vmatpush.bf16.msrb.mxu1 %v6626_v13  ;;  %v7816_v52 = vpop.eup %7815  ;;  %v4994_v38 = vmul.f32 %v4980_v62, %v4971_v44  ;;  %v5004_v13 = vperm.slane %v9407_v1, 3 }
 0x2ff   : > { %4737 = vmatpush.bf16.msrb.mxu2 %v6850_v20  ;;  %v4930_v54 = vmul.f32 %v7816_v52, %v4895_v15  ;;  %vm4936_vm12 = vweird.f32 %v7816_v52 }
 0x300   : > { %4750 = vmatpush.bf16.msrb.mxu3 %v7074_v21  ;;  %vm4937_vm14 = vmor %vm4935_vm13, %vm4936_vm12  ;;  %v5017_v43 = vadd.f32 %v5003_v6, %v4994_v38  ;;  %vm5061_vm12 = vcmask 1045508   ;;  %vm5063_vm13 = vcmask 1043456  }
 0x301   : > { %4712 = vmatpush.bf16.msrb.mxu0 %v6374_v36  ;;  %v4931_v4 = vmul.f32 %v7816_v52, %v4930_v54 }
 0x302   : > { %4725 = vmatpush.bf16.msrb.mxu1 %v6598_v10  ;;  %v5024_v22 = vmax.f32 %v5017_v43, 0.0 }
 0x303   : > { %4738 = vmatpush.bf16.msrb.mxu2 %v6822_v30  ;;  %v4932_v39 = vmul.f32 0.5, %v4931_v4  ;;  %v5047_v30 = vsel %vm5044_vm15, %v9153_v9, %v5037_v28 }
 0x304   : > { %4751 = vmatpush.bf16.msrb.mxu3 %v7046_v42 }
 0x305   : > { %4713 = vmatpush.bf16.msrb.mxu0 %v6346_v45  ;;  %v4933_v0 = vsub.f32 1.5, %v4932_v39  ;;  %v4507_v25 = vpop.f32.mrf.mxu0 }
 0x306   : > { %4726 = vmatpush.bf16.msrb.mxu1 %v6570_v23  ;;  %v4508_v59 = vadd.f32 %v4507_v25, %v9377_v29  ;;  %v4520_v32 = vpop.f32.mrf.mxu1 }
 0x307   : > { %4739 = vmatpush.bf16.msrb.mxu2 %v6794_v47  ;;  %v4934_v31 = vmul.f32 %v7816_v52, %v4933_v0 }
 0x308   : > { %4752 = vmatpush.bf16.msrb.mxu3 %v7018_v48  ;;  %4714 = vmatmul.bf16.vlgmr.msrb.gmra.mxu0 %v7843_v55  ;;  %v4521_v7 = vadd.f32 %v4520_v32, %v4508_v59 }
 0x309   : > { %4727 = vmatmul.bf16.vlgmr.msrb.gmra.mxu1 %v7844_v3  ;;  %v4938_v34 = vsel %vm4937_vm14, %v7816_v52, %v4934_v31 }
 0x30a   : > { %4740 = vmatmul.bf16.vlgmr.msrb.gmra.mxu2 %v7845_v40  ;;  %v4972_v8 = vmul.f32 %v4938_v34, %v9341_v16 }
 0x30b   : > { %4753 = vmatmul.bf16.vlgmr.msrb.gmra.mxu3 %v7846_v61 }
 0x30c   : > { %v4995_v14 = vmul.f32 %v4981_v12, %v4972_v8 }
 0x30d   : > { %v4533_v20 = vpop.f32.mrf.mxu2  ;;  %v4509_v21 = vpop.f32.mrf.mxu0 }
 0x30e   : > { %v4534_v51 = vadd.f32 %v4533_v20, %v4521_v7  ;;  %v4546_v29 = vpop.f32.mrf.mxu3  ;;  %v5018_v50 = vadd.f32 %v5004_v13, %v4995_v14  ;;  %v4522_v56 = vpop.f32.mrf.mxu1 }
 0x310   : > { %v4547_v2 = vadd.f32 %v4546_v29, %v4534_v51  ;;  %v5025_v57 = vmax.f32 %v5018_v50, 0.0 }
 0x312   : > { %v5030_v24 = vpack.c.bf16 %v5025_v57, %v5024_v22  ;;  %v4787_v26 = vsel %vm4758_vm0, %v4547_v2, 0.0 }
 0x313   : > { %v4788_v10 = vrot.slane %v4787_v26, 4 }
 0x314   : > { %v5038_v18 = vrot.slane %v5030_v24, 6  ;;  %v5039_v36 = vrot.slane %v5030_v24, 1 }
 0x315   : > { %v4535_v16 = vpop.f32.mrf.mxu2  ;;  %v4789_v58 = vadd.f32 %v4788_v10, %v4787_v26 }
 0x316   : > { %v4548_v17 = vpop.f32.mrf.mxu3  ;;  %v5051_v35 = vsel %vm5048_vm1, %v5038_v18, %v5039_v36 }
 0x317   : > { %v9417_v60 = vsel %vm4758_vm0, %v5047_v30, %v5051_v35  ;;  %v4790_v41 = vrot.slane %v4789_v58, 2 }
 0x319   : > { %v4791_v15 = vadd.f32 %v4790_v41, %v4789_v58 }
 0x31b   : > { %v4792_v53 = vrot.slane %v4791_v15, 1 }
 0x31d   : > { %v4793_v27 = vadd.f32 %v4792_v53, %v4791_v15 }
 0x31f   : > { %v4819_v48 = vmul.f32 %v8811_v11, %v4793_v27 }
 0x321   : > { %v9420_v49 = vsub.f32 %v4547_v2, %v4819_v48 }
 0x323   : > { %v4833_v55 = vmul.f32 %v9420_v49, %v9420_v49 }
 0x325   : > { %v4559_v42 = vpop.f32.mrf.mxu0  ;;  %v4864_v3 = vsel %vm4758_vm0, %v4833_v55, 0.0 }
 0x326   : > { %v4572_v33 = vpop.f32.mrf.mxu1  ;;  %v4865_v40 = vrot.slane %v4864_v3, 4 }
 0x327   : > { %v4573_v19 = vadd.f32 %v4572_v33, %v4559_v42 }
 0x328   : > { %v4866_v5 = vadd.f32 %v4865_v40, %v4864_v3 }
 0x32a   : > { %v4867_v44 = vrot.slane %v4866_v5, 2 }
 0x32c   : > { %v4868_v25 = vadd.f32 %v4867_v44, %v4866_v5 }
 0x32d   : > { %v4585_v37 = vpop.f32.mrf.mxu2  ;;  %v4561_v47 = vpop.f32.mrf.mxu0 }
 0x32e   : > { %v4586_v45 = vadd.f32 %v4585_v37, %v4573_v19  ;;  %v4598_v46 = vpop.f32.mrf.mxu3  ;;  %v4574_v9 = vpop.f32.mrf.mxu1  ;;  %v4869_v12 = vrot.slane %v4868_v25, 1 }
 0x330   : > { %v4599_v23 = vadd.f32 %v4598_v46, %v4586_v45  ;;  %v4870_v20 = vadd.f32 %v4869_v12, %v4868_v25 }
 0x332   : > { %v4889_v29 = vmul.f32 %v4870_v20, %v8811_v11 }
 0x334   : > { %v4896_v21 = vadd.f32 1e-05, %v4889_v29 }
 0x335   : > { %v4587_v52 = vpop.f32.mrf.mxu2 }
 0x336   : > { %v4600_v54 = vpop.f32.mrf.mxu3  ;;  %7817 = vrsqrt.f32 %v4896_v21  ;;  %vm4945_vm3 = vweird.f32 %v4896_v21 }
 0x33c   : > { %v7818_v18 = vpop.eup %7817 }
 0x33d   : > { %v4940_v10 = vmul.f32 %v7818_v18, %v4896_v21  ;;  %vm4946_vm2 = vweird.f32 %v7818_v18 }
 0x33e   : > { %vm4947_vm4 = vmor %vm4945_vm3, %vm4946_vm2 }
 0x33f   : > { %v4941_v42 = vmul.f32 %v7818_v18, %v4940_v10 }
 0x341   : > { %v4942_v27 = vmul.f32 0.5, %v4941_v42 }
 0x345   : > { %v4611_v4 = vpop.f32.mrf.mxu0 }
 0x346   : > { %v4612_v61 = vadd.f32 %v4611_v4, %v4599_v23  ;;  %v4624_v39 = vpop.f32.mrf.mxu1  ;;  %v4943_v23 = vsub.f32 1.5, %v4942_v27  ;;  %v4982_v4 = vperm.slane %v9402_v63, 4 }
 0x348   : > { %v4625_v62 = vadd.f32 %v4624_v39, %v4612_v61  ;;  %v4944_v48 = vmul.f32 %v7818_v18, %v4943_v23 }
 0x34a   : > { %v4948_v55 = vsel %vm4947_vm4, %v7818_v18, %v4944_v48 }
 0x34b   : > { %v4973_v5 = vmul.f32 %v4948_v55, %v9420_v49  ;;  %v5006_v49 = vperm.slane %v9407_v1, 5  ;;  %v5007_v55 = vperm.slane %v9407_v1, 6 }
 0x34d   : > { %v4637_v0 = vpop.f32.mrf.mxu2  ;;  %v4613_v38 = vpop.f32.mrf.mxu0 }
 0x34e   : > { %v4638_v31 = vadd.f32 %v4637_v0, %v4625_v62  ;;  %v4650_v59 = vpop.f32.mrf.mxu3  ;;  %v4626_v6 = vpop.f32.mrf.mxu1 }
 0x350   : > { %v4651_v32 = vadd.f32 %v4650_v59, %v4638_v31  ;;  %v4996_v31 = vmul.f32 %v4982_v4, %v4973_v5  ;;  %v5005_v59 = vperm.slane %v9407_v1, 4 }
 0x352   : > { %v4794_v34 = vsel %vm4758_vm0, %v4651_v32, 0.0 }
 0x353   : > { %v4795_v7 = vrot.slane %v4794_v34, 4 }
 0x355   : > { %v4796_v8 = vadd.f32 %v4795_v7, %v4794_v34  ;;  %v4639_v13 = vpop.f32.mrf.mxu2  ;;  %v5019_v7 = vadd.f32 %v5005_v59, %v4996_v31 }
 0x356   : > { %v4652_v43 = vpop.f32.mrf.mxu3 }
 0x357   : > { %v4797_v14 = vrot.slane %v4796_v8, 2 }
 0x359   : > { %v4798_v51 = vadd.f32 %v4797_v14, %v4796_v8 }
 0x35b   : > { %v4799_v50 = vrot.slane %v4798_v51, 1 }
 0x35d   : > { %v4800_v2 = vadd.f32 %v4799_v50, %v4798_v51  ;;  %v5026_v50 = vmax.f32 %v5019_v7, 0.0 }
 0x35f   : > { %v4820_v56 = vmul.f32 %v8811_v11, %v4800_v2 }
 0x361   : > { %v4827_v22 = vsub.f32 %v4651_v32, %v4820_v56  ;;  %v4983_v32 = vperm.slane %v9402_v63, 5 }
 0x363   : > { %v4834_v57 = vmul.f32 %v4827_v22, %v4827_v22 }
 0x365   : > { %v4871_v28 = vsel %vm4758_vm0, %v4834_v57, 0.0  ;;  %v4663_v26 = vpop.f32.mrf.mxu0 }
 0x366   : > { %v4872_v24 = vrot.slane %v4871_v28, 4  ;;  %v4676_v16 = vpop.f32.mrf.mxu1 }
 0x367   : > { %v4677_v47 = vadd.f32 %v4676_v16, %v4663_v26 }
 0x368   : > { %v4873_v36 = vadd.f32 %v4872_v24, %v4871_v28 }
 0x36a   : > { %v4874_v17 = vrot.slane %v4873_v36, 2 }
 0x36c   : > { %v4875_v35 = vadd.f32 %v4874_v17, %v4873_v36 }
 0x36d   : > { %v4689_v30 = vpop.f32.mrf.mxu2  ;;  %v4665_v15 = vpop.f32.mrf.mxu0 }
 0x36e   : > { %v4702_v58 = vpop.f32.mrf.mxu3  ;;  %v4876_v41 = vrot.slane %v4875_v35, 1  ;;  %v4678_v53 = vpop.f32.mrf.mxu1  ;;  %v4690_v54 = vadd.f32 %v4689_v30, %v4677_v47 }
 0x370   : > { %v4877_v33 = vadd.f32 %v4876_v41, %v4875_v35  ;;  %v4703_v61 = vadd.f32 %v4702_v58, %v4690_v54 }
 0x372   : > { %v4890_v19 = vmul.f32 %v4877_v33, %v8811_v11 }
 0x374   : > { %v4897_v45 = vadd.f32 1e-05, %v4890_v19 }
 0x375   : > { %v4691_v37 = vpop.f32.mrf.mxu2 }
 0x376   : > { %v4704_v46 = vpop.f32.mrf.mxu3  ;;  %7819 = vrsqrt.f32 %v4897_v45  ;;  %vm4955_vm6 = vweird.f32 %v4897_v45 }
 0x37c   : > { %v7820_v9 = vpop.eup %7819 }
 0x37d   : > { %v4950_v52 = vmul.f32 %v7820_v9, %v4897_v45  ;;  %vm4956_vm5 = vweird.f32 %v7820_v9 }
 0x37e   : > { %vm4957_vm7 = vmor %vm4955_vm6, %vm4956_vm5 }
 0x37f   : > { %v4951_v3 = vmul.f32 %v7820_v9, %v4950_v52 }
 0x381   : > { %v4952_v40 = vmul.f32 0.5, %v4951_v3 }
 0x383   : > { %v4953_v44 = vsub.f32 1.5, %v4952_v40 }
 0x385   : > { %v4715_v39 = vpop.f32.mrf.mxu0  ;;  %v4954_v25 = vmul.f32 %v7820_v9, %v4953_v44 }
 0x386   : > { %v4728_v62 = vpop.f32.mrf.mxu1  ;;  %v4716_v0 = vadd.f32 %v4715_v39, %v4703_v61 }
 0x387   : > { %v4958_v38 = vsel %vm4957_vm7, %v7820_v9, %v4954_v25  ;;  %v4984_v9 = vperm.slane %v9402_v63, 6 }
 0x388   : > { %v4974_v6 = vmul.f32 %v4958_v38, %v4827_v22  ;;  %v4729_v12 = vadd.f32 %v4728_v62, %v4716_v0 }
 0x38a   : > { %v4997_v8 = vmul.f32 %v4983_v32, %v4974_v6 }
 0x38c   : > { %v5020_v51 = vadd.f32 %v5006_v49, %v4997_v8 }
 0x38d   : > { %v4741_v34 = vpop.f32.mrf.mxu2  ;;  %v4717_v43 = vpop.f32.mrf.mxu0 }
 0x38e   : > { %v4742_v13 = vadd.f32 %v4741_v34, %v4729_v12  ;;  %v4754_v20 = vpop.f32.mrf.mxu3  ;;  %v4730_v14 = vpop.f32.mrf.mxu1  ;;  %v5027_v2 = vmax.f32 %v5020_v51, 0.0 }
 0x390   : > { %v4755_v29 = vadd.f32 %v4754_v20, %v4742_v13  ;;  %v5031_v57 = vpack.c.bf16 %v5027_v2, %v5026_v50 }
 0x392   : > { %v4801_v21 = vsel %vm4758_vm0, %v4755_v29, 0.0  ;;  %v5040_v5 = vrot.slane %v5031_v57, 4  ;;  %v5041_v4 = vrot.slane %v5031_v57, 7 }
 0x393   : > { %v4802_v56 = vrot.slane %v4801_v21, 4 }
 0x395   : > { %v4803_v28 = vadd.f32 %v4802_v56, %v4801_v21  ;;  %v4743_v22 = vpop.f32.mrf.mxu2 }
 0x396   : > { %v4756_v24 = vpop.f32.mrf.mxu3 }
 0x397   : > { %v4804_v26 = vrot.slane %v4803_v28, 2 }
 0x399   : > { %v4805_v16 = vadd.f32 %v4804_v26, %v4803_v28 }
 0x39b   : > { %v4806_v18 = vrot.slane %v4805_v16, 1 }
 0x39d   : > { %v4807_v36 = vadd.f32 %v4806_v18, %v4805_v16 }
 0x39f   : > { %v4821_v17 = vmul.f32 %v8811_v11, %v4807_v36 }
 0x3a1   : > { %v4828_v10 = vsub.f32 %v4755_v29, %v4821_v17 }
 0x3a3   : > { %v4835_v30 = vmul.f32 %v4828_v10, %v4828_v10 }
 0x3a5   : > { %v4878_v35 = vsel %vm4758_vm0, %v4835_v30, 0.0  ;;  %vm5053_vm0 = vcmask 1044484  }
 0x3a6   : > { %v4879_v58 = vrot.slane %v4878_v35, 4  ;;  %v5056_v62 = vsel %vm5053_vm0, %v5040_v5, %v5041_v4 }
 0x3a8   : > { %v4880_v41 = vadd.f32 %v4879_v58, %v4878_v35 }
 0x3aa   : > { %v4881_v15 = vrot.slane %v4880_v41, 2 }
 0x3ac   : > { %v4882_v42 = vadd.f32 %v4881_v15, %v4880_v41 }
 0x3ae   : > { %v4883_v53 = vrot.slane %v4882_v42, 1 }
 0x3b0   : > { %v4884_v33 = vadd.f32 %v4883_v53, %v4882_v42 }
 0x3b2   : > { %v4891_v19 = vmul.f32 %v4884_v33, %v8811_v11 }
 0x3b4   : > { %v4898_v27 = vadd.f32 1e-05, %v4891_v19 }
 0x3b6   : > { %7821 = vrsqrt.f32 %v4898_v27  ;;  %vm4965_vm9 = vweird.f32 %v4898_v27 }
 0x3bc   : > { %v7822_v37 = vpop.eup %7821 }
 0x3bd   : > { %v4960_v45 = vmul.f32 %v7822_v37, %v4898_v27  ;;  %vm4966_vm8 = vweird.f32 %v7822_v37 }
 0x3be   : > { %vm4967_vm10 = vmor %vm4965_vm9, %vm4966_vm8 }
 0x3bf   : > { %v4961_v46 = vmul.f32 %v7822_v37, %v4960_v45 }
 0x3c1   : > { %v4962_v23 = vmul.f32 0.5, %v4961_v46 }
 0x3c3   : > { %v4963_v47 = vsub.f32 1.5, %v4962_v23 }
 0x3c5   : > { %v4964_v48 = vmul.f32 %v7822_v37, %v4963_v47 }
 0x3c7   : > { %v4968_v52 = vsel %vm4967_vm10, %v7822_v37, %v4964_v48 }
 0x3c8   : > { %v4975_v54 = vmul.f32 %v4968_v52, %v4828_v10 }
 0x3ca   : > { %v4998_v3 = vmul.f32 %v4984_v9, %v4975_v54 }
 0x3cc   : > { %v5021_v11 = vadd.f32 %v5007_v55, %v4998_v3 }
 0x3ce   : > { %v5028_v40 = vmax.f32 %v5021_v11, 0.0 }
 0x3d0   : > { %v5032_v61 = vpack.c.bf16 %v5028_v40, %v5028_v40 }
 0x3d2   : > { %v5042_v39 = vrot.slane %v5032_v61, 2  ;;  %v5043_v44 = vrot.slane %v5032_v61, 5 }
 0x3d4   : > { %v5060_v0 = vsel %vm5057_vm11, %v5042_v39, %v5043_v44 }
 0x3d5   : > { %v5062_v63 = vsel %vm5061_vm12, %v5056_v62, %v5060_v0 }
 0x3d6   : > { %v5064_v25 = vsel %vm5063_vm13, %v9417_v60, %v5062_v63 }
 0x3d7   : > { %5066 = vst [vmem:[%s354_s23] sm:$0x7f] %v5064_v25 }
 0x3d8 PF: > { %p18_p1 = scmp.ge.s32.totalorder %s8041_s13, 9   ;;  %s9475_s24 = smov %s7939_s25 }
 0x3d9   : > { %s9476_s25 = smov %s7943_s26  ;;  %s9477_s26 = smov %s8051_s18 }
 0x3da   : > { %s9478_s27 = smov %s8041_s13  ;;  %20 = sbr.rel (!%p18_p1) target bundleno = 4 (0x4), region = 103 }
 0x3df   :  { %5087 = vsyncpa [#allocation4], 1 }
 0x3e0   :  { %5089 = vsyncpa [#allocation4 + $0x1], 1 }
 0x3e1   :  { %5090 = vsyncpa [#allocation6], 1 }
 0x3e2   :  { %5092 = vsyncpa [#allocation6 + $0x1], 1 }

// kernel: generator_forward.5
= control target key start
LH: loop header
LB: loop body
LE: loop exit
PB: predicated region body
PF: predicated region fallthrough
CT: control target
= control target key end

     0   :  { %9 = vsyncpa [#allocation3], 0  ;;  %s1216_s18 = smov [#allocation2]   ;;  %s1217_s20 = smov 64   ;;  %s2252_s0 = inlined_call_operand.vmem [shape: f32[392,64], index: 0, kind: input, shape index: {}]   ;;  %s2253_s1 = inlined_call_operand.vmem [shape: f32[1,64], index: 1, kind: input, shape index: {}]   ;;  %s2254_s2 = inlined_call_operand.vmem [shape: f32[1,64], index: 2, kind: input, shape index: {}]   ;;  %s2255_s3 = inlined_call_operand.hbm [shape: bf16[64,128], index: 3, kind: input, shape index: {}]   ;;  %s2256_s4 = inlined_call_operand.vmem [shape: bf16[392,128], index: 4, kind: output, shape index: {}]  }
   0x1   :  { %s20_s17 = sshll.u32 %s2255_s3, 4  ;;  %s22_s19 = sshll.u32 %s1216_s18, 4  ;;  %s21_s17 = int_to_ptr.hbm [resolvable:$true] %s20_s17  ;;  %s23_s19 = int_to_ptr.vmem [resolvable:$true] %s22_s19 }
   0x2   :  { %s1218_s21 = smov 4  }
   0x3   :  { %28 = dma.hbm_to_vmem [thread:$0]  %s21_s17, 512, %s23_s19, [#allocation3], %s1217_s20, %s1217_s20, %s1218_s21  }
   0x4   :  { %1214 = dma.done.wait [#allocation3], 512  }
   0x5   :  { %1215 = vsyncadd [#allocation3], 4294966784  ;;  %vm83_vm0 = vcmask 523264   ;;  %v1024_v0 = vld [vmem:[#allocation2 + $0x18] sm:$0xff]  ;;  %v1251_v1 = vld [vmem:[%s2252_s0] sm:$0xff] }
   0x6   :  { %v1256_v2 = vld [vmem:[%s2252_s0 + $0x8] sm:$0xff]  ;;  %1169 = vmatpush.bf16.msra.mxu2 %v1024_v0  ;;  %v1023_v3 = vld [vmem:[#allocation2 + $0x10] sm:$0xff]  ;;  %1170 = vmatpush.bf16.msra.mxu3 %v1024_v0  ;;  %v1266_v5 = vld [vmem:[%s2252_s0 + $0x18] sm:$0xff]  ;;  %v84_v6 = vsel %vm83_vm0, %v1251_v1, 0.0 }
   0x7   :  { %v1261_v4 = vld [vmem:[%s2252_s0 + $0x10] sm:$0xff]  ;;  %v85_v7 = vsel %vm83_vm0, %v1256_v2, 0.0  ;;  %748 = vmatpush.bf16.msra.mxu0 %v1024_v0  ;;  %1168 = vmatpush.bf16.msra.mxu1 %v1024_v0  ;;  %v1275_v8 = vld [vmem:[%s2252_s0 + $0x20] sm:$0xff]  ;;  %v89_v11 = vsel %vm83_vm0, %v1266_v5, 0.0  ;;  %v1284_v12 = vld [vmem:[%s2252_s0 + $0x28] sm:$0xff] }
   0x8   :  { %v86_v9 = vadd.f32 %v85_v7, %v84_v6  ;;  %v87_v10 = vsel %vm83_vm0, %v1261_v4, 0.0  ;;  %v1022_v14 = vld [vmem:[#allocation2 + $0x8] sm:$0xff]  ;;  %v91_v15 = vsel %vm83_vm0, %v1275_v8, 0.0  ;;  %v1291_v16 = vld [vmem:[%s2252_s0 + $0x30] sm:$0xff]  ;;  %v93_v18 = vsel %vm83_vm0, %v1284_v12, 0.0  ;;  %v1298_v19 = vld [vmem:[%s2252_s0 + $0x38] sm:$0xff] }
   0x9   :  { %v1021_v21 = vld [vmem:[#allocation2] sm:$0xff]  ;;  %v95_v22 = vsel %vm83_vm0, %v1291_v16, 0.0  ;;  %v97_v25 = vsel %vm83_vm0, %v1298_v19, 0.0  ;;  %v1312_v26 = vld [vmem:[%s2252_s0 + $0x48] sm:$0xff]  ;;  %v1319_v29 = vld [vmem:[%s2252_s0 + $0x50] sm:$0xff] }
   0xa   :  { %v88_v13 = vadd.f32 %v87_v10, %v86_v9  ;;  %1172 = vmatpush.bf16.msra.mxu2 %v1023_v3  ;;  %1173 = vmatpush.bf16.msra.mxu3 %v1023_v3  ;;  %v1305_v23 = vld [vmem:[%s2252_s0 + $0x40] sm:$0xff]  ;;  %v101_v31 = vsel %vm83_vm0, %v1312_v26, 0.0  ;;  %v1326_v32 = vld [vmem:[%s2252_s0 + $0x58] sm:$0xff]  ;;  %v103_v34 = vsel %vm83_vm0, %v1319_v29, 0.0  ;;  %v1340_v38 = vld [vmem:[%s2252_s0 + $0x68] sm:$0xff] }
   0xb   :  { %749 = vmatpush.bf16.msra.mxu0 %v1023_v3  ;;  %1171 = vmatpush.bf16.msra.mxu1 %v1023_v3  ;;  %v99_v28 = vsel %vm83_vm0, %v1305_v23, 0.0  ;;  %v1333_v35 = vld [vmem:[%s2252_s0 + $0x60] sm:$0xff]  ;;  %v105_v37 = vsel %vm83_vm0, %v1326_v32, 0.0  ;;  %v1347_v41 = vld [vmem:[%s2252_s0 + $0x70] sm:$0xff]  ;;  %v109_v43 = vsel %vm83_vm0, %v1340_v38, 0.0  ;;  %v1354_v44 = vld [vmem:[%s2252_s0 + $0x78] sm:$0xff] }
   0xc   :  { %v90_v17 = vadd.f32 %v89_v11, %v88_v13  ;;  %v107_v40 = vsel %vm83_vm0, %v1333_v35, 0.0  ;;  %v111_v46 = vsel %vm83_vm0, %v1347_v41, 0.0  ;;  %v1361_v47 = vld [vmem:[%s2252_s0 + $0x80] sm:$0xff]  ;;  %v113_v49 = vsel %vm83_vm0, %v1354_v44, 0.0  ;;  %v1368_v50 = vld [vmem:[%s2252_s0 + $0x88] sm:$0xff]  ;;  %v1375_v53 = vld [vmem:[%s2252_s0 + $0x90] sm:$0xff] }
   0xd   :  { %v115_v52 = vsel %vm83_vm0, %v1361_v47, 0.0  ;;  %v117_v55 = vsel %vm83_vm0, %v1368_v50, 0.0  ;;  %v1382_v56 = vld [vmem:[%s2252_s0 + $0x98] sm:$0xff]  ;;  %v119_v58 = vsel %vm83_vm0, %v1375_v53, 0.0  ;;  %v1389_v59 = vld [vmem:[%s2252_s0 + $0xa0] sm:$0xff]  ;;  %v1396_v62 = vld [vmem:[%s2252_s0 + $0xa8] sm:$0xff] }
   0xe   :  { %v92_v20 = vadd.f32 %v91_v15, %v90_v17  ;;  %1175 = vmatpush.bf16.msra.mxu2 %v1022_v14  ;;  %1176 = vmatpush.bf16.msra.mxu3 %v1022_v14  ;;  %v121_v61 = vsel %vm83_vm0, %v1382_v56, 0.0  ;;  %v123_v0 = vsel %vm83_vm0, %v1389_v59, 0.0  ;;  %v1403_v3 = vld [vmem:[%s2252_s0 + $0xb0] sm:$0xff]  ;;  %v125_v7 = vsel %vm83_vm0, %v1396_v62, 0.0  ;;  %v1410_v9 = vld [vmem:[%s2252_s0 + $0xb8] sm:$0xff]  ;;  %v1417_v13 = vld [vmem:[%s2252_s0 + $0xc0] sm:$0xff] }
   0xf   :  { %750 = vmatpush.bf16.msra.mxu0 %v1022_v14  ;;  %1174 = vmatpush.bf16.msra.mxu1 %v1022_v14  ;;  %v127_v11 = vsel %vm83_vm0, %v1403_v3, 0.0  ;;  %v129_v15 = vsel %vm83_vm0, %v1410_v9, 0.0  ;;  %v1424_v17 = vld [vmem:[%s2252_s0 + $0xc8] sm:$0xff] }
  0x10   :  { %v94_v24 = vadd.f32 %v93_v18, %v92_v20  ;;  %v131_v20 = vsel %vm83_vm0, %v1417_v13, 0.0 }
  0x12   :  { %v96_v27 = vadd.f32 %v95_v22, %v94_v24  ;;  %1178 = vmatpush.bf16.msra.mxu2 %v1021_v21  ;;  %1179 = vmatpush.bf16.msra.mxu3 %v1021_v21  ;;  %v133_v24 = vsel %vm83_vm0, %v1424_v17, 0.0 }
  0x13   :  { %751 = vmatpush.bf16.msra.mxu0 %v1021_v21  ;;  %1177 = vmatpush.bf16.msra.mxu1 %v1021_v21  ;;  %v1431_v21 = vld [vmem:[%s2252_s0 + $0xd0] sm:$0xff] }
  0x14   :  { %v98_v30 = vadd.f32 %v97_v25, %v96_v27  ;;  %v1438_v25 = vld [vmem:[%s2252_s0 + $0xd8] sm:$0xff] }
  0x16   :  { %v100_v33 = vadd.f32 %v99_v28, %v98_v30  ;;  %v135_v28 = vsel %vm83_vm0, %v1431_v21, 0.0  ;;  %v1445_v30 = vld [vmem:[%s2252_s0 + $0xe0] sm:$0xff] }
  0x18   :  { %v102_v36 = vadd.f32 %v101_v31, %v100_v33  ;;  %v137_v33 = vsel %vm83_vm0, %v1438_v25, 0.0 }
  0x1a   :  { %v104_v39 = vadd.f32 %v103_v34, %v102_v36  ;;  %v1452_v34 = vld [vmem:[%s2252_s0 + $0xe8] sm:$0xff] }
  0x1c   :  { %v106_v42 = vadd.f32 %v105_v37, %v104_v39  ;;  %v139_v37 = vsel %vm83_vm0, %v1445_v30, 0.0  ;;  %v1459_v39 = vld [vmem:[%s2252_s0 + $0xf0] sm:$0xff] }
  0x1e   :  { %v108_v45 = vadd.f32 %v107_v40, %v106_v42  ;;  %v141_v42 = vsel %vm83_vm0, %v1452_v34, 0.0 }
  0x20   :  { %v110_v48 = vadd.f32 %v109_v43, %v108_v45  ;;  %v1466_v43 = vld [vmem:[%s2252_s0 + $0xf8] sm:$0xff] }
  0x22   :  { %v112_v51 = vadd.f32 %v111_v46, %v110_v48  ;;  %v143_v46 = vsel %vm83_vm0, %v1459_v39, 0.0  ;;  %v1473_v48 = vld [vmem:[%s2252_s0 + $0x100] sm:$0xff] }
  0x24   :  { %v114_v54 = vadd.f32 %v113_v49, %v112_v51  ;;  %v145_v51 = vsel %vm83_vm0, %v1466_v43, 0.0 }
  0x26   :  { %v116_v57 = vadd.f32 %v115_v52, %v114_v54  ;;  %v1480_v52 = vld [vmem:[%s2252_s0 + $0x108] sm:$0xff] }
  0x28   :  { %v118_v60 = vadd.f32 %v117_v55, %v116_v57  ;;  %v147_v55 = vsel %vm83_vm0, %v1473_v48, 0.0  ;;  %v1487_v57 = vld [vmem:[%s2252_s0 + $0x110] sm:$0xff] }
  0x2a   :  { %v120_v63 = vadd.f32 %v119_v58, %v118_v60  ;;  %v149_v60 = vsel %vm83_vm0, %v1480_v52, 0.0 }
  0x2c   :  { %v122_v6 = vadd.f32 %v121_v61, %v120_v63  ;;  %v1494_v61 = vld [vmem:[%s2252_s0 + $0x118] sm:$0xff] }
  0x2e   :  { %v124_v10 = vadd.f32 %v123_v0, %v122_v6  ;;  %v151_v0 = vsel %vm83_vm0, %v1487_v57, 0.0  ;;  %v1501_v6 = vld [vmem:[%s2252_s0 + $0x120] sm:$0xff] }
  0x30   :  { %v126_v14 = vadd.f32 %v125_v7, %v124_v10  ;;  %v153_v10 = vsel %vm83_vm0, %v1494_v61, 0.0 }
  0x32   :  { %v128_v18 = vadd.f32 %v127_v11, %v126_v14  ;;  %v1508_v11 = vld [vmem:[%s2252_s0 + $0x128] sm:$0xff] }
  0x34   :  { %v130_v22 = vadd.f32 %v129_v15, %v128_v18  ;;  %v155_v15 = vsel %vm83_vm0, %v1501_v6, 0.0  ;;  %v1515_v18 = vld [vmem:[%s2252_s0 + $0x130] sm:$0xff] }
  0x36   :  { %v132_v27 = vadd.f32 %v131_v20, %v130_v22  ;;  %v157_v22 = vsel %vm83_vm0, %v1508_v11, 0.0 }
  0x38   :  { %v134_v31 = vadd.f32 %v133_v24, %v132_v27  ;;  %v1522_v24 = vld [vmem:[%s2252_s0 + $0x138] sm:$0xff] }
  0x3a   :  { %v136_v36 = vadd.f32 %v135_v28, %v134_v31  ;;  %v159_v28 = vsel %vm83_vm0, %v1515_v18, 0.0  ;;  %v1529_v31 = vld [vmem:[%s2252_s0 + $0x140] sm:$0xff] }
  0x3c   :  { %v138_v40 = vadd.f32 %v137_v33, %v136_v36  ;;  %v161_v36 = vsel %vm83_vm0, %v1522_v24, 0.0 }
  0x3e   :  { %v140_v45 = vadd.f32 %v139_v37, %v138_v40  ;;  %v1536_v37 = vld [vmem:[%s2252_s0 + $0x148] sm:$0xff] }
  0x40   :  { %v142_v49 = vadd.f32 %v141_v42, %v140_v45  ;;  %v163_v42 = vsel %vm83_vm0, %v1529_v31, 0.0  ;;  %v1543_v45 = vld [vmem:[%s2252_s0 + $0x150] sm:$0xff] }
  0x41   :  { %2269 = vst [vmem:[#allocation5_spill] sm:$0xff] %v1543_v45 }
  0x42   :  { %v144_v54 = vadd.f32 %v143_v46, %v142_v49  ;;  %v165_v49 = vsel %vm83_vm0, %v1536_v37, 0.0 }
  0x44   :  { %v146_v58 = vadd.f32 %v145_v51, %v144_v54  ;;  %v1550_v51 = vld [vmem:[%s2252_s0 + $0x158] sm:$0xff] }
  0x45   :  { %2270 = vst [vmem:[#allocation6_spill] sm:$0xff] %v1550_v51 }
  0x46   :  { %v148_v63 = vadd.f32 %v147_v55, %v146_v58  ;;  %v167_v55 = vsel %vm83_vm0, %v1543_v45, 0.0  ;;  %v1557_v58 = vld [vmem:[%s2252_s0 + $0x160] sm:$0xff] }
  0x47   :  { %2271 = vst [vmem:[#allocation7_spill] sm:$0xff] %v1557_v58 }
  0x48   :  { %v150_v7 = vadd.f32 %v149_v60, %v148_v63  ;;  %v169_v63 = vsel %vm83_vm0, %v1550_v51, 0.0 }
  0x4a   :  { %v152_v14 = vadd.f32 %v151_v0, %v150_v7  ;;  %v1564_v0 = vld [vmem:[%s2252_s0 + $0x168] sm:$0xff] }
  0x4b   :  { %2272 = vst [vmem:[#allocation8_spill] sm:$0xff] %v1564_v0 }
  0x4c   :  { %v154_v20 = vadd.f32 %v153_v10, %v152_v14  ;;  %v171_v10 = vsel %vm83_vm0, %v1557_v58, 0.0  ;;  %v1571_v14 = vld [vmem:[%s2252_s0 + $0x170] sm:$0xff] }
  0x4d   :  { %2273 = vst [vmem:[#allocation9_spill] sm:$0xff] %v1571_v14 }
  0x4e   :  { %v156_v27 = vadd.f32 %v155_v15, %v154_v20  ;;  %v173_v20 = vsel %vm83_vm0, %v1564_v0, 0.0 }
  0x50   :  { %v158_v33 = vadd.f32 %v157_v22, %v156_v27  ;;  %v81_v22 = vld [vmem:[%s2252_s0 + $0x178] sm:$0xff] }
  0x52   :  { %v160_v40 = vadd.f32 %v159_v28, %v158_v33  ;;  %v175_v28 = vsel %vm83_vm0, %v1571_v14, 0.0  ;;  %v82_v33 = vld [vmem:[%s2252_s0 + $0x180] sm:$0xff] }
  0x54   :  { %v162_v46 = vadd.f32 %v161_v36, %v160_v40  ;;  %v177_v40 = vsel %vm83_vm0, %v81_v22, 0.0 }
  0x56   :  { %v164_v54 = vadd.f32 %v163_v42, %v162_v46  ;;  %v179_v46 = vsel %vm83_vm0, %v82_v33, 0.0 }
  0x58   :  { %v166_v60 = vadd.f32 %v165_v49, %v164_v54  ;;  %v1219_v49 = vmov 392.0  }
  0x59   :  { %1186 = vrcp.f32 %v1219_v49 }
  0x5a   :  { %v168_v7 = vadd.f32 %v167_v55, %v166_v60 }
  0x5c   :  { %v170_v15 = vadd.f32 %v169_v63, %v168_v7 }
  0x5e   :  { %v172_v27 = vadd.f32 %v171_v10, %v170_v15 }
  0x5f   :  { %v1187_v63 = vpop.eup %1186 }
  0x60   :  { %v174_v36 = vadd.f32 %v173_v20, %v172_v27  ;;  %v188_v10 = vmul.f32 392.0, %v1187_v63  ;;  %vm192_vm1 = vweird.f32 %v1187_v63 }
  0x62   :  { %v176_v42 = vadd.f32 %v175_v28, %v174_v36  ;;  %v189_v14 = vsub.f32 1.0, %v188_v10 }
  0x64   :  { %v178_v54 = vadd.f32 %v177_v40, %v176_v42  ;;  %v190_v58 = vmul.f32 %v1187_v63, %v189_v14 }
  0x66   :  { %v180_v55 = vadd.f32 %v179_v46, %v178_v54  ;;  %v191_v45 = vadd.f32 %v1187_v63, %v190_v58 }
  0x68   :  { %v181_v60 = vrot.slane %v180_v55, 4  ;;  %v1585_v27 = vsel %vm192_vm1, %v1187_v63, %v191_v45 }
  0x6a   :  { %v182_v7 = vadd.f32 %v181_v60, %v180_v55 }
  0x6c   :  { %v183_v15 = vrot.slane %v182_v7, 2 }
  0x6e   :  { %v184_v0 = vadd.f32 %v183_v15, %v182_v7 }
  0x70   :  { %v185_v51 = vrot.slane %v184_v0, 1 }
  0x72   :  { %v186_v20 = vadd.f32 %v185_v51, %v184_v0 }
  0x74   :  { %v1588_v28 = vmul.f32 %v1585_v27, %v186_v20 }
  0x76   :  { %v1591_v36 = vsub.f32 %v81_v22, %v1588_v28  ;;  %v1594_v40 = vsub.f32 %v82_v33, %v1588_v28  ;;  %v1598_v42 = vsub.f32 %v1251_v1, %v1588_v28  ;;  %v1602_v58 = vsub.f32 %v1256_v2, %v1588_v28 }
  0x77   :  { %v1606_v45 = vsub.f32 %v1261_v4, %v1588_v28  ;;  %v1610_v51 = vsub.f32 %v1266_v5, %v1588_v28  ;;  %v1614_v0 = vsub.f32 %v1275_v8, %v1588_v28  ;;  %v1624_v4 = vsub.f32 %v1284_v12, %v1588_v28 }
  0x78   :  { %2274 = vst [vmem:[#allocation10_spill] sm:$0xff] %v1594_v40  ;;  %v244_v1 = vmul.f32 %v1598_v42, %v1598_v42  ;;  %v245_v14 = vmul.f32 %v1602_v58, %v1602_v58  ;;  %v1630_v8 = vsub.f32 %v1291_v16, %v1588_v28  ;;  %v1639_v12 = vsub.f32 %v1298_v19, %v1588_v28 }
  0x79   :  { %v246_v2 = vmul.f32 %v1606_v45, %v1606_v45  ;;  %v247_v5 = vmul.f32 %v1610_v51, %v1610_v51  ;;  %v248_v22 = vmul.f32 %v1614_v0, %v1614_v0  ;;  %v249_v55 = vmul.f32 %v1624_v4, %v1624_v4 }
  0x7a   :  { %v293_v33 = vsel %vm83_vm0, %v244_v1, 0.0  ;;  %v294_v46 = vsel %vm83_vm0, %v245_v14, 0.0  ;;  %v1646_v63 = vsub.f32 %v1305_v23, %v1588_v28  ;;  %v250_v7 = vmul.f32 %v1630_v8, %v1630_v8 }
  0x7b   :  { %v295_v49 = vadd.f32 %v294_v46, %v293_v33  ;;  %v296_v54 = vsel %vm83_vm0, %v246_v2, 0.0  ;;  %v298_v16 = vsel %vm83_vm0, %v247_v5, 0.0  ;;  %v300_v10 = vsel %vm83_vm0, %v248_v22, 0.0 }
  0x7c   :  { %v1653_v19 = vsub.f32 %v1312_v26, %v1588_v28  ;;  %v251_v20 = vmul.f32 %v1639_v12, %v1639_v12  ;;  %v302_v1 = vsel %vm83_vm0, %v249_v55, 0.0  ;;  %v1660_v23 = vsub.f32 %v1319_v29, %v1588_v28 }
  0x7d   :  { %v297_v60 = vadd.f32 %v296_v54, %v295_v49  ;;  %v252_v2 = vmul.f32 %v1646_v63, %v1646_v63  ;;  %v304_v5 = vsel %vm83_vm0, %v250_v7, 0.0  ;;  %v1667_v26 = vsub.f32 %v1326_v32, %v1588_v28 }
  0x7e   :  { %2275 = vst [vmem:[#allocation11_spill] sm:$0xff] %v1660_v23  ;;  %v253_v33 = vmul.f32 %v1653_v19, %v1653_v19  ;;  %v306_v46 = vsel %vm83_vm0, %v251_v20, 0.0  ;;  %v1674_v29 = vsub.f32 %v1333_v35, %v1588_v28  ;;  %v254_v54 = vmul.f32 %v1660_v23, %v1660_v23 }
  0x7f   :  { %v299_v15 = vadd.f32 %v298_v16, %v297_v60  ;;  %2276 = vst [vmem:[#allocation12_spill] sm:$0xff] %v1667_v26  ;;  %v308_v55 = vsel %vm83_vm0, %v252_v2, 0.0  ;;  %v1681_v32 = vsub.f32 %v1340_v38, %v1588_v28  ;;  %v255_v60 = vmul.f32 %v1667_v26, %v1667_v26 }
  0x80   :  { %v310_v7 = vsel %vm83_vm0, %v253_v33, 0.0  ;;  %v1688_v35 = vsub.f32 %v1347_v41, %v1588_v28  ;;  %v312_v20 = vsel %vm83_vm0, %v254_v54, 0.0  ;;  %v1695_v38 = vsub.f32 %v1354_v44, %v1588_v28 }
  0x81   :  { %v301_v14 = vadd.f32 %v300_v10, %v299_v15  ;;  %v256_v15 = vmul.f32 %v1674_v29, %v1674_v29  ;;  %v314_v2 = vsel %vm83_vm0, %v255_v60, 0.0  ;;  %v1702_v41 = vsub.f32 %v1361_v47, %v1588_v28 }
  0x82   :  { %v1709_v44 = vsub.f32 %v1368_v50, %v1588_v28  ;;  %v1716_v47 = vsub.f32 %v1375_v53, %v1588_v28  ;;  %v1723_v50 = vsub.f32 %v1382_v56, %v1588_v28  ;;  %v1730_v53 = vsub.f32 %v1389_v59, %v1588_v28 }
  0x83   :  { %v303_v22 = vadd.f32 %v302_v1, %v301_v14  ;;  %v257_v14 = vmul.f32 %v1681_v32, %v1681_v32  ;;  %v316_v33 = vsel %vm83_vm0, %v256_v15, 0.0  ;;  %v1737_v56 = vsub.f32 %v1396_v62, %v1588_v28 }
  0x84   :  { %v1744_v59 = vsub.f32 %v1403_v3, %v1588_v28  ;;  %v1751_v62 = vsub.f32 %v1410_v9, %v1588_v28  ;;  %v1758_v3 = vsub.f32 %v1417_v13, %v1588_v28  ;;  %v1765_v9 = vsub.f32 %v1424_v17, %v1588_v28 }
  0x85   :  { %v305_v49 = vadd.f32 %v304_v5, %v303_v22  ;;  %v258_v22 = vmul.f32 %v1688_v35, %v1688_v35  ;;  %v318_v54 = vsel %vm83_vm0, %v257_v14, 0.0  ;;  %v1772_v13 = vsub.f32 %v1431_v21, %v1588_v28 }
  0x86   :  { %2277 = vst [vmem:[#allocation13_spill] sm:$0xff] %v1744_v59  ;;  %v1779_v17 = vsub.f32 %v1438_v25, %v1588_v28  ;;  %v1786_v21 = vsub.f32 %v1445_v30, %v1588_v28  ;;  %v1793_v25 = vsub.f32 %v1452_v34, %v1588_v28  ;;  %v1800_v30 = vsub.f32 %v1459_v39, %v1588_v28 }
  0x87   :  { %v307_v16 = vadd.f32 %v306_v46, %v305_v49  ;;  %v259_v49 = vmul.f32 %v1695_v38, %v1695_v38  ;;  %v320_v60 = vsel %vm83_vm0, %v258_v22, 0.0  ;;  %2278 = vst [vmem:[#allocation14_spill] sm:$0xff] %v1751_v62  ;;  %v1807_v34 = vsub.f32 %v1466_v43, %v1588_v28 }
  0x88   :  { %v1814_v39 = vsub.f32 %v1473_v48, %v1588_v28  ;;  %v1821_v43 = vsub.f32 %v1480_v52, %v1588_v28  ;;  %v1828_v48 = vsub.f32 %v1487_v57, %v1588_v28  ;;  %v1835_v52 = vsub.f32 %v1494_v61, %v1588_v28 }
  0x89   :  { %v309_v10 = vadd.f32 %v308_v55, %v307_v16  ;;  %v260_v16 = vmul.f32 %v1702_v41, %v1702_v41  ;;  %v322_v15 = vsel %vm83_vm0, %v259_v49, 0.0  ;;  %v1842_v57 = vsub.f32 %v1501_v6, %v1588_v28 }
  0x8a   :  { %v1849_v61 = vsub.f32 %v1508_v11, %v1588_v28  ;;  %v1856_v6 = vsub.f32 %v1515_v18, %v1588_v28  ;;  %v1863_v11 = vsub.f32 %v1522_v24, %v1588_v28  ;;  %v1870_v18 = vsub.f32 %v1529_v31, %v1588_v28 }
  0x8b   :  { %v311_v1 = vadd.f32 %v310_v7, %v309_v10  ;;  %v261_v10 = vmul.f32 %v1709_v44, %v1709_v44  ;;  %v324_v14 = vsel %vm83_vm0, %v260_v16, 0.0  ;;  %2279 = vst [vmem:[#allocation15_spill] sm:$0xff] %v1842_v57  ;;  %v1877_v24 = vsub.f32 %v1536_v37, %v1588_v28 }
  0x8c   :  { %2280 = vst [vmem:[#allocation16_spill] sm:$0xff] %v1849_v61 }
  0x8d   :  { %v313_v5 = vadd.f32 %v312_v20, %v311_v1  ;;  %v262_v1 = vmul.f32 %v1716_v47, %v1716_v47  ;;  %v326_v22 = vsel %vm83_vm0, %v261_v10, 0.0 }
  0x8f   :  { %v315_v46 = vadd.f32 %v314_v2, %v313_v5  ;;  %v263_v5 = vmul.f32 %v1723_v50, %v1723_v50  ;;  %v328_v49 = vsel %vm83_vm0, %v262_v1, 0.0 }
  0x91   :  { %v317_v55 = vadd.f32 %v316_v33, %v315_v46  ;;  %v264_v46 = vmul.f32 %v1730_v53, %v1730_v53  ;;  %v330_v16 = vsel %vm83_vm0, %v263_v5, 0.0 }
  0x93   :  { %v319_v7 = vadd.f32 %v318_v54, %v317_v55  ;;  %v265_v55 = vmul.f32 %v1737_v56, %v1737_v56  ;;  %v332_v10 = vsel %vm83_vm0, %v264_v46, 0.0 }
  0x95   :  { %v321_v20 = vadd.f32 %v320_v60, %v319_v7  ;;  %v266_v7 = vmul.f32 %v1744_v59, %v1744_v59  ;;  %v334_v1 = vsel %vm83_vm0, %v265_v55, 0.0 }
  0x97   :  { %v323_v2 = vadd.f32 %v322_v15, %v321_v20  ;;  %v267_v20 = vmul.f32 %v1751_v62, %v1751_v62  ;;  %v336_v5 = vsel %vm83_vm0, %v266_v7, 0.0 }
  0x99   :  { %v325_v33 = vadd.f32 %v324_v14, %v323_v2  ;;  %v268_v2 = vmul.f32 %v1758_v3, %v1758_v3  ;;  %v338_v46 = vsel %vm83_vm0, %v267_v20, 0.0 }
  0x9b   :  { %v327_v54 = vadd.f32 %v326_v22, %v325_v33  ;;  %v269_v33 = vmul.f32 %v1765_v9, %v1765_v9  ;;  %v340_v55 = vsel %vm83_vm0, %v268_v2, 0.0 }
  0x9d   :  { %v329_v60 = vadd.f32 %v328_v49, %v327_v54  ;;  %v270_v54 = vmul.f32 %v1772_v13, %v1772_v13  ;;  %v342_v7 = vsel %vm83_vm0, %v269_v33, 0.0 }
  0x9f   :  { %v331_v15 = vadd.f32 %v330_v16, %v329_v60  ;;  %v271_v60 = vmul.f32 %v1779_v17, %v1779_v17  ;;  %v344_v20 = vsel %vm83_vm0, %v270_v54, 0.0 }
  0xa1   :  { %v333_v14 = vadd.f32 %v332_v10, %v331_v15  ;;  %v272_v15 = vmul.f32 %v1786_v21, %v1786_v21  ;;  %v346_v2 = vsel %vm83_vm0, %v271_v60, 0.0 }
  0xa3   :  { %v335_v22 = vadd.f32 %v334_v1, %v333_v14  ;;  %v273_v14 = vmul.f32 %v1793_v25, %v1793_v25  ;;  %v348_v33 = vsel %vm83_vm0, %v272_v15, 0.0 }
  0xa5   :  { %v337_v49 = vadd.f32 %v336_v5, %v335_v22  ;;  %v274_v22 = vmul.f32 %v1800_v30, %v1800_v30  ;;  %v350_v54 = vsel %vm83_vm0, %v273_v14, 0.0 }
  0xa7   :  { %v339_v16 = vadd.f32 %v338_v46, %v337_v49  ;;  %v275_v49 = vmul.f32 %v1807_v34, %v1807_v34  ;;  %v352_v60 = vsel %vm83_vm0, %v274_v22, 0.0 }
  0xa9   :  { %v341_v10 = vadd.f32 %v340_v55, %v339_v16  ;;  %v276_v16 = vmul.f32 %v1814_v39, %v1814_v39  ;;  %v354_v15 = vsel %vm83_vm0, %v275_v49, 0.0 }
  0xab   :  { %v343_v1 = vadd.f32 %v342_v7, %v341_v10  ;;  %v277_v10 = vmul.f32 %v1821_v43, %v1821_v43  ;;  %v356_v14 = vsel %vm83_vm0, %v276_v16, 0.0 }
  0xad   :  { %v345_v5 = vadd.f32 %v344_v20, %v343_v1  ;;  %v278_v1 = vmul.f32 %v1828_v48, %v1828_v48  ;;  %v358_v22 = vsel %vm83_vm0, %v277_v10, 0.0 }
  0xaf   :  { %v347_v46 = vadd.f32 %v346_v2, %v345_v5  ;;  %v279_v5 = vmul.f32 %v1835_v52, %v1835_v52  ;;  %v360_v49 = vsel %vm83_vm0, %v278_v1, 0.0 }
  0xb1   :  { %v349_v55 = vadd.f32 %v348_v33, %v347_v46  ;;  %v280_v46 = vmul.f32 %v1842_v57, %v1842_v57  ;;  %v362_v16 = vsel %vm83_vm0, %v279_v5, 0.0  ;;  %v284_v5 = vmul.f32 %v1870_v18, %v1870_v18 }
  0xb3   :  { %v351_v7 = vadd.f32 %v350_v54, %v349_v55  ;;  %v281_v55 = vmul.f32 %v1849_v61, %v1849_v61  ;;  %v364_v10 = vsel %vm83_vm0, %v280_v46, 0.0  ;;  %v2282_v46 = vld [vmem:[#allocation6_spill] sm:$0xff] }
  0xb4   :  { %v1891_v37 = vsub.f32 %v2282_v46, %v1588_v28 }
  0xb5   :  { %v353_v20 = vadd.f32 %v352_v60, %v351_v7  ;;  %v282_v7 = vmul.f32 %v1856_v6, %v1856_v6  ;;  %v366_v1 = vsel %vm83_vm0, %v281_v55, 0.0 }
  0xb7   :  { %v355_v2 = vadd.f32 %v354_v15, %v353_v20  ;;  %v283_v20 = vmul.f32 %v1863_v11, %v1863_v11 }
  0xb9   :  { %v357_v33 = vadd.f32 %v356_v14, %v355_v2  ;;  %v2281_v2 = vld [vmem:[#allocation5_spill] sm:$0xff] }
  0xba   :  { %v1884_v31 = vsub.f32 %v2281_v2, %v1588_v28  ;;  %v287_v2 = vmul.f32 %v1891_v37, %v1891_v37 }
  0xbb   :  { %v359_v54 = vadd.f32 %v358_v22, %v357_v33  ;;  %v368_v22 = vsel %vm83_vm0, %v282_v7, 0.0  ;;  %v372_v7 = vsel %vm83_vm0, %v284_v5, 0.0 }
  0xbd   :  { %v361_v60 = vadd.f32 %v360_v49, %v359_v54  ;;  %v285_v49 = vmul.f32 %v1877_v24, %v1877_v24  ;;  %v370_v54 = vsel %vm83_vm0, %v283_v20, 0.0 }
  0xbf   :  { %v363_v15 = vadd.f32 %v362_v16, %v361_v60  ;;  %v2283_v16 = vld [vmem:[#allocation7_spill] sm:$0xff]  ;;  %v374_v20 = vsel %vm83_vm0, %v285_v49, 0.0 }
  0xc0   :  { %v1898_v60 = vsub.f32 %v2283_v16, %v1588_v28 }
  0xc1   :  { %v365_v14 = vadd.f32 %v364_v10, %v363_v15  ;;  %v286_v10 = vmul.f32 %v1884_v31, %v1884_v31 }
  0xc2   :  { %v288_v16 = vmul.f32 %v1898_v60, %v1898_v60 }
  0xc3   :  { %v367_v33 = vadd.f32 %v366_v1, %v365_v14  ;;  %v2284_v1 = vld [vmem:[#allocation8_spill] sm:$0xff]  ;;  %v376_v5 = vsel %vm83_vm0, %v286_v10, 0.0  ;;  %v292_v10 = vmul.f32 %v1594_v40, %v1594_v40 }
  0xc4   :  { %v1905_v14 = vsub.f32 %v2284_v1, %v1588_v28  ;;  %v378_v1 = vsel %vm83_vm0, %v287_v2, 0.0 }
  0xc5   :  { %v369_v55 = vadd.f32 %v368_v22, %v367_v33  ;;  %v2285_v33 = vld [vmem:[#allocation9_spill] sm:$0xff] }
  0xc6   :  { %v1912_v46 = vsub.f32 %v2285_v33, %v1588_v28  ;;  %v291_v28 = vmul.f32 %v1591_v36, %v1591_v36 }
  0xc7   :  { %v371_v15 = vadd.f32 %v370_v54, %v369_v55  ;;  %v289_v55 = vmul.f32 %v1905_v14, %v1905_v14 }
  0xc8   :  { %v290_v49 = vmul.f32 %v1912_v46, %v1912_v46  ;;  %v386_v2 = vsel %vm83_vm0, %v291_v28, 0.0 }
  0xc9   :  { %v373_v22 = vadd.f32 %v372_v7, %v371_v15  ;;  %v380_v7 = vsel %vm83_vm0, %v288_v16, 0.0  ;;  %v382_v33 = vsel %vm83_vm0, %v289_v55, 0.0 }
  0xcb   :  { %v375_v54 = vadd.f32 %v374_v20, %v373_v22  ;;  %v384_v20 = vsel %vm83_vm0, %v290_v49, 0.0 }
  0xcd   :  { %v377_v61 = vadd.f32 %v376_v5, %v375_v54  ;;  %v388_v54 = vsel %vm83_vm0, %v292_v10, 0.0 }
  0xcf   :  { %v379_v15 = vadd.f32 %v378_v1, %v377_v61 }
  0xd1   :  { %v381_v57 = vadd.f32 %v380_v7, %v379_v15 }
  0xd3   :  { %v383_v22 = vadd.f32 %v382_v33, %v381_v57 }
  0xd5   :  { %v385_v5 = vadd.f32 %v384_v20, %v383_v22 }
  0xd7   :  { %v387_v62 = vadd.f32 %v386_v2, %v385_v5 }
  0xd9   :  { %v389_v16 = vadd.f32 %v388_v54, %v387_v62  ;;  %v1935_v62 = vld [vmem:[%s2253_s1] ss:$0 sm:$0xff] }
  0xdb   :  { %v390_v61 = vrot.slane %v389_v16, 4 }
  0xdd   :  { %v391_v1 = vadd.f32 %v390_v61, %v389_v16 }
  0xdf   :  { %v392_v59 = vrot.slane %v391_v1, 2 }
  0xe1   :  { %v393_v26 = vadd.f32 %v392_v59, %v391_v1 }
  0xe3   :  { %v394_v23 = vrot.slane %v393_v26, 1 }
  0xe5   :  { %v395_v55 = vadd.f32 %v394_v23, %v393_v26  ;;  %v1946_v26 = vld [vmem:[%s2254_s2] ss:$0 sm:$0xff] }
  0xe7   :  { %v396_v7 = vmul.f32 %v395_v55, %v1585_v27 }
  0xe9   :  { %v397_v15 = vadd.f32 1e-05, %v396_v7 }
  0xeb   :  { %1188 = vrsqrt.f32 %v397_v15  ;;  %vm404_vm2 = vweird.f32 %v397_v15 }
  0xf1   :  { %v1189_v40 = vpop.eup %1188 }
  0xf2   :  { %v399_v49 = vmul.f32 %v1189_v40, %v397_v15  ;;  %vm405_vm3 = vweird.f32 %v1189_v40 }
  0xf3   :  { %vm406_vm4 = vmor %vm404_vm2, %vm405_vm3 }
  0xf4   :  { %v400_v57 = vmul.f32 %v1189_v40, %v399_v49 }
  0xf6   :  { %v401_v33 = vmul.f32 0.5, %v400_v57 }
  0xf8   :  { %v402_v28 = vsub.f32 1.5, %v401_v33 }
  0xfa   :  { %v403_v10 = vmul.f32 %v1189_v40, %v402_v28 }
  0xfc   :  { %v1937_v59 = vsel %vm406_vm4, %v1189_v40, %v403_v10 }
  0xfd   :  { %v432_v27 = vmul.f32 %v1937_v59, %v1758_v3  ;;  %v433_v23 = vmul.f32 %v1937_v59, %v1765_v9  ;;  %v446_v20 = vmul.f32 %v1937_v59, %v1856_v6  ;;  %v447_v22 = vmul.f32 %v1937_v59, %v1863_v11 }
  0xfe   :  { %v408_v40 = vmul.f32 %v1937_v59, %v1598_v42  ;;  %v409_v3 = vmul.f32 %v1937_v59, %v1602_v58  ;;  %v420_v9 = vmul.f32 %v1937_v59, %v1674_v29  ;;  %v421_v2 = vmul.f32 %v1937_v59, %v1681_v32 }
  0xff   :  { %v485_v5 = vmul.f32 %v1935_v62, %v432_v27  ;;  %v486_v54 = vmul.f32 %v1935_v62, %v433_v23  ;;  %v499_v6 = vmul.f32 %v1935_v62, %v446_v20  ;;  %v500_v11 = vmul.f32 %v1935_v62, %v447_v22 }
 0x100   :  { %v461_v16 = vmul.f32 %v1935_v62, %v408_v40  ;;  %v462_v42 = vmul.f32 %v1935_v62, %v409_v3  ;;  %v473_v58 = vmul.f32 %v1935_v62, %v420_v9  ;;  %v474_v61 = vmul.f32 %v1935_v62, %v421_v2 }
 0x101   :  { %v538_v29 = vadd.f32 %v1946_v26, %v485_v5  ;;  %v539_v32 = vadd.f32 %v1946_v26, %v486_v54  ;;  %v552_v1 = vadd.f32 %v1946_v26, %v499_v6  ;;  %v553_v55 = vadd.f32 %v1946_v26, %v500_v11 }
 0x102   :  { %v514_v7 = vadd.f32 %v1946_v26, %v461_v16  ;;  %v515_v15 = vadd.f32 %v1946_v26, %v462_v42  ;;  %v526_v49 = vadd.f32 %v1946_v26, %v473_v58  ;;  %v527_v57 = vadd.f32 %v1946_v26, %v474_v61 }
 0x103   :  { %v587_v33 = vmax.f32 %v538_v29, 0.0  ;;  %v588_v28 = vmax.f32 %v539_v32, 0.0  ;;  %v601_v10 = vmax.f32 %v552_v1, 0.0  ;;  %v602_v27 = vmax.f32 %v553_v55, 0.0 }
 0x104   :  { %v563_v23 = vmax.f32 %v514_v7, 0.0  ;;  %v564_v20 = vmax.f32 %v515_v15, 0.0  ;;  %v575_v22 = vmax.f32 %v526_v49, 0.0  ;;  %v576_v40 = vmax.f32 %v527_v57, 0.0 }
 0x105   :  { %v624_v3 = vpack.c.bf16 %v588_v28, %v587_v33  ;;  %v631_v9 = vpack.c.bf16 %v602_v27, %v601_v10  ;;  %v434_v2 = vmul.f32 %v1937_v59, %v1772_v13  ;;  %v435_v5 = vmul.f32 %v1937_v59, %v1779_v17 }
 0x106   :  { %v612_v54 = vpack.c.bf16 %v564_v20, %v563_v23  ;;  %v618_v6 = vpack.c.bf16 %v576_v40, %v575_v22  ;;  %v448_v11 = vmul.f32 %v1937_v59, %v1870_v18  ;;  %v449_v16 = vmul.f32 %v1937_v59, %v1877_v24 }
 0x107   :  { %1008 = vmatmul.msk.bf16.vlgmr.msra.gmra.mxu2 %vm83_vm0, %v624_v3  ;;  %1015 = vmatmul.msk.bf16.vlgmr.msra.gmra.mxu3 %vm83_vm0, %v631_v9  ;;  %v487_v42 = vmul.f32 %v1935_v62, %v434_v2  ;;  %v488_v58 = vmul.f32 %v1935_v62, %v435_v5  ;;  %v410_v13 = vmul.f32 %v1937_v59, %v1606_v45 }
 0x108   :  { %996 = vmatmul.msk.bf16.vlgmr.msra.gmra.mxu0 %vm83_vm0, %v612_v54  ;;  %1002 = vmatmul.msk.bf16.vlgmr.msra.gmra.mxu1 %vm83_vm0, %v618_v6  ;;  %v501_v17 = vmul.f32 %v1935_v62, %v448_v11  ;;  %v502_v18 = vmul.f32 %v1935_v62, %v449_v16  ;;  %v411_v24 = vmul.f32 %v1937_v59, %v1610_v51 }
 0x109   :  { %v540_v61 = vadd.f32 %v1946_v26, %v487_v42  ;;  %v541_v29 = vadd.f32 %v1946_v26, %v488_v58  ;;  %v463_v32 = vmul.f32 %v1935_v62, %v410_v13  ;;  %v422_v45 = vmul.f32 %v1937_v59, %v1688_v35 }
 0x10a   :  { %v554_v1 = vadd.f32 %v1946_v26, %v501_v17  ;;  %v555_v55 = vadd.f32 %v1946_v26, %v502_v18  ;;  %v464_v7 = vmul.f32 %v1935_v62, %v411_v24  ;;  %v423_v15 = vmul.f32 %v1937_v59, %v1695_v38 }
 0x10b   :  { %v516_v51 = vadd.f32 %v1946_v26, %v463_v32  ;;  %v475_v49 = vmul.f32 %v1935_v62, %v422_v45  ;;  %v589_v28 = vmax.f32 %v540_v61, 0.0  ;;  %v590_v10 = vmax.f32 %v541_v29, 0.0 }
 0x10c   :  { %v517_v57 = vadd.f32 %v1946_v26, %v464_v7  ;;  %v476_v33 = vmul.f32 %v1935_v62, %v423_v15  ;;  %v603_v27 = vmax.f32 %v554_v1, 0.0  ;;  %v604_v23 = vmax.f32 %v555_v55, 0.0 }
 0x10d   :  { %v528_v35 = vadd.f32 %v1946_v26, %v475_v49  ;;  %v436_v22 = vmul.f32 %v1937_v59, %v1786_v21  ;;  %v565_v38 = vmax.f32 %v516_v51, 0.0  ;;  %v437_v2 = vmul.f32 %v1937_v59, %v1793_v25 }
 0x10e   :  { %v529_v20 = vadd.f32 %v1946_v26, %v476_v33  ;;  %v566_v40 = vmax.f32 %v517_v57, 0.0  ;;  %v450_v5 = vmul.f32 %v1937_v59, %v1884_v31  ;;  %v625_v54 = vpack.c.bf16 %v590_v10, %v589_v28 }
 0x10f   :  { %v577_v3 = vmax.f32 %v528_v35, 0.0  ;;  %v632_v6 = vpack.c.bf16 %v604_v23, %v603_v27  ;;  %v489_v11 = vmul.f32 %v1935_v62, %v436_v22  ;;  %v451_v16 = vmul.f32 %v1937_v59, %v1891_v37 }
 0x110   :  { %v578_v9 = vmax.f32 %v529_v20, 0.0  ;;  %v613_v42 = vpack.c.bf16 %v566_v40, %v565_v38  ;;  %v412_v21 = vmul.f32 %v1937_v59, %v1614_v0  ;;  %v413_v58 = vmul.f32 %v1937_v59, %v1624_v4 }
 0x111   :  { %v424_v25 = vmul.f32 %v1937_v59, %v1702_v41  ;;  %v490_v31 = vmul.f32 %v1935_v62, %v437_v2  ;;  %v503_v17 = vmul.f32 %v1935_v62, %v450_v5  ;;  %v425_v18 = vmul.f32 %v1937_v59, %v1709_v44 }
 0x112   :  { %v619_v13 = vpack.c.bf16 %v578_v9, %v577_v3  ;;  %v542_v37 = vadd.f32 %v1946_v26, %v489_v11  ;;  %v504_v24 = vmul.f32 %v1935_v62, %v451_v16  ;;  %v465_v0 = vmul.f32 %v1935_v62, %v412_v21 }
 0x113   :  { %v466_v4 = vmul.f32 %v1935_v62, %v413_v58  ;;  %v477_v41 = vmul.f32 %v1935_v62, %v424_v25  ;;  %v543_v44 = vadd.f32 %v1946_v26, %v490_v31  ;;  %v556_v61 = vadd.f32 %v1946_v26, %v503_v17 }
 0x114   :  { %v478_v29 = vmul.f32 %v1935_v62, %v425_v18  ;;  %v438_v32 = vmul.f32 %v1937_v59, %v1800_v30  ;;  %v439_v45 = vmul.f32 %v1937_v59, %v1807_v34  ;;  %v452_v1 = vmul.f32 %v1937_v59, %v1898_v60 }
 0x115   :  { %v591_v55 = vmax.f32 %v542_v37, 0.0  ;;  %v557_v7 = vadd.f32 %v1946_v26, %v504_v24  ;;  %v518_v15 = vadd.f32 %v1946_v26, %v465_v0  ;;  %v519_v51 = vadd.f32 %v1946_v26, %v466_v4 }
 0x116   :  { %v530_v49 = vadd.f32 %v1946_v26, %v477_v41  ;;  %v453_v57 = vmul.f32 %v1937_v59, %v1905_v14  ;;  %v592_v33 = vmax.f32 %v543_v44, 0.0  ;;  %v605_v30 = vmax.f32 %v556_v61, 0.0 }
 0x117   :  { %1009 = vmatmul.msk.bf16.gmra.mxu2 %vm83_vm0, %v625_v54  ;;  %1016 = vmatmul.msk.bf16.gmra.mxu3 %vm83_vm0, %v632_v6  ;;  %v531_v28 = vadd.f32 %v1946_v26, %v478_v29  ;;  %v414_v34 = vmul.f32 %v1937_v59, %v1630_v8  ;;  %v491_v60 = vmul.f32 %v1935_v62, %v438_v32  ;;  %v606_v23 = vmax.f32 %v557_v7, 0.0 }
 0x118   :  { %997 = vmatmul.msk.bf16.gmra.mxu0 %vm83_vm0, %v613_v42  ;;  %1003 = vmatmul.msk.bf16.gmra.mxu1 %vm83_vm0, %v619_v13  ;;  %v492_v10 = vmul.f32 %v1935_v62, %v439_v45  ;;  %v505_v35 = vmul.f32 %v1935_v62, %v452_v1  ;;  %v415_v27 = vmul.f32 %v1937_v59, %v1639_v12  ;;  %v567_v8 = vmax.f32 %v518_v15, 0.0 }
 0x119   :  { %v426_v14 = vmul.f32 %v1937_v59, %v1716_v47  ;;  %v427_v20 = vmul.f32 %v1937_v59, %v1723_v50  ;;  %v440_v22 = vmul.f32 %v1937_v59, %v1814_v39  ;;  %v568_v38 = vmax.f32 %v519_v51, 0.0 }
 0x11a   :  { %v579_v40 = vmax.f32 %v530_v49, 0.0  ;;  %v506_v3 = vmul.f32 %v1935_v62, %v453_v57  ;;  %v580_v9 = vmax.f32 %v531_v28, 0.0  ;;  %v467_v2 = vmul.f32 %v1935_v62, %v414_v34 }
 0x11b   :  { %v441_v12 = vmul.f32 %v1937_v59, %v1821_v43  ;;  %v493_v5 = vmul.f32 %v1935_v62, %v440_v22  ;;  %v2075_v47 = vadd.f32 %v1946_v26, %v491_v60  ;;  %v2078_v50 = vadd.f32 %v1946_v26, %v492_v10 }
 0x11c   :  { %v2081_v39 = vadd.f32 %v1946_v26, %v505_v35  ;;  %v468_v54 = vmul.f32 %v1935_v62, %v415_v27  ;;  %v479_v6 = vmul.f32 %v1935_v62, %v426_v14  ;;  %v480_v11 = vmul.f32 %v1935_v62, %v427_v20 }
 0x11d   :  { %v494_v16 = vmul.f32 %v1935_v62, %v441_v12  ;;  %v546_v43 = vadd.f32 %v1946_v26, %v493_v5  ;;  %v626_v42 = vpack.c.bf16 %v592_v33, %v591_v55  ;;  %v633_v21 = vpack.c.bf16 %v606_v23, %v605_v30 }
 0x11e   :  { %v614_v58 = vpack.c.bf16 %v568_v38, %v567_v8  ;;  %v559_v25 = vadd.f32 %v1946_v26, %v506_v3  ;;  %v620_v13 = vpack.c.bf16 %v580_v9, %v579_v40  ;;  %v520_v31 = vadd.f32 %v1946_v26, %v467_v2 }
 0x11f   :  { %v547_v17 = vadd.f32 %v1946_v26, %v494_v16  ;;  %v595_v18 = vmax.f32 %v546_v43, 0.0  ;;  %v593_v37 = vmax.f32 %v2075_v47, 0.0  ;;  %v594_v24 = vmax.f32 %v2078_v50, 0.0 }
 0x120   :  { %v607_v0 = vmax.f32 %v2081_v39, 0.0  ;;  %v521_v4 = vadd.f32 %v1946_v26, %v468_v54  ;;  %v532_v41 = vadd.f32 %v1946_v26, %v479_v6  ;;  %v533_v44 = vadd.f32 %v1946_v26, %v480_v11 }
 0x121   :  { %v596_v61 = vmax.f32 %v547_v17, 0.0  ;;  %v608_v29 = vmax.f32 %v559_v25, 0.0  ;;  %v454_v32 = vmul.f32 %v1937_v59, %v1912_v46  ;;  %v455_v45 = vmul.f32 %v1937_v59, %v1591_v36  ;;  %v2289_v17 = vld [vmem:[#allocation13_spill] sm:$0xff] }
 0x122   :  { %v416_v1 = vmul.f32 %v1937_v59, %v1646_v63  ;;  %v569_v55 = vmax.f32 %v520_v31, 0.0  ;;  %v417_v15 = vmul.f32 %v1937_v59, %v1653_v19  ;;  %v428_v51 = vmul.f32 %v1937_v59, %v1730_v53 }
 0x123   :  { %v2107_v7 = vpack.c.bf16 %v596_v61, %v595_v18  ;;  %v507_v46 = vmul.f32 %v1935_v62, %v454_v32  ;;  %v508_v36 = vmul.f32 %v1935_v62, %v455_v45  ;;  %v429_v63 = vmul.f32 %v1937_v59, %v1737_v56 }
 0x124   :  { %v469_v49 = vmul.f32 %v1935_v62, %v416_v1  ;;  %v470_v57 = vmul.f32 %v1935_v62, %v417_v15  ;;  %v481_v33 = vmul.f32 %v1935_v62, %v428_v51  ;;  %v442_v30 = vmul.f32 %v1937_v59, %v1828_v48 }
 0x125   :  { %v443_v19 = vmul.f32 %v1937_v59, %v1835_v52  ;;  %v560_v53 = vadd.f32 %v1946_v26, %v507_v46  ;;  %v561_v28 = vadd.f32 %v1946_v26, %v508_v36  ;;  %v482_v60 = vmul.f32 %v1935_v62, %v429_v63 }
 0x126   :  { %v522_v34 = vadd.f32 %v1946_v26, %v469_v49  ;;  %v523_v56 = vadd.f32 %v1946_v26, %v470_v57  ;;  %v534_v10 = vadd.f32 %v1946_v26, %v481_v33  ;;  %v495_v35 = vmul.f32 %v1935_v62, %v442_v30 }
 0x127   :  { %1010 = vmatmul.msk.bf16.gmra.mxu2 %vm83_vm0, %v626_v42  ;;  %1017 = vmatmul.msk.bf16.gmra.mxu3 %vm83_vm0, %v633_v21  ;;  %v496_v27 = vmul.f32 %v1935_v62, %v443_v19  ;;  %v609_v48 = vmax.f32 %v560_v53, 0.0  ;;  %v610_v23 = vmax.f32 %v561_v28, 0.0  ;;  %v535_v52 = vadd.f32 %v1946_v26, %v482_v60  ;;  %v2286_v42 = vld [vmem:[#allocation10_spill] sm:$0xff] }
 0x128   :  { %998 = vmatmul.msk.bf16.gmra.mxu0 %vm83_vm0, %v614_v58  ;;  %1004 = vmatmul.msk.bf16.gmra.mxu1 %vm83_vm0, %v620_v13  ;;  %v571_v14 = vmax.f32 %v522_v34, 0.0  ;;  %v572_v20 = vmax.f32 %v523_v56, 0.0  ;;  %v583_v22 = vmax.f32 %v534_v10, 0.0  ;;  %v548_v8 = vadd.f32 %v1946_v26, %v495_v35  ;;  %v2287_v58 = vld [vmem:[#allocation11_spill] sm:$0xff]  ;;  %v2288_v13 = vld [vmem:[#allocation12_spill] sm:$0xff] }
 0x129   :  { %v549_v38 = vadd.f32 %v1946_v26, %v496_v27  ;;  %v570_v40 = vmax.f32 %v521_v4, 0.0  ;;  %v581_v3 = vmax.f32 %v532_v41, 0.0  ;;  %v635_v9 = vpack.c.bf16 %v610_v23, %v609_v48 }
 0x12a   :  { %v584_v2 = vmax.f32 %v535_v52, 0.0  ;;  %v582_v12 = vmax.f32 %v533_v44, 0.0  ;;  %v616_v5 = vpack.c.bf16 %v572_v20, %v571_v14  ;;  %v597_v47 = vmax.f32 %v548_v8, 0.0 }
 0x12b   :  { %v598_v50 = vmax.f32 %v549_v38, 0.0  ;;  %v627_v6 = vpack.c.bf16 %v594_v24, %v593_v37  ;;  %v634_v11 = vpack.c.bf16 %v608_v29, %v607_v0  ;;  %v615_v16 = vpack.c.bf16 %v570_v40, %v569_v55  ;;  %v2290_v37 = vld [vmem:[#allocation14_spill] sm:$0xff]  ;;  %v2291_v0 = vld [vmem:[#allocation15_spill] sm:$0xff]  ;;  %v2292_v29 = vld [vmem:[#allocation16_spill] sm:$0xff] }
 0x12c   :  { %v622_v39 = vpack.c.bf16 %v584_v2, %v583_v22  ;;  %v621_v43 = vpack.c.bf16 %v582_v12, %v581_v3  ;;  %v456_v21 = vmul.f32 %v1937_v59, %v2286_v42  ;;  %v418_v25 = vmul.f32 %v1937_v59, %v2287_v58 }
 0x12d   :  { %v629_v54 = vpack.c.bf16 %v598_v50, %v597_v47  ;;  %v419_v31 = vmul.f32 %v1937_v59, %v2288_v13  ;;  %v430_v18 = vmul.f32 %v1937_v59, %v2289_v17  ;;  %v431_v24 = vmul.f32 %v1937_v59, %v2290_v37 }
 0x12e   :  { %v444_v4 = vmul.f32 %v1937_v59, %v2291_v0  ;;  %v509_v41 = vmul.f32 %v1935_v62, %v456_v21  ;;  %v471_v44 = vmul.f32 %v1935_v62, %v418_v25  ;;  %v445_v32 = vmul.f32 %v1937_v59, %v2292_v29 }
 0x12f   :  { %v472_v61 = vmul.f32 %v1935_v62, %v419_v31  ;;  %v483_v45 = vmul.f32 %v1935_v62, %v430_v18  ;;  %v484_v1 = vmul.f32 %v1935_v62, %v431_v24 }
 0x130   :  { %v497_v55 = vmul.f32 %v1935_v62, %v444_v4  ;;  %v562_v15 = vadd.f32 %v1946_v26, %v509_v41  ;;  %v524_v51 = vadd.f32 %v1946_v26, %v471_v44  ;;  %v498_v36 = vmul.f32 %v1935_v62, %v445_v32 }
 0x131   :  { %v525_v46 = vadd.f32 %v1946_v26, %v472_v61  ;;  %v536_v49 = vadd.f32 %v1946_v26, %v483_v45  ;;  %v537_v63 = vadd.f32 %v1946_v26, %v484_v1 }
 0x132   :  { %v550_v59 = vadd.f32 %v1946_v26, %v497_v55  ;;  %v573_v57 = vmax.f32 %v524_v51, 0.0  ;;  %v551_v30 = vadd.f32 %v1946_v26, %v498_v36  ;;  %v611_v62 = vmax.f32 %v562_v15, 0.0 }
 0x133   :  { %v574_v33 = vmax.f32 %v525_v46, 0.0  ;;  %v585_v19 = vmax.f32 %v536_v49, 0.0  ;;  %v586_v53 = vmax.f32 %v537_v63, 0.0 }
 0x134   :  { %v599_v28 = vmax.f32 %v550_v59, 0.0  ;;  %v600_v60 = vmax.f32 %v551_v30, 0.0  ;;  %v636_v35 = vpack.c.bf16 %v611_v62, %v611_v62 }
 0x135   :  { %v617_v34 = vpack.c.bf16 %v574_v33, %v573_v57  ;;  %v623_v56 = vpack.c.bf16 %v586_v53, %v585_v19 }
 0x136   :  { %v630_v10 = vpack.c.bf16 %v600_v60, %v599_v28 }
 0x137   :  { %1011 = vmatmul.msk.bf16.gmra.mxu2 %vm83_vm0, %v627_v6  ;;  %1018 = vmatmul.msk.bf16.gmra.mxu3 %vm83_vm0, %v634_v11 }
 0x138   :  { %999 = vmatmul.msk.bf16.gmra.mxu0 %vm83_vm0, %v615_v16  ;;  %1005 = vmatmul.msk.bf16.gmra.mxu1 %vm83_vm0, %v621_v43 }
 0x147   :  { %1012 = vmatmul.msk.bf16.gmra.mxu2 %vm83_vm0, %v2107_v7  ;;  %1019 = vmatmul.msk.bf16.gmra.mxu3 %vm83_vm0, %v635_v9 }
 0x148   :  { %1000 = vmatmul.msk.bf16.gmra.mxu0 %vm83_vm0, %v616_v5  ;;  %1006 = vmatmul.msk.bf16.gmra.mxu1 %vm83_vm0, %v622_v39 }
 0x157   :  { %1013 = vmatmul.msk.bf16.gmra.mxu2 %vm83_vm0, %v629_v54  ;;  %1020 = vmatmul.msk.bf16.gmra.mxu3 %vm83_vm0, %v636_v35 }
 0x158   :  { %1001 = vmatmul.msk.bf16.gmra.mxu0 %vm83_vm0, %v617_v34  ;;  %1007 = vmatmul.msk.bf16.gmra.mxu1 %vm83_vm0, %v623_v56 }
 0x167   :  { %1014 = vmatmul.msk.bf16.gmra.mxu2 %vm83_vm0, %v630_v10 }
 0x185   :  { %v753_v26 = vpop.f32.mrf.mxu0  ;;  %v783_v7 = vpop.f32.mrf.mxu1 }
 0x18a   :  { %v813_v27 = vpop.f32.mrf.mxu2  ;;  %v848_v48 = vpop.f32.mrf.mxu3 }
 0x18d   :  { %v755_v23 = vpop.f32.mrf.mxu0  ;;  %v785_v14 = vpop.f32.mrf.mxu1 }
 0x18e   :  { %v1028_v52 = vpack.c.bf16 %v755_v23, %v753_v26  ;;  %v1058_v20 = vpack.c.bf16 %v785_v14, %v783_v7 }
 0x190   :  { %1029 = vst [vmem:[%s2256_s4] sm:$0xff] %v1028_v52  }
 0x191   :  { %1150 = vst [vmem:[%s2256_s4 + $0x30] sm:$0xff] %v1058_v20  }
 0x192   :  { %v815_v22 = vpop.f32.mrf.mxu2  ;;  %v850_v8 = vpop.f32.mrf.mxu3 }
 0x193   :  { %v1088_v38 = vpack.c.bf16 %v815_v22, %v813_v27  ;;  %v1123_v40 = vpack.c.bf16 %v850_v8, %v848_v48 }
 0x195   :  { %1156 = vst [vmem:[%s2256_s4 + $0x60] sm:$0xff] %v1088_v38   ;;  %v758_v3 = vpop.f32.mrf.mxu0  ;;  %v788_v9 = vpop.f32.mrf.mxu1 }
 0x196   :  { %1163 = vst [vmem:[%s2256_s4 + $0x98] sm:$0xff] %v1123_v40  }
 0x19a   :  { %v818_v2 = vpop.f32.mrf.mxu2  ;;  %v853_v12 = vpop.f32.mrf.mxu3 }
 0x19d   :  { %v760_v5 = vpop.f32.mrf.mxu0  ;;  %v790_v47 = vpop.f32.mrf.mxu1 }
 0x19e   :  { %v1033_v50 = vpack.c.bf16 %v760_v5, %v758_v3  ;;  %v1063_v39 = vpack.c.bf16 %v790_v47, %v788_v9 }
 0x1a0   :  { %1145 = vst [vmem:[%s2256_s4 + $0x8] sm:$0xff] %v1033_v50  }
 0x1a1   :  { %1151 = vst [vmem:[%s2256_s4 + $0x38] sm:$0xff] %v1063_v39  }
 0x1a2   :  { %v820_v54 = vpop.f32.mrf.mxu2  ;;  %v855_v6 = vpop.f32.mrf.mxu3 }
 0x1a3   :  { %v1093_v11 = vpack.c.bf16 %v820_v54, %v818_v2  ;;  %v1128_v16 = vpack.c.bf16 %v855_v6, %v853_v12 }
 0x1a5   :  { %1157 = vst [vmem:[%s2256_s4 + $0x68] sm:$0xff] %v1093_v11   ;;  %v763_v43 = vpop.f32.mrf.mxu0  ;;  %v793_v42 = vpop.f32.mrf.mxu1 }
 0x1a6   :  { %1164 = vst [vmem:[%s2256_s4 + $0xa0] sm:$0xff] %v1128_v16  }
 0x1aa   :  { %v823_v21 = vpop.f32.mrf.mxu2  ;;  %v858_v58 = vpop.f32.mrf.mxu3 }
 0x1ad   :  { %v765_v25 = vpop.f32.mrf.mxu0  ;;  %v795_v13 = vpop.f32.mrf.mxu1 }
 0x1ae   :  { %v1038_v31 = vpack.c.bf16 %v765_v25, %v763_v43  ;;  %v1068_v17 = vpack.c.bf16 %v795_v13, %v793_v42 }
 0x1b0   :  { %1146 = vst [vmem:[%s2256_s4 + $0x10] sm:$0xff] %v1038_v31  }
 0x1b1   :  { %1152 = vst [vmem:[%s2256_s4 + $0x40] sm:$0xff] %v1068_v17  }
 0x1b2   :  { %v825_v18 = vpop.f32.mrf.mxu2  ;;  %v860_v37 = vpop.f32.mrf.mxu3 }
 0x1b3   :  { %v1098_v24 = vpack.c.bf16 %v825_v18, %v823_v21  ;;  %v1133_v0 = vpack.c.bf16 %v860_v37, %v858_v58 }
 0x1b5   :  { %1158 = vst [vmem:[%s2256_s4 + $0x70] sm:$0xff] %v1098_v24   ;;  %v768_v4 = vpop.f32.mrf.mxu0  ;;  %v798_v41 = vpop.f32.mrf.mxu1 }
 0x1b6   :  { %1165 = vst [vmem:[%s2256_s4 + $0xa8] sm:$0xff] %v1133_v0  }
 0x1ba   :  { %v828_v44 = vpop.f32.mrf.mxu2  ;;  %v863_v61 = vpop.f32.mrf.mxu3 }
 0x1bd   :  { %v770_v29 = vpop.f32.mrf.mxu0  ;;  %v800_v32 = vpop.f32.mrf.mxu1 }
 0x1be   :  { %v1043_v45 = vpack.c.bf16 %v770_v29, %v768_v4  ;;  %v1073_v1 = vpack.c.bf16 %v800_v32, %v798_v41 }
 0x1c0   :  { %1147 = vst [vmem:[%s2256_s4 + $0x18] sm:$0xff] %v1043_v45  }
 0x1c1   :  { %1153 = vst [vmem:[%s2256_s4 + $0x48] sm:$0xff] %v1073_v1  }
 0x1c2   :  { %v830_v55 = vpop.f32.mrf.mxu2  ;;  %v865_v15 = vpop.f32.mrf.mxu3 }
 0x1c3   :  { %v1103_v51 = vpack.c.bf16 %v830_v55, %v828_v44  ;;  %v1138_v46 = vpack.c.bf16 %v865_v15, %v863_v61 }
 0x1c5   :  { %1159 = vst [vmem:[%s2256_s4 + $0x78] sm:$0xff] %v1103_v51   ;;  %v773_v36 = vpop.f32.mrf.mxu0  ;;  %v803_v49 = vpop.f32.mrf.mxu1 }
 0x1c6   :  { %1166 = vst [vmem:[%s2256_s4 + $0xb0] sm:$0xff] %v1138_v46  }
 0x1ca   :  { %v833_v63 = vpop.f32.mrf.mxu2  ;;  %v868_v59 = vpop.f32.mrf.mxu3 }
 0x1cd   :  { %v775_v57 = vpop.f32.mrf.mxu0  ;;  %v805_v33 = vpop.f32.mrf.mxu1 }
 0x1ce   :  { %v1048_v30 = vpack.c.bf16 %v775_v57, %v773_v36  ;;  %v1078_v19 = vpack.c.bf16 %v805_v33, %v803_v49 }
 0x1d0   :  { %1148 = vst [vmem:[%s2256_s4 + $0x20] sm:$0xff] %v1048_v30  }
 0x1d1   :  { %1154 = vst [vmem:[%s2256_s4 + $0x50] sm:$0xff] %v1078_v19  }
 0x1d2   :  { %v835_v53 = vpop.f32.mrf.mxu2  ;;  %v870_v28 = vpop.f32.mrf.mxu3 }
 0x1d3   :  { %v1108_v34 = vpack.c.bf16 %v835_v53, %v833_v63  ;;  %v1143_v60 = vpack.c.bf16 %v870_v28, %v868_v59 }
 0x1d5   :  { %1160 = vst [vmem:[%s2256_s4 + $0x80] sm:$0xff] %v1108_v34   ;;  %v778_v56 = vpop.f32.mrf.mxu0  ;;  %v808_v10 = vpop.f32.mrf.mxu1 }
 0x1d6   :  { %1167 = vst [vmem:[%s2256_s4 + $0xb8] sm:$0xff] %v1143_v60  }
 0x1da   :  { %v838_v62 = vpop.f32.mrf.mxu2  ;;  %v873_v35 = vpop.f32.mrf.mxu3 }
 0x1db   :  { %v925_v26 = vpack.c.bf16 %v873_v35, %v873_v35 }
 0x1dd   :  { %974 = vst [vmem:[%s2256_s4 + $0xc0] sm:$0xf] %v925_v26  ;;  %v780_v7 = vpop.f32.mrf.mxu0  ;;  %v810_v27 = vpop.f32.mrf.mxu1 }
 0x1de   :  { %v1053_v48 = vpack.c.bf16 %v780_v7, %v778_v56  ;;  %v1083_v23 = vpack.c.bf16 %v810_v27, %v808_v10 }
 0x1e0   :  { %1149 = vst [vmem:[%s2256_s4 + $0x28] sm:$0xff] %v1053_v48  }
 0x1e1   :  { %1155 = vst [vmem:[%s2256_s4 + $0x58] sm:$0xff] %v1083_v23  }
 0x1e2   :  { %v840_v14 = vpop.f32.mrf.mxu2  ;;  %v875_v52 = vpop.f32.mrf.mxu3 }
 0x1e3   :  { %v1113_v20 = vpack.c.bf16 %v840_v14, %v838_v62 }
 0x1e5   :  { %1161 = vst [vmem:[%s2256_s4 + $0x88] sm:$0xff] %v1113_v20  }
 0x1ea   :  { %v843_v22 = vpop.f32.mrf.mxu2 }
 0x1f2   :  { %v845_v8 = vpop.f32.mrf.mxu2 }
 0x1f3   :  { %v1118_v38 = vpack.c.bf16 %v845_v8, %v843_v22 }
 0x1f5   :  { %1162 = vst [vmem:[%s2256_s4 + $0x90] sm:$0xff] %v1118_v38  }
 0x1f6   :  { %979 = vsyncpa [#allocation3], 1 }

</bundles_post_ra>
